<compile_context>
chip_gen: v7x
topology: tpu7x:2x2x1
jax: 0.10.0
libtpu: 0.0.40
codegen_flags: <defaults>
</compile_context>

<pallas_src>
import functools

import jax
import jax.numpy as jnp
from jax.experimental import pallas as pl
from jax.experimental.pallas import tpu as pltpu

C_FEAT, H_FEAT, W_FEAT = 1280, 8, 8
K_IN = C_FEAT * H_FEAT * W_FEAT          # 81920  (1280 * 8 * 8)
HIDDEN = 2048
EMB_DIM = 256


def _tiling_for_device():
    """(tn, tk, vmem_limit_bytes) tuned per TPU generation.

    v5e/v6e: single TensorCore -> no n-split, contiguous 8 MiB bf16 w1 tiles.
    v7x: 2 TensorCores -> 2-way 'parallel' n-split, larger tk to cut step count.
    """
    try:
        kind = jax.devices()[0].device_kind.lower()
    except Exception:  # pragma: no cover - defensive; default config is safe
        kind = ""
    multi_tc = ("v7" in kind) or ("7x" in kind)
    if multi_tc:
        return 1024, 4096, 40 * 1024 * 1024
    return 2048, 2048, 48 * 1024 * 1024


def _fused_fc_kernel(x_ref, w1_ref, b1_ref, w2_ref, alpha_ref,
                     out_ref, acc_ref):
    """One hidden-dim slab of fc1 (+bias, PReLU) fused with its fc2 share.

    grid = (HIDDEN // tn, K_IN // tk); k (axis 1, 'arbitrary') streams w1.
    x is fully VMEM-resident and sliced per k-step.  acc_ref carries the
    running (M, tn) hidden slab across k.  At the last k-step the slab is
    biased, PReLU'd and contracted with the matching (tn, EMB) slice of w2;
    each n-block emits its partial (M, EMB) embedding (summed + b2 outside
    the kernel - a trivially small XLA op).
    """
    k = pl.program_id(1)
    tk = w1_ref.shape[0]                              # static (tk, tn) view

    @pl.when(k == 0)
    def _():
        acc_ref[...] = jnp.zeros_like(acc_ref)

    start = pl.multiple_of(k * tk, tk)
    x_blk = x_ref[:, pl.ds(start, tk)]                # (M, tk) bf16, resident x
    acc_ref[...] += jnp.dot(x_blk, w1_ref[...],
                            preferred_element_type=jnp.float32)

    @pl.when(k == pl.num_programs(1) - 1)
    def _():
        h = acc_ref[...] + b1_ref[...]                # f32 bias add
        a = alpha_ref[0]                              # PReLU shared slope (SMEM)
        h = jnp.where(h > 0, h, a * h)
        partial = jnp.dot(h.astype(w2_ref.dtype), w2_ref[...],
                          preferred_element_type=jnp.float32)
        out_ref[...] = partial[None].astype(out_ref.dtype)


def fused_fc(x, w1_tiled, b1, w2, alpha, *, tk, vmem_limit):
    """x: (M, K_IN) bf16; w1_tiled: (n_blocks, K_IN, tn) bf16.

    Returns per-n-block partial embeddings (n_blocks, M, EMB_DIM) f32.
    """
    M, K = x.shape
    n_blocks, _, tn = w1_tiled.shape
    emb = w2.shape[1]
    assert K % tk == 0 and n_blocks * tn == w2.shape[0]
    grid = (n_blocks, K // tk)
    return pl.pallas_call(
        _fused_fc_kernel,
        out_shape=jax.ShapeDtypeStruct((n_blocks, M, emb), jnp.float32),
        grid_spec=pltpu.PrefetchScalarGridSpec(
            num_scalar_prefetch=0,
            grid=grid,
            in_specs=[
                # x fully resident in VMEM (one DMA); sliced in-kernel.
                pl.BlockSpec((M, K), lambda n, k: (0, 0)),
                # w1 pre-laid-out (n_blocks, K, tn): each tile is contiguous.
                pl.BlockSpec((None, tk, tn), lambda n, k: (n, k, 0)),
                pl.BlockSpec((1, tn), lambda n, k: (0, n)),      # b1 slab (f32)
                pl.BlockSpec((tn, emb), lambda n, k: (n, 0)),    # w2 slab (bf16)
                pl.BlockSpec(memory_space=pltpu.MemorySpace.SMEM),  # alpha
            ],
            out_specs=pl.BlockSpec((1, M, emb), lambda n, k: (n, 0, 0)),
            scratch_shapes=[pltpu.VMEM((M, tn), jnp.float32)],
        ),
        compiler_params=pltpu.CompilerParams(
            dimension_semantics=("parallel", "arbitrary"),
            vmem_limit_bytes=vmem_limit,
        ),
    )(x, w1_tiled, b1, w2, alpha)


def network_forward(x_feat, kparams, *, tk, vmem_limit):
    """x_feat: (B, 1280, 8, 8) NCHW backbone features -> (B, emb_dim)."""
    B = x_feat.shape[0]
    x = x_feat.reshape(B, K_IN).astype(jnp.bfloat16)  # == view(-1, 1280*8*8)
    partials = fused_fc(x, kparams["w1"], kparams["b1"], kparams["w2"],
                        kparams["alpha"], tk=tk, vmem_limit=vmem_limit)
    return partials.sum(axis=0) + kparams["b2"]       # tiny (n, M, 256) reduce


def init_params(key):
    """Deterministic init matching nn.Linear / nn.PReLU default schemes."""
    k1, k2, k3, k4 = jax.random.split(key, 4)
    bound1 = 1.0 / jnp.sqrt(jnp.float32(K_IN))
    bound2 = 1.0 / jnp.sqrt(jnp.float32(HIDDEN))
    w1 = jax.random.uniform(k1, (K_IN, HIDDEN), jnp.float32, -bound1, bound1)
    b1 = jax.random.uniform(k2, (1, HIDDEN), jnp.float32, -bound1, bound1)
    w2 = jax.random.uniform(k3, (HIDDEN, EMB_DIM), jnp.float32, -bound2, bound2)
    b2 = jax.random.uniform(k4, (1, EMB_DIM), jnp.float32, -bound2, bound2)
    alpha = jnp.full((1,), 0.25, jnp.float32)         # nn.PReLU() default a=0.25
    return dict(w1=w1, b1=b1, w2=w2, b2=b2, alpha=alpha)


def prepare_kernel_params(params, tn):
    """One-time cast to bf16 + relayout of w1 to (n_blocks, K_IN, tn)."""
    n_blocks = HIDDEN // tn
    w1_tiled = (params["w1"].astype(jnp.bfloat16)
                .reshape(K_IN, n_blocks, tn)
                .transpose(1, 0, 2))                  # [n, k, :] = w1[k, n*tn:]
    return dict(
        w1=w1_tiled,
        b1=params["b1"],
        w2=params["w2"].astype(jnp.bfloat16),
        b2=params["b2"],
        alpha=params["alpha"],
    )


if __name__ == "__main__":
    tn, tk, vmem_limit = _tiling_for_device()

    key = jax.random.PRNGKey(0)
    pkey, xkey = jax.random.split(key)
    params = init_params(pkey)
    kparams = prepare_kernel_params(params, tn)

    # small batch; feature dims are hard-coded by the module's fc head
    x_feat = jax.random.normal(xkey, (2, C_FEAT, H_FEAT, W_FEAT), jnp.float32)

    fwd = jax.jit(functools.partial(network_forward, tk=tk,
                                    vmem_limit=vmem_limit))
    out = fwd(x_feat, kparams)
    out = jax.block_until_ready(out)
    assert out.shape == (2, EMB_DIM)

    # 1) Tight check vs a pure-JAX reference that mirrors the bf16-weight /
    #    f32-accumulate policy (validates the kernel math itself).
    xf_bf = x_feat.reshape(2, K_IN).astype(jnp.bfloat16)
    w1_bf = params["w1"].astype(jnp.bfloat16)
    w2_bf = params["w2"].astype(jnp.bfloat16)
    h_ref = jnp.dot(xf_bf, w1_bf, preferred_element_type=jnp.float32) + params["b1"]
    h_ref = jnp.where(h_ref > 0, h_ref, params["alpha"][0] * h_ref)
    ref_bf = (jnp.dot(h_ref.astype(jnp.bfloat16), w2_bf,
                      preferred_element_type=jnp.float32) + params["b2"])
    assert jnp.allclose(out, ref_bf, atol=1e-2, rtol=1e-2), "mismatch vs bf16 reference"

    # 2) Loose check vs the full-f32 module semantics (validates that the
    #    bf16 weight-streaming policy stays within ~1% of the original model).
    xf = x_feat.reshape(2, K_IN)
    h32 = xf @ params["w1"] + params["b1"]
    h32 = jnp.where(h32 > 0, h32, params["alpha"][0] * h32)
    ref32 = h32 @ params["w2"] + params["b2"]
    assert jnp.allclose(out, ref32, atol=5e-2, rtol=5e-2), "mismatch vs f32 reference"

    print("KERNEL_OK")
</pallas_src>

<mosaic_0001>
module attributes {stable_mosaic.version = 11 : i64} {
  func.func @_fused_fc_kernel(%arg0: i32, %arg1: i32, %arg2: memref<2x81920xbf16, #tpu.memory_space<vmem>>, %arg3: memref<1x2048x2048xbf16, #tpu.memory_space<vmem>>, %arg4: memref<1x2048xf32, #tpu.memory_space<vmem>>, %arg5: memref<2048x256xbf16, #tpu.memory_space<vmem>>, %arg6: memref<1xf32, #tpu.memory_space<smem>>, %arg7: memref<1x2x256xf32, #tpu.memory_space<vmem>>, %arg8: memref<2x2048xf32, #tpu.memory_space<vmem>>) attributes {dimension_semantics = [#tpu.dimension_semantics<parallel>, #tpu.dimension_semantics<arbitrary>], iteration_bounds = array<i64: 1, 40>, scalar_prefetch = 0 : i64, scratch_operands = 1 : i64, tpu.core_type = #tpu.core_type<tc>, window_params = [{pipeline_mode = #tpu.pipeline_mode<synchronous>, transform_indices = @transform_0, window_bounds = array<i64: 2, 81920>}, {transform_indices = @transform_1, window_bounds = array<i64: 1, 2048, 2048>}, {transform_indices = @transform_2, window_bounds = array<i64: 1, 2048>}, {transform_indices = @transform_3, window_bounds = array<i64: 2048, 256>}, {transform_indices = @transform_4, window_bounds = array<i64: 1>}, {transform_indices = @transform_5, window_bounds = array<i64: 1, 2, 256>}]} {
    %c0_i32 = arith.constant 0 : i32
    %0 = arith.cmpi eq, %arg1, %c0_i32 : i32
    %1 = arith.extui %0 : i1 to i32
    %c0_i32_0 = arith.constant 0 : i32
    %2 = arith.cmpi ne, %1, %c0_i32_0 : i32
    scf.if %2 {
      %cst_9 = arith.constant 0.000000e+00 : f32
      %16 = vector.broadcast %cst_9 : f32 to vector<2x2048xf32>
      %c0_10 = arith.constant 0 : index
      %c0_11 = arith.constant 0 : index
      %17 = vector.load %arg8[%c0_10, %c0_11] : memref<2x2048xf32, #tpu.memory_space<vmem>>, vector<2x2048xf32>
      tpu.vector_store %arg8[%c0_10, %c0_11], %16 {strides = array<i32>} : memref<2x2048xf32, #tpu.memory_space<vmem>>, vector<2x2048xf32>,
    } else {
    }
    %c2048_i32 = arith.constant 2048 : i32
    %3 = arith.muli %arg1, %c2048_i32 : i32
    %4 = tpu.assume_multiple %3, 2048 : i32
    %c0 = arith.constant 0 : index
    %5 = arith.index_cast %4 : i32 to index
    %6 = vector.load %arg2[%c0, %5] : memref<2x81920xbf16, #tpu.memory_space<vmem>>, vector<2x2048xbf16>
    %c0_1 = arith.constant 0 : index
    %c0_2 = arith.constant 0 : index
    %7 = vector.load %arg8[%c0_1, %c0_2] : memref<2x2048xf32, #tpu.memory_space<vmem>>, vector<2x2048xf32>
    %c0_3 = arith.constant 0 : index
    %c0_4 = arith.constant 0 : index
    %c0_5 = arith.constant 0 : index
    %8 = vector.load %arg3[%c0_3, %c0_4, %c0_5] : memref<1x2048x2048xbf16, #tpu.memory_space<vmem>>, vector<1x2048x2048xbf16>
    %9 = vector.shape_cast %8 : vector<1x2048x2048xbf16> to vector<2048x2048xbf16>
    %cst = arith.constant dense<0.000000e+00> : vector<2x2048xf32>
    %10 = tpu.matmul %6, %9, %cst {dimension_numbers = #tpu.dot_dimension_numbers<[1], [0], [0], [1], [0, 0, 1, 1], [], []>} : vector<2x2048xbf16>, vector<2048x2048xbf16>, vector<2x2048xf32> -> vector<2x2048xf32>
    %11 = arith.addf %7, %10 : vector<2x2048xf32>
    %c0_6 = arith.constant 0 : index
    %c0_7 = arith.constant 0 : index
    %12 = vector.load %arg8[%c0_6, %c0_7] : memref<2x2048xf32, #tpu.memory_space<vmem>>, vector<2x2048xf32>
    tpu.vector_store %arg8[%c0_6, %c0_7], %11 {strides = array<i32>} : memref<2x2048xf32, #tpu.memory_space<vmem>>, vector<2x2048xf32>,
    %c39_i32 = arith.constant 39 : i32
    %13 = arith.cmpi eq, %arg1, %c39_i32 : i32
    %14 = arith.extui %13 : i1 to i32
    %c0_i32_8 = arith.constant 0 : i32
    %15 = arith.cmpi ne, %14, %c0_i32_8 : i32
    scf.if %15 {
      %c0_9 = arith.constant 0 : index
      %c0_10 = arith.constant 0 : index
      %16 = vector.load %arg8[%c0_9, %c0_10] : memref<2x2048xf32, #tpu.memory_space<vmem>>, vector<2x2048xf32>
      %c0_11 = arith.constant 0 : index
      %c0_12 = arith.constant 0 : index
      %17 = vector.load %arg4[%c0_11, %c0_12] : memref<1x2048xf32, #tpu.memory_space<vmem>>, vector<1x2048xf32>
      %18 = vector.broadcast %17 : vector<1x2048xf32> to vector<2x2048xf32>
      %19 = arith.addf %16, %18 : vector<2x2048xf32>
      %c0_13 = arith.constant 0 : index
      %20 = memref.load %arg6[%c0_13] : memref<1xf32, #tpu.memory_space<smem>>
      %cst_14 = arith.constant 0.000000e+00 : f32
      %21 = vector.broadcast %cst_14 : f32 to vector<2x2048xf32>
      %22 = arith.cmpf ogt, %19, %21 : vector<2x2048xf32>
      %23 = vector.broadcast %20 : f32 to vector<2x2048xf32>
      %24 = arith.mulf %23, %19 : vector<2x2048xf32>
      %25 = arith.select %22, %19, %24 : vector<2x2048xi1>, vector<2x2048xf32>
      %26 = arith.truncf %25 : vector<2x2048xf32> to vector<2x2048xbf16>
      %c0_15 = arith.constant 0 : index
      %c0_16 = arith.constant 0 : index
      %27 = vector.load %arg5[%c0_15, %c0_16] : memref<2048x256xbf16, #tpu.memory_space<vmem>>, vector<2048x256xbf16>
      %cst_17 = arith.constant dense<0.000000e+00> : vector<2x256xf32>
      %28 = tpu.matmul %26, %27, %cst_17 {dimension_numbers = #tpu.dot_dimension_numbers<[1], [0], [0], [1], [0, 0, 1, 1], [], []>} : vector<2x2048xbf16>, vector<2048x256xbf16>, vector<2x256xf32> -> vector<2x256xf32>
      %29 = vector.shape_cast %28 : vector<2x256xf32> to vector<1x2x256xf32>
      %c0_18 = arith.constant 0 : index
      %c0_19 = arith.constant 0 : index
      %c0_20 = arith.constant 0 : index
      %30 = vector.load %arg7[%c0_18, %c0_19, %c0_20] : memref<1x2x256xf32, #tpu.memory_space<vmem>>, vector<1x2x256xf32>
      tpu.vector_store %arg7[%c0_18, %c0_19, %c0_20], %29 {strides = array<i32>} : memref<1x2x256xf32, #tpu.memory_space<vmem>>, vector<1x2x256xf32>,
    } else {
    }
    return
  }
  func.func @transform_0(%arg0: i32, %arg1: i32) -> (i32, i32) {
    %c0_i32 = arith.constant 0 : i32
    %c0_i32_0 = arith.constant 0 : i32
    %c0_i32_1 = arith.constant 0 : i32
    return %c0_i32, %c0_i32_0 : i32, i32
  }
  func.func @transform_1(%arg0: i32, %arg1: i32) -> (i32, i32, i32) {
    %c0_i32 = arith.constant 0 : i32
    %c0_i32_0 = arith.constant 0 : i32
    return %arg0, %arg1, %c0_i32 : i32, i32, i32
  }
  func.func @transform_2(%arg0: i32, %arg1: i32) -> (i32, i32) {
    %c0_i32 = arith.constant 0 : i32
    %c0_i32_0 = arith.constant 0 : i32
    return %c0_i32, %arg0 : i32, i32
  }
  func.func @transform_3(%arg0: i32, %arg1: i32) -> (i32, i32) {
    %c0_i32 = arith.constant 0 : i32
    %c0_i32_0 = arith.constant 0 : i32
    return %arg0, %c0_i32 : i32, i32
  }
  func.func @transform_4(%arg0: i32, %arg1: i32) -> i32 {
    %c0_i32 = arith.constant 0 : i32
    %c0_i32_0 = arith.constant 0 : i32
    return %c0_i32 : i32
  }
  func.func @transform_5(%arg0: i32, %arg1: i32) -> (i32, i32, i32) {
    %c0_i32 = arith.constant 0 : i32
    %c0_i32_0 = arith.constant 0 : i32
    %c0_i32_1 = arith.constant 0 : i32
    return %arg0, %c0_i32, %c0_i32_0 : i32, i32, i32
  }
}

</mosaic_0001>

<bundles_post_ra>
// kernel: network_forward.1
= control target key start
LH: loop header
LB: loop body
LE: loop exit
PB: predicated region body
PF: predicated region fallthrough
CT: control target
= control target key end

     0   :  { %s23504_s0 = inlined_call_operand.vmem [shape: bf16[2,81920], index: 0, kind: input, shape index: {}]   ;;  %s23505_s1 = inlined_call_operand.hbm [shape: bf16[1,81920,2048], index: 1, kind: input, shape index: {}]   ;;  %s23506_s2 = inlined_call_operand.hbm [shape: f32[1,2048], index: 2, kind: input, shape index: {}]   ;;  %s23507_s3 = inlined_call_operand.hbm [shape: bf16[2048,256], index: 3, kind: input, shape index: {}]   ;;  %s23508_s4 = inlined_call_operand.<no memory space> [shape: f32[1], index: 4, kind: input, shape index: {}]   ;;  %s23509_s5 = inlined_call_operand.vmem [shape: f32[1,2,256], index: 5, kind: output, shape index: {}]  }
   0x1   :  { %10 = sst [smem:[#allocation3]] %s23508_s4 }
   0x2   :  { %11 = vsyncpa [#allocation5], 0 }
   0x3   :  { %13 = vsyncpa [#allocation5 + $0x1], 0 }
   0x4   :  { %14 = vsyncpa [#allocation7], 0  ;;  %s20927_s20 = smov 0   ;;  %s20929_s21 = smov 0  }
   0x5   :  { %s20931_s22 = smov 0   ;;  %s20933_s23 = smov 0  }
   0x6   :  { %s20935_s24 = smov 0   ;;  %s20937_s25 = smov 0  }
   0x7 LB: > { %s17697_s4 = sadd.s32 4294967295, %s20882_s25   ;;  %s62_s26 = sadd.s32 1, %s20870_s22  ;;  %s20882_s25 = sphi %s20937_s25, %s20_s25   ;;  %s20878_s24 = sphi %s20935_s24, %s23529_s24   ;;  %s20874_s23 = sphi %s20933_s23, %s23528_s23   ;;  %s20870_s22 = sphi %s20931_s22, %s23527_s22   ;;  %s20866_s21 = sphi %s20929_s21, %s23526_s21   ;;  %s20862_s20 = sphi %s20927_s20, %s23525_s20  }
   0x8   : > { %p69_p0 = scmp.ne.s32.totalorder %s20870_s22, %s20866_s21  ;;  %p70_p1 = scmp.eq.s32.totalorder %s20882_s25, 0 }
   0x9   : > { %p75_p2 = scmp.ne.s32.totalorder %s20866_s21, %s20862_s20  ;;  %p20961_p3 = scmp.eq.s32.totalorder %s17697_s4, 0 }
   0xa   : > { %p71_p4 = por %p70_p1, %p69_p0  ;;  %p17698_p5 = scmp.ge.s32.totalorder %s20882_s25, 1 }
   0xb   : > { %s23515_s27 = scalar_select %p20961_p3, 1, 0 }
   0xc   : > { %p20968_p6 = por %p20961_p3, %p75_p2  ;;  %p185_p7 = scmp.lt.s32.totalorder %s20882_s25, 41 }
   0xd   : > { %s20884_s30 = smov [#allocation6]   ;;  %p20296_p10 = scmp.lt.s32.totalorder %s20882_s25, 40 }
   0xe   : > { %s23516_s28 = scalar_select %p20968_p6, 1, 0 }
   0xf   : > { %p20973_p8 = pnand %p17698_p5, %p185_p7  ;;  %s204_s6 = sshll.u32 %s20884_s30, 4  ;;  %s205_s6 = int_to_ptr.vmem [resolvable:$true] %s204_s6 }
  0x10   : > { %p20986_p12 = pnand %p20296_p10, %p71_p4  ;;  %s20885_s9 = smov [#allocation8]  }
  0x11   : > { %s23517_s29 = scalar_select %p20973_p8, 1, 0 }
  0x12   : > { %p20283_p9 = pneg %p20973_p8  ;;  %s218_s10 = sshll.u32 %s20885_s9, 4  ;;  %s219_s10 = int_to_ptr.vmem [resolvable:$true] %s218_s10 }
  0x13   : > { %s23519_s8 = scalar_select %p20986_p12, 1, 0 }
  0x14   : > { %p20982_p11 = pnand %p20283_p9, %p20961_p3  ;;  %s20742_s13 = scalar_lea.hbm %s23506_s2, 256 }
  0x15   : > { %p20743_p13 = scmp.ne.s32.totalorder %s23506_s2, %s20742_s13  ;;  %p20749_p4 = scmp.lt.u32.totalorder %s20742_s13, %s23506_s2 }
  0x16   : > { %p20744_p0 = pneg %p20982_p11 }
  0x18   : > { %p20745_p1 = pnand %p20744_p0, %p20743_p13 }
  0x1a   : > { %p20746_p2 = pneg %p20745_p1 }
  0x1c   : > { %p20751_p5 = pnand %p20749_p4, %p20746_p2 }
  0x1e   : > { %20754 = shalt.err (!%p20751_p5)
}
  0x1f   : > { %s20755_s18 = scalar_lea.vmem %s205_s6, 256  ;;  %p20763_p3 = scmp.lt.s32.totalorder %s205_s6, %s205_s6 }
  0x20   : > { %p20756_p7 = scmp.ne.s32.totalorder %s205_s6, %s20755_s18  ;;  %p20764_p6 = scmp.lt.s32.totalorder %s20755_s18, %s20755_s18 }
  0x22   : > { %p20758_p9 = pnand %p20756_p7, %p20744_p0  ;;  %p20765_p8 = por %p20764_p6, %p20763_p3 }
  0x24   : > { %p20759_p10 = pneg %p20758_p9 }
  0x26   : > { %p20766_p12 = pnand %p20765_p8, %p20759_p10 }
  0x28   : > { %20769 = shalt.err (!%p20766_p12)
}
  0x29   : > { %20286 = dma.hbm_to_vmem [thread:$0]  (!%p20982_p11), %s23506_s2, 256, %s205_s6, [#allocation7]  }
  0x2a   : > { %s20770_s9 = scalar_lea.hbm %s23507_s3, 32768 }
  0x2b   : > { %p20771_p13 = scmp.ne.s32.totalorder %s23507_s3, %s20770_s9  ;;  %p20777_p8 = scmp.lt.u32.totalorder %s20770_s9, %s23507_s3 }
  0x2d   : > { %p20773_p3 = pnand %p20771_p13, %p20744_p0 }
  0x2f   : > { %p20774_p6 = pneg %p20773_p3 }
  0x31   : > { %p20779_p12 = pnand %p20777_p8, %p20774_p6 }
  0x33   : > { %20782 = shalt.err (!%p20779_p12)
}
  0x34   : > { %s20783_s6 = scalar_lea.vmem %s219_s10, 32768  ;;  %p20791_p5 = scmp.lt.s32.totalorder %s219_s10, %s219_s10 }
  0x35   : > { %p20784_p1 = scmp.ne.s32.totalorder %s219_s10, %s20783_s6  ;;  %p20792_p7 = scmp.lt.s32.totalorder %s20783_s6, %s20783_s6 }
  0x37   : > { %p20786_p2 = pnand %p20784_p1, %p20744_p0  ;;  %p20793_p9 = por %p20792_p7, %p20791_p5 }
  0x39   : > { %p20787_p4 = pneg %p20786_p2 }
  0x3b   : > { %p20794_p10 = pnand %p20793_p9, %p20787_p4 }
  0x3d   : > { %20797 = shalt.err (!%p20794_p10)
}
  0x3e   : > { %s20886_s15 = smov 128   ;;  %s20887_s16 = smov 8  }
  0x3f   : > { %20289 = dma.hbm_to_vmem [thread:$0]  (!%p20982_p11), %s23507_s3, 32768, %s219_s10, [#allocation7], %s20886_s15, %s20886_s15, %s20887_s16  }
  0x40   : > { %s235_s19 = sand.u32 1, %s20870_s22   ;;  %s29_s20 = sadd.s32 1, %s20878_s24 }
  0x41   : > { %p30_p0 = scmp.ge.s32.totalorder %s29_s20, 40  ;;  %s17702_s4 = sshll.u32 %s235_s19, 14 }
  0x42   : > { %s20022_s30 = sshll.u32 %s20878_s24, 18  ;;  %s239_s7 = scalar_lea.vmem [#allocation4], %s17702_s4 }
  0x43   : > { %s23531_s20 = smov (%p30_p0, %s29_s20), 0  ;;  %s21040_s12 = scalar_lea.hbm %s23505_s1, %s20022_s30 }
  0x44   : > { %s249_s10 = sshll.u32 %s239_s7, 4  ;;  %s58_s13 = ssub.s32 %s20878_s24, %s23531_s20  ;;  %s21044_s10 = int_to_ptr.vmem [resolvable:$true] %s249_s10 }
  0x45   : > { %p60_p11 = scmp.eq.s32.totalorder %s58_s13, 0  ;;  %s21051_s6 = scalar_lea.sflag [#allocation5], %s235_s19 }
  0x46   : > { %s20798_s15 = scalar_lea.hbm %s21040_s12, 262144  ;;  %p23520_p3 = scmp.ne.s32.totalorder %s23519_s8, 0 }
  0x47   : > { %s21049_s14 = scalar_select %p60_p11, %s20870_s22, %s62_s26  }
  0x48   : > { %p20799_p13 = scmp.ne.s32.totalorder %s21040_s12, %s20798_s15  ;;  %p20800_p6 = pneg %p23520_p3 }
  0x49   : > { %s20803_s18 = scalar_lea.hbm %s23505_s1, 10485760  ;;  %p20804_p1 = scmp.lt.u32.totalorder %s21040_s12, %s23505_s1 }
  0x4a   : > { %p20801_p8 = pnand %p20800_p6, %p20799_p13  ;;  %p20805_p2 = scmp.lt.u32.totalorder %s20803_s18, %s20798_s15 }
  0x4b   : > { %p20807_p5 = scmp.lt.u32.totalorder %s20798_s15, %s21040_s12 }
  0x4c   : > { %p20802_p12 = pneg %p20801_p8  ;;  %p20806_p4 = por %p20805_p2, %p20804_p1 }
  0x4e   : > { %p20808_p7 = por %p20807_p5, %p20806_p4 }
  0x50   : > { %p20809_p9 = pnand %p20808_p7, %p20802_p12 }
  0x52   : > { %20812 = shalt.err (!%p20809_p9)
}
  0x53   : > { %s20813_s26 = scalar_lea.vmem %s21044_s10, 262144  ;;  %s20888_s19 = smov [#allocation4]  }
  0x54   : > { %p20814_p10 = scmp.ne.s32.totalorder %s21044_s10, %s20813_s26  ;;  %s20818_s9 = sshll.u32 %s20888_s19, 4  ;;  %s20819_s9 = int_to_ptr.vmem [resolvable:$false] %s20818_s9 }
  0x55   : > { %s20820_s11 = scalar_lea.vmem %s20819_s9, 524288  ;;  %p20821_p13 = scmp.lt.s32.totalorder %s21044_s10, %s20819_s9 }
  0x56   : > { %p20816_p0 = pnand %p20814_p10, %p20800_p6  ;;  %p20822_p8 = scmp.lt.s32.totalorder %s20820_s11, %s20813_s26 }
  0x58   : > { %p20817_p11 = pneg %p20816_p0  ;;  %p20823_p1 = por %p20822_p8, %p20821_p13 }
  0x5a   : > { %p20824_p2 = pnand %p20823_p1, %p20817_p11 }
  0x5c   : > { %20827 = shalt.err (!%p20824_p2)
}
  0x5d   : > { %s20889_s7 = smov 1024   ;;  %s20890_s13 = smov 64  }
  0x5e   : > { %20293 = dma.hbm_to_vmem [thread:$0]  (!%p23520_p3), %s21040_s12, 262144, %s21044_s10, %s21051_s6, %s20889_s7, %s20889_s7, %s20890_s13  }
  0x5f   : > { %p23521_p6 = scmp.ne.s32.totalorder %s23517_s29, 0 }
  0x60   : > { %s263_s15 = sand.u32 (!%p23521_p6), 1, %s20866_s21   ;;  %p23522_p12 = scmp.ne.s32.totalorder (!%p23521_p6), %s23516_s28, 0 }
  0x61   : > { %261 = sbr.rel (%p23521_p6) target bundleno = 2820 (0xb04), region = 40  ;;  %s17707_s16 = sshll.u32 (!%p23521_p6), %s263_s15, 14 }
  0x62   : > { %s264_s17 = scalar_lea.sflag (!%p23521_p6), [#allocation5], %s263_s15  ;;  %s21082_s18 = scalar_lea.vmem (!%p23521_p6), [#allocation4], %s17707_s16 }
  0x68   : > { %20853 = dma.done.wait (%p23522_p12), %s264_s17, 262144  }
  0x69   : > { %20855 = vsyncadd (%p23522_p12), %s264_s17, 4294705152  ;;  %p23523_p4 = scmp.ne.s32.totalorder %s23515_s27, 0 }
  0x6b   : > { %20857 = dma.done.wait (%p23523_p4), [#allocation7], 33024  }
  0x6c   : > { %20859 = vsyncadd (%p23523_p4), [#allocation7], 4294934272  ;;  %p17710_p3 = scmp.ne.s32.totalorder %s20874_s23, 0 }
  0x6d   : > { %v20891_v0 = vmov (!%p17710_p3), 0.0  }
  0x6e   : > { %313 = sbr.rel (%p17710_p3) target bundleno = 117 (0x75), region = 56  ;;  %314 = vst [vmem:[#allocation2] sm:$0xff] (!%p17710_p3), %v20891_v0  ;;  %315 = vst [vmem:[#allocation2 + $0x8] sm:$0xff] (!%p17710_p3), %v20891_v0 }
  0x6f   : > { %316 = vst [vmem:[#allocation2 + $0x10] sm:$0xff] (!%p17710_p3), %v20891_v0  ;;  %317 = vst [vmem:[#allocation2 + $0x18] sm:$0xff] (!%p17710_p3), %v20891_v0 }
  0x75 PF: > { %v328_v1 = vld [vmem:[%s21082_s18] sm:$0xff]  ;;  %v329_v3 = vld [vmem:[%s21082_s18 + $0x8] sm:$0xff]  ;;  %v20892_v33 = vmov 1966171168   ;;  %v2382_v35 = vlaneseq  ;;  %s17711_s27 = sshll.u32 %s20874_s23, 11  ;;  %p19760_p5 = scmp.ne.s32.totalorder %s20874_s23, 39 }
  0x76   : > { %v336_v2 = vld [vmem:[%s21082_s18 + $0x40] sm:$0xff]  ;;  %v337_v5 = vld [vmem:[%s21082_s18 + $0x48] sm:$0xff]  ;;  %v2380_v34 = vunpack.c.l.s4 %v20892_v33  ;;  %s319_s28 = sshra.s32 %s17711_s27, 7  ;;  %s23390_s23 = sld [smem:[#allocation3]] (!%p19760_p5) }
  0x77   : > { %v17713_v4 = vcombine.high %v328_v1, %v336_v2  ;;  %v17712_v6 = vcombine.low %v328_v1, %v336_v2  ;;  %v344_v7 = vld [vmem:[%s21082_s18 + $0x80] sm:$0xff]  ;;  %v17715_v9 = vcombine.high %v329_v3, %v337_v5  ;;  %v17714_v10 = vcombine.low %v329_v3, %v337_v5  ;;  %v345_v12 = vld [vmem:[%s21082_s18 + $0x88] sm:$0xff]  ;;  %s21125_s12 = scalar_lea.vmem %s23504_s0, %s319_s28 }
  0x78   : > { %v352_v8 = vld [vmem:[%s21082_s18 + $0xc0] sm:$0xff]  ;;  %v353_v13 = vld [vmem:[%s21082_s18 + $0xc8] sm:$0xff]  ;;  %v2381_v44 = vunpack.c.0.s8 %v2380_v34  ;;  %v21116_v45 = vshrl.u32 %v2382_v35, 7 }
  0x79   : > { %v17729_v11 = vcombine.high %v344_v7, %v352_v8  ;;  %v360_v14 = vld [vmem:[%s21082_s18 + $0x100] sm:$0xff]  ;;  %12732 = vmatprep.subr.bf16.mxu0 %v17713_v4  ;;  %v17731_v15 = vcombine.high %v345_v12, %v353_v13  ;;  %v361_v17 = vld [vmem:[%s21082_s18 + $0x108] sm:$0xff]  ;;  %13060 = vmatprep.subr.bf16.mxu1 %v17715_v9  ;;  %v17728_v19 = vcombine.low %v344_v7, %v352_v8 }
  0x7a   : > { %v368_v16 = vld [vmem:[%s21082_s18 + $0x140] sm:$0xff]  ;;  %v369_v18 = vld [vmem:[%s21082_s18 + $0x148] sm:$0xff]  ;;  %12733 = vmatpush1.bf16.msra.mxu0 %v17712_v6  ;;  %13061 = vmatpush1.bf16.msra.mxu1 %v17714_v10  ;;  %v17730_v20 = vcombine.low %v345_v12, %v353_v13  ;;  %v21128_v54 = vsub.s32 %v2381_v44, %v21116_v45 }
  0x7b   : > { %12734 = vmatprep.subr.bf16.mxu0 %v17729_v11  ;;  %v17745_v21 = vcombine.high %v360_v14, %v368_v16  ;;  %13062 = vmatprep.subr.bf16.mxu1 %v17731_v15  ;;  %v17747_v22 = vcombine.high %v361_v17, %v369_v18  ;;  %v376_v23 = vld [vmem:[%s21082_s18 + $0x180] sm:$0xff]  ;;  %v377_v25 = vld [vmem:[%s21082_s18 + $0x188] sm:$0xff]  ;;  %v17744_v27 = vcombine.low %v360_v14, %v368_v16 }
  0x7c   : > { %v384_v24 = vld [vmem:[%s21082_s18 + $0x1c0] sm:$0xff]  ;;  %v385_v26 = vld [vmem:[%s21082_s18 + $0x1c8] sm:$0xff]  ;;  %v17746_v28 = vcombine.low %v361_v17, %v369_v18 }
  0x7d   : > { %v17761_v29 = vcombine.high %v376_v23, %v384_v24  ;;  %v17763_v30 = vcombine.high %v377_v25, %v385_v26  ;;  %v392_v31 = vld [vmem:[%s21082_s18 + $0x200] sm:$0xff]  ;;  %v393_v36 = vld [vmem:[%s21082_s18 + $0x208] sm:$0xff]  ;;  %v17760_v38 = vcombine.low %v376_v23, %v384_v24  ;;  %v17762_v39 = vcombine.low %v377_v25, %v385_v26 }
  0x7e   : > { %12735 = vmatpush1.bf16.msra.mxu0 %v17728_v19  ;;  %13063 = vmatpush1.bf16.msra.mxu1 %v17730_v20  ;;  %v400_v32 = vld [vmem:[%s21082_s18 + $0x240] sm:$0xff]  ;;  %v401_v37 = vld [vmem:[%s21082_s18 + $0x248] sm:$0xff] }
  0x7f   : > { %12736 = vmatprep.subr.bf16.mxu0 %v17745_v21  ;;  %13064 = vmatprep.subr.bf16.mxu1 %v17747_v22  ;;  %v17777_v40 = vcombine.high %v392_v31, %v400_v32  ;;  %v17779_v41 = vcombine.high %v393_v36, %v401_v37  ;;  %v408_v42 = vld [vmem:[%s21082_s18 + $0x280] sm:$0xff]  ;;  %v409_v46 = vld [vmem:[%s21082_s18 + $0x288] sm:$0xff]  ;;  %v17776_v48 = vcombine.low %v392_v31, %v400_v32 }
  0x80   : > { %v416_v43 = vld [vmem:[%s21082_s18 + $0x2c0] sm:$0xff]  ;;  %v417_v47 = vld [vmem:[%s21082_s18 + $0x2c8] sm:$0xff]  ;;  %v17778_v49 = vcombine.low %v393_v36, %v401_v37 }
  0x81   : > { %v17793_v50 = vcombine.high %v408_v42, %v416_v43  ;;  %v17795_v51 = vcombine.high %v409_v46, %v417_v47  ;;  %v424_v52 = vld [vmem:[%s21082_s18 + $0x300] sm:$0xff]  ;;  %v425_v55 = vld [vmem:[%s21082_s18 + $0x308] sm:$0xff]  ;;  %v17792_v57 = vcombine.low %v408_v42, %v416_v43  ;;  %v17794_v58 = vcombine.low %v409_v46, %v417_v47 }
  0x82   : > { %12737 = vmatpush1.bf16.msra.mxu0 %v17744_v27  ;;  %13065 = vmatpush1.bf16.msra.mxu1 %v17746_v28  ;;  %v432_v53 = vld [vmem:[%s21082_s18 + $0x340] sm:$0xff]  ;;  %v433_v56 = vld [vmem:[%s21082_s18 + $0x348] sm:$0xff] }
  0x83   : > { %12738 = vmatprep.subr.bf16.mxu0 %v17761_v29  ;;  %13066 = vmatprep.subr.bf16.mxu1 %v17763_v30  ;;  %v17809_v59 = vcombine.high %v424_v52, %v432_v53  ;;  %v21133_v60 = vld [vmem:[%s21125_s12] sm:$0xff]  ;;  %v17811_v61 = vcombine.high %v425_v55, %v433_v56  ;;  %v441_v1 = vld [vmem:[%s21082_s18 + $0x388] sm:$0xff]  ;;  %v17808_v3 = vcombine.low %v424_v52, %v432_v53 }
  0x84   : > { %v440_v62 = vld [vmem:[%s21082_s18 + $0x380] sm:$0xff]  ;;  %v21139_v0 = vrot.slane %v21133_v60, %v21128_v54  ;;  %v449_v2 = vld [vmem:[%s21082_s18 + $0x3c8] sm:$0xff]  ;;  %v17810_v5 = vcombine.low %v425_v55, %v433_v56 }
  0x85   : > { %v448_v63 = vld [vmem:[%s21082_s18 + $0x3c0] sm:$0xff]  ;;  %v17827_v7 = vcombine.high %v441_v1, %v449_v2  ;;  %v457_v11 = vld [vmem:[%s21082_s18 + $0x408] sm:$0xff]  ;;  %v17826_v14 = vcombine.low %v441_v1, %v449_v2 }
  0x86   : > { %12739 = vmatpush1.bf16.msra.mxu0 %v17760_v38  ;;  %13067 = vmatpush1.bf16.msra.mxu1 %v17762_v39  ;;  %v2393_v4 = vcombine.high %v21139_v0, %v21139_v0  ;;  %v17825_v6 = vcombine.high %v440_v62, %v448_v63  ;;  %v456_v8 = vld [vmem:[%s21082_s18 + $0x400] sm:$0xff]  ;;  %v465_v12 = vld [vmem:[%s21082_s18 + $0x448] sm:$0xff]  ;;  %v17824_v13 = vcombine.low %v440_v62, %v448_v63 }
  0x87   : > { %12740 = vmatprep.subr.bf16.mxu0 %v17777_v40  ;;  %13068 = vmatprep.subr.bf16.mxu1 %v17779_v41  ;;  %v464_v9 = vld [vmem:[%s21082_s18 + $0x440] sm:$0xff]  ;;  %v17843_v16 = vcombine.high %v457_v11, %v465_v12  ;;  %v473_v19 = vld [vmem:[%s21082_s18 + $0x488] sm:$0xff]  ;;  %v17842_v22 = vcombine.low %v457_v11, %v465_v12 }
  0x88   : > { %v21148_v10 = vrot.slane %v2393_v4, %v21128_v54  ;;  %v17841_v15 = vcombine.high %v456_v8, %v464_v9  ;;  %v472_v17 = vld [vmem:[%s21082_s18 + $0x480] sm:$0xff]  ;;  %v481_v20 = vld [vmem:[%s21082_s18 + $0x4c8] sm:$0xff]  ;;  %v17840_v21 = vcombine.low %v456_v8, %v464_v9 }
  0x89   : > { %v480_v18 = vld [vmem:[%s21082_s18 + $0x4c0] sm:$0xff]  ;;  %v17859_v24 = vcombine.high %v473_v19, %v481_v20  ;;  %v489_v27 = vld [vmem:[%s21082_s18 + $0x508] sm:$0xff]  ;;  %v17858_v30 = vcombine.low %v473_v19, %v481_v20 }
  0x8a   : > { %12741 = vmatpush1.bf16.msra.mxu0 %v17776_v48  ;;  %13069 = vmatpush1.bf16.msra.mxu1 %v17778_v49  ;;  %v17857_v23 = vcombine.high %v472_v17, %v480_v18  ;;  %v488_v25 = vld [vmem:[%s21082_s18 + $0x500] sm:$0xff]  ;;  %v497_v28 = vld [vmem:[%s21082_s18 + $0x548] sm:$0xff]  ;;  %v17856_v29 = vcombine.low %v472_v17, %v480_v18 }
  0x8b   : > { %12742 = vmatprep.subr.bf16.mxu0 %v17793_v50  ;;  %13070 = vmatprep.subr.bf16.mxu1 %v17795_v51  ;;  %v496_v26 = vld [vmem:[%s21082_s18 + $0x540] sm:$0xff]  ;;  %v17875_v32 = vcombine.high %v489_v27, %v497_v28  ;;  %v505_v35 = vld [vmem:[%s21082_s18 + $0x588] sm:$0xff]  ;;  %v17874_v38 = vcombine.low %v489_v27, %v497_v28 }
  0x8c   : > { %12764 = vmatprep.mubr.bf16.mxu0 %v21148_v10  ;;  %13092 = vmatprep.mubr.bf16.mxu1 %v21148_v10  ;;  %v17873_v31 = vcombine.high %v488_v25, %v496_v26  ;;  %v504_v33 = vld [vmem:[%s21082_s18 + $0x580] sm:$0xff]  ;;  %v513_v36 = vld [vmem:[%s21082_s18 + $0x5c8] sm:$0xff]  ;;  %v17872_v37 = vcombine.low %v488_v25, %v496_v26 }
  0x8d   : > { %v512_v34 = vld [vmem:[%s21082_s18 + $0x5c0] sm:$0xff]  ;;  %v17891_v40 = vcombine.high %v505_v35, %v513_v36  ;;  %v521_v43 = vld [vmem:[%s21082_s18 + $0x608] sm:$0xff]  ;;  %v17890_v47 = vcombine.low %v505_v35, %v513_v36 }
  0x8e   : > { %12743 = vmatpush1.bf16.msra.mxu0 %v17792_v57  ;;  %13071 = vmatpush1.bf16.msra.mxu1 %v17794_v58  ;;  %v17889_v39 = vcombine.high %v504_v33, %v512_v34  ;;  %v520_v41 = vld [vmem:[%s21082_s18 + $0x600] sm:$0xff]  ;;  %v529_v44 = vld [vmem:[%s21082_s18 + $0x648] sm:$0xff]  ;;  %v17888_v46 = vcombine.low %v504_v33, %v512_v34  ;;  %v21198_v33 = vcombine.high %v21148_v10, %v21148_v10 }
  0x8f   : > { %12744 = vmatprep.subr.bf16.mxu0 %v17809_v59  ;;  %13072 = vmatprep.subr.bf16.mxu1 %v17811_v61  ;;  %v528_v42 = vld [vmem:[%s21082_s18 + $0x640] sm:$0xff]  ;;  %v17907_v49 = vcombine.high %v521_v43, %v529_v44  ;;  %v537_v52 = vld [vmem:[%s21082_s18 + $0x688] sm:$0xff]  ;;  %v17906_v56 = vcombine.low %v521_v43, %v529_v44 }
  0x90   : > { %v17905_v48 = vcombine.high %v520_v41, %v528_v42  ;;  %v536_v50 = vld [vmem:[%s21082_s18 + $0x680] sm:$0xff]  ;;  %v545_v53 = vld [vmem:[%s21082_s18 + $0x6c8] sm:$0xff]  ;;  %v17904_v55 = vcombine.low %v520_v41, %v528_v42 }
  0x91   : > { %v544_v51 = vld [vmem:[%s21082_s18 + $0x6c0] sm:$0xff]  ;;  %v17923_v58 = vcombine.high %v537_v52, %v545_v53  ;;  %v553_v62 = vld [vmem:[%s21082_s18 + $0x708] sm:$0xff]  ;;  %v17922_v2 = vcombine.low %v537_v52, %v545_v53 }
  0x92   : > { %12745 = vmatpush1.bf16.msra.mxu0 %v17808_v3  ;;  %13073 = vmatpush1.bf16.msra.mxu1 %v17810_v5  ;;  %v17921_v57 = vcombine.high %v536_v50, %v544_v51  ;;  %v552_v59 = vld [vmem:[%s21082_s18 + $0x700] sm:$0xff]  ;;  %v561_v63 = vld [vmem:[%s21082_s18 + $0x748] sm:$0xff]  ;;  %v17920_v1 = vcombine.low %v536_v50, %v544_v51 }
  0x93   : > { %12746 = vmatprep.subr.bf16.mxu0 %v17825_v6  ;;  %13074 = vmatprep.subr.bf16.mxu1 %v17827_v7  ;;  %v560_v61 = vld [vmem:[%s21082_s18 + $0x740] sm:$0xff]  ;;  %v17939_v4 = vcombine.high %v553_v62, %v561_v63  ;;  %v569_v7 = vld [vmem:[%s21082_s18 + $0x788] sm:$0xff]  ;;  %v17938_v11 = vcombine.low %v553_v62, %v561_v63 }
  0x94   : > { %v17937_v3 = vcombine.high %v552_v59, %v560_v61  ;;  %v568_v5 = vld [vmem:[%s21082_s18 + $0x780] sm:$0xff]  ;;  %v577_v8 = vld [vmem:[%s21082_s18 + $0x7c8] sm:$0xff]  ;;  %v17936_v9 = vcombine.low %v552_v59, %v560_v61 }
  0x95   : > { %v576_v6 = vld [vmem:[%s21082_s18 + $0x7c0] sm:$0xff]  ;;  %v593_v17 = vld [vmem:[%s21082_s18 + $0x848] sm:$0xff]  ;;  %v17954_v19 = vcombine.low %v569_v7, %v577_v8 }
  0x96   : > { %12747 = vmatpush1.bf16.msra.mxu0 %v17824_v13  ;;  %13075 = vmatpush1.bf16.msra.mxu1 %v17826_v14  ;;  %v17953_v12 = vcombine.high %v568_v5, %v576_v6  ;;  %v17955_v13 = vcombine.high %v569_v7, %v577_v8  ;;  %v584_v14 = vld [vmem:[%s21082_s18 + $0x800] sm:$0xff]  ;;  %v17952_v18 = vcombine.low %v568_v5, %v576_v6  ;;  %v601_v25 = vld [vmem:[%s21082_s18 + $0x888] sm:$0xff] }
  0x97   : > { %12748 = vmatprep.subr.bf16.mxu0 %v17841_v15  ;;  %13076 = vmatprep.subr.bf16.mxu1 %v17843_v16  ;;  %v592_v15 = vld [vmem:[%s21082_s18 + $0x840] sm:$0xff]  ;;  %v585_v16 = vld [vmem:[%s21082_s18 + $0x808] sm:$0xff] }
  0x98   : > { %v17969_v20 = vcombine.high %v584_v14, %v592_v15  ;;  %v609_v26 = vld [vmem:[%s21082_s18 + $0x8c8] sm:$0xff]  ;;  %v17968_v27 = vcombine.low %v584_v14, %v592_v15  ;;  %v17970_v28 = vcombine.low %v585_v16, %v593_v17 }
  0x99   : > { %v625_v34 = vld [vmem:[%s21082_s18 + $0x948] sm:$0xff]  ;;  %v17986_v36 = vcombine.low %v601_v25, %v609_v26 }
  0x9a   : > { %12749 = vmatpush1.bf16.msra.mxu0 %v17840_v21  ;;  %13077 = vmatpush1.bf16.msra.mxu1 %v17842_v22  ;;  %v17971_v21 = vcombine.high %v585_v16, %v593_v17  ;;  %v600_v22 = vld [vmem:[%s21082_s18 + $0x880] sm:$0xff]  ;;  %v633_v41 = vld [vmem:[%s21082_s18 + $0x988] sm:$0xff] }
  0x9b   : > { %12750 = vmatprep.subr.bf16.mxu0 %v17857_v23  ;;  %13078 = vmatprep.subr.bf16.mxu1 %v17859_v24  ;;  %v608_v23 = vld [vmem:[%s21082_s18 + $0x8c0] sm:$0xff]  ;;  %v21190_v24 = vrot.slane %v21139_v0, %v21128_v54  ;;  %v617_v0 = vld [vmem:[%s21082_s18 + $0x908] sm:$0xff] }
  0x9c   : > { %v17984_v35 = vcombine.low %v600_v22, %v608_v23  ;;  %v641_v42 = vld [vmem:[%s21082_s18 + $0x9c8] sm:$0xff]  ;;  %v18002_v44 = vcombine.low %v617_v0, %v625_v34 }
  0x9d   : > { %v649_v50 = vld [vmem:[%s21082_s18 + $0xa08] sm:$0xff]  ;;  %v18018_v53 = vcombine.low %v633_v41, %v641_v42 }
  0x9e   : > { %12751 = vmatpush1.bf16.msra.mxu0 %v17856_v29  ;;  %13079 = vmatpush1.bf16.msra.mxu1 %v17858_v30  ;;  %v17985_v29 = vcombine.high %v600_v22, %v608_v23  ;;  %v17987_v30 = vcombine.high %v601_v25, %v609_v26  ;;  %v657_v51 = vld [vmem:[%s21082_s18 + $0xa48] sm:$0xff] }
  0x9f   : > { %12752 = vmatprep.subr.bf16.mxu0 %v17873_v31  ;;  %13080 = vmatprep.subr.bf16.mxu1 %v17875_v32  ;;  %v616_v31 = vld [vmem:[%s21082_s18 + $0x900] sm:$0xff]  ;;  %v665_v59 = vld [vmem:[%s21082_s18 + $0xa88] sm:$0xff]  ;;  %v18034_v63 = vcombine.low %v649_v50, %v657_v51 }
  0xa0   : > { %v624_v32 = vld [vmem:[%s21082_s18 + $0x940] sm:$0xff]  ;;  %v673_v61 = vld [vmem:[%s21082_s18 + $0xac8] sm:$0xff] }
  0xa1   : > { %v18000_v43 = vcombine.low %v616_v31, %v624_v32  ;;  %v681_v5 = vld [vmem:[%s21082_s18 + $0xb08] sm:$0xff]  ;;  %v18050_v8 = vcombine.low %v665_v59, %v673_v61 }
  0xa2   : > { %12753 = vmatpush1.bf16.msra.mxu0 %v17872_v37  ;;  %13081 = vmatpush1.bf16.msra.mxu1 %v17874_v38  ;;  %v18001_v37 = vcombine.high %v616_v31, %v624_v32  ;;  %v18003_v38 = vcombine.high %v617_v0, %v625_v34  ;;  %v689_v6 = vld [vmem:[%s21082_s18 + $0xb48] sm:$0xff] }
  0xa3   : > { %12754 = vmatprep.subr.bf16.mxu0 %v17889_v39  ;;  %13082 = vmatprep.subr.bf16.mxu1 %v17891_v40  ;;  %v632_v39 = vld [vmem:[%s21082_s18 + $0x980] sm:$0xff]  ;;  %v697_v14 = vld [vmem:[%s21082_s18 + $0xb88] sm:$0xff]  ;;  %v18066_v17 = vcombine.low %v681_v5, %v689_v6 }
  0xa4   : > { %v640_v40 = vld [vmem:[%s21082_s18 + $0x9c0] sm:$0xff]  ;;  %v705_v15 = vld [vmem:[%s21082_s18 + $0xbc8] sm:$0xff] }
  0xa5   : > { %v18016_v52 = vcombine.low %v632_v39, %v640_v40  ;;  %v713_v22 = vld [vmem:[%s21082_s18 + $0xc08] sm:$0xff]  ;;  %v18082_v26 = vcombine.low %v697_v14, %v705_v15 }
  0xa6   : > { %12755 = vmatpush1.bf16.msra.mxu0 %v17888_v46  ;;  %13083 = vmatpush1.bf16.msra.mxu1 %v17890_v47  ;;  %v18017_v46 = vcombine.high %v632_v39, %v640_v40  ;;  %v18019_v47 = vcombine.high %v633_v41, %v641_v42  ;;  %v721_v23 = vld [vmem:[%s21082_s18 + $0xc48] sm:$0xff] }
  0xa7   : > { %12756 = vmatprep.subr.bf16.mxu0 %v17905_v48  ;;  %13084 = vmatprep.subr.bf16.mxu1 %v17907_v49  ;;  %v648_v48 = vld [vmem:[%s21082_s18 + $0xa00] sm:$0xff]  ;;  %v729_v31 = vld [vmem:[%s21082_s18 + $0xc88] sm:$0xff]  ;;  %v18098_v34 = vcombine.low %v713_v22, %v721_v23 }
  0xa8   : > { %v656_v49 = vld [vmem:[%s21082_s18 + $0xa40] sm:$0xff]  ;;  %v737_v32 = vld [vmem:[%s21082_s18 + $0xcc8] sm:$0xff] }
  0xa9   : > { %v18032_v62 = vcombine.low %v648_v48, %v656_v49  ;;  %v745_v39 = vld [vmem:[%s21082_s18 + $0xd08] sm:$0xff]  ;;  %v18114_v42 = vcombine.low %v729_v31, %v737_v32 }
  0xaa   : > { %12757 = vmatpush1.bf16.msra.mxu0 %v17904_v55  ;;  %13085 = vmatpush1.bf16.msra.mxu1 %v17906_v56  ;;  %v18033_v55 = vcombine.high %v648_v48, %v656_v49  ;;  %v18035_v56 = vcombine.high %v649_v50, %v657_v51  ;;  %v753_v40 = vld [vmem:[%s21082_s18 + $0xd48] sm:$0xff] }
  0xab   : > { %12758 = vmatprep.subr.bf16.mxu0 %v17921_v57  ;;  %13086 = vmatprep.subr.bf16.mxu1 %v17923_v58  ;;  %v664_v57 = vld [vmem:[%s21082_s18 + $0xa80] sm:$0xff]  ;;  %v761_v48 = vld [vmem:[%s21082_s18 + $0xd88] sm:$0xff]  ;;  %v18130_v51 = vcombine.low %v745_v39, %v753_v40 }
  0xac   : > { %v672_v58 = vld [vmem:[%s21082_s18 + $0xac0] sm:$0xff]  ;;  %v769_v49 = vld [vmem:[%s21082_s18 + $0xdc8] sm:$0xff] }
  0xad   : > { %v18048_v7 = vcombine.low %v664_v57, %v672_v58 }
  0xae   : > { %12759 = vmatpush1.bf16.msra.mxu0 %v17920_v1  ;;  %13087 = vmatpush1.bf16.msra.mxu1 %v17922_v2  ;;  %v18049_v1 = vcombine.high %v664_v57, %v672_v58  ;;  %v18051_v2 = vcombine.high %v665_v59, %v673_v61  ;;  %v777_v57 = vld [vmem:[%s21082_s18 + $0xe08] sm:$0xff]  ;;  %v18146_v61 = vcombine.low %v761_v48, %v769_v49 }
  0xaf   : > { %12760 = vmatprep.subr.bf16.mxu0 %v17937_v3  ;;  %13088 = vmatprep.subr.bf16.mxu1 %v17939_v4  ;;  %v680_v3 = vld [vmem:[%s21082_s18 + $0xb00] sm:$0xff]  ;;  %v785_v58 = vld [vmem:[%s21082_s18 + $0xe48] sm:$0xff] }
  0xb0   : > { %v688_v4 = vld [vmem:[%s21082_s18 + $0xb40] sm:$0xff] }
  0xb1   : > { %v18064_v16 = vcombine.low %v680_v3, %v688_v4 }
  0xb2   : > { %12761 = vmatpush1.bf16.msra.mxu0 %v17936_v9  ;;  %13089 = vmatpush1.bf16.msra.mxu1 %v17938_v11  ;;  %v18065_v9 = vcombine.high %v680_v3, %v688_v4  ;;  %v18067_v11 = vcombine.high %v681_v5, %v689_v6  ;;  %v793_v3 = vld [vmem:[%s21082_s18 + $0xe88] sm:$0xff]  ;;  %v18162_v6 = vcombine.low %v777_v57, %v785_v58 }
  0xb3   : > { %12762 = vmatprep.subr.bf16.mxu0 %v17953_v12  ;;  %13090 = vmatprep.subr.bf16.mxu1 %v17955_v13  ;;  %v696_v12 = vld [vmem:[%s21082_s18 + $0xb80] sm:$0xff]  ;;  %v801_v4 = vld [vmem:[%s21082_s18 + $0xec8] sm:$0xff] }
  0xb4   : > { %v704_v13 = vld [vmem:[%s21082_s18 + $0xbc0] sm:$0xff] }
  0xb5   : > { %v18080_v25 = vcombine.low %v696_v12, %v704_v13 }
  0xb6   : > { %12763 = vmatpush1.bf16.msra.mxu0 %v17952_v18  ;;  %13091 = vmatpush1.bf16.msra.mxu1 %v17954_v19  ;;  %v18081_v18 = vcombine.high %v696_v12, %v704_v13  ;;  %v18083_v19 = vcombine.high %v697_v14, %v705_v15  ;;  %v809_v12 = vld [vmem:[%s21082_s18 + $0xf08] sm:$0xff]  ;;  %v18178_v15 = vcombine.low %v793_v3, %v801_v4 }
  0xb7   : > { %12773 = vmatprep.subr.bf16.mxu0 %v17969_v20  ;;  %13101 = vmatprep.subr.bf16.mxu1 %v17971_v21  ;;  %v712_v20 = vld [vmem:[%s21082_s18 + $0xc00] sm:$0xff]  ;;  %v817_v13 = vld [vmem:[%s21082_s18 + $0xf48] sm:$0xff] }
  0xb8   : > { %v720_v21 = vld [vmem:[%s21082_s18 + $0xc40] sm:$0xff] }
  0xb9   : > { %12765 = vmatmul.mubr.bf16.vlgmr.msra.gmra.mrb[0].mxu0 %v21190_v24  ;;  %13093 = vmatmul.mubr.bf16.vlgmr.msra.gmra.mrb[0].mxu1 %v21190_v24  ;;  %v18096_v0 = vcombine.low %v712_v20, %v720_v21 }
  0xba   : > { %12774 = vmatpush1.bf16.msra.mxu0 %v17968_v27  ;;  %13102 = vmatpush1.bf16.msra.mxu1 %v17970_v28  ;;  %v18097_v27 = vcombine.high %v712_v20, %v720_v21  ;;  %v18099_v28 = vcombine.high %v713_v22, %v721_v23  ;;  %v2378_v20 = vcombine.high %v21133_v60, %v21133_v60  ;;  %v825_v21 = vld [vmem:[%s21082_s18 + $0xf88] sm:$0xff] }
  0xbb   : > { %12775 = vmatprep.subr.bf16.mxu0 %v17985_v29  ;;  %13103 = vmatprep.subr.bf16.mxu1 %v17987_v30  ;;  %v728_v29 = vld [vmem:[%s21082_s18 + $0xc80] sm:$0xff]  ;;  %v833_v22 = vld [vmem:[%s21082_s18 + $0xfc8] sm:$0xff] }
  0xbc   : > { %12805 = vmatprep.mubr.bf16.mxu0 %v21198_v33  ;;  %13133 = vmatprep.mubr.bf16.mxu1 %v21198_v33  ;;  %v736_v30 = vld [vmem:[%s21082_s18 + $0xcc0] sm:$0xff]  ;;  %v841_v60 = vld [vmem:[%s21082_s18 + $0x1008] sm:$0xff] }
  0xbd   : > { %v18112_v41 = vcombine.low %v728_v29, %v736_v30 }
  0xbe   : > { %12776 = vmatpush1.bf16.msra.mxu0 %v17984_v35  ;;  %13104 = vmatpush1.bf16.msra.mxu1 %v17986_v36  ;;  %v18113_v35 = vcombine.high %v728_v29, %v736_v30  ;;  %v18115_v36 = vcombine.high %v729_v31, %v737_v32  ;;  %v848_v29 = vld [vmem:[%s21082_s18 + $0x1040] sm:$0xff]  ;;  %v21263_v30 = vrot.slane %v2378_v20, %v21128_v54  ;;  %v849_v31 = vld [vmem:[%s21082_s18 + $0x1048] sm:$0xff] }
  0xbf   : > { %12777 = vmatprep.subr.bf16.mxu0 %v18001_v37  ;;  %13105 = vmatprep.subr.bf16.mxu1 %v18003_v38  ;;  %v744_v37 = vld [vmem:[%s21082_s18 + $0xd00] sm:$0xff] }
  0xc0   : > { %v752_v38 = vld [vmem:[%s21082_s18 + $0xd40] sm:$0xff] }
  0xc1   : > { %v18128_v50 = vcombine.low %v744_v37, %v752_v38  ;;  %v936_v20 = vld [vmem:[%s21082_s18 + $0x1300] sm:$0xff] }
  0xc2   : > { %12778 = vmatpush1.bf16.msra.mxu0 %v18000_v43  ;;  %13106 = vmatpush1.bf16.msra.mxu1 %v18002_v44  ;;  %v18129_v43 = vcombine.high %v744_v37, %v752_v38  ;;  %v18131_v44 = vcombine.high %v745_v39, %v753_v40  ;;  %v864_v37 = vld [vmem:[%s21082_s18 + $0x10c0] sm:$0xff]  ;;  %v2394_v38 = vcombine.high %v21263_v30, %v21263_v30  ;;  %v857_v40 = vld [vmem:[%s21082_s18 + $0x1088] sm:$0xff] }
  0xc3   : > { %12779 = vmatprep.subr.bf16.mxu0 %v18017_v46  ;;  %13107 = vmatprep.subr.bf16.mxu1 %v18019_v47  ;;  %v760_v46 = vld [vmem:[%s21082_s18 + $0xd80] sm:$0xff]  ;;  %v21273_v39 = vcombine.high %v21190_v24, %v21190_v24 }
  0xc4   : > { %v768_v47 = vld [vmem:[%s21082_s18 + $0xdc0] sm:$0xff] }
  0xc5   : > { %v18144_v59 = vcombine.low %v760_v46, %v768_v47 }
  0xc6   : > { %12780 = vmatpush1.bf16.msra.mxu0 %v18016_v52  ;;  %13108 = vmatpush1.bf16.msra.mxu1 %v18018_v53  ;;  %v18145_v52 = vcombine.high %v760_v46, %v768_v47  ;;  %v18147_v53 = vcombine.high %v761_v48, %v769_v49  ;;  %v872_v47 = vld [vmem:[%s21082_s18 + $0x1100] sm:$0xff]  ;;  %v21280_v49 = vrot.slane %v2394_v38, %v21128_v54 }
  0xc7   : > { %12781 = vmatprep.subr.bf16.mxu0 %v18033_v55  ;;  %13109 = vmatprep.subr.bf16.mxu1 %v18035_v56  ;;  %v776_v55 = vld [vmem:[%s21082_s18 + $0xe00] sm:$0xff] }
  0xc8   : > { %v784_v56 = vld [vmem:[%s21082_s18 + $0xe40] sm:$0xff] }
  0xc9   : > { %v18160_v5 = vcombine.low %v776_v55, %v784_v56  ;;  %v880_v48 = vld [vmem:[%s21082_s18 + $0x1140] sm:$0xff] }
  0xca   : > { %12782 = vmatpush1.bf16.msra.mxu0 %v18032_v62  ;;  %13110 = vmatpush1.bf16.msra.mxu1 %v18034_v63  ;;  %v18161_v62 = vcombine.high %v776_v55, %v784_v56  ;;  %v18163_v63 = vcombine.high %v777_v57, %v785_v58  ;;  %v18257_v55 = vcombine.high %v872_v47, %v880_v48  ;;  %v888_v57 = vld [vmem:[%s21082_s18 + $0x1180] sm:$0xff] }
  0xcb   : > { %12783 = vmatprep.subr.bf16.mxu0 %v18049_v1  ;;  %13111 = vmatprep.subr.bf16.mxu1 %v18051_v2  ;;  %v792_v1 = vld [vmem:[%s21082_s18 + $0xe80] sm:$0xff] }
  0xcc   : > { %v800_v2 = vld [vmem:[%s21082_s18 + $0xec0] sm:$0xff] }
  0xcd   : > { %v18176_v14 = vcombine.low %v792_v1, %v800_v2  ;;  %v896_v58 = vld [vmem:[%s21082_s18 + $0x11c0] sm:$0xff] }
  0xce   : > { %12784 = vmatpush1.bf16.msra.mxu0 %v18048_v7  ;;  %13112 = vmatpush1.bf16.msra.mxu1 %v18050_v8  ;;  %v18177_v7 = vcombine.high %v792_v1, %v800_v2  ;;  %v18179_v8 = vcombine.high %v793_v3, %v801_v4  ;;  %v18273_v1 = vcombine.high %v888_v57, %v896_v58  ;;  %v904_v3 = vld [vmem:[%s21082_s18 + $0x1200] sm:$0xff] }
  0xcf   : > { %12785 = vmatprep.subr.bf16.mxu0 %v18065_v9  ;;  %13113 = vmatprep.subr.bf16.mxu1 %v18067_v11  ;;  %v808_v9 = vld [vmem:[%s21082_s18 + $0xf00] sm:$0xff] }
  0xd0   : > { %v816_v11 = vld [vmem:[%s21082_s18 + $0xf40] sm:$0xff] }
  0xd1   : > { %v18192_v23 = vcombine.low %v808_v9, %v816_v11  ;;  %v912_v4 = vld [vmem:[%s21082_s18 + $0x1240] sm:$0xff] }
  0xd2   : > { %12786 = vmatpush1.bf16.msra.mxu0 %v18064_v16  ;;  %13114 = vmatpush1.bf16.msra.mxu1 %v18066_v17  ;;  %v18193_v16 = vcombine.high %v808_v9, %v816_v11  ;;  %v18195_v17 = vcombine.high %v809_v12, %v817_v13  ;;  %v18289_v9 = vcombine.high %v904_v3, %v912_v4  ;;  %v976_v38 = vld [vmem:[%s21082_s18 + $0x1440] sm:$0xff] }
  0xd3   : > { %12787 = vmatprep.subr.bf16.mxu0 %v18081_v18  ;;  %13115 = vmatprep.subr.bf16.mxu1 %v18083_v19  ;;  %v824_v18 = vld [vmem:[%s21082_s18 + $0xf80] sm:$0xff] }
  0xd4   : > { %v832_v19 = vld [vmem:[%s21082_s18 + $0xfc0] sm:$0xff] }
  0xd5   : > { %v18208_v32 = vcombine.low %v824_v18, %v832_v19 }
  0xd6   : > { %12788 = vmatpush1.bf16.msra.mxu0 %v18080_v25  ;;  %13116 = vmatpush1.bf16.msra.mxu1 %v18082_v26  ;;  %v18194_v25 = vcombine.low %v809_v12, %v817_v13  ;;  %v18209_v26 = vcombine.high %v824_v18, %v832_v19  ;;  %v920_v12 = vld [vmem:[%s21082_s18 + $0x1280] sm:$0xff] }
  0xd7   : > { %12789 = vmatprep.subr.bf16.mxu0 %v18097_v27  ;;  %13117 = vmatprep.subr.bf16.mxu1 %v18099_v28  ;;  %v18211_v27 = vcombine.high %v825_v21, %v833_v22  ;;  %v840_v28 = vld [vmem:[%s21082_s18 + $0x1000] sm:$0xff] }
  0xd8   : > { %v928_v13 = vld [vmem:[%s21082_s18 + $0x12c0] sm:$0xff] }
  0xd9   : > { %v18305_v18 = vcombine.high %v920_v12, %v928_v13 }
  0xda   : > { %12790 = vmatpush1.bf16.msra.mxu0 %v18096_v0  ;;  %13118 = vmatpush1.bf16.msra.mxu1 %v18098_v34  ;;  %v18210_v0 = vcombine.low %v825_v21, %v833_v22  ;;  %v18225_v34 = vcombine.high %v840_v28, %v848_v29  ;;  %v944_v21 = vld [vmem:[%s21082_s18 + $0x1340] sm:$0xff]  ;;  %v937_v22 = vld [vmem:[%s21082_s18 + $0x1308] sm:$0xff] }
  0xdb   : > { %12791 = vmatprep.subr.bf16.mxu0 %v18113_v35  ;;  %13119 = vmatprep.subr.bf16.mxu1 %v18115_v36  ;;  %v18227_v35 = vcombine.high %v841_v60, %v849_v31  ;;  %v856_v36 = vld [vmem:[%s21082_s18 + $0x1080] sm:$0xff] }
  0xde   : > { %12792 = vmatpush1.bf16.msra.mxu0 %v18112_v41  ;;  %13120 = vmatpush1.bf16.msra.mxu1 %v18114_v42  ;;  %v865_v41 = vld [vmem:[%s21082_s18 + $0x10c8] sm:$0xff]  ;;  %v18224_v42 = vcombine.low %v840_v28, %v848_v29  ;;  %v952_v29 = vld [vmem:[%s21082_s18 + $0x1380] sm:$0xff] }
  0xdf   : > { %12793 = vmatprep.subr.bf16.mxu0 %v18129_v43  ;;  %13121 = vmatprep.subr.bf16.mxu1 %v18131_v44  ;;  %v18226_v43 = vcombine.low %v841_v60, %v849_v31  ;;  %v18241_v44 = vcombine.high %v856_v36, %v864_v37  ;;  %v18243_v46 = vcombine.high %v857_v40, %v865_v41  ;;  %v960_v60 = vld [vmem:[%s21082_s18 + $0x13c0] sm:$0xff]  ;;  %v953_v31 = vld [vmem:[%s21082_s18 + $0x1388] sm:$0xff] }
  0xe2   : > { %12794 = vmatpush1.bf16.msra.mxu0 %v18128_v50  ;;  %13122 = vmatpush1.bf16.msra.mxu1 %v18130_v51  ;;  %v873_v50 = vld [vmem:[%s21082_s18 + $0x1108] sm:$0xff] }
  0xe3   : > { %12795 = vmatprep.subr.bf16.mxu0 %v18145_v52  ;;  %13123 = vmatprep.subr.bf16.mxu1 %v18147_v53  ;;  %v881_v51 = vld [vmem:[%s21082_s18 + $0x1148] sm:$0xff]  ;;  %v18240_v52 = vcombine.low %v856_v36, %v864_v37  ;;  %v18242_v53 = vcombine.low %v857_v40, %v865_v41  ;;  %v968_v37 = vld [vmem:[%s21082_s18 + $0x1400] sm:$0xff] }
  0xe4   : > { %v18259_v56 = vcombine.high %v873_v50, %v881_v51  ;;  %v969_v40 = vld [vmem:[%s21082_s18 + $0x1408] sm:$0xff] }
  0xe5   : > { %v977_v41 = vld [vmem:[%s21082_s18 + $0x1448] sm:$0xff] }
  0xe6   : > { %12796 = vmatpush1.bf16.msra.mxu0 %v18144_v59  ;;  %13124 = vmatpush1.bf16.msra.mxu1 %v18146_v61  ;;  %v889_v59 = vld [vmem:[%s21082_s18 + $0x1188] sm:$0xff] }
  0xe7   : > { %12797 = vmatprep.subr.bf16.mxu0 %v18161_v62  ;;  %13125 = vmatprep.subr.bf16.mxu1 %v18163_v63  ;;  %v897_v61 = vld [vmem:[%s21082_s18 + $0x11c8] sm:$0xff]  ;;  %v18256_v62 = vcombine.low %v872_v47, %v880_v48  ;;  %v18258_v63 = vcombine.low %v873_v50, %v881_v51  ;;  %v984_v47 = vld [vmem:[%s21082_s18 + $0x1480] sm:$0xff] }
  0xe8   : > { %v18275_v2 = vcombine.high %v889_v59, %v897_v61  ;;  %v992_v48 = vld [vmem:[%s21082_s18 + $0x14c0] sm:$0xff]  ;;  %v985_v50 = vld [vmem:[%s21082_s18 + $0x1488] sm:$0xff] }
  0xe9   : > { %v993_v51 = vld [vmem:[%s21082_s18 + $0x14c8] sm:$0xff] }
  0xea   : > { %12798 = vmatpush1.bf16.msra.mxu0 %v18160_v5  ;;  %13126 = vmatpush1.bf16.msra.mxu1 %v18162_v6  ;;  %v905_v5 = vld [vmem:[%s21082_s18 + $0x1208] sm:$0xff] }
  0xeb   : > { %12799 = vmatprep.subr.bf16.mxu0 %v18177_v7  ;;  %13127 = vmatprep.subr.bf16.mxu1 %v18179_v8  ;;  %v913_v6 = vld [vmem:[%s21082_s18 + $0x1248] sm:$0xff]  ;;  %v18272_v7 = vcombine.low %v888_v57, %v896_v58  ;;  %v18274_v8 = vcombine.low %v889_v59, %v897_v61  ;;  %v1000_v57 = vld [vmem:[%s21082_s18 + $0x1500] sm:$0xff] }
  0xec   : > { %v18291_v11 = vcombine.high %v905_v5, %v913_v6  ;;  %v1008_v58 = vld [vmem:[%s21082_s18 + $0x1540] sm:$0xff]  ;;  %v1001_v59 = vld [vmem:[%s21082_s18 + $0x1508] sm:$0xff] }
  0xed   : > { %v1009_v61 = vld [vmem:[%s21082_s18 + $0x1548] sm:$0xff] }
  0xee   : > { %12800 = vmatpush1.bf16.msra.mxu0 %v18176_v14  ;;  %13128 = vmatpush1.bf16.msra.mxu1 %v18178_v15  ;;  %v921_v14 = vld [vmem:[%s21082_s18 + $0x1288] sm:$0xff] }
  0xef   : > { %12801 = vmatprep.subr.bf16.mxu0 %v18193_v16  ;;  %13129 = vmatprep.subr.bf16.mxu1 %v18195_v17  ;;  %v929_v15 = vld [vmem:[%s21082_s18 + $0x12c8] sm:$0xff]  ;;  %v18288_v16 = vcombine.low %v904_v3, %v912_v4  ;;  %v18290_v17 = vcombine.low %v905_v5, %v913_v6  ;;  %v1016_v3 = vld [vmem:[%s21082_s18 + $0x1580] sm:$0xff] }
  0xf0   : > { %v18307_v19 = vcombine.high %v921_v14, %v929_v15  ;;  %v1024_v4 = vld [vmem:[%s21082_s18 + $0x15c0] sm:$0xff]  ;;  %v1017_v5 = vld [vmem:[%s21082_s18 + $0x1588] sm:$0xff] }
  0xf1   : > { %v1025_v6 = vld [vmem:[%s21082_s18 + $0x15c8] sm:$0xff] }
  0xf2   : > { %12802 = vmatpush1.bf16.msra.mxu0 %v18192_v23  ;;  %13130 = vmatpush1.bf16.msra.mxu1 %v18194_v25  ;;  %v945_v23 = vld [vmem:[%s21082_s18 + $0x1348] sm:$0xff]  ;;  %v18304_v25 = vcombine.low %v920_v12, %v928_v13  ;;  %v1032_v12 = vld [vmem:[%s21082_s18 + $0x1600] sm:$0xff] }
  0xf3   : > { %12803 = vmatprep.subr.bf16.mxu0 %v18209_v26  ;;  %13131 = vmatprep.subr.bf16.mxu1 %v18211_v27  ;;  %v18306_v26 = vcombine.low %v921_v14, %v929_v15  ;;  %v18321_v27 = vcombine.high %v936_v20, %v944_v21  ;;  %v18323_v28 = vcombine.high %v937_v22, %v945_v23  ;;  %v1040_v13 = vld [vmem:[%s21082_s18 + $0x1640] sm:$0xff]  ;;  %v1033_v14 = vld [vmem:[%s21082_s18 + $0x1608] sm:$0xff] }
  0xf4   : > { %v1041_v15 = vld [vmem:[%s21082_s18 + $0x1648] sm:$0xff] }
  0xf6   : > { %12804 = vmatpush1.bf16.msra.mxu0 %v18208_v32  ;;  %13132 = vmatpush1.bf16.msra.mxu1 %v18210_v0  ;;  %v961_v32 = vld [vmem:[%s21082_s18 + $0x13c8] sm:$0xff]  ;;  %v18320_v0 = vcombine.low %v936_v20, %v944_v21  ;;  %v1048_v20 = vld [vmem:[%s21082_s18 + $0x1680] sm:$0xff] }
  0xf7   : > { %12814 = vmatprep.subr.bf16.mxu0 %v18225_v34  ;;  %13142 = vmatprep.subr.bf16.mxu1 %v18227_v35  ;;  %v18322_v34 = vcombine.low %v937_v22, %v945_v23  ;;  %v18337_v35 = vcombine.high %v952_v29, %v960_v60  ;;  %v18339_v36 = vcombine.high %v953_v31, %v961_v32  ;;  %v1056_v21 = vld [vmem:[%s21082_s18 + $0x16c0] sm:$0xff]  ;;  %v1049_v22 = vld [vmem:[%s21082_s18 + $0x1688] sm:$0xff] }
  0xf8   : > { %v1057_v23 = vld [vmem:[%s21082_s18 + $0x16c8] sm:$0xff] }
  0xf9   : > { %12806 = vmatmul.mubr.bf16.vlgmr.msra.gmra.mrb[0].mxu0 %v21273_v39  ;;  %13134 = vmatmul.mubr.bf16.vlgmr.msra.gmra.mrb[0].mxu1 %v21273_v39 }
  0xfa   : > { %12815 = vmatpush1.bf16.msra.mxu0 %v18224_v42  ;;  %13143 = vmatpush1.bf16.msra.mxu1 %v18226_v43  ;;  %v18336_v42 = vcombine.low %v952_v29, %v960_v60  ;;  %v18338_v43 = vcombine.low %v953_v31, %v961_v32  ;;  %v1064_v29 = vld [vmem:[%s21082_s18 + $0x1700] sm:$0xff]  ;;  %v1065_v31 = vld [vmem:[%s21082_s18 + $0x1708] sm:$0xff] }
  0xfb   : > { %12816 = vmatprep.subr.bf16.mxu0 %v18241_v44  ;;  %13144 = vmatprep.subr.bf16.mxu1 %v18243_v46  ;;  %v18353_v44 = vcombine.high %v968_v37, %v976_v38  ;;  %v18355_v46 = vcombine.high %v969_v40, %v977_v41  ;;  %v1072_v60 = vld [vmem:[%s21082_s18 + $0x1740] sm:$0xff]  ;;  %v1073_v32 = vld [vmem:[%s21082_s18 + $0x1748] sm:$0xff] }
  0xfc   : > { %12846 = vmatprep.mubr.bf16.mxu0 %v21280_v49  ;;  %13174 = vmatprep.mubr.bf16.mxu1 %v21280_v49 }
  0xfe   : > { %12817 = vmatpush1.bf16.msra.mxu0 %v18240_v52  ;;  %13145 = vmatpush1.bf16.msra.mxu1 %v18242_v53  ;;  %v18352_v52 = vcombine.low %v968_v37, %v976_v38  ;;  %v18354_v53 = vcombine.low %v969_v40, %v977_v41  ;;  %v1080_v37 = vld [vmem:[%s21082_s18 + $0x1780] sm:$0xff]  ;;  %v1081_v40 = vld [vmem:[%s21082_s18 + $0x1788] sm:$0xff] }
  0xff   : > { %12818 = vmatprep.subr.bf16.mxu0 %v18257_v55  ;;  %13146 = vmatprep.subr.bf16.mxu1 %v18259_v56  ;;  %v18369_v55 = vcombine.high %v984_v47, %v992_v48  ;;  %v18371_v56 = vcombine.high %v985_v50, %v993_v51  ;;  %v1088_v38 = vld [vmem:[%s21082_s18 + $0x17c0] sm:$0xff]  ;;  %v1089_v41 = vld [vmem:[%s21082_s18 + $0x17c8] sm:$0xff] }
 0x102   : > { %12819 = vmatpush1.bf16.msra.mxu0 %v18256_v62  ;;  %13147 = vmatpush1.bf16.msra.mxu1 %v18258_v63  ;;  %v18368_v62 = vcombine.low %v984_v47, %v992_v48  ;;  %v18370_v63 = vcombine.low %v985_v50, %v993_v51  ;;  %v1096_v47 = vld [vmem:[%s21082_s18 + $0x1800] sm:$0xff]  ;;  %v1097_v50 = vld [vmem:[%s21082_s18 + $0x1808] sm:$0xff] }
 0x103   : > { %12820 = vmatprep.subr.bf16.mxu0 %v18273_v1  ;;  %13148 = vmatprep.subr.bf16.mxu1 %v18275_v2  ;;  %v18385_v1 = vcombine.high %v1000_v57, %v1008_v58  ;;  %v18387_v2 = vcombine.high %v1001_v59, %v1009_v61  ;;  %v1104_v48 = vld [vmem:[%s21082_s18 + $0x1840] sm:$0xff]  ;;  %v1105_v51 = vld [vmem:[%s21082_s18 + $0x1848] sm:$0xff] }
 0x106   : > { %12821 = vmatpush1.bf16.msra.mxu0 %v18272_v7  ;;  %13149 = vmatpush1.bf16.msra.mxu1 %v18274_v8  ;;  %v18384_v7 = vcombine.low %v1000_v57, %v1008_v58  ;;  %v18386_v8 = vcombine.low %v1001_v59, %v1009_v61  ;;  %v1112_v57 = vld [vmem:[%s21082_s18 + $0x1880] sm:$0xff]  ;;  %v21348_v59 = vrot.slane %v21263_v30, %v21128_v54  ;;  %v1113_v61 = vld [vmem:[%s21082_s18 + $0x1888] sm:$0xff] }
 0x107   : > { %12822 = vmatprep.subr.bf16.mxu0 %v18289_v9  ;;  %13150 = vmatprep.subr.bf16.mxu1 %v18291_v11  ;;  %v18401_v9 = vcombine.high %v1016_v3, %v1024_v4  ;;  %v18403_v11 = vcombine.high %v1017_v5, %v1025_v6  ;;  %v1120_v58 = vld [vmem:[%s21082_s18 + $0x18c0] sm:$0xff]  ;;  %v1129_v30 = vld [vmem:[%s21082_s18 + $0x1908] sm:$0xff] }
 0x10a   : > { %12823 = vmatpush1.bf16.msra.mxu0 %v18288_v16  ;;  %13151 = vmatpush1.bf16.msra.mxu1 %v18290_v17  ;;  %v18400_v16 = vcombine.low %v1016_v3, %v1024_v4  ;;  %v18402_v17 = vcombine.low %v1017_v5, %v1025_v6  ;;  %v1128_v4 = vld [vmem:[%s21082_s18 + $0x1900] sm:$0xff]  ;;  %v21356_v6 = vcombine.high %v21280_v49, %v21280_v49 }
 0x10b   : > { %12824 = vmatprep.subr.bf16.mxu0 %v18305_v18  ;;  %13152 = vmatprep.subr.bf16.mxu1 %v18307_v19  ;;  %v18417_v18 = vcombine.high %v1032_v12, %v1040_v13  ;;  %v18419_v19 = vcombine.high %v1033_v14, %v1041_v15  ;;  %v1136_v5 = vld [vmem:[%s21082_s18 + $0x1940] sm:$0xff] }
 0x10e   : > { %12825 = vmatpush1.bf16.msra.mxu0 %v18304_v25  ;;  %13153 = vmatpush1.bf16.msra.mxu1 %v18306_v26  ;;  %v18416_v25 = vcombine.low %v1032_v12, %v1040_v13  ;;  %v18418_v26 = vcombine.low %v1033_v14, %v1041_v15  ;;  %v1144_v13 = vld [vmem:[%s21082_s18 + $0x1980] sm:$0xff]  ;;  %v1145_v15 = vld [vmem:[%s21082_s18 + $0x1988] sm:$0xff] }
 0x10f   : > { %12826 = vmatprep.subr.bf16.mxu0 %v18321_v27  ;;  %13154 = vmatprep.subr.bf16.mxu1 %v18323_v28  ;;  %v18433_v27 = vcombine.high %v1048_v20, %v1056_v21  ;;  %v18435_v28 = vcombine.high %v1049_v22, %v1057_v23  ;;  %v1152_v14 = vld [vmem:[%s21082_s18 + $0x19c0] sm:$0xff] }
 0x112   : > { %12827 = vmatpush1.bf16.msra.mxu0 %v18320_v0  ;;  %13155 = vmatpush1.bf16.msra.mxu1 %v18322_v34  ;;  %v18432_v0 = vcombine.low %v1048_v20, %v1056_v21  ;;  %v18434_v34 = vcombine.low %v1049_v22, %v1057_v23  ;;  %v1160_v21 = vld [vmem:[%s21082_s18 + $0x1a00] sm:$0xff]  ;;  %v1161_v23 = vld [vmem:[%s21082_s18 + $0x1a08] sm:$0xff] }
 0x113   : > { %12828 = vmatprep.subr.bf16.mxu0 %v18337_v35  ;;  %13156 = vmatprep.subr.bf16.mxu1 %v18339_v36  ;;  %v18449_v35 = vcombine.high %v1064_v29, %v1072_v60  ;;  %v18451_v36 = vcombine.high %v1065_v31, %v1073_v32  ;;  %v1168_v22 = vld [vmem:[%s21082_s18 + $0x1a40] sm:$0xff] }
 0x116   : > { %12829 = vmatpush1.bf16.msra.mxu0 %v18336_v42  ;;  %13157 = vmatpush1.bf16.msra.mxu1 %v18338_v43  ;;  %v18448_v42 = vcombine.low %v1064_v29, %v1072_v60  ;;  %v18450_v43 = vcombine.low %v1065_v31, %v1073_v32  ;;  %v1176_v60 = vld [vmem:[%s21082_s18 + $0x1a80] sm:$0xff]  ;;  %v1177_v32 = vld [vmem:[%s21082_s18 + $0x1a88] sm:$0xff] }
 0x117   : > { %12830 = vmatprep.subr.bf16.mxu0 %v18353_v44  ;;  %13158 = vmatprep.subr.bf16.mxu1 %v18355_v46  ;;  %v18465_v44 = vcombine.high %v1080_v37, %v1088_v38  ;;  %v18467_v46 = vcombine.high %v1081_v40, %v1089_v41  ;;  %v1184_v31 = vld [vmem:[%s21082_s18 + $0x1ac0] sm:$0xff] }
 0x11a   : > { %12831 = vmatpush1.bf16.msra.mxu0 %v18352_v52  ;;  %13159 = vmatpush1.bf16.msra.mxu1 %v18354_v53  ;;  %v18464_v52 = vcombine.low %v1080_v37, %v1088_v38  ;;  %v18466_v53 = vcombine.low %v1081_v40, %v1089_v41  ;;  %v1192_v38 = vld [vmem:[%s21082_s18 + $0x1b00] sm:$0xff]  ;;  %v1193_v41 = vld [vmem:[%s21082_s18 + $0x1b08] sm:$0xff] }
 0x11b   : > { %12832 = vmatprep.subr.bf16.mxu0 %v18369_v55  ;;  %13160 = vmatprep.subr.bf16.mxu1 %v18371_v56  ;;  %v18481_v55 = vcombine.high %v1096_v47, %v1104_v48  ;;  %v18483_v56 = vcombine.high %v1097_v50, %v1105_v51  ;;  %v1200_v40 = vld [vmem:[%s21082_s18 + $0x1b40] sm:$0xff] }
 0x11e   : > { %12833 = vmatpush1.bf16.msra.mxu0 %v18368_v62  ;;  %13161 = vmatpush1.bf16.msra.mxu1 %v18370_v63  ;;  %v1121_v62 = vld [vmem:[%s21082_s18 + $0x18c8] sm:$0xff]  ;;  %v18480_v63 = vcombine.low %v1096_v47, %v1104_v48  ;;  %v1208_v48 = vld [vmem:[%s21082_s18 + $0x1b80] sm:$0xff] }
 0x11f   : > { %12834 = vmatprep.subr.bf16.mxu0 %v18385_v1  ;;  %13162 = vmatprep.subr.bf16.mxu1 %v18387_v2  ;;  %v18482_v1 = vcombine.low %v1097_v50, %v1105_v51  ;;  %v18497_v2 = vcombine.high %v1112_v57, %v1120_v58  ;;  %v18499_v3 = vcombine.high %v1113_v61, %v1121_v62  ;;  %v1216_v50 = vld [vmem:[%s21082_s18 + $0x1bc0] sm:$0xff]  ;;  %v1209_v51 = vld [vmem:[%s21082_s18 + $0x1b88] sm:$0xff] }
 0x122   : > { %12835 = vmatpush1.bf16.msra.mxu0 %v18384_v7  ;;  %13163 = vmatpush1.bf16.msra.mxu1 %v18386_v8  ;;  %v1137_v7 = vld [vmem:[%s21082_s18 + $0x1948] sm:$0xff]  ;;  %v18496_v8 = vcombine.low %v1112_v57, %v1120_v58  ;;  %v1224_v58 = vld [vmem:[%s21082_s18 + $0x1c00] sm:$0xff] }
 0x123   : > { %12836 = vmatprep.subr.bf16.mxu0 %v18401_v9  ;;  %13164 = vmatprep.subr.bf16.mxu1 %v18403_v11  ;;  %v18498_v9 = vcombine.low %v1113_v61, %v1121_v62  ;;  %v18513_v11 = vcombine.high %v1128_v4, %v1136_v5  ;;  %v18515_v12 = vcombine.high %v1129_v30, %v1137_v7  ;;  %v1232_v61 = vld [vmem:[%s21082_s18 + $0x1c40] sm:$0xff]  ;;  %v1225_v62 = vld [vmem:[%s21082_s18 + $0x1c08] sm:$0xff] }
 0x126   : > { %12837 = vmatpush1.bf16.msra.mxu0 %v18400_v16  ;;  %13165 = vmatpush1.bf16.msra.mxu1 %v18402_v17  ;;  %v1153_v16 = vld [vmem:[%s21082_s18 + $0x19c8] sm:$0xff]  ;;  %v18512_v17 = vcombine.low %v1128_v4, %v1136_v5  ;;  %v1240_v5 = vld [vmem:[%s21082_s18 + $0x1c80] sm:$0xff] }
 0x127   : > { %12838 = vmatprep.subr.bf16.mxu0 %v18417_v18  ;;  %13166 = vmatprep.subr.bf16.mxu1 %v18419_v19  ;;  %v18514_v18 = vcombine.low %v1129_v30, %v1137_v7  ;;  %v18529_v19 = vcombine.high %v1144_v13, %v1152_v14  ;;  %v18531_v20 = vcombine.high %v1145_v15, %v1153_v16  ;;  %v1248_v30 = vld [vmem:[%s21082_s18 + $0x1cc0] sm:$0xff]  ;;  %v1241_v7 = vld [vmem:[%s21082_s18 + $0x1c88] sm:$0xff] }
 0x12a   : > { %12839 = vmatpush1.bf16.msra.mxu0 %v18416_v25  ;;  %13167 = vmatpush1.bf16.msra.mxu1 %v18418_v26  ;;  %v1169_v25 = vld [vmem:[%s21082_s18 + $0x1a48] sm:$0xff]  ;;  %v18528_v26 = vcombine.low %v1144_v13, %v1152_v14  ;;  %v1256_v14 = vld [vmem:[%s21082_s18 + $0x1d00] sm:$0xff] }
 0x12b   : > { %12840 = vmatprep.subr.bf16.mxu0 %v18433_v27  ;;  %13168 = vmatprep.subr.bf16.mxu1 %v18435_v28  ;;  %v18530_v27 = vcombine.low %v1145_v15, %v1153_v16  ;;  %v18545_v28 = vcombine.high %v1160_v21, %v1168_v22  ;;  %v18547_v29 = vcombine.high %v1161_v23, %v1169_v25  ;;  %v1264_v15 = vld [vmem:[%s21082_s18 + $0x1d40] sm:$0xff]  ;;  %v1257_v16 = vld [vmem:[%s21082_s18 + $0x1d08] sm:$0xff] }
 0x12e   : > { %12841 = vmatpush1.bf16.msra.mxu0 %v18432_v0  ;;  %13169 = vmatpush1.bf16.msra.mxu1 %v18434_v34  ;;  %v1185_v0 = vld [vmem:[%s21082_s18 + $0x1ac8] sm:$0xff]  ;;  %v18544_v34 = vcombine.low %v1160_v21, %v1168_v22  ;;  %v1272_v22 = vld [vmem:[%s21082_s18 + $0x1d80] sm:$0xff] }
 0x12f   : > { %12842 = vmatprep.subr.bf16.mxu0 %v18449_v35  ;;  %13170 = vmatprep.subr.bf16.mxu1 %v18451_v36  ;;  %v18546_v35 = vcombine.low %v1161_v23, %v1169_v25  ;;  %v18561_v36 = vcombine.high %v1176_v60, %v1184_v31  ;;  %v18563_v37 = vcombine.high %v1177_v32, %v1185_v0  ;;  %v1280_v23 = vld [vmem:[%s21082_s18 + $0x1dc0] sm:$0xff]  ;;  %v1273_v25 = vld [vmem:[%s21082_s18 + $0x1d88] sm:$0xff] }
 0x132   : > { %12843 = vmatpush1.bf16.msra.mxu0 %v18448_v42  ;;  %13171 = vmatpush1.bf16.msra.mxu1 %v18450_v43  ;;  %v1201_v42 = vld [vmem:[%s21082_s18 + $0x1b48] sm:$0xff]  ;;  %v18560_v43 = vcombine.low %v1176_v60, %v1184_v31  ;;  %v1288_v31 = vld [vmem:[%s21082_s18 + $0x1e00] sm:$0xff] }
 0x133   : > { %12844 = vmatprep.subr.bf16.mxu0 %v18465_v44  ;;  %13172 = vmatprep.subr.bf16.mxu1 %v18467_v46  ;;  %v18562_v44 = vcombine.low %v1177_v32, %v1185_v0  ;;  %v18577_v46 = vcombine.high %v1192_v38, %v1200_v40  ;;  %v18579_v47 = vcombine.high %v1193_v41, %v1201_v42  ;;  %v1296_v32 = vld [vmem:[%s21082_s18 + $0x1e40] sm:$0xff]  ;;  %v1289_v0 = vld [vmem:[%s21082_s18 + $0x1e08] sm:$0xff] }
 0x136   : > { %12845 = vmatpush1.bf16.msra.mxu0 %v18464_v52  ;;  %13173 = vmatpush1.bf16.msra.mxu1 %v18466_v53  ;;  %v1217_v52 = vld [vmem:[%s21082_s18 + $0x1bc8] sm:$0xff]  ;;  %v18576_v53 = vcombine.low %v1192_v38, %v1200_v40  ;;  %v1304_v40 = vld [vmem:[%s21082_s18 + $0x1e80] sm:$0xff] }
 0x137   : > { %12855 = vmatprep.subr.bf16.mxu0 %v18481_v55  ;;  %13183 = vmatprep.subr.bf16.mxu1 %v18483_v56  ;;  %v18578_v55 = vcombine.low %v1193_v41, %v1201_v42  ;;  %v18593_v56 = vcombine.high %v1208_v48, %v1216_v50  ;;  %v18595_v57 = vcombine.high %v1209_v51, %v1217_v52  ;;  %v1312_v41 = vld [vmem:[%s21082_s18 + $0x1ec0] sm:$0xff]  ;;  %v1305_v42 = vld [vmem:[%s21082_s18 + $0x1e88] sm:$0xff] }
 0x139   : > { %12847 = vmatmul.mubr.bf16.vlgmr.msra.gmra.mrb[0].mxu0 %v21348_v59  ;;  %13175 = vmatmul.mubr.bf16.vlgmr.msra.gmra.mrb[0].mxu1 %v21348_v59 }
 0x13a   : > { %12856 = vmatpush1.bf16.msra.mxu0 %v18480_v63  ;;  %13184 = vmatpush1.bf16.msra.mxu1 %v18482_v1  ;;  %v1233_v63 = vld [vmem:[%s21082_s18 + $0x1c48] sm:$0xff]  ;;  %v18592_v1 = vcombine.low %v1208_v48, %v1216_v50  ;;  %v1320_v50 = vld [vmem:[%s21082_s18 + $0x1f00] sm:$0xff] }
 0x13b   : > { %12857 = vmatprep.subr.bf16.mxu0 %v18497_v2  ;;  %13185 = vmatprep.subr.bf16.mxu1 %v18499_v3  ;;  %v18594_v2 = vcombine.low %v1209_v51, %v1217_v52  ;;  %v18609_v3 = vcombine.high %v1224_v58, %v1232_v61  ;;  %v18611_v4 = vcombine.high %v1225_v62, %v1233_v63  ;;  %v1328_v51 = vld [vmem:[%s21082_s18 + $0x1f40] sm:$0xff]  ;;  %v1321_v52 = vld [vmem:[%s21082_s18 + $0x1f08] sm:$0xff] }
 0x13c   : > { %12887 = vmatprep.mubr.bf16.mxu0 %v21356_v6  ;;  %13215 = vmatprep.mubr.bf16.mxu1 %v21356_v6 }
 0x13e   : > { %12858 = vmatpush1.bf16.msra.mxu0 %v18496_v8  ;;  %13186 = vmatpush1.bf16.msra.mxu1 %v18498_v9  ;;  %v1249_v8 = vld [vmem:[%s21082_s18 + $0x1cc8] sm:$0xff]  ;;  %v18608_v9 = vcombine.low %v1224_v58, %v1232_v61  ;;  %v1336_v61 = vld [vmem:[%s21082_s18 + $0x1f80] sm:$0xff] }
 0x13f   : > { %12859 = vmatprep.subr.bf16.mxu0 %v18513_v11  ;;  %13187 = vmatprep.subr.bf16.mxu1 %v18515_v12  ;;  %v18610_v11 = vcombine.low %v1225_v62, %v1233_v63  ;;  %v18625_v12 = vcombine.high %v1240_v5, %v1248_v30  ;;  %v18627_v13 = vcombine.high %v1241_v7, %v1249_v8  ;;  %v1344_v62 = vld [vmem:[%s21082_s18 + $0x1fc0] sm:$0xff]  ;;  %v1337_v63 = vld [vmem:[%s21082_s18 + $0x1f88] sm:$0xff] }
 0x142   : > { %12860 = vmatpush1.bf16.msra.mxu0 %v18512_v17  ;;  %13188 = vmatpush1.bf16.msra.mxu1 %v18514_v18  ;;  %v1265_v17 = vld [vmem:[%s21082_s18 + $0x1d48] sm:$0xff]  ;;  %v18624_v18 = vcombine.low %v1240_v5, %v1248_v30  ;;  %v18721_v5 = vcombine.high %v1336_v61, %v1344_v62 }
 0x143   : > { %12861 = vmatprep.subr.bf16.mxu0 %v18529_v19  ;;  %13189 = vmatprep.subr.bf16.mxu1 %v18531_v20  ;;  %v18626_v19 = vcombine.low %v1241_v7, %v1249_v8  ;;  %v18641_v20 = vcombine.high %v1256_v14, %v1264_v15  ;;  %v18643_v21 = vcombine.high %v1257_v16, %v1265_v17  ;;  %v1352_v7 = vld [vmem:[%s21082_s18 + $0x2000] sm:$0xff] }
 0x144   : > { %v1360_v8 = vld [vmem:[%s21082_s18 + $0x2040] sm:$0xff] }
 0x146   : > { %12862 = vmatpush1.bf16.msra.mxu0 %v18528_v26  ;;  %13190 = vmatpush1.bf16.msra.mxu1 %v18530_v27  ;;  %v1281_v26 = vld [vmem:[%s21082_s18 + $0x1dc8] sm:$0xff]  ;;  %v18640_v27 = vcombine.low %v1256_v14, %v1264_v15  ;;  %v18737_v15 = vcombine.high %v1352_v7, %v1360_v8 }
 0x147   : > { %12863 = vmatprep.subr.bf16.mxu0 %v18545_v28  ;;  %13191 = vmatprep.subr.bf16.mxu1 %v18547_v29  ;;  %v18642_v28 = vcombine.low %v1257_v16, %v1265_v17  ;;  %v18657_v29 = vcombine.high %v1272_v22, %v1280_v23  ;;  %v18659_v60 = vcombine.high %v1273_v25, %v1281_v26  ;;  %v1368_v17 = vld [vmem:[%s21082_s18 + $0x2080] sm:$0xff] }
 0x14a   : > { %12864 = vmatpush1.bf16.msra.mxu0 %v18544_v34  ;;  %13192 = vmatpush1.bf16.msra.mxu1 %v18546_v35  ;;  %v1297_v34 = vld [vmem:[%s21082_s18 + $0x1e48] sm:$0xff]  ;;  %v18656_v35 = vcombine.low %v1272_v22, %v1280_v23  ;;  %v18736_v23 = vcombine.low %v1352_v7, %v1360_v8 }
 0x14b   : > { %12865 = vmatprep.subr.bf16.mxu0 %v18561_v36  ;;  %13193 = vmatprep.subr.bf16.mxu1 %v18563_v37  ;;  %v18658_v36 = vcombine.low %v1273_v25, %v1281_v26  ;;  %v18673_v37 = vcombine.high %v1288_v31, %v1296_v32  ;;  %v18675_v38 = vcombine.high %v1289_v0, %v1297_v34  ;;  %v1377_v22 = vld [vmem:[%s21082_s18 + $0x20c8] sm:$0xff] }
 0x14c   : > { %v1449_v7 = vld [vmem:[%s21082_s18 + $0x2308] sm:$0xff] }
 0x14d   : > { %v1457_v8 = vld [vmem:[%s21082_s18 + $0x2348] sm:$0xff] }
 0x14e   : > { %12866 = vmatpush1.bf16.msra.mxu0 %v18560_v43  ;;  %13194 = vmatpush1.bf16.msra.mxu1 %v18562_v44  ;;  %v1313_v43 = vld [vmem:[%s21082_s18 + $0x1ec8] sm:$0xff]  ;;  %v18672_v44 = vcombine.low %v1288_v31, %v1296_v32 }
 0x14f   : > { %12867 = vmatprep.subr.bf16.mxu0 %v18577_v46  ;;  %13195 = vmatprep.subr.bf16.mxu1 %v18579_v47  ;;  %v18674_v46 = vcombine.low %v1289_v0, %v1297_v34  ;;  %v18689_v47 = vcombine.high %v1304_v40, %v1312_v41  ;;  %v18691_v48 = vcombine.high %v1305_v42, %v1313_v43  ;;  %v1385_v31 = vld [vmem:[%s21082_s18 + $0x2108] sm:$0xff] }
 0x150   : > { %v1393_v32 = vld [vmem:[%s21082_s18 + $0x2148] sm:$0xff] }
 0x152   : > { %12868 = vmatpush1.bf16.msra.mxu0 %v18576_v53  ;;  %13196 = vmatpush1.bf16.msra.mxu1 %v18578_v55  ;;  %v1329_v53 = vld [vmem:[%s21082_s18 + $0x1f48] sm:$0xff]  ;;  %v18688_v55 = vcombine.low %v1304_v40, %v1312_v41 }
 0x153   : > { %12869 = vmatprep.subr.bf16.mxu0 %v18593_v56  ;;  %13197 = vmatprep.subr.bf16.mxu1 %v18595_v57  ;;  %v18690_v56 = vcombine.low %v1305_v42, %v1313_v43  ;;  %v18705_v57 = vcombine.high %v1320_v50, %v1328_v51  ;;  %v18707_v58 = vcombine.high %v1321_v52, %v1329_v53  ;;  %v1401_v40 = vld [vmem:[%s21082_s18 + $0x2188] sm:$0xff] }
 0x154   : > { %v1409_v41 = vld [vmem:[%s21082_s18 + $0x21c8] sm:$0xff]  ;;  %v18770_v43 = vcombine.low %v1385_v31, %v1393_v32 }
 0x156   : > { %12870 = vmatpush1.bf16.msra.mxu0 %v18592_v1  ;;  %13198 = vmatpush1.bf16.msra.mxu1 %v18594_v2  ;;  %v1345_v1 = vld [vmem:[%s21082_s18 + $0x1fc8] sm:$0xff] }
 0x157   : > { %12871 = vmatprep.subr.bf16.mxu0 %v18609_v3  ;;  %13199 = vmatprep.subr.bf16.mxu1 %v18611_v4  ;;  %v21417_v2 = vld [vmem:[%s21125_s12 + $0x8] sm:$0xff]  ;;  %v18704_v3 = vcombine.low %v1320_v50, %v1328_v51  ;;  %v18706_v4 = vcombine.low %v1321_v52, %v1329_v53  ;;  %v18723_v30 = vcombine.high %v1337_v63, %v1345_v1 }
 0x158   : > { %v18722_v14 = vcombine.low %v1337_v63, %v1345_v1  ;;  %v1417_v50 = vld [vmem:[%s21082_s18 + $0x2208] sm:$0xff]  ;;  %v18786_v53 = vcombine.low %v1401_v40, %v1409_v41 }
 0x159   : > { %v1425_v51 = vld [vmem:[%s21082_s18 + $0x2248] sm:$0xff] }
 0x15a   : > { %12872 = vmatpush1.bf16.msra.mxu0 %v18608_v9  ;;  %13200 = vmatpush1.bf16.msra.mxu1 %v18610_v11  ;;  %v21423_v9 = vrot.slane %v21417_v2, %v21128_v54  ;;  %v1353_v11 = vld [vmem:[%s21082_s18 + $0x2008] sm:$0xff]  ;;  %v18802_v1 = vcombine.low %v1417_v50, %v1425_v51 }
 0x15b   : > { %12873 = vmatprep.subr.bf16.mxu0 %v18625_v12  ;;  %13201 = vmatprep.subr.bf16.mxu1 %v18627_v13  ;;  %v1361_v12 = vld [vmem:[%s21082_s18 + $0x2048] sm:$0xff]  ;;  %v18720_v13 = vcombine.low %v1336_v61, %v1344_v62 }
 0x15c   : > { %v18739_v16 = vcombine.high %v1353_v11, %v1361_v12  ;;  %v18738_v25 = vcombine.low %v1353_v11, %v1361_v12  ;;  %v1433_v61 = vld [vmem:[%s21082_s18 + $0x2288] sm:$0xff] }
 0x15d   : > { %v1441_v62 = vld [vmem:[%s21082_s18 + $0x22c8] sm:$0xff] }
 0x15e   : > { %12874 = vmatpush1.bf16.msra.mxu0 %v18624_v18  ;;  %13202 = vmatpush1.bf16.msra.mxu1 %v18626_v19  ;;  %v1376_v18 = vld [vmem:[%s21082_s18 + $0x20c0] sm:$0xff]  ;;  %v2442_v19 = vcombine.high %v21423_v9, %v21423_v9  ;;  %v18818_v12 = vcombine.low %v1433_v61, %v1441_v62 }
 0x15f   : > { %12875 = vmatprep.subr.bf16.mxu0 %v18641_v20  ;;  %13203 = vmatprep.subr.bf16.mxu1 %v18643_v21  ;;  %v21433_v20 = vcombine.high %v21348_v59, %v21348_v59  ;;  %v1369_v21 = vld [vmem:[%s21082_s18 + $0x2088] sm:$0xff]  ;;  %v18753_v26 = vcombine.high %v1368_v17, %v1376_v18  ;;  %v18752_v0 = vcombine.low %v1368_v17, %v1376_v18 }
 0x160   : > { %v18754_v34 = vcombine.low %v1369_v21, %v1377_v22  ;;  %v1465_v17 = vld [vmem:[%s21082_s18 + $0x2388] sm:$0xff] }
 0x161   : > { %v1473_v18 = vld [vmem:[%s21082_s18 + $0x23c8] sm:$0xff] }
 0x162   : > { %12876 = vmatpush1.bf16.msra.mxu0 %v18640_v27  ;;  %13204 = vmatpush1.bf16.msra.mxu1 %v18642_v28  ;;  %v18755_v27 = vcombine.high %v1369_v21, %v1377_v22  ;;  %v1384_v28 = vld [vmem:[%s21082_s18 + $0x2100] sm:$0xff]  ;;  %v18834_v21 = vcombine.low %v1449_v7, %v1457_v8 }
 0x163   : > { %12877 = vmatprep.subr.bf16.mxu0 %v18657_v29  ;;  %13205 = vmatprep.subr.bf16.mxu1 %v18659_v60  ;;  %v1392_v29 = vld [vmem:[%s21082_s18 + $0x2140] sm:$0xff]  ;;  %v21440_v60 = vrot.slane %v2442_v19, %v21128_v54 }
 0x164   : > { %v18768_v42 = vcombine.low %v1384_v28, %v1392_v29 }
 0x166   : > { %12878 = vmatpush1.bf16.msra.mxu0 %v18656_v35  ;;  %13206 = vmatpush1.bf16.msra.mxu1 %v18658_v36  ;;  %v18769_v35 = vcombine.high %v1384_v28, %v1392_v29  ;;  %v18771_v36 = vcombine.high %v1385_v31, %v1393_v32  ;;  %v1489_v28 = vld [vmem:[%s21082_s18 + $0x2448] sm:$0xff]  ;;  %v18850_v31 = vcombine.low %v1465_v17, %v1473_v18 }
 0x167   : > { %12879 = vmatprep.subr.bf16.mxu0 %v18673_v37  ;;  %13207 = vmatprep.subr.bf16.mxu1 %v18675_v38  ;;  %v1400_v37 = vld [vmem:[%s21082_s18 + $0x2180] sm:$0xff] }
 0x168   : > { %v1408_v38 = vld [vmem:[%s21082_s18 + $0x21c0] sm:$0xff] }
 0x169   : > { %v18784_v52 = vcombine.low %v1400_v37, %v1408_v38 }
 0x16a   : > { %12880 = vmatpush1.bf16.msra.mxu0 %v18672_v44  ;;  %13208 = vmatpush1.bf16.msra.mxu1 %v18674_v46  ;;  %v18785_v44 = vcombine.high %v1400_v37, %v1408_v38  ;;  %v18787_v46 = vcombine.high %v1401_v40, %v1409_v41  ;;  %v1505_v37 = vld [vmem:[%s21082_s18 + $0x24c8] sm:$0xff] }
 0x16b   : > { %12881 = vmatprep.subr.bf16.mxu0 %v18689_v47  ;;  %13209 = vmatprep.subr.bf16.mxu1 %v18691_v48  ;;  %v1416_v47 = vld [vmem:[%s21082_s18 + $0x2200] sm:$0xff] }
 0x16c   : > { %v1424_v48 = vld [vmem:[%s21082_s18 + $0x2240] sm:$0xff] }
 0x16d   : > { %v18800_v63 = vcombine.low %v1416_v47, %v1424_v48 }
 0x16e   : > { %12882 = vmatpush1.bf16.msra.mxu0 %v18688_v55  ;;  %13210 = vmatpush1.bf16.msra.mxu1 %v18690_v56  ;;  %v18801_v55 = vcombine.high %v1416_v47, %v1424_v48  ;;  %v18803_v56 = vcombine.high %v1417_v50, %v1425_v51  ;;  %v1521_v47 = vld [vmem:[%s21082_s18 + $0x2548] sm:$0xff] }
 0x16f   : > { %12883 = vmatprep.subr.bf16.mxu0 %v18705_v57  ;;  %13211 = vmatprep.subr.bf16.mxu1 %v18707_v58  ;;  %v1432_v57 = vld [vmem:[%s21082_s18 + $0x2280] sm:$0xff] }
 0x170   : > { %v1440_v58 = vld [vmem:[%s21082_s18 + $0x22c0] sm:$0xff] }
 0x171   : > { %v18816_v11 = vcombine.low %v1432_v57, %v1440_v58 }
 0x172   : > { %12884 = vmatpush1.bf16.msra.mxu0 %v18704_v3  ;;  %13212 = vmatpush1.bf16.msra.mxu1 %v18706_v4  ;;  %v18817_v3 = vcombine.high %v1432_v57, %v1440_v58  ;;  %v18819_v4 = vcombine.high %v1433_v61, %v1441_v62  ;;  %v1537_v57 = vld [vmem:[%s21082_s18 + $0x25c8] sm:$0xff] }
 0x173   : > { %12885 = vmatprep.subr.bf16.mxu0 %v18721_v5  ;;  %13213 = vmatprep.subr.bf16.mxu1 %v18723_v30  ;;  %v1448_v5 = vld [vmem:[%s21082_s18 + $0x2300] sm:$0xff] }
 0x174   : > { %v1456_v30 = vld [vmem:[%s21082_s18 + $0x2340] sm:$0xff] }
 0x175   : > { %v18832_v19 = vcombine.low %v1448_v5, %v1456_v30 }
 0x176   : > { %12886 = vmatpush1.bf16.msra.mxu0 %v18720_v13  ;;  %13214 = vmatpush1.bf16.msra.mxu1 %v18722_v14  ;;  %v18833_v13 = vcombine.high %v1448_v5, %v1456_v30  ;;  %v18835_v14 = vcombine.high %v1449_v7, %v1457_v8  ;;  %v1553_v5 = vld [vmem:[%s21082_s18 + $0x2648] sm:$0xff] }
 0x177   : > { %12896 = vmatprep.subr.bf16.mxu0 %v18737_v15  ;;  %13224 = vmatprep.subr.bf16.mxu1 %v18739_v16  ;;  %v1464_v15 = vld [vmem:[%s21082_s18 + $0x2380] sm:$0xff] }
 0x178   : > { %v1472_v16 = vld [vmem:[%s21082_s18 + $0x23c0] sm:$0xff] }
 0x179   : > { %12888 = vmatmul.mubr.bf16.vlgmr.msra.gmra.mrb[0].mxu0 %v21433_v20  ;;  %13216 = vmatmul.mubr.bf16.vlgmr.msra.gmra.mrb[0].mxu1 %v21433_v20  ;;  %v18849_v22 = vcombine.high %v1464_v15, %v1472_v16  ;;  %v18848_v29 = vcombine.low %v1464_v15, %v1472_v16  ;;  %v1569_v15 = vld [vmem:[%s21082_s18 + $0x26c8] sm:$0xff] }
 0x17a   : > { %12897 = vmatpush1.bf16.msra.mxu0 %v18736_v23  ;;  %13225 = vmatpush1.bf16.msra.mxu1 %v18738_v25  ;;  %v18851_v23 = vcombine.high %v1465_v17, %v1473_v18  ;;  %v1480_v25 = vld [vmem:[%s21082_s18 + $0x2400] sm:$0xff] }
 0x17b   : > { %12898 = vmatprep.subr.bf16.mxu0 %v18753_v26  ;;  %13226 = vmatprep.subr.bf16.mxu1 %v18755_v27  ;;  %v1488_v26 = vld [vmem:[%s21082_s18 + $0x2440] sm:$0xff]  ;;  %v1481_v27 = vld [vmem:[%s21082_s18 + $0x2408] sm:$0xff] }
 0x17c   : > { %12928 = vmatprep.mubr.bf16.mxu0 %v21440_v60  ;;  %13256 = vmatprep.mubr.bf16.mxu1 %v21440_v60  ;;  %v18865_v32 = vcombine.high %v1480_v25, %v1488_v26  ;;  %v18864_v38 = vcombine.low %v1480_v25, %v1488_v26  ;;  %v18866_v40 = vcombine.low %v1481_v27, %v1489_v28  ;;  %v1585_v25 = vld [vmem:[%s21082_s18 + $0x2748] sm:$0xff] }
 0x17e   : > { %12899 = vmatpush1.bf16.msra.mxu0 %v18752_v0  ;;  %13227 = vmatpush1.bf16.msra.mxu1 %v18754_v34  ;;  %v18867_v0 = vcombine.high %v1481_v27, %v1489_v28  ;;  %v1496_v34 = vld [vmem:[%s21082_s18 + $0x2480] sm:$0xff] }
 0x17f   : > { %12900 = vmatprep.subr.bf16.mxu0 %v18769_v35  ;;  %13228 = vmatprep.subr.bf16.mxu1 %v18771_v36  ;;  %v1504_v35 = vld [vmem:[%s21082_s18 + $0x24c0] sm:$0xff]  ;;  %v1497_v36 = vld [vmem:[%s21082_s18 + $0x2488] sm:$0xff] }
 0x180   : > { %v18881_v41 = vcombine.high %v1496_v34, %v1504_v35  ;;  %v18880_v48 = vcombine.low %v1496_v34, %v1504_v35  ;;  %v18882_v50 = vcombine.low %v1497_v36, %v1505_v37  ;;  %v1601_v34 = vld [vmem:[%s21082_s18 + $0x27c8] sm:$0xff] }
 0x182   : > { %12901 = vmatpush1.bf16.msra.mxu0 %v18768_v42  ;;  %13229 = vmatpush1.bf16.msra.mxu1 %v18770_v43  ;;  %v18883_v42 = vcombine.high %v1497_v36, %v1505_v37  ;;  %v1512_v43 = vld [vmem:[%s21082_s18 + $0x2500] sm:$0xff] }
 0x183   : > { %12902 = vmatprep.subr.bf16.mxu0 %v18785_v44  ;;  %13230 = vmatprep.subr.bf16.mxu1 %v18787_v46  ;;  %v1520_v44 = vld [vmem:[%s21082_s18 + $0x2540] sm:$0xff]  ;;  %v1513_v46 = vld [vmem:[%s21082_s18 + $0x2508] sm:$0xff] }
 0x184   : > { %v18897_v51 = vcombine.high %v1512_v43, %v1520_v44  ;;  %v18896_v58 = vcombine.low %v1512_v43, %v1520_v44  ;;  %v18898_v61 = vcombine.low %v1513_v46, %v1521_v47  ;;  %v1617_v43 = vld [vmem:[%s21082_s18 + $0x2848] sm:$0xff] }
 0x186   : > { %12903 = vmatpush1.bf16.msra.mxu0 %v18784_v52  ;;  %13231 = vmatpush1.bf16.msra.mxu1 %v18786_v53  ;;  %v18899_v52 = vcombine.high %v1513_v46, %v1521_v47  ;;  %v1528_v53 = vld [vmem:[%s21082_s18 + $0x2580] sm:$0xff] }
 0x187   : > { %12904 = vmatprep.subr.bf16.mxu0 %v18801_v55  ;;  %13232 = vmatprep.subr.bf16.mxu1 %v18803_v56  ;;  %v1536_v55 = vld [vmem:[%s21082_s18 + $0x25c0] sm:$0xff]  ;;  %v1529_v56 = vld [vmem:[%s21082_s18 + $0x2588] sm:$0xff] }
 0x188   : > { %v18913_v62 = vcombine.high %v1528_v53, %v1536_v55  ;;  %v18912_v30 = vcombine.low %v1528_v53, %v1536_v55  ;;  %v18914_v7 = vcombine.low %v1529_v56, %v1537_v57  ;;  %v1625_v53 = vld [vmem:[%s21082_s18 + $0x2888] sm:$0xff] }
 0x189   : > { %v1633_v55 = vld [vmem:[%s21082_s18 + $0x28c8] sm:$0xff] }
 0x18a   : > { %12905 = vmatpush1.bf16.msra.mxu0 %v18800_v63  ;;  %13233 = vmatpush1.bf16.msra.mxu1 %v18802_v1  ;;  %v18915_v63 = vcombine.high %v1529_v56, %v1537_v57  ;;  %v1544_v1 = vld [vmem:[%s21082_s18 + $0x2600] sm:$0xff] }
 0x18b   : > { %12906 = vmatprep.subr.bf16.mxu0 %v18817_v3  ;;  %13234 = vmatprep.subr.bf16.mxu1 %v18819_v4  ;;  %v1552_v3 = vld [vmem:[%s21082_s18 + $0x2640] sm:$0xff]  ;;  %v1545_v4 = vld [vmem:[%s21082_s18 + $0x2608] sm:$0xff] }
 0x18c   : > { %v18929_v8 = vcombine.high %v1544_v1, %v1552_v3  ;;  %v18928_v16 = vcombine.low %v1544_v1, %v1552_v3  ;;  %v18930_v17 = vcombine.low %v1545_v4, %v1553_v5  ;;  %v21516_v1 = vcombine.high %v21440_v60, %v21440_v60  ;;  %v1649_v3 = vld [vmem:[%s21082_s18 + $0x2948] sm:$0xff] }
 0x18e   : > { %12907 = vmatpush1.bf16.msra.mxu0 %v18816_v11  ;;  %13235 = vmatpush1.bf16.msra.mxu1 %v18818_v12  ;;  %v18931_v11 = vcombine.high %v1545_v4, %v1553_v5  ;;  %v1560_v12 = vld [vmem:[%s21082_s18 + $0x2680] sm:$0xff]  ;;  %v19010_v5 = vcombine.low %v1625_v53, %v1633_v55 }
 0x18f   : > { %12908 = vmatprep.subr.bf16.mxu0 %v18833_v13  ;;  %13236 = vmatprep.subr.bf16.mxu1 %v18835_v14  ;;  %v1568_v13 = vld [vmem:[%s21082_s18 + $0x26c0] sm:$0xff]  ;;  %v1561_v14 = vld [vmem:[%s21082_s18 + $0x2688] sm:$0xff] }
 0x190   : > { %v18945_v18 = vcombine.high %v1560_v12, %v1568_v13  ;;  %v18944_v26 = vcombine.low %v1560_v12, %v1568_v13  ;;  %v18946_v27 = vcombine.low %v1561_v14, %v1569_v15  ;;  %v1657_v12 = vld [vmem:[%s21082_s18 + $0x2988] sm:$0xff] }
 0x191   : > { %v1665_v13 = vld [vmem:[%s21082_s18 + $0x29c8] sm:$0xff] }
 0x192   : > { %12909 = vmatpush1.bf16.msra.mxu0 %v18832_v19  ;;  %13237 = vmatpush1.bf16.msra.mxu1 %v18834_v21  ;;  %v18947_v19 = vcombine.high %v1561_v14, %v1569_v15  ;;  %v1576_v21 = vld [vmem:[%s21082_s18 + $0x2700] sm:$0xff] }
 0x193   : > { %12910 = vmatprep.subr.bf16.mxu0 %v18849_v22  ;;  %13238 = vmatprep.subr.bf16.mxu1 %v18851_v23  ;;  %v1584_v22 = vld [vmem:[%s21082_s18 + $0x2740] sm:$0xff]  ;;  %v1577_v23 = vld [vmem:[%s21082_s18 + $0x2708] sm:$0xff] }
 0x194   : > { %v18961_v28 = vcombine.high %v1576_v21, %v1584_v22  ;;  %v18960_v35 = vcombine.low %v1576_v21, %v1584_v22  ;;  %v18962_v36 = vcombine.low %v1577_v23, %v1585_v25  ;;  %v1673_v21 = vld [vmem:[%s21082_s18 + $0x2a08] sm:$0xff] }
 0x195   : > { %v1681_v22 = vld [vmem:[%s21082_s18 + $0x2a48] sm:$0xff] }
 0x196   : > { %12911 = vmatpush1.bf16.msra.mxu0 %v18848_v29  ;;  %13239 = vmatpush1.bf16.msra.mxu1 %v18850_v31  ;;  %v18963_v29 = vcombine.high %v1577_v23, %v1585_v25  ;;  %v1592_v31 = vld [vmem:[%s21082_s18 + $0x2780] sm:$0xff]  ;;  %v19042_v25 = vcombine.low %v1657_v12, %v1665_v13 }
 0x197   : > { %12912 = vmatprep.subr.bf16.mxu0 %v18865_v32  ;;  %13240 = vmatprep.subr.bf16.mxu1 %v18867_v0  ;;  %v1600_v32 = vld [vmem:[%s21082_s18 + $0x27c0] sm:$0xff]  ;;  %v1593_v0 = vld [vmem:[%s21082_s18 + $0x2788] sm:$0xff] }
 0x198   : > { %v18977_v37 = vcombine.high %v1592_v31, %v1600_v32  ;;  %v18976_v44 = vcombine.low %v1592_v31, %v1600_v32  ;;  %v18978_v46 = vcombine.low %v1593_v0, %v1601_v34  ;;  %v1689_v31 = vld [vmem:[%s21082_s18 + $0x2a88] sm:$0xff] }
 0x199   : > { %v1697_v32 = vld [vmem:[%s21082_s18 + $0x2ac8] sm:$0xff] }
 0x19a   : > { %12913 = vmatpush1.bf16.msra.mxu0 %v18864_v38  ;;  %13241 = vmatpush1.bf16.msra.mxu1 %v18866_v40  ;;  %v18979_v38 = vcombine.high %v1593_v0, %v1601_v34  ;;  %v1608_v40 = vld [vmem:[%s21082_s18 + $0x2800] sm:$0xff]  ;;  %v19058_v34 = vcombine.low %v1673_v21, %v1681_v22 }
 0x19b   : > { %12914 = vmatprep.subr.bf16.mxu0 %v18881_v41  ;;  %13242 = vmatprep.subr.bf16.mxu1 %v18883_v42  ;;  %v1616_v41 = vld [vmem:[%s21082_s18 + $0x2840] sm:$0xff]  ;;  %v1609_v42 = vld [vmem:[%s21082_s18 + $0x2808] sm:$0xff] }
 0x19c   : > { %v18993_v47 = vcombine.high %v1608_v40, %v1616_v41  ;;  %v18992_v56 = vcombine.low %v1608_v40, %v1616_v41  ;;  %v18994_v57 = vcombine.low %v1609_v42, %v1617_v43  ;;  %v1705_v40 = vld [vmem:[%s21082_s18 + $0x2b08] sm:$0xff] }
 0x19d   : > { %v1713_v41 = vld [vmem:[%s21082_s18 + $0x2b48] sm:$0xff] }
 0x19e   : > { %12915 = vmatpush1.bf16.msra.mxu0 %v18880_v48  ;;  %13243 = vmatpush1.bf16.msra.mxu1 %v18882_v50  ;;  %v18995_v48 = vcombine.high %v1609_v42, %v1617_v43  ;;  %v1624_v50 = vld [vmem:[%s21082_s18 + $0x2880] sm:$0xff]  ;;  %v19074_v43 = vcombine.low %v1689_v31, %v1697_v32 }
 0x19f   : > { %12916 = vmatprep.subr.bf16.mxu0 %v18897_v51  ;;  %13244 = vmatprep.subr.bf16.mxu1 %v18899_v52  ;;  %v1632_v51 = vld [vmem:[%s21082_s18 + $0x28c0] sm:$0xff]  ;;  %v21508_v52 = vrot.slane %v21423_v9, %v21128_v54  ;;  %v1641_v9 = vld [vmem:[%s21082_s18 + $0x2908] sm:$0xff] }
 0x1a0   : > { %v19008_v4 = vcombine.low %v1624_v50, %v1632_v51  ;;  %v19026_v15 = vcombine.low %v1641_v9, %v1649_v3 }
 0x1a2   : > { %12917 = vmatpush1.bf16.msra.mxu0 %v18896_v58  ;;  %13245 = vmatpush1.bf16.msra.mxu1 %v18898_v61  ;;  %v19009_v58 = vcombine.high %v1624_v50, %v1632_v51  ;;  %v19011_v61 = vcombine.high %v1625_v53, %v1633_v55  ;;  %v1721_v50 = vld [vmem:[%s21082_s18 + $0x2b88] sm:$0xff]  ;;  %v19090_v55 = vcombine.low %v1705_v40, %v1713_v41 }
 0x1a3   : > { %12918 = vmatprep.subr.bf16.mxu0 %v18913_v62  ;;  %13246 = vmatprep.subr.bf16.mxu1 %v18915_v63  ;;  %v1640_v62 = vld [vmem:[%s21082_s18 + $0x2900] sm:$0xff]  ;;  %v1729_v51 = vld [vmem:[%s21082_s18 + $0x2bc8] sm:$0xff] }
 0x1a4   : > { %v1648_v63 = vld [vmem:[%s21082_s18 + $0x2940] sm:$0xff] }
 0x1a5   : > { %v19024_v14 = vcombine.low %v1640_v62, %v1648_v63 }
 0x1a6   : > { %12919 = vmatpush1.bf16.msra.mxu0 %v18912_v30  ;;  %13247 = vmatpush1.bf16.msra.mxu1 %v18914_v7  ;;  %v19025_v30 = vcombine.high %v1640_v62, %v1648_v63  ;;  %v19027_v7 = vcombine.high %v1641_v9, %v1649_v3  ;;  %v1737_v62 = vld [vmem:[%s21082_s18 + $0x2c08] sm:$0xff]  ;;  %v19106_v3 = vcombine.low %v1721_v50, %v1729_v51 }
 0x1a7   : > { %12920 = vmatprep.subr.bf16.mxu0 %v18929_v8  ;;  %13248 = vmatprep.subr.bf16.mxu1 %v18931_v11  ;;  %v1656_v8 = vld [vmem:[%s21082_s18 + $0x2980] sm:$0xff]  ;;  %v1745_v63 = vld [vmem:[%s21082_s18 + $0x2c48] sm:$0xff] }
 0x1a8   : > { %v1664_v11 = vld [vmem:[%s21082_s18 + $0x29c0] sm:$0xff] }
 0x1a9   : > { %v19040_v23 = vcombine.low %v1656_v8, %v1664_v11 }
 0x1aa   : > { %12921 = vmatpush1.bf16.msra.mxu0 %v18928_v16  ;;  %13249 = vmatpush1.bf16.msra.mxu1 %v18930_v17  ;;  %v19041_v16 = vcombine.high %v1656_v8, %v1664_v11  ;;  %v19043_v17 = vcombine.high %v1657_v12, %v1665_v13  ;;  %v1753_v8 = vld [vmem:[%s21082_s18 + $0x2c88] sm:$0xff]  ;;  %v19122_v13 = vcombine.low %v1737_v62, %v1745_v63 }
 0x1ab   : > { %12922 = vmatprep.subr.bf16.mxu0 %v18945_v18  ;;  %13250 = vmatprep.subr.bf16.mxu1 %v18947_v19  ;;  %v1672_v18 = vld [vmem:[%s21082_s18 + $0x2a00] sm:$0xff]  ;;  %v1761_v11 = vld [vmem:[%s21082_s18 + $0x2cc8] sm:$0xff] }
 0x1ac   : > { %v1680_v19 = vld [vmem:[%s21082_s18 + $0x2a40] sm:$0xff] }
 0x1ad   : > { %v19056_v0 = vcombine.low %v1672_v18, %v1680_v19 }
 0x1ae   : > { %12923 = vmatpush1.bf16.msra.mxu0 %v18944_v26  ;;  %13251 = vmatpush1.bf16.msra.mxu1 %v18946_v27  ;;  %v19057_v26 = vcombine.high %v1672_v18, %v1680_v19  ;;  %v19059_v27 = vcombine.high %v1673_v21, %v1681_v22  ;;  %v1769_v18 = vld [vmem:[%s21082_s18 + $0x2d08] sm:$0xff]  ;;  %v19138_v22 = vcombine.low %v1753_v8, %v1761_v11 }
 0x1af   : > { %12924 = vmatprep.subr.bf16.mxu0 %v18961_v28  ;;  %13252 = vmatprep.subr.bf16.mxu1 %v18963_v29  ;;  %v1688_v28 = vld [vmem:[%s21082_s18 + $0x2a80] sm:$0xff]  ;;  %v1777_v19 = vld [vmem:[%s21082_s18 + $0x2d48] sm:$0xff] }
 0x1b0   : > { %v1696_v29 = vld [vmem:[%s21082_s18 + $0x2ac0] sm:$0xff] }
 0x1b1   : > { %v19072_v42 = vcombine.low %v1688_v28, %v1696_v29 }
 0x1b2   : > { %12925 = vmatpush1.bf16.msra.mxu0 %v18960_v35  ;;  %13253 = vmatpush1.bf16.msra.mxu1 %v18962_v36  ;;  %v19073_v35 = vcombine.high %v1688_v28, %v1696_v29  ;;  %v19075_v36 = vcombine.high %v1689_v31, %v1697_v32  ;;  %v1785_v28 = vld [vmem:[%s21082_s18 + $0x2d88] sm:$0xff]  ;;  %v19154_v32 = vcombine.low %v1769_v18, %v1777_v19 }
 0x1b3   : > { %12926 = vmatprep.subr.bf16.mxu0 %v18977_v37  ;;  %13254 = vmatprep.subr.bf16.mxu1 %v18979_v38  ;;  %v1704_v37 = vld [vmem:[%s21082_s18 + $0x2b00] sm:$0xff]  ;;  %v1793_v29 = vld [vmem:[%s21082_s18 + $0x2dc8] sm:$0xff] }
 0x1b4   : > { %v1712_v38 = vld [vmem:[%s21082_s18 + $0x2b40] sm:$0xff] }
 0x1b5   : > { %v19088_v53 = vcombine.low %v1704_v37, %v1712_v38 }
 0x1b6   : > { %12927 = vmatpush1.bf16.msra.mxu0 %v18976_v44  ;;  %13255 = vmatpush1.bf16.msra.mxu1 %v18978_v46  ;;  %v19089_v44 = vcombine.high %v1704_v37, %v1712_v38  ;;  %v19091_v46 = vcombine.high %v1705_v40, %v1713_v41  ;;  %v1801_v37 = vld [vmem:[%s21082_s18 + $0x2e08] sm:$0xff]  ;;  %v19170_v41 = vcombine.low %v1785_v28, %v1793_v29 }
 0x1b7   : > { %12937 = vmatprep.subr.bf16.mxu0 %v18993_v47  ;;  %13265 = vmatprep.subr.bf16.mxu1 %v18995_v48  ;;  %v1720_v47 = vld [vmem:[%s21082_s18 + $0x2b80] sm:$0xff]  ;;  %v1809_v38 = vld [vmem:[%s21082_s18 + $0x2e48] sm:$0xff] }
 0x1b8   : > { %v1728_v48 = vld [vmem:[%s21082_s18 + $0x2bc0] sm:$0xff] }
 0x1b9   : > { %12929 = vmatmul.mubr.bf16.vlgmr.msra.gmra.mrb[0].mxu0 %v21508_v52  ;;  %13257 = vmatmul.mubr.bf16.vlgmr.msra.gmra.mrb[0].mxu1 %v21508_v52  ;;  %v19104_v9 = vcombine.low %v1720_v47, %v1728_v48 }
 0x1ba   : > { %12938 = vmatpush1.bf16.msra.mxu0 %v18992_v56  ;;  %13266 = vmatpush1.bf16.msra.mxu1 %v18994_v57  ;;  %v19105_v56 = vcombine.high %v1720_v47, %v1728_v48  ;;  %v19107_v57 = vcombine.high %v1721_v50, %v1729_v51  ;;  %v1817_v47 = vld [vmem:[%s21082_s18 + $0x2e88] sm:$0xff]  ;;  %v19186_v51 = vcombine.low %v1801_v37, %v1809_v38 }
 0x1bb   : > { %12939 = vmatprep.subr.bf16.mxu0 %v19009_v58  ;;  %13267 = vmatprep.subr.bf16.mxu1 %v19011_v61  ;;  %v1736_v58 = vld [vmem:[%s21082_s18 + $0x2c00] sm:$0xff]  ;;  %v1825_v48 = vld [vmem:[%s21082_s18 + $0x2ec8] sm:$0xff] }
 0x1bc   : > { %12969 = vmatprep.mubr.bf16.mxu0 %v21516_v1  ;;  %13297 = vmatprep.mubr.bf16.mxu1 %v21516_v1  ;;  %v1744_v61 = vld [vmem:[%s21082_s18 + $0x2c40] sm:$0xff] }
 0x1bd   : > { %v19120_v12 = vcombine.low %v1736_v58, %v1744_v61 }
 0x1be   : > { %12940 = vmatpush1.bf16.msra.mxu0 %v19008_v4  ;;  %13268 = vmatpush1.bf16.msra.mxu1 %v19010_v5  ;;  %v19121_v4 = vcombine.high %v1736_v58, %v1744_v61  ;;  %v19123_v5 = vcombine.high %v1737_v62, %v1745_v63  ;;  %v1833_v58 = vld [vmem:[%s21082_s18 + $0x2f08] sm:$0xff]  ;;  %v19202_v63 = vcombine.low %v1817_v47, %v1825_v48 }
 0x1bf   : > { %12941 = vmatprep.subr.bf16.mxu0 %v19025_v30  ;;  %13269 = vmatprep.subr.bf16.mxu1 %v19027_v7  ;;  %v1752_v30 = vld [vmem:[%s21082_s18 + $0x2c80] sm:$0xff]  ;;  %v1841_v61 = vld [vmem:[%s21082_s18 + $0x2f48] sm:$0xff] }
 0x1c0   : > { %v1760_v7 = vld [vmem:[%s21082_s18 + $0x2cc0] sm:$0xff] }
 0x1c1   : > { %v19136_v21 = vcombine.low %v1752_v30, %v1760_v7 }
 0x1c2   : > { %12942 = vmatpush1.bf16.msra.mxu0 %v19024_v14  ;;  %13270 = vmatpush1.bf16.msra.mxu1 %v19026_v15  ;;  %v19137_v14 = vcombine.high %v1752_v30, %v1760_v7  ;;  %v19139_v15 = vcombine.high %v1753_v8, %v1761_v11  ;;  %v2427_v30 = vcombine.high %v21417_v2, %v21417_v2  ;;  %v1849_v7 = vld [vmem:[%s21082_s18 + $0x2f88] sm:$0xff] }
 0x1c3   : > { %12943 = vmatprep.subr.bf16.mxu0 %v19041_v16  ;;  %13271 = vmatprep.subr.bf16.mxu1 %v19043_v17  ;;  %v1768_v16 = vld [vmem:[%s21082_s18 + $0x2d00] sm:$0xff]  ;;  %v1857_v8 = vld [vmem:[%s21082_s18 + $0x2fc8] sm:$0xff] }
 0x1c4   : > { %v1776_v17 = vld [vmem:[%s21082_s18 + $0x2d40] sm:$0xff]  ;;  %v1865_v2 = vld [vmem:[%s21082_s18 + $0x3008] sm:$0xff] }
 0x1c5   : > { %v19152_v31 = vcombine.low %v1768_v16, %v1776_v17 }
 0x1c6   : > { %12944 = vmatpush1.bf16.msra.mxu0 %v19040_v23  ;;  %13272 = vmatpush1.bf16.msra.mxu1 %v19042_v25  ;;  %v19153_v23 = vcombine.high %v1768_v16, %v1776_v17  ;;  %v19155_v25 = vcombine.high %v1769_v18, %v1777_v19  ;;  %v1872_v16 = vld [vmem:[%s21082_s18 + $0x3040] sm:$0xff]  ;;  %v21581_v17 = vrot.slane %v2427_v30, %v21128_v54  ;;  %v1873_v18 = vld [vmem:[%s21082_s18 + $0x3048] sm:$0xff] }
 0x1c7   : > { %12945 = vmatprep.subr.bf16.mxu0 %v19057_v26  ;;  %13273 = vmatprep.subr.bf16.mxu1 %v19059_v27  ;;  %v1784_v26 = vld [vmem:[%s21082_s18 + $0x2d80] sm:$0xff] }
 0x1c8   : > { %v1792_v27 = vld [vmem:[%s21082_s18 + $0x2dc0] sm:$0xff] }
 0x1c9   : > { %v19168_v40 = vcombine.low %v1784_v26, %v1792_v27  ;;  %v1944_v30 = vld [vmem:[%s21082_s18 + $0x3280] sm:$0xff] }
 0x1ca   : > { %12946 = vmatpush1.bf16.msra.mxu0 %v19056_v0  ;;  %13274 = vmatpush1.bf16.msra.mxu1 %v19058_v34  ;;  %v19169_v0 = vcombine.high %v1784_v26, %v1792_v27  ;;  %v19171_v34 = vcombine.high %v1785_v28, %v1793_v29  ;;  %v1888_v26 = vld [vmem:[%s21082_s18 + $0x30c0] sm:$0xff]  ;;  %v2443_v27 = vcombine.high %v21581_v17, %v21581_v17  ;;  %v1881_v29 = vld [vmem:[%s21082_s18 + $0x3088] sm:$0xff] }
 0x1cb   : > { %12947 = vmatprep.subr.bf16.mxu0 %v19073_v35  ;;  %13275 = vmatprep.subr.bf16.mxu1 %v19075_v36  ;;  %v1800_v35 = vld [vmem:[%s21082_s18 + $0x2e00] sm:$0xff]  ;;  %v21591_v28 = vcombine.high %v21508_v52, %v21508_v52 }
 0x1cc   : > { %v1808_v36 = vld [vmem:[%s21082_s18 + $0x2e40] sm:$0xff] }
 0x1cd   : > { %v19184_v50 = vcombine.low %v1800_v35, %v1808_v36 }
 0x1ce   : > { %12948 = vmatpush1.bf16.msra.mxu0 %v19072_v42  ;;  %13276 = vmatpush1.bf16.msra.mxu1 %v19074_v43  ;;  %v19185_v42 = vcombine.high %v1800_v35, %v1808_v36  ;;  %v19187_v43 = vcombine.high %v1801_v37, %v1809_v38  ;;  %v1896_v36 = vld [vmem:[%s21082_s18 + $0x3100] sm:$0xff]  ;;  %v21598_v38 = vrot.slane %v2443_v27, %v21128_v54 }
 0x1cf   : > { %12949 = vmatprep.subr.bf16.mxu0 %v19089_v44  ;;  %13277 = vmatprep.subr.bf16.mxu1 %v19091_v46  ;;  %v1816_v44 = vld [vmem:[%s21082_s18 + $0x2e80] sm:$0xff] }
 0x1d0   : > { %v1824_v46 = vld [vmem:[%s21082_s18 + $0x2ec0] sm:$0xff] }
 0x1d1   : > { %v19200_v62 = vcombine.low %v1816_v44, %v1824_v46  ;;  %v1904_v37 = vld [vmem:[%s21082_s18 + $0x3140] sm:$0xff] }
 0x1d2   : > { %12950 = vmatpush1.bf16.msra.mxu0 %v19088_v53  ;;  %13278 = vmatpush1.bf16.msra.mxu1 %v19090_v55  ;;  %v19201_v53 = vcombine.high %v1816_v44, %v1824_v46  ;;  %v19203_v55 = vcombine.high %v1817_v47, %v1825_v48  ;;  %v19281_v44 = vcombine.high %v1896_v36, %v1904_v37  ;;  %v1912_v47 = vld [vmem:[%s21082_s18 + $0x3180] sm:$0xff] }
 0x1d3   : > { %12951 = vmatprep.subr.bf16.mxu0 %v19105_v56  ;;  %13279 = vmatprep.subr.bf16.mxu1 %v19107_v57  ;;  %v1832_v56 = vld [vmem:[%s21082_s18 + $0x2f00] sm:$0xff] }
 0x1d4   : > { %v1840_v57 = vld [vmem:[%s21082_s18 + $0x2f40] sm:$0xff] }
 0x1d5   : > { %v19216_v11 = vcombine.low %v1832_v56, %v1840_v57  ;;  %v1920_v48 = vld [vmem:[%s21082_s18 + $0x31c0] sm:$0xff] }
 0x1d6   : > { %12952 = vmatpush1.bf16.msra.mxu0 %v19104_v9  ;;  %13280 = vmatpush1.bf16.msra.mxu1 %v19106_v3  ;;  %v19217_v9 = vcombine.high %v1832_v56, %v1840_v57  ;;  %v19219_v3 = vcombine.high %v1833_v58, %v1841_v61  ;;  %v19297_v56 = vcombine.high %v1912_v47, %v1920_v48  ;;  %v1984_v27 = vld [vmem:[%s21082_s18 + $0x33c0] sm:$0xff] }
 0x1d7   : > { %12953 = vmatprep.subr.bf16.mxu0 %v19121_v4  ;;  %13281 = vmatprep.subr.bf16.mxu1 %v19123_v5  ;;  %v1848_v4 = vld [vmem:[%s21082_s18 + $0x2f80] sm:$0xff] }
 0x1d8   : > { %v1856_v5 = vld [vmem:[%s21082_s18 + $0x2fc0] sm:$0xff] }
 0x1d9   : > { %v19232_v19 = vcombine.low %v1848_v4, %v1856_v5 }
 0x1da   : > { %12954 = vmatpush1.bf16.msra.mxu0 %v19120_v12  ;;  %13282 = vmatpush1.bf16.msra.mxu1 %v19122_v13  ;;  %v19218_v12 = vcombine.low %v1833_v58, %v1841_v61  ;;  %v19233_v13 = vcombine.high %v1848_v4, %v1856_v5  ;;  %v1928_v58 = vld [vmem:[%s21082_s18 + $0x3200] sm:$0xff] }
 0x1db   : > { %12955 = vmatprep.subr.bf16.mxu0 %v19137_v14  ;;  %13283 = vmatprep.subr.bf16.mxu1 %v19139_v15  ;;  %v19235_v14 = vcombine.high %v1849_v7, %v1857_v8  ;;  %v1864_v15 = vld [vmem:[%s21082_s18 + $0x3000] sm:$0xff] }
 0x1dc   : > { %v1936_v61 = vld [vmem:[%s21082_s18 + $0x3240] sm:$0xff] }
 0x1dd   : > { %v19313_v4 = vcombine.high %v1928_v58, %v1936_v61 }
 0x1de   : > { %12956 = vmatpush1.bf16.msra.mxu0 %v19136_v21  ;;  %13284 = vmatpush1.bf16.msra.mxu1 %v19138_v22  ;;  %v19234_v21 = vcombine.low %v1849_v7, %v1857_v8  ;;  %v19249_v22 = vcombine.high %v1864_v15, %v1872_v16  ;;  %v1952_v7 = vld [vmem:[%s21082_s18 + $0x32c0] sm:$0xff]  ;;  %v1945_v8 = vld [vmem:[%s21082_s18 + $0x3288] sm:$0xff] }
 0x1df   : > { %12957 = vmatprep.subr.bf16.mxu0 %v19153_v23  ;;  %13285 = vmatprep.subr.bf16.mxu1 %v19155_v25  ;;  %v19251_v23 = vcombine.high %v1865_v2, %v1873_v18  ;;  %v1880_v25 = vld [vmem:[%s21082_s18 + $0x3080] sm:$0xff] }
 0x1e2   : > { %12958 = vmatpush1.bf16.msra.mxu0 %v19152_v31  ;;  %13286 = vmatpush1.bf16.msra.mxu1 %v19154_v32  ;;  %v1889_v31 = vld [vmem:[%s21082_s18 + $0x30c8] sm:$0xff]  ;;  %v19248_v32 = vcombine.low %v1864_v15, %v1872_v16  ;;  %v1960_v16 = vld [vmem:[%s21082_s18 + $0x3300] sm:$0xff] }
 0x1e3   : > { %12959 = vmatprep.subr.bf16.mxu0 %v19169_v0  ;;  %13287 = vmatprep.subr.bf16.mxu1 %v19171_v34  ;;  %v19250_v0 = vcombine.low %v1865_v2, %v1873_v18  ;;  %v19265_v34 = vcombine.high %v1880_v25, %v1888_v26  ;;  %v19267_v35 = vcombine.high %v1881_v29, %v1889_v31  ;;  %v1968_v2 = vld [vmem:[%s21082_s18 + $0x3340] sm:$0xff]  ;;  %v1961_v18 = vld [vmem:[%s21082_s18 + $0x3308] sm:$0xff] }
 0x1e6   : > { %12960 = vmatpush1.bf16.msra.mxu0 %v19168_v40  ;;  %13288 = vmatpush1.bf16.msra.mxu1 %v19170_v41  ;;  %v1897_v40 = vld [vmem:[%s21082_s18 + $0x3108] sm:$0xff] }
 0x1e7   : > { %12961 = vmatprep.subr.bf16.mxu0 %v19185_v42  ;;  %13289 = vmatprep.subr.bf16.mxu1 %v19187_v43  ;;  %v1905_v41 = vld [vmem:[%s21082_s18 + $0x3148] sm:$0xff]  ;;  %v19264_v42 = vcombine.low %v1880_v25, %v1888_v26  ;;  %v19266_v43 = vcombine.low %v1881_v29, %v1889_v31  ;;  %v1976_v26 = vld [vmem:[%s21082_s18 + $0x3380] sm:$0xff] }
 0x1e8   : > { %v19283_v46 = vcombine.high %v1897_v40, %v1905_v41  ;;  %v1977_v29 = vld [vmem:[%s21082_s18 + $0x3388] sm:$0xff] }
 0x1e9   : > { %v1985_v31 = vld [vmem:[%s21082_s18 + $0x33c8] sm:$0xff] }
 0x1ea   : > { %12962 = vmatpush1.bf16.msra.mxu0 %v19184_v50  ;;  %13290 = vmatpush1.bf16.msra.mxu1 %v19186_v51  ;;  %v1913_v50 = vld [vmem:[%s21082_s18 + $0x3188] sm:$0xff] }
 0x1eb   : > { %12963 = vmatprep.subr.bf16.mxu0 %v19201_v53  ;;  %13291 = vmatprep.subr.bf16.mxu1 %v19203_v55  ;;  %v1921_v51 = vld [vmem:[%s21082_s18 + $0x31c8] sm:$0xff]  ;;  %v19280_v53 = vcombine.low %v1896_v36, %v1904_v37  ;;  %v19282_v55 = vcombine.low %v1897_v40, %v1905_v41  ;;  %v1992_v36 = vld [vmem:[%s21082_s18 + $0x3400] sm:$0xff] }
 0x1ec   : > { %v19299_v57 = vcombine.high %v1913_v50, %v1921_v51  ;;  %v2000_v37 = vld [vmem:[%s21082_s18 + $0x3440] sm:$0xff]  ;;  %v1993_v40 = vld [vmem:[%s21082_s18 + $0x3408] sm:$0xff] }
 0x1ed   : > { %v2001_v41 = vld [vmem:[%s21082_s18 + $0x3448] sm:$0xff] }
 0x1ee   : > { %12964 = vmatpush1.bf16.msra.mxu0 %v19200_v62  ;;  %13292 = vmatpush1.bf16.msra.mxu1 %v19202_v63  ;;  %v1929_v62 = vld [vmem:[%s21082_s18 + $0x3208] sm:$0xff] }
 0x1ef   : > { %12965 = vmatprep.subr.bf16.mxu0 %v19217_v9  ;;  %13293 = vmatprep.subr.bf16.mxu1 %v19219_v3  ;;  %v1937_v63 = vld [vmem:[%s21082_s18 + $0x3248] sm:$0xff]  ;;  %v19296_v9 = vcombine.low %v1912_v47, %v1920_v48  ;;  %v19298_v3 = vcombine.low %v1913_v50, %v1921_v51  ;;  %v2008_v47 = vld [vmem:[%s21082_s18 + $0x3480] sm:$0xff] }
 0x1f0   : > { %v19315_v5 = vcombine.high %v1929_v62, %v1937_v63  ;;  %v2016_v48 = vld [vmem:[%s21082_s18 + $0x34c0] sm:$0xff]  ;;  %v2009_v50 = vld [vmem:[%s21082_s18 + $0x3488] sm:$0xff] }
 0x1f1   : > { %v2017_v51 = vld [vmem:[%s21082_s18 + $0x34c8] sm:$0xff] }
 0x1f2   : > { %12966 = vmatpush1.bf16.msra.mxu0 %v19216_v11  ;;  %13294 = vmatpush1.bf16.msra.mxu1 %v19218_v12  ;;  %v1953_v11 = vld [vmem:[%s21082_s18 + $0x32c8] sm:$0xff]  ;;  %v19312_v12 = vcombine.low %v1928_v58, %v1936_v61  ;;  %v2024_v58 = vld [vmem:[%s21082_s18 + $0x3500] sm:$0xff] }
 0x1f3   : > { %12967 = vmatprep.subr.bf16.mxu0 %v19233_v13  ;;  %13295 = vmatprep.subr.bf16.mxu1 %v19235_v14  ;;  %v19314_v13 = vcombine.low %v1929_v62, %v1937_v63  ;;  %v19329_v14 = vcombine.high %v1944_v30, %v1952_v7  ;;  %v19331_v15 = vcombine.high %v1945_v8, %v1953_v11  ;;  %v2032_v61 = vld [vmem:[%s21082_s18 + $0x3540] sm:$0xff]  ;;  %v2025_v62 = vld [vmem:[%s21082_s18 + $0x3508] sm:$0xff] }
 0x1f4   : > { %v2033_v63 = vld [vmem:[%s21082_s18 + $0x3548] sm:$0xff] }
 0x1f6   : > { %12968 = vmatpush1.bf16.msra.mxu0 %v19232_v19  ;;  %13296 = vmatpush1.bf16.msra.mxu1 %v19234_v21  ;;  %v1969_v19 = vld [vmem:[%s21082_s18 + $0x3348] sm:$0xff]  ;;  %v19328_v21 = vcombine.low %v1944_v30, %v1952_v7  ;;  %v2040_v30 = vld [vmem:[%s21082_s18 + $0x3580] sm:$0xff] }
 0x1f7   : > { %12978 = vmatprep.subr.bf16.mxu0 %v19249_v22  ;;  %13306 = vmatprep.subr.bf16.mxu1 %v19251_v23  ;;  %v19330_v22 = vcombine.low %v1945_v8, %v1953_v11  ;;  %v19345_v23 = vcombine.high %v1960_v16, %v1968_v2  ;;  %v19347_v25 = vcombine.high %v1961_v18, %v1969_v19  ;;  %v2048_v7 = vld [vmem:[%s21082_s18 + $0x35c0] sm:$0xff]  ;;  %v2041_v8 = vld [vmem:[%s21082_s18 + $0x3588] sm:$0xff] }
 0x1f8   : > { %v2049_v11 = vld [vmem:[%s21082_s18 + $0x35c8] sm:$0xff] }
 0x1f9   : > { %12970 = vmatmul.mubr.bf16.vlgmr.msra.gmra.mrb[0].mxu0 %v21591_v28  ;;  %13298 = vmatmul.mubr.bf16.vlgmr.msra.gmra.mrb[0].mxu1 %v21591_v28 }
 0x1fa   : > { %12979 = vmatpush1.bf16.msra.mxu0 %v19248_v32  ;;  %13307 = vmatpush1.bf16.msra.mxu1 %v19250_v0  ;;  %v19344_v32 = vcombine.low %v1960_v16, %v1968_v2  ;;  %v19346_v0 = vcombine.low %v1961_v18, %v1969_v19  ;;  %v2056_v16 = vld [vmem:[%s21082_s18 + $0x3600] sm:$0xff]  ;;  %v2057_v18 = vld [vmem:[%s21082_s18 + $0x3608] sm:$0xff] }
 0x1fb   : > { %12980 = vmatprep.subr.bf16.mxu0 %v19265_v34  ;;  %13308 = vmatprep.subr.bf16.mxu1 %v19267_v35  ;;  %v19361_v34 = vcombine.high %v1976_v26, %v1984_v27  ;;  %v19363_v35 = vcombine.high %v1977_v29, %v1985_v31  ;;  %v2064_v2 = vld [vmem:[%s21082_s18 + $0x3640] sm:$0xff]  ;;  %v2065_v19 = vld [vmem:[%s21082_s18 + $0x3648] sm:$0xff] }
 0x1fc   : > { %13010 = vmatprep.mubr.bf16.mxu0 %v21598_v38  ;;  %13338 = vmatprep.mubr.bf16.mxu1 %v21598_v38 }
 0x1fe   : > { %12981 = vmatpush1.bf16.msra.mxu0 %v19264_v42  ;;  %13309 = vmatpush1.bf16.msra.mxu1 %v19266_v43  ;;  %v19360_v42 = vcombine.low %v1976_v26, %v1984_v27  ;;  %v19362_v43 = vcombine.low %v1977_v29, %v1985_v31  ;;  %v2072_v26 = vld [vmem:[%s21082_s18 + $0x3680] sm:$0xff]  ;;  %v2073_v29 = vld [vmem:[%s21082_s18 + $0x3688] sm:$0xff] }
 0x1ff   : > { %12982 = vmatprep.subr.bf16.mxu0 %v19281_v44  ;;  %13310 = vmatprep.subr.bf16.mxu1 %v19283_v46  ;;  %v19377_v44 = vcombine.high %v1992_v36, %v2000_v37  ;;  %v19379_v46 = vcombine.high %v1993_v40, %v2001_v41  ;;  %v2080_v27 = vld [vmem:[%s21082_s18 + $0x36c0] sm:$0xff]  ;;  %v2081_v31 = vld [vmem:[%s21082_s18 + $0x36c8] sm:$0xff] }
 0x202   : > { %12983 = vmatpush1.bf16.msra.mxu0 %v19280_v53  ;;  %13311 = vmatpush1.bf16.msra.mxu1 %v19282_v55  ;;  %v19376_v53 = vcombine.low %v1992_v36, %v2000_v37  ;;  %v19378_v55 = vcombine.low %v1993_v40, %v2001_v41  ;;  %v2088_v36 = vld [vmem:[%s21082_s18 + $0x3700] sm:$0xff]  ;;  %v2089_v40 = vld [vmem:[%s21082_s18 + $0x3708] sm:$0xff] }
 0x203   : > { %12984 = vmatprep.subr.bf16.mxu0 %v19297_v56  ;;  %13312 = vmatprep.subr.bf16.mxu1 %v19299_v57  ;;  %v19393_v56 = vcombine.high %v2008_v47, %v2016_v48  ;;  %v19395_v57 = vcombine.high %v2009_v50, %v2017_v51  ;;  %v2096_v37 = vld [vmem:[%s21082_s18 + $0x3740] sm:$0xff]  ;;  %v2097_v41 = vld [vmem:[%s21082_s18 + $0x3748] sm:$0xff] }
 0x206   : > { %12985 = vmatpush1.bf16.msra.mxu0 %v19296_v9  ;;  %13313 = vmatpush1.bf16.msra.mxu1 %v19298_v3  ;;  %v19392_v9 = vcombine.low %v2008_v47, %v2016_v48  ;;  %v19394_v3 = vcombine.low %v2009_v50, %v2017_v51  ;;  %v2104_v47 = vld [vmem:[%s21082_s18 + $0x3780] sm:$0xff]  ;;  %v2105_v50 = vld [vmem:[%s21082_s18 + $0x3788] sm:$0xff] }
 0x207   : > { %12986 = vmatprep.subr.bf16.mxu0 %v19313_v4  ;;  %13314 = vmatprep.subr.bf16.mxu1 %v19315_v5  ;;  %v19409_v4 = vcombine.high %v2024_v58, %v2032_v61  ;;  %v19411_v5 = vcombine.high %v2025_v62, %v2033_v63  ;;  %v2112_v48 = vld [vmem:[%s21082_s18 + $0x37c0] sm:$0xff]  ;;  %v2113_v51 = vld [vmem:[%s21082_s18 + $0x37c8] sm:$0xff] }
 0x20a   : > { %12987 = vmatpush1.bf16.msra.mxu0 %v19312_v12  ;;  %13315 = vmatpush1.bf16.msra.mxu1 %v19314_v13  ;;  %v19408_v12 = vcombine.low %v2024_v58, %v2032_v61  ;;  %v19410_v13 = vcombine.low %v2025_v62, %v2033_v63  ;;  %v2120_v58 = vld [vmem:[%s21082_s18 + $0x3800] sm:$0xff]  ;;  %v2121_v62 = vld [vmem:[%s21082_s18 + $0x3808] sm:$0xff] }
 0x20b   : > { %12988 = vmatprep.subr.bf16.mxu0 %v19329_v14  ;;  %13316 = vmatprep.subr.bf16.mxu1 %v19331_v15  ;;  %v19425_v14 = vcombine.high %v2040_v30, %v2048_v7  ;;  %v19427_v15 = vcombine.high %v2041_v8, %v2049_v11  ;;  %v2128_v61 = vld [vmem:[%s21082_s18 + $0x3840] sm:$0xff]  ;;  %v2129_v63 = vld [vmem:[%s21082_s18 + $0x3848] sm:$0xff] }
 0x20e   : > { %12989 = vmatpush1.bf16.msra.mxu0 %v19328_v21  ;;  %13317 = vmatpush1.bf16.msra.mxu1 %v19330_v22  ;;  %v19424_v21 = vcombine.low %v2040_v30, %v2048_v7  ;;  %v19426_v22 = vcombine.low %v2041_v8, %v2049_v11  ;;  %v2136_v30 = vld [vmem:[%s21082_s18 + $0x3880] sm:$0xff]  ;;  %v21666_v8 = vrot.slane %v21581_v17, %v21128_v54  ;;  %v2137_v11 = vld [vmem:[%s21082_s18 + $0x3888] sm:$0xff] }
 0x20f   : > { %12990 = vmatprep.subr.bf16.mxu0 %v19345_v23  ;;  %13318 = vmatprep.subr.bf16.mxu1 %v19347_v25  ;;  %v19441_v23 = vcombine.high %v2056_v16, %v2064_v2  ;;  %v19443_v25 = vcombine.high %v2057_v18, %v2065_v19  ;;  %v2144_v7 = vld [vmem:[%s21082_s18 + $0x38c0] sm:$0xff]  ;;  %v2153_v54 = vld [vmem:[%s21082_s18 + $0x3908] sm:$0xff] }
 0x210   : > { %v2161_v17 = vld [vmem:[%s21082_s18 + $0x3948] sm:$0xff] }
 0x212   : > { %12991 = vmatpush1.bf16.msra.mxu0 %v19344_v32  ;;  %13319 = vmatpush1.bf16.msra.mxu1 %v19346_v0  ;;  %v19440_v32 = vcombine.low %v2056_v16, %v2064_v2  ;;  %v19442_v0 = vcombine.low %v2057_v18, %v2065_v19  ;;  %v2152_v2 = vld [vmem:[%s21082_s18 + $0x3900] sm:$0xff]  ;;  %v21674_v19 = vcombine.high %v21598_v38, %v21598_v38 }
 0x213   : > { %12992 = vmatprep.subr.bf16.mxu0 %v19361_v34  ;;  %13320 = vmatprep.subr.bf16.mxu1 %v19363_v35  ;;  %v19457_v34 = vcombine.high %v2072_v26, %v2080_v27  ;;  %v19459_v35 = vcombine.high %v2073_v29, %v2081_v31  ;;  %v2160_v18 = vld [vmem:[%s21082_s18 + $0x3940] sm:$0xff] }
 0x216   : > { %12993 = vmatpush1.bf16.msra.mxu0 %v19360_v42  ;;  %13321 = vmatpush1.bf16.msra.mxu1 %v19362_v43  ;;  %v19456_v42 = vcombine.low %v2072_v26, %v2080_v27  ;;  %v19458_v43 = vcombine.low %v2073_v29, %v2081_v31  ;;  %v2168_v26 = vld [vmem:[%s21082_s18 + $0x3980] sm:$0xff]  ;;  %v2169_v29 = vld [vmem:[%s21082_s18 + $0x3988] sm:$0xff] }
 0x217   : > { %12994 = vmatprep.subr.bf16.mxu0 %v19377_v44  ;;  %13322 = vmatprep.subr.bf16.mxu1 %v19379_v46  ;;  %v19473_v44 = vcombine.high %v2088_v36, %v2096_v37  ;;  %v19475_v46 = vcombine.high %v2089_v40, %v2097_v41  ;;  %v2176_v27 = vld [vmem:[%s21082_s18 + $0x39c0] sm:$0xff]  ;;  %v2177_v31 = vld [vmem:[%s21082_s18 + $0x39c8] sm:$0xff] }
 0x21a   : > { %12995 = vmatpush1.bf16.msra.mxu0 %v19376_v53  ;;  %13323 = vmatpush1.bf16.msra.mxu1 %v19378_v55  ;;  %v19472_v53 = vcombine.low %v2088_v36, %v2096_v37  ;;  %v19474_v55 = vcombine.low %v2089_v40, %v2097_v41  ;;  %v2184_v36 = vld [vmem:[%s21082_s18 + $0x3a00] sm:$0xff]  ;;  %v2185_v40 = vld [vmem:[%s21082_s18 + $0x3a08] sm:$0xff] }
 0x21b   : > { %12996 = vmatprep.subr.bf16.mxu0 %v19393_v56  ;;  %13324 = vmatprep.subr.bf16.mxu1 %v19395_v57  ;;  %v19489_v56 = vcombine.high %v2104_v47, %v2112_v48  ;;  %v19491_v57 = vcombine.high %v2105_v50, %v2113_v51  ;;  %v2192_v37 = vld [vmem:[%s21082_s18 + $0x3a40] sm:$0xff]  ;;  %v2193_v41 = vld [vmem:[%s21082_s18 + $0x3a48] sm:$0xff] }
 0x21e   : > { %12997 = vmatpush1.bf16.msra.mxu0 %v19392_v9  ;;  %13325 = vmatpush1.bf16.msra.mxu1 %v19394_v3  ;;  %v19488_v9 = vcombine.low %v2104_v47, %v2112_v48  ;;  %v19490_v3 = vcombine.low %v2105_v50, %v2113_v51  ;;  %v2200_v47 = vld [vmem:[%s21082_s18 + $0x3a80] sm:$0xff]  ;;  %v2201_v50 = vld [vmem:[%s21082_s18 + $0x3a88] sm:$0xff] }
 0x21f   : > { %12998 = vmatprep.subr.bf16.mxu0 %v19409_v4  ;;  %13326 = vmatprep.subr.bf16.mxu1 %v19411_v5  ;;  %v19505_v4 = vcombine.high %v2120_v58, %v2128_v61  ;;  %v19507_v5 = vcombine.high %v2121_v62, %v2129_v63  ;;  %v2208_v48 = vld [vmem:[%s21082_s18 + $0x3ac0] sm:$0xff]  ;;  %v2209_v51 = vld [vmem:[%s21082_s18 + $0x3ac8] sm:$0xff] }
 0x222   : > { %12999 = vmatpush1.bf16.msra.mxu0 %v19408_v12  ;;  %13327 = vmatpush1.bf16.msra.mxu1 %v19410_v13  ;;  %v2145_v12 = vld [vmem:[%s21082_s18 + $0x38c8] sm:$0xff]  ;;  %v19504_v13 = vcombine.low %v2120_v58, %v2128_v61  ;;  %v2216_v58 = vld [vmem:[%s21082_s18 + $0x3b00] sm:$0xff] }
 0x223   : > { %13000 = vmatprep.subr.bf16.mxu0 %v19425_v14  ;;  %13328 = vmatprep.subr.bf16.mxu1 %v19427_v15  ;;  %v19506_v14 = vcombine.low %v2121_v62, %v2129_v63  ;;  %v19521_v15 = vcombine.high %v2136_v30, %v2144_v7  ;;  %v19523_v16 = vcombine.high %v2137_v11, %v2145_v12  ;;  %v2224_v61 = vld [vmem:[%s21082_s18 + $0x3b40] sm:$0xff]  ;;  %v2217_v62 = vld [vmem:[%s21082_s18 + $0x3b08] sm:$0xff] }
 0x224   : > { %v2225_v63 = vld [vmem:[%s21082_s18 + $0x3b48] sm:$0xff] }
 0x226   : > { %13001 = vmatpush1.bf16.msra.mxu0 %v19424_v21  ;;  %13329 = vmatpush1.bf16.msra.mxu1 %v19426_v22  ;;  %v19520_v21 = vcombine.low %v2136_v30, %v2144_v7  ;;  %v19522_v22 = vcombine.low %v2137_v11, %v2145_v12  ;;  %v2232_v30 = vld [vmem:[%s21082_s18 + $0x3b80] sm:$0xff]  ;;  %v2233_v11 = vld [vmem:[%s21082_s18 + $0x3b88] sm:$0xff] }
 0x227   : > { %13002 = vmatprep.subr.bf16.mxu0 %v19441_v23  ;;  %13330 = vmatprep.subr.bf16.mxu1 %v19443_v25  ;;  %v19537_v23 = vcombine.high %v2152_v2, %v2160_v18  ;;  %v19539_v25 = vcombine.high %v2153_v54, %v2161_v17  ;;  %v2240_v7 = vld [vmem:[%s21082_s18 + $0x3bc0] sm:$0xff]  ;;  %v2241_v12 = vld [vmem:[%s21082_s18 + $0x3bc8] sm:$0xff] }
 0x22a   : > { %13003 = vmatpush1.bf16.msra.mxu0 %v19440_v32  ;;  %13331 = vmatpush1.bf16.msra.mxu1 %v19442_v0  ;;  %v19536_v32 = vcombine.low %v2152_v2, %v2160_v18  ;;  %v19538_v0 = vcombine.low %v2153_v54, %v2161_v17  ;;  %v2248_v2 = vld [vmem:[%s21082_s18 + $0x3c00] sm:$0xff]  ;;  %v2249_v54 = vld [vmem:[%s21082_s18 + $0x3c08] sm:$0xff] }
 0x22b   : > { %13004 = vmatprep.subr.bf16.mxu0 %v19457_v34  ;;  %13332 = vmatprep.subr.bf16.mxu1 %v19459_v35  ;;  %v19553_v34 = vcombine.high %v2168_v26, %v2176_v27  ;;  %v19555_v35 = vcombine.high %v2169_v29, %v2177_v31  ;;  %v2256_v18 = vld [vmem:[%s21082_s18 + $0x3c40] sm:$0xff]  ;;  %v2257_v17 = vld [vmem:[%s21082_s18 + $0x3c48] sm:$0xff] }
 0x22e   : > { %13005 = vmatpush1.bf16.msra.mxu0 %v19456_v42  ;;  %13333 = vmatpush1.bf16.msra.mxu1 %v19458_v43  ;;  %v19552_v42 = vcombine.low %v2168_v26, %v2176_v27  ;;  %v19554_v43 = vcombine.low %v2169_v29, %v2177_v31  ;;  %v2264_v26 = vld [vmem:[%s21082_s18 + $0x3c80] sm:$0xff]  ;;  %v2265_v29 = vld [vmem:[%s21082_s18 + $0x3c88] sm:$0xff] }
 0x22f   : > { %13006 = vmatprep.subr.bf16.mxu0 %v19473_v44  ;;  %13334 = vmatprep.subr.bf16.mxu1 %v19475_v46  ;;  %v19569_v44 = vcombine.high %v2184_v36, %v2192_v37  ;;  %v19571_v46 = vcombine.high %v2185_v40, %v2193_v41  ;;  %v2272_v27 = vld [vmem:[%s21082_s18 + $0x3cc0] sm:$0xff]  ;;  %v2273_v31 = vld [vmem:[%s21082_s18 + $0x3cc8] sm:$0xff] }
 0x232   : > { %13007 = vmatpush1.bf16.msra.mxu0 %v19472_v53  ;;  %13335 = vmatpush1.bf16.msra.mxu1 %v19474_v55  ;;  %v19568_v53 = vcombine.low %v2184_v36, %v2192_v37  ;;  %v19570_v55 = vcombine.low %v2185_v40, %v2193_v41  ;;  %v2280_v36 = vld [vmem:[%s21082_s18 + $0x3d00] sm:$0xff]  ;;  %v2281_v40 = vld [vmem:[%s21082_s18 + $0x3d08] sm:$0xff] }
 0x233   : > { %13008 = vmatprep.subr.bf16.mxu0 %v19489_v56  ;;  %13336 = vmatprep.subr.bf16.mxu1 %v19491_v57  ;;  %v19585_v56 = vcombine.high %v2200_v47, %v2208_v48  ;;  %v19587_v57 = vcombine.high %v2201_v50, %v2209_v51  ;;  %v2288_v37 = vld [vmem:[%s21082_s18 + $0x3d40] sm:$0xff]  ;;  %v2289_v41 = vld [vmem:[%s21082_s18 + $0x3d48] sm:$0xff] }
 0x236   : > { %13009 = vmatpush1.bf16.msra.mxu0 %v19488_v9  ;;  %13337 = vmatpush1.bf16.msra.mxu1 %v19490_v3  ;;  %v19584_v9 = vcombine.low %v2200_v47, %v2208_v48  ;;  %v19586_v3 = vcombine.low %v2201_v50, %v2209_v51  ;;  %v2296_v47 = vld [vmem:[%s21082_s18 + $0x3d80] sm:$0xff]  ;;  %v2297_v50 = vld [vmem:[%s21082_s18 + $0x3d88] sm:$0xff] }
 0x237   : > { %13019 = vmatprep.subr.bf16.mxu0 %v19505_v4  ;;  %13347 = vmatprep.subr.bf16.mxu1 %v19507_v5  ;;  %v19601_v4 = vcombine.high %v2216_v58, %v2224_v61  ;;  %v19603_v5 = vcombine.high %v2217_v62, %v2225_v63  ;;  %v2304_v48 = vld [vmem:[%s21082_s18 + $0x3dc0] sm:$0xff]  ;;  %v2305_v51 = vld [vmem:[%s21082_s18 + $0x3dc8] sm:$0xff] }
 0x239   : > { %13011 = vmatmul.mubr.bf16.vlgmr.msra.gmra.mrb[0].mxu0 %v21666_v8  ;;  %13339 = vmatmul.mubr.bf16.vlgmr.msra.gmra.mrb[0].mxu1 %v21666_v8 }
 0x23a   : > { %13020 = vmatpush1.bf16.msra.mxu0 %v19504_v13  ;;  %13348 = vmatpush1.bf16.msra.mxu1 %v19506_v14  ;;  %v19600_v13 = vcombine.low %v2216_v58, %v2224_v61  ;;  %v19602_v14 = vcombine.low %v2217_v62, %v2225_v63  ;;  %v2312_v58 = vld [vmem:[%s21082_s18 + $0x3e00] sm:$0xff]  ;;  %v2313_v62 = vld [vmem:[%s21082_s18 + $0x3e08] sm:$0xff] }
 0x23b   : > { %13021 = vmatprep.subr.bf16.mxu0 %v19521_v15  ;;  %13349 = vmatprep.subr.bf16.mxu1 %v19523_v16  ;;  %v19617_v15 = vcombine.high %v2232_v30, %v2240_v7  ;;  %v19619_v16 = vcombine.high %v2233_v11, %v2241_v12  ;;  %v2320_v61 = vld [vmem:[%s21082_s18 + $0x3e40] sm:$0xff]  ;;  %v2321_v63 = vld [vmem:[%s21082_s18 + $0x3e48] sm:$0xff] }
 0x23c   : > { %13051 = vmatprep.mubr.bf16.mxu0 %v21674_v19  ;;  %13379 = vmatprep.mubr.bf16.mxu1 %v21674_v19 }
 0x23e   : > { %13022 = vmatpush1.bf16.msra.mxu0 %v19520_v21  ;;  %13350 = vmatpush1.bf16.msra.mxu1 %v19522_v22  ;;  %v19616_v21 = vcombine.low %v2232_v30, %v2240_v7  ;;  %v19618_v22 = vcombine.low %v2233_v11, %v2241_v12  ;;  %v2328_v30 = vld [vmem:[%s21082_s18 + $0x3e80] sm:$0xff]  ;;  %v2329_v11 = vld [vmem:[%s21082_s18 + $0x3e88] sm:$0xff] }
 0x23f   : > { %13023 = vmatprep.subr.bf16.mxu0 %v19537_v23  ;;  %13351 = vmatprep.subr.bf16.mxu1 %v19539_v25  ;;  %v19633_v23 = vcombine.high %v2248_v2, %v2256_v18  ;;  %v19635_v25 = vcombine.high %v2249_v54, %v2257_v17  ;;  %v2336_v7 = vld [vmem:[%s21082_s18 + $0x3ec0] sm:$0xff]  ;;  %v2337_v12 = vld [vmem:[%s21082_s18 + $0x3ec8] sm:$0xff] }
 0x242   : > { %13024 = vmatpush1.bf16.msra.mxu0 %v19536_v32  ;;  %13352 = vmatpush1.bf16.msra.mxu1 %v19538_v0  ;;  %v19632_v32 = vcombine.low %v2248_v2, %v2256_v18  ;;  %v19634_v0 = vcombine.low %v2249_v54, %v2257_v17  ;;  %v2344_v2 = vld [vmem:[%s21082_s18 + $0x3f00] sm:$0xff]  ;;  %v2345_v54 = vld [vmem:[%s21082_s18 + $0x3f08] sm:$0xff] }
 0x243   : > { %13025 = vmatprep.subr.bf16.mxu0 %v19553_v34  ;;  %13353 = vmatprep.subr.bf16.mxu1 %v19555_v35  ;;  %v19649_v34 = vcombine.high %v2264_v26, %v2272_v27  ;;  %v19651_v35 = vcombine.high %v2265_v29, %v2273_v31  ;;  %v2352_v18 = vld [vmem:[%s21082_s18 + $0x3f40] sm:$0xff]  ;;  %v2353_v17 = vld [vmem:[%s21082_s18 + $0x3f48] sm:$0xff] }
 0x246   : > { %13026 = vmatpush1.bf16.msra.mxu0 %v19552_v42  ;;  %13354 = vmatpush1.bf16.msra.mxu1 %v19554_v43  ;;  %v19648_v42 = vcombine.low %v2264_v26, %v2272_v27  ;;  %v19650_v43 = vcombine.low %v2265_v29, %v2273_v31  ;;  %v2360_v26 = vld [vmem:[%s21082_s18 + $0x3f80] sm:$0xff]  ;;  %v2361_v29 = vld [vmem:[%s21082_s18 + $0x3f88] sm:$0xff] }
 0x247   : > { %13027 = vmatprep.subr.bf16.mxu0 %v19569_v44  ;;  %13355 = vmatprep.subr.bf16.mxu1 %v19571_v46  ;;  %v19665_v44 = vcombine.high %v2280_v36, %v2288_v37  ;;  %v19667_v46 = vcombine.high %v2281_v40, %v2289_v41  ;;  %v2368_v27 = vld [vmem:[%s21082_s18 + $0x3fc0] sm:$0xff]  ;;  %v2369_v31 = vld [vmem:[%s21082_s18 + $0x3fc8] sm:$0xff] }
 0x24a   : > { %13028 = vmatpush1.bf16.msra.mxu0 %v19568_v53  ;;  %13356 = vmatpush1.bf16.msra.mxu1 %v19570_v55  ;;  %v19664_v53 = vcombine.low %v2280_v36, %v2288_v37  ;;  %v19666_v55 = vcombine.low %v2281_v40, %v2289_v41  ;;  %v330_v36 = vld [vmem:[%s21082_s18 + $0x10] sm:$0xff]  ;;  %v331_v40 = vld [vmem:[%s21082_s18 + $0x18] sm:$0xff] }
 0x24b   : > { %13029 = vmatprep.subr.bf16.mxu0 %v19585_v56  ;;  %13357 = vmatprep.subr.bf16.mxu1 %v19587_v57  ;;  %v19681_v56 = vcombine.high %v2296_v47, %v2304_v48  ;;  %v19683_v57 = vcombine.high %v2297_v50, %v2305_v51  ;;  %v338_v37 = vld [vmem:[%s21082_s18 + $0x50] sm:$0xff]  ;;  %v339_v41 = vld [vmem:[%s21082_s18 + $0x58] sm:$0xff] }
 0x24e   : > { %13030 = vmatpush1.bf16.msra.mxu0 %v19584_v9  ;;  %13358 = vmatpush1.bf16.msra.mxu1 %v19586_v3  ;;  %v19680_v9 = vcombine.low %v2296_v47, %v2304_v48  ;;  %v19682_v3 = vcombine.low %v2297_v50, %v2305_v51  ;;  %v346_v47 = vld [vmem:[%s21082_s18 + $0x90] sm:$0xff]  ;;  %v21742_v50 = vcombine.high %v21666_v8, %v21666_v8  ;;  %v347_v51 = vld [vmem:[%s21082_s18 + $0x98] sm:$0xff] }
 0x24f   : > { %13031 = vmatprep.subr.bf16.mxu0 %v19601_v4  ;;  %13359 = vmatprep.subr.bf16.mxu1 %v19603_v5  ;;  %v19697_v4 = vcombine.high %v2312_v58, %v2320_v61  ;;  %v19699_v5 = vcombine.high %v2313_v62, %v2321_v63  ;;  %v354_v48 = vld [vmem:[%s21082_s18 + $0xd0] sm:$0xff] }
 0x252   : > { %13032 = vmatpush1.bf16.msra.mxu0 %v19600_v13  ;;  %13360 = vmatpush1.bf16.msra.mxu1 %v19602_v14  ;;  %v19696_v13 = vcombine.low %v2312_v58, %v2320_v61  ;;  %v19698_v14 = vcombine.low %v2313_v62, %v2321_v63  ;;  %v362_v61 = vld [vmem:[%s21082_s18 + $0x110] sm:$0xff]  ;;  %v363_v63 = vld [vmem:[%s21082_s18 + $0x118] sm:$0xff] }
 0x253   : > { %13033 = vmatprep.subr.bf16.mxu0 %v19617_v15  ;;  %13361 = vmatprep.subr.bf16.mxu1 %v19619_v16  ;;  %v19713_v15 = vcombine.high %v2328_v30, %v2336_v7  ;;  %v19715_v16 = vcombine.high %v2329_v11, %v2337_v12  ;;  %v370_v62 = vld [vmem:[%s21082_s18 + $0x150] sm:$0xff] }
 0x256   : > { %13034 = vmatpush1.bf16.msra.mxu0 %v19616_v21  ;;  %13362 = vmatpush1.bf16.msra.mxu1 %v19618_v22  ;;  %v19712_v21 = vcombine.low %v2328_v30, %v2336_v7  ;;  %v19714_v22 = vcombine.low %v2329_v11, %v2337_v12  ;;  %v378_v7 = vld [vmem:[%s21082_s18 + $0x190] sm:$0xff]  ;;  %v379_v12 = vld [vmem:[%s21082_s18 + $0x198] sm:$0xff] }
 0x257   : > { %13035 = vmatprep.subr.bf16.mxu0 %v19633_v23  ;;  %13363 = vmatprep.subr.bf16.mxu1 %v19635_v25  ;;  %v19729_v23 = vcombine.high %v2344_v2, %v2352_v18  ;;  %v19731_v25 = vcombine.high %v2345_v54, %v2353_v17  ;;  %v386_v11 = vld [vmem:[%s21082_s18 + $0x1d0] sm:$0xff] }
 0x25a   : > { %13036 = vmatpush1.bf16.msra.mxu0 %v19632_v32  ;;  %13364 = vmatpush1.bf16.msra.mxu1 %v19634_v0  ;;  %v19728_v32 = vcombine.low %v2344_v2, %v2352_v18  ;;  %v19730_v0 = vcombine.low %v2345_v54, %v2353_v17  ;;  %v394_v18 = vld [vmem:[%s21082_s18 + $0x210] sm:$0xff]  ;;  %v395_v17 = vld [vmem:[%s21082_s18 + $0x218] sm:$0xff] }
 0x25b   : > { %13037 = vmatprep.subr.bf16.mxu0 %v19649_v34  ;;  %13365 = vmatprep.subr.bf16.mxu1 %v19651_v35  ;;  %v19745_v34 = vcombine.high %v2360_v26, %v2368_v27  ;;  %v19747_v35 = vcombine.high %v2361_v29, %v2369_v31  ;;  %v402_v54 = vld [vmem:[%s21082_s18 + $0x250] sm:$0xff] }
 0x25e   : > { %13038 = vmatpush1.bf16.msra.mxu0 %v19648_v42  ;;  %13366 = vmatpush1.bf16.msra.mxu1 %v19650_v43  ;;  %v19744_v42 = vcombine.low %v2360_v26, %v2368_v27  ;;  %v19746_v43 = vcombine.low %v2361_v29, %v2369_v31  ;;  %v410_v27 = vld [vmem:[%s21082_s18 + $0x290] sm:$0xff]  ;;  %v411_v31 = vld [vmem:[%s21082_s18 + $0x298] sm:$0xff] }
 0x25f   : > { %13039 = vmatprep.subr.bf16.mxu0 %v19665_v44  ;;  %13367 = vmatprep.subr.bf16.mxu1 %v19667_v46  ;;  %v17717_v44 = vcombine.high %v330_v36, %v338_v37  ;;  %v17719_v46 = vcombine.high %v331_v40, %v339_v41  ;;  %v418_v29 = vld [vmem:[%s21082_s18 + $0x2d0] sm:$0xff] }
 0x262   : > { %13040 = vmatpush1.bf16.msra.mxu0 %v19664_v53  ;;  %13368 = vmatpush1.bf16.msra.mxu1 %v19666_v55  ;;  %v355_v53 = vld [vmem:[%s21082_s18 + $0xd8] sm:$0xff]  ;;  %v17716_v55 = vcombine.low %v330_v36, %v338_v37  ;;  %v426_v37 = vld [vmem:[%s21082_s18 + $0x310] sm:$0xff] }
 0x263   : > { %13041 = vmatprep.subr.bf16.mxu0 %v19681_v56  ;;  %13369 = vmatprep.subr.bf16.mxu1 %v19683_v57  ;;  %v17718_v56 = vcombine.low %v331_v40, %v339_v41  ;;  %v17733_v57 = vcombine.high %v346_v47, %v354_v48  ;;  %v17735_v58 = vcombine.high %v347_v51, %v355_v53  ;;  %v434_v40 = vld [vmem:[%s21082_s18 + $0x350] sm:$0xff]  ;;  %v427_v41 = vld [vmem:[%s21082_s18 + $0x318] sm:$0xff] }
 0x266   : > { %13042 = vmatpush1.bf16.msra.mxu0 %v19680_v9  ;;  %13370 = vmatpush1.bf16.msra.mxu1 %v19682_v3  ;;  %v371_v9 = vld [vmem:[%s21082_s18 + $0x158] sm:$0xff]  ;;  %v17732_v3 = vcombine.low %v346_v47, %v354_v48  ;;  %v442_v48 = vld [vmem:[%s21082_s18 + $0x390] sm:$0xff] }
 0x267   : > { %13043 = vmatprep.subr.bf16.mxu0 %v19697_v4  ;;  %13371 = vmatprep.subr.bf16.mxu1 %v19699_v5  ;;  %v17734_v4 = vcombine.low %v347_v51, %v355_v53  ;;  %v17749_v5 = vcombine.high %v362_v61, %v370_v62  ;;  %v17751_v30 = vcombine.high %v363_v63, %v371_v9  ;;  %v450_v51 = vld [vmem:[%s21082_s18 + $0x3d0] sm:$0xff]  ;;  %v443_v53 = vld [vmem:[%s21082_s18 + $0x398] sm:$0xff] }
 0x26a   : > { %13044 = vmatpush1.bf16.msra.mxu0 %v19696_v13  ;;  %13372 = vmatpush1.bf16.msra.mxu1 %v19698_v14  ;;  %v387_v13 = vld [vmem:[%s21082_s18 + $0x1d8] sm:$0xff]  ;;  %v17748_v14 = vcombine.low %v362_v61, %v370_v62  ;;  %v458_v62 = vld [vmem:[%s21082_s18 + $0x410] sm:$0xff] }
 0x26b   : > { %13045 = vmatprep.subr.bf16.mxu0 %v19713_v15  ;;  %13373 = vmatprep.subr.bf16.mxu1 %v19715_v16  ;;  %v17750_v15 = vcombine.low %v363_v63, %v371_v9  ;;  %v17765_v16 = vcombine.high %v378_v7, %v386_v11  ;;  %v17767_v2 = vcombine.high %v379_v12, %v387_v13  ;;  %v466_v63 = vld [vmem:[%s21082_s18 + $0x450] sm:$0xff]  ;;  %v459_v9 = vld [vmem:[%s21082_s18 + $0x418] sm:$0xff] }
 0x26e   : > { %13046 = vmatpush1.bf16.msra.mxu0 %v19712_v21  ;;  %13374 = vmatpush1.bf16.msra.mxu1 %v19714_v22  ;;  %v403_v21 = vld [vmem:[%s21082_s18 + $0x258] sm:$0xff]  ;;  %v17764_v22 = vcombine.low %v378_v7, %v386_v11  ;;  %v474_v11 = vld [vmem:[%s21082_s18 + $0x490] sm:$0xff] }
 0x26f   : > { %13047 = vmatprep.subr.bf16.mxu0 %v19729_v23  ;;  %13375 = vmatprep.subr.bf16.mxu1 %v19731_v25  ;;  %v17766_v23 = vcombine.low %v379_v12, %v387_v13  ;;  %v17781_v25 = vcombine.high %v394_v18, %v402_v54  ;;  %v17783_v26 = vcombine.high %v395_v17, %v403_v21  ;;  %v482_v12 = vld [vmem:[%s21082_s18 + $0x4d0] sm:$0xff]  ;;  %v475_v13 = vld [vmem:[%s21082_s18 + $0x498] sm:$0xff] }
 0x272   : > { %13048 = vmatpush1.bf16.msra.mxu0 %v19728_v32  ;;  %13376 = vmatpush1.bf16.msra.mxu1 %v19730_v0  ;;  %v419_v32 = vld [vmem:[%s21082_s18 + $0x2d8] sm:$0xff]  ;;  %v17780_v0 = vcombine.low %v394_v18, %v402_v54  ;;  %v490_v54 = vld [vmem:[%s21082_s18 + $0x510] sm:$0xff] }
 0x273   : > { %13049 = vmatprep.subr.bf16.mxu0 %v19745_v34  ;;  %13377 = vmatprep.subr.bf16.mxu1 %v19747_v35  ;;  %v17782_v34 = vcombine.low %v395_v17, %v403_v21  ;;  %v17797_v35 = vcombine.high %v410_v27, %v418_v29  ;;  %v17799_v36 = vcombine.high %v411_v31, %v419_v32  ;;  %v498_v17 = vld [vmem:[%s21082_s18 + $0x550] sm:$0xff]  ;;  %v491_v21 = vld [vmem:[%s21082_s18 + $0x518] sm:$0xff] }
 0x276   : > { %13050 = vmatpush1.bf16.msra.mxu0 %v19744_v42  ;;  %13378 = vmatpush1.bf16.msra.mxu1 %v19746_v43  ;;  %v435_v42 = vld [vmem:[%s21082_s18 + $0x358] sm:$0xff]  ;;  %v17796_v43 = vcombine.low %v410_v27, %v418_v29  ;;  %v506_v29 = vld [vmem:[%s21082_s18 + $0x590] sm:$0xff] }
 0x277   : > { %13388 = vmatprep.subr.bf16.mxu0 %v17717_v44  ;;  %13716 = vmatprep.subr.bf16.mxu1 %v17719_v46  ;;  %v17798_v44 = vcombine.low %v411_v31, %v419_v32  ;;  %v17813_v46 = vcombine.high %v426_v37, %v434_v40  ;;  %v17815_v47 = vcombine.high %v427_v41, %v435_v42  ;;  %v514_v31 = vld [vmem:[%s21082_s18 + $0x5d0] sm:$0xff]  ;;  %v507_v32 = vld [vmem:[%s21082_s18 + $0x598] sm:$0xff] }
 0x279   : > { %13052 = vmatmul.mubr.bf16.vlgmr.msra.gmra.mrb[0].mxu0 %v21742_v50  ;;  %13380 = vmatmul.mubr.bf16.vlgmr.msra.gmra.mrb[0].mxu1 %v21742_v50 }
 0x27a   : > { %13389 = vmatpush1.bf16.msra.mxu0 %v17716_v55  ;;  %13717 = vmatpush1.bf16.msra.mxu1 %v17718_v56  ;;  %v451_v55 = vld [vmem:[%s21082_s18 + $0x3d8] sm:$0xff]  ;;  %v17812_v56 = vcombine.low %v426_v37, %v434_v40  ;;  %v522_v40 = vld [vmem:[%s21082_s18 + $0x610] sm:$0xff] }
 0x27b   : > { %13390 = vmatprep.subr.bf16.mxu0 %v17733_v57  ;;  %13718 = vmatprep.subr.bf16.mxu1 %v17735_v58  ;;  %v17814_v57 = vcombine.low %v427_v41, %v435_v42  ;;  %v17829_v58 = vcombine.high %v442_v48, %v450_v51  ;;  %v17831_v61 = vcombine.high %v443_v53, %v451_v55  ;;  %v530_v41 = vld [vmem:[%s21082_s18 + $0x650] sm:$0xff]  ;;  %v523_v42 = vld [vmem:[%s21082_s18 + $0x618] sm:$0xff] }
 0x27c   : > { %13420 = vmatprep.mubr.bf16.mxu0 %v21148_v10  ;;  %13748 = vmatprep.mubr.bf16.mxu1 %v21148_v10 }
 0x27e   : > { %13391 = vmatpush1.bf16.msra.mxu0 %v17732_v3  ;;  %13719 = vmatpush1.bf16.msra.mxu1 %v17734_v4  ;;  %v467_v3 = vld [vmem:[%s21082_s18 + $0x458] sm:$0xff]  ;;  %v17828_v4 = vcombine.low %v442_v48, %v450_v51  ;;  %v538_v51 = vld [vmem:[%s21082_s18 + $0x690] sm:$0xff] }
 0x27f   : > { %13392 = vmatprep.subr.bf16.mxu0 %v17749_v5  ;;  %13720 = vmatprep.subr.bf16.mxu1 %v17751_v30  ;;  %v17830_v5 = vcombine.low %v443_v53, %v451_v55  ;;  %v17845_v30 = vcombine.high %v458_v62, %v466_v63  ;;  %v17847_v7 = vcombine.high %v459_v9, %v467_v3  ;;  %v546_v53 = vld [vmem:[%s21082_s18 + $0x6d0] sm:$0xff]  ;;  %v539_v55 = vld [vmem:[%s21082_s18 + $0x698] sm:$0xff] }
 0x282   : > { %13393 = vmatpush1.bf16.msra.mxu0 %v17748_v14  ;;  %13721 = vmatpush1.bf16.msra.mxu1 %v17750_v15  ;;  %v483_v14 = vld [vmem:[%s21082_s18 + $0x4d8] sm:$0xff]  ;;  %v17844_v15 = vcombine.low %v458_v62, %v466_v63  ;;  %v554_v63 = vld [vmem:[%s21082_s18 + $0x710] sm:$0xff] }
 0x283   : > { %13394 = vmatprep.subr.bf16.mxu0 %v17765_v16  ;;  %13722 = vmatprep.subr.bf16.mxu1 %v17767_v2  ;;  %v17846_v16 = vcombine.low %v459_v9, %v467_v3  ;;  %v17861_v2 = vcombine.high %v474_v11, %v482_v12  ;;  %v17863_v18 = vcombine.high %v475_v13, %v483_v14  ;;  %v562_v9 = vld [vmem:[%s21082_s18 + $0x750] sm:$0xff]  ;;  %v555_v3 = vld [vmem:[%s21082_s18 + $0x718] sm:$0xff] }
 0x286   : > { %13395 = vmatpush1.bf16.msra.mxu0 %v17764_v22  ;;  %13723 = vmatpush1.bf16.msra.mxu1 %v17766_v23  ;;  %v499_v22 = vld [vmem:[%s21082_s18 + $0x558] sm:$0xff]  ;;  %v17860_v23 = vcombine.low %v474_v11, %v482_v12  ;;  %v570_v12 = vld [vmem:[%s21082_s18 + $0x790] sm:$0xff] }
 0x287   : > { %13396 = vmatprep.subr.bf16.mxu0 %v17781_v25  ;;  %13724 = vmatprep.subr.bf16.mxu1 %v17783_v26  ;;  %v17862_v25 = vcombine.low %v475_v13, %v483_v14  ;;  %v17877_v26 = vcombine.high %v490_v54, %v498_v17  ;;  %v17879_v27 = vcombine.high %v491_v21, %v499_v22  ;;  %v578_v13 = vld [vmem:[%s21082_s18 + $0x7d0] sm:$0xff]  ;;  %v571_v14 = vld [vmem:[%s21082_s18 + $0x798] sm:$0xff] }
 0x28a   : > { %13397 = vmatpush1.bf16.msra.mxu0 %v17780_v0  ;;  %13725 = vmatpush1.bf16.msra.mxu1 %v17782_v34  ;;  %v515_v0 = vld [vmem:[%s21082_s18 + $0x5d8] sm:$0xff]  ;;  %v17876_v34 = vcombine.low %v490_v54, %v498_v17  ;;  %v586_v17 = vld [vmem:[%s21082_s18 + $0x810] sm:$0xff] }
 0x28b   : > { %13398 = vmatprep.subr.bf16.mxu0 %v17797_v35  ;;  %13726 = vmatprep.subr.bf16.mxu1 %v17799_v36  ;;  %v17878_v35 = vcombine.low %v491_v21, %v499_v22  ;;  %v17893_v36 = vcombine.high %v506_v29, %v514_v31  ;;  %v17895_v37 = vcombine.high %v507_v32, %v515_v0  ;;  %v594_v21 = vld [vmem:[%s21082_s18 + $0x850] sm:$0xff]  ;;  %v587_v22 = vld [vmem:[%s21082_s18 + $0x818] sm:$0xff] }
 0x28e   : > { %13399 = vmatpush1.bf16.msra.mxu0 %v17796_v43  ;;  %13727 = vmatpush1.bf16.msra.mxu1 %v17798_v44  ;;  %v531_v43 = vld [vmem:[%s21082_s18 + $0x658] sm:$0xff]  ;;  %v17892_v44 = vcombine.low %v506_v29, %v514_v31  ;;  %v602_v31 = vld [vmem:[%s21082_s18 + $0x890] sm:$0xff] }
 0x28f   : > { %13400 = vmatprep.subr.bf16.mxu0 %v17813_v46  ;;  %13728 = vmatprep.subr.bf16.mxu1 %v17815_v47  ;;  %v17894_v46 = vcombine.low %v507_v32, %v515_v0  ;;  %v17909_v47 = vcombine.high %v522_v40, %v530_v41  ;;  %v17911_v48 = vcombine.high %v523_v42, %v531_v43  ;;  %v610_v32 = vld [vmem:[%s21082_s18 + $0x8d0] sm:$0xff]  ;;  %v603_v0 = vld [vmem:[%s21082_s18 + $0x898] sm:$0xff] }
 0x292   : > { %13401 = vmatpush1.bf16.msra.mxu0 %v17812_v56  ;;  %13729 = vmatpush1.bf16.msra.mxu1 %v17814_v57  ;;  %v547_v56 = vld [vmem:[%s21082_s18 + $0x6d8] sm:$0xff]  ;;  %v17908_v57 = vcombine.low %v522_v40, %v530_v41  ;;  %v618_v41 = vld [vmem:[%s21082_s18 + $0x910] sm:$0xff] }
 0x293   : > { %13402 = vmatprep.subr.bf16.mxu0 %v17829_v58  ;;  %13730 = vmatprep.subr.bf16.mxu1 %v17831_v61  ;;  %v17910_v58 = vcombine.low %v523_v42, %v531_v43  ;;  %v17925_v61 = vcombine.high %v538_v51, %v546_v53  ;;  %v17927_v62 = vcombine.high %v539_v55, %v547_v56  ;;  %v626_v42 = vld [vmem:[%s21082_s18 + $0x950] sm:$0xff]  ;;  %v619_v43 = vld [vmem:[%s21082_s18 + $0x918] sm:$0xff] }
 0x296   : > { %13403 = vmatpush1.bf16.msra.mxu0 %v17828_v4  ;;  %13731 = vmatpush1.bf16.msra.mxu1 %v17830_v5  ;;  %v563_v4 = vld [vmem:[%s21082_s18 + $0x758] sm:$0xff]  ;;  %v17924_v5 = vcombine.low %v538_v51, %v546_v53  ;;  %v634_v53 = vld [vmem:[%s21082_s18 + $0x990] sm:$0xff] }
 0x297   : > { %13404 = vmatprep.subr.bf16.mxu0 %v17845_v30  ;;  %13732 = vmatprep.subr.bf16.mxu1 %v17847_v7  ;;  %v17926_v30 = vcombine.low %v539_v55, %v547_v56  ;;  %v17941_v7 = vcombine.high %v554_v63, %v562_v9  ;;  %v17943_v11 = vcombine.high %v555_v3, %v563_v4  ;;  %v642_v55 = vld [vmem:[%s21082_s18 + $0x9d0] sm:$0xff]  ;;  %v635_v56 = vld [vmem:[%s21082_s18 + $0x998] sm:$0xff] }
 0x29a   : > { %13405 = vmatpush1.bf16.msra.mxu0 %v17844_v15  ;;  %13733 = vmatpush1.bf16.msra.mxu1 %v17846_v16  ;;  %v579_v15 = vld [vmem:[%s21082_s18 + $0x7d8] sm:$0xff]  ;;  %v17940_v16 = vcombine.low %v554_v63, %v562_v9  ;;  %v650_v9 = vld [vmem:[%s21082_s18 + $0xa10] sm:$0xff] }
 0x29b   : > { %13406 = vmatprep.subr.bf16.mxu0 %v17861_v2  ;;  %13734 = vmatprep.subr.bf16.mxu1 %v17863_v18  ;;  %v17942_v2 = vcombine.low %v555_v3, %v563_v4  ;;  %v17957_v18 = vcombine.high %v570_v12, %v578_v13  ;;  %v17959_v54 = vcombine.high %v571_v14, %v579_v15  ;;  %v658_v3 = vld [vmem:[%s21082_s18 + $0xa50] sm:$0xff]  ;;  %v651_v4 = vld [vmem:[%s21082_s18 + $0xa18] sm:$0xff] }
 0x29e   : > { %13407 = vmatpush1.bf16.msra.mxu0 %v17860_v23  ;;  %13735 = vmatpush1.bf16.msra.mxu1 %v17862_v25  ;;  %v595_v23 = vld [vmem:[%s21082_s18 + $0x858] sm:$0xff]  ;;  %v17956_v25 = vcombine.low %v570_v12, %v578_v13  ;;  %v666_v13 = vld [vmem:[%s21082_s18 + $0xa90] sm:$0xff] }
 0x29f   : > { %13408 = vmatprep.subr.bf16.mxu0 %v17877_v26  ;;  %13736 = vmatprep.subr.bf16.mxu1 %v17879_v27  ;;  %v17958_v26 = vcombine.low %v571_v14, %v579_v15  ;;  %v17973_v27 = vcombine.high %v586_v17, %v594_v21  ;;  %v17975_v29 = vcombine.high %v587_v22, %v595_v23  ;;  %v674_v14 = vld [vmem:[%s21082_s18 + $0xad0] sm:$0xff]  ;;  %v667_v15 = vld [vmem:[%s21082_s18 + $0xa98] sm:$0xff] }
 0x2a2   : > { %13409 = vmatpush1.bf16.msra.mxu0 %v17876_v34  ;;  %13737 = vmatpush1.bf16.msra.mxu1 %v17878_v35  ;;  %v611_v34 = vld [vmem:[%s21082_s18 + $0x8d8] sm:$0xff]  ;;  %v17972_v35 = vcombine.low %v586_v17, %v594_v21  ;;  %v682_v21 = vld [vmem:[%s21082_s18 + $0xb10] sm:$0xff] }
 0x2a3   : > { %13410 = vmatprep.subr.bf16.mxu0 %v17893_v36  ;;  %13738 = vmatprep.subr.bf16.mxu1 %v17895_v37  ;;  %v17974_v36 = vcombine.low %v587_v22, %v595_v23  ;;  %v17989_v37 = vcombine.high %v602_v31, %v610_v32  ;;  %v17991_v40 = vcombine.high %v603_v0, %v611_v34  ;;  %v690_v22 = vld [vmem:[%s21082_s18 + $0xb50] sm:$0xff]  ;;  %v683_v23 = vld [vmem:[%s21082_s18 + $0xb18] sm:$0xff] }
 0x2a6   : > { %13411 = vmatpush1.bf16.msra.mxu0 %v17892_v44  ;;  %13739 = vmatpush1.bf16.msra.mxu1 %v17894_v46  ;;  %v627_v44 = vld [vmem:[%s21082_s18 + $0x958] sm:$0xff]  ;;  %v17988_v46 = vcombine.low %v602_v31, %v610_v32  ;;  %v698_v32 = vld [vmem:[%s21082_s18 + $0xb90] sm:$0xff] }
 0x2a7   : > { %13412 = vmatprep.subr.bf16.mxu0 %v17909_v47  ;;  %13740 = vmatprep.subr.bf16.mxu1 %v17911_v48  ;;  %v17990_v47 = vcombine.low %v603_v0, %v611_v34  ;;  %v18005_v48 = vcombine.high %v618_v41, %v626_v42  ;;  %v18007_v51 = vcombine.high %v619_v43, %v627_v44  ;;  %v706_v0 = vld [vmem:[%s21082_s18 + $0xbd0] sm:$0xff]  ;;  %v699_v34 = vld [vmem:[%s21082_s18 + $0xb98] sm:$0xff] }
 0x2aa   : > { %13413 = vmatpush1.bf16.msra.mxu0 %v17908_v57  ;;  %13741 = vmatpush1.bf16.msra.mxu1 %v17910_v58  ;;  %v643_v57 = vld [vmem:[%s21082_s18 + $0x9d8] sm:$0xff]  ;;  %v18004_v58 = vcombine.low %v618_v41, %v626_v42  ;;  %v714_v42 = vld [vmem:[%s21082_s18 + $0xc10] sm:$0xff] }
 0x2ab   : > { %13414 = vmatprep.subr.bf16.mxu0 %v17925_v61  ;;  %13742 = vmatprep.subr.bf16.mxu1 %v17927_v62  ;;  %v18006_v61 = vcombine.low %v619_v43, %v627_v44  ;;  %v18021_v62 = vcombine.high %v634_v53, %v642_v55  ;;  %v18023_v63 = vcombine.high %v635_v56, %v643_v57  ;;  %v722_v43 = vld [vmem:[%s21082_s18 + $0xc50] sm:$0xff]  ;;  %v715_v44 = vld [vmem:[%s21082_s18 + $0xc18] sm:$0xff] }
 0x2ae   : > { %13415 = vmatpush1.bf16.msra.mxu0 %v17924_v5  ;;  %13743 = vmatpush1.bf16.msra.mxu1 %v17926_v30  ;;  %v659_v5 = vld [vmem:[%s21082_s18 + $0xa58] sm:$0xff]  ;;  %v18020_v30 = vcombine.low %v634_v53, %v642_v55  ;;  %v730_v55 = vld [vmem:[%s21082_s18 + $0xc90] sm:$0xff] }
 0x2af   : > { %13416 = vmatprep.subr.bf16.mxu0 %v17941_v7  ;;  %13744 = vmatprep.subr.bf16.mxu1 %v17943_v11  ;;  %v18022_v7 = vcombine.low %v635_v56, %v643_v57  ;;  %v18037_v11 = vcombine.high %v650_v9, %v658_v3  ;;  %v18039_v12 = vcombine.high %v651_v4, %v659_v5  ;;  %v738_v56 = vld [vmem:[%s21082_s18 + $0xcd0] sm:$0xff]  ;;  %v731_v57 = vld [vmem:[%s21082_s18 + $0xc98] sm:$0xff] }
 0x2b2   : > { %13417 = vmatpush1.bf16.msra.mxu0 %v17940_v16  ;;  %13745 = vmatpush1.bf16.msra.mxu1 %v17942_v2  ;;  %v675_v16 = vld [vmem:[%s21082_s18 + $0xad8] sm:$0xff]  ;;  %v18036_v2 = vcombine.low %v650_v9, %v658_v3  ;;  %v746_v3 = vld [vmem:[%s21082_s18 + $0xd10] sm:$0xff] }
 0x2b3   : > { %13418 = vmatprep.subr.bf16.mxu0 %v17957_v18  ;;  %13746 = vmatprep.subr.bf16.mxu1 %v17959_v54  ;;  %v18038_v18 = vcombine.low %v651_v4, %v659_v5  ;;  %v18053_v54 = vcombine.high %v666_v13, %v674_v14  ;;  %v18055_v17 = vcombine.high %v667_v15, %v675_v16  ;;  %v754_v4 = vld [vmem:[%s21082_s18 + $0xd50] sm:$0xff]  ;;  %v747_v5 = vld [vmem:[%s21082_s18 + $0xd18] sm:$0xff] }
 0x2b6   : > { %13419 = vmatpush1.bf16.msra.mxu0 %v17956_v25  ;;  %13747 = vmatpush1.bf16.msra.mxu1 %v17958_v26  ;;  %v691_v25 = vld [vmem:[%s21082_s18 + $0xb58] sm:$0xff]  ;;  %v18052_v26 = vcombine.low %v666_v13, %v674_v14  ;;  %v762_v14 = vld [vmem:[%s21082_s18 + $0xd90] sm:$0xff] }
 0x2b7   : > { %13429 = vmatprep.subr.bf16.mxu0 %v17973_v27  ;;  %13757 = vmatprep.subr.bf16.mxu1 %v17975_v29  ;;  %v18054_v27 = vcombine.low %v667_v15, %v675_v16  ;;  %v18069_v29 = vcombine.high %v682_v21, %v690_v22  ;;  %v18071_v31 = vcombine.high %v683_v23, %v691_v25  ;;  %v770_v15 = vld [vmem:[%s21082_s18 + $0xdd0] sm:$0xff]  ;;  %v763_v16 = vld [vmem:[%s21082_s18 + $0xd98] sm:$0xff] }
 0x2b9   : > { %13421 = vmatmul.mubr.bf16.vlgmr.msra.gmra.mrb[4].mxu0 %v21190_v24  ;;  %13749 = vmatmul.mubr.bf16.vlgmr.msra.gmra.mrb[4].mxu1 %v21190_v24 }
 0x2ba   : > { %13430 = vmatpush1.bf16.msra.mxu0 %v17972_v35  ;;  %13758 = vmatpush1.bf16.msra.mxu1 %v17974_v36  ;;  %v707_v35 = vld [vmem:[%s21082_s18 + $0xbd8] sm:$0xff]  ;;  %v18068_v36 = vcombine.low %v682_v21, %v690_v22  ;;  %v778_v22 = vld [vmem:[%s21082_s18 + $0xe10] sm:$0xff] }
 0x2bb   : > { %13431 = vmatprep.subr.bf16.mxu0 %v17989_v37  ;;  %13759 = vmatprep.subr.bf16.mxu1 %v17991_v40  ;;  %v18070_v37 = vcombine.low %v683_v23, %v691_v25  ;;  %v18085_v40 = vcombine.high %v698_v32, %v706_v0  ;;  %v18087_v41 = vcombine.high %v699_v34, %v707_v35  ;;  %v786_v23 = vld [vmem:[%s21082_s18 + $0xe50] sm:$0xff]  ;;  %v779_v25 = vld [vmem:[%s21082_s18 + $0xe18] sm:$0xff] }
 0x2bc   : > { %13461 = vmatprep.mubr.bf16.mxu0 %v21198_v33  ;;  %13789 = vmatprep.mubr.bf16.mxu1 %v21198_v33 }
 0x2be   : > { %13432 = vmatpush1.bf16.msra.mxu0 %v17988_v46  ;;  %13760 = vmatpush1.bf16.msra.mxu1 %v17990_v47  ;;  %v723_v46 = vld [vmem:[%s21082_s18 + $0xc58] sm:$0xff]  ;;  %v18084_v47 = vcombine.low %v698_v32, %v706_v0  ;;  %v794_v0 = vld [vmem:[%s21082_s18 + $0xe90] sm:$0xff] }
 0x2bf   : > { %13433 = vmatprep.subr.bf16.mxu0 %v18005_v48  ;;  %13761 = vmatprep.subr.bf16.mxu1 %v18007_v51  ;;  %v18086_v48 = vcombine.low %v699_v34, %v707_v35  ;;  %v18101_v51 = vcombine.high %v714_v42, %v722_v43  ;;  %v18103_v53 = vcombine.high %v715_v44, %v723_v46  ;;  %v802_v34 = vld [vmem:[%s21082_s18 + $0xed0] sm:$0xff]  ;;  %v795_v35 = vld [vmem:[%s21082_s18 + $0xe98] sm:$0xff] }
 0x2c2   : > { %13434 = vmatpush1.bf16.msra.mxu0 %v18004_v58  ;;  %13762 = vmatpush1.bf16.msra.mxu1 %v18006_v61  ;;  %v739_v58 = vld [vmem:[%s21082_s18 + $0xcd8] sm:$0xff]  ;;  %v18100_v61 = vcombine.low %v714_v42, %v722_v43  ;;  %v810_v43 = vld [vmem:[%s21082_s18 + $0xf10] sm:$0xff] }
 0x2c3   : > { %13435 = vmatprep.subr.bf16.mxu0 %v18021_v62  ;;  %13763 = vmatprep.subr.bf16.mxu1 %v18023_v63  ;;  %v18102_v62 = vcombine.low %v715_v44, %v723_v46  ;;  %v18117_v63 = vcombine.high %v730_v55, %v738_v56  ;;  %v18119_v9 = vcombine.high %v731_v57, %v739_v58  ;;  %v818_v44 = vld [vmem:[%s21082_s18 + $0xf50] sm:$0xff]  ;;  %v811_v46 = vld [vmem:[%s21082_s18 + $0xf18] sm:$0xff] }
 0x2c6   : > { %13436 = vmatpush1.bf16.msra.mxu0 %v18020_v30  ;;  %13764 = vmatpush1.bf16.msra.mxu1 %v18022_v7  ;;  %v755_v30 = vld [vmem:[%s21082_s18 + $0xd58] sm:$0xff]  ;;  %v18116_v7 = vcombine.low %v730_v55, %v738_v56  ;;  %v826_v56 = vld [vmem:[%s21082_s18 + $0xf90] sm:$0xff] }
 0x2c7   : > { %13437 = vmatprep.subr.bf16.mxu0 %v18037_v11  ;;  %13765 = vmatprep.subr.bf16.mxu1 %v18039_v12  ;;  %v18118_v11 = vcombine.low %v731_v57, %v739_v58  ;;  %v18133_v12 = vcombine.high %v746_v3, %v754_v4  ;;  %v18135_v13 = vcombine.high %v747_v5, %v755_v30  ;;  %v834_v57 = vld [vmem:[%s21082_s18 + $0xfd0] sm:$0xff]  ;;  %v827_v58 = vld [vmem:[%s21082_s18 + $0xf98] sm:$0xff] }
 0x2ca   : > { %13438 = vmatpush1.bf16.msra.mxu0 %v18036_v2  ;;  %13766 = vmatpush1.bf16.msra.mxu1 %v18038_v18  ;;  %v771_v2 = vld [vmem:[%s21082_s18 + $0xdd8] sm:$0xff]  ;;  %v18132_v18 = vcombine.low %v746_v3, %v754_v4  ;;  %v842_v4 = vld [vmem:[%s21082_s18 + $0x1010] sm:$0xff] }
 0x2cb   : > { %13439 = vmatprep.subr.bf16.mxu0 %v18053_v54  ;;  %13767 = vmatprep.subr.bf16.mxu1 %v18055_v17  ;;  %v18134_v54 = vcombine.low %v747_v5, %v755_v30  ;;  %v18149_v17 = vcombine.high %v762_v14, %v770_v15  ;;  %v18151_v21 = vcombine.high %v763_v16, %v771_v2  ;;  %v850_v5 = vld [vmem:[%s21082_s18 + $0x1050] sm:$0xff]  ;;  %v843_v30 = vld [vmem:[%s21082_s18 + $0x1018] sm:$0xff] }
 0x2ce   : > { %13440 = vmatpush1.bf16.msra.mxu0 %v18052_v26  ;;  %13768 = vmatpush1.bf16.msra.mxu1 %v18054_v27  ;;  %v787_v26 = vld [vmem:[%s21082_s18 + $0xe58] sm:$0xff]  ;;  %v18148_v27 = vcombine.low %v762_v14, %v770_v15  ;;  %v858_v15 = vld [vmem:[%s21082_s18 + $0x1090] sm:$0xff] }
 0x2cf   : > { %13441 = vmatprep.subr.bf16.mxu0 %v18069_v29  ;;  %13769 = vmatprep.subr.bf16.mxu1 %v18071_v31  ;;  %v18150_v29 = vcombine.low %v763_v16, %v771_v2  ;;  %v18165_v31 = vcombine.high %v778_v22, %v786_v23  ;;  %v18167_v32 = vcombine.high %v779_v25, %v787_v26  ;;  %v866_v16 = vld [vmem:[%s21082_s18 + $0x10d0] sm:$0xff]  ;;  %v859_v2 = vld [vmem:[%s21082_s18 + $0x1098] sm:$0xff] }
 0x2d2   : > { %13442 = vmatpush1.bf16.msra.mxu0 %v18068_v36  ;;  %13770 = vmatpush1.bf16.msra.mxu1 %v18070_v37  ;;  %v803_v36 = vld [vmem:[%s21082_s18 + $0xed8] sm:$0xff]  ;;  %v18164_v37 = vcombine.low %v778_v22, %v786_v23  ;;  %v874_v23 = vld [vmem:[%s21082_s18 + $0x1110] sm:$0xff] }
 0x2d3   : > { %13443 = vmatprep.subr.bf16.mxu0 %v18085_v40  ;;  %13771 = vmatprep.subr.bf16.mxu1 %v18087_v41  ;;  %v18166_v40 = vcombine.low %v779_v25, %v787_v26  ;;  %v18181_v41 = vcombine.high %v794_v0, %v802_v34  ;;  %v18183_v42 = vcombine.high %v795_v35, %v803_v36  ;;  %v882_v25 = vld [vmem:[%s21082_s18 + $0x1150] sm:$0xff]  ;;  %v875_v26 = vld [vmem:[%s21082_s18 + $0x1118] sm:$0xff] }
 0x2d6   : > { %13444 = vmatpush1.bf16.msra.mxu0 %v18084_v47  ;;  %13772 = vmatpush1.bf16.msra.mxu1 %v18086_v48  ;;  %v819_v47 = vld [vmem:[%s21082_s18 + $0xf58] sm:$0xff]  ;;  %v18180_v48 = vcombine.low %v794_v0, %v802_v34  ;;  %v890_v34 = vld [vmem:[%s21082_s18 + $0x1190] sm:$0xff] }
 0x2d7   : > { %13445 = vmatprep.subr.bf16.mxu0 %v18101_v51  ;;  %13773 = vmatprep.subr.bf16.mxu1 %v18103_v53  ;;  %v18182_v51 = vcombine.low %v795_v35, %v803_v36  ;;  %v18197_v53 = vcombine.high %v810_v43, %v818_v44  ;;  %v18199_v55 = vcombine.high %v811_v46, %v819_v47  ;;  %v898_v35 = vld [vmem:[%s21082_s18 + $0x11d0] sm:$0xff]  ;;  %v891_v36 = vld [vmem:[%s21082_s18 + $0x1198] sm:$0xff] }
 0x2da   : > { %13446 = vmatpush1.bf16.msra.mxu0 %v18100_v61  ;;  %13774 = vmatpush1.bf16.msra.mxu1 %v18102_v62  ;;  %v835_v61 = vld [vmem:[%s21082_s18 + $0xfd8] sm:$0xff]  ;;  %v18196_v62 = vcombine.low %v810_v43, %v818_v44  ;;  %v906_v44 = vld [vmem:[%s21082_s18 + $0x1210] sm:$0xff] }
 0x2db   : > { %13447 = vmatprep.subr.bf16.mxu0 %v18117_v63  ;;  %13775 = vmatprep.subr.bf16.mxu1 %v18119_v9  ;;  %v18198_v63 = vcombine.low %v811_v46, %v819_v47  ;;  %v18213_v9 = vcombine.high %v826_v56, %v834_v57  ;;  %v18215_v3 = vcombine.high %v827_v58, %v835_v61  ;;  %v914_v46 = vld [vmem:[%s21082_s18 + $0x1250] sm:$0xff]  ;;  %v907_v47 = vld [vmem:[%s21082_s18 + $0x1218] sm:$0xff] }
 0x2de   : > { %13448 = vmatpush1.bf16.msra.mxu0 %v18116_v7  ;;  %13776 = vmatpush1.bf16.msra.mxu1 %v18118_v11  ;;  %v851_v7 = vld [vmem:[%s21082_s18 + $0x1058] sm:$0xff]  ;;  %v18212_v11 = vcombine.low %v826_v56, %v834_v57  ;;  %v922_v57 = vld [vmem:[%s21082_s18 + $0x1290] sm:$0xff] }
 0x2df   : > { %13449 = vmatprep.subr.bf16.mxu0 %v18133_v12  ;;  %13777 = vmatprep.subr.bf16.mxu1 %v18135_v13  ;;  %v18214_v12 = vcombine.low %v827_v58, %v835_v61  ;;  %v18229_v13 = vcombine.high %v842_v4, %v850_v5  ;;  %v18231_v14 = vcombine.high %v843_v30, %v851_v7  ;;  %v930_v58 = vld [vmem:[%s21082_s18 + $0x12d0] sm:$0xff]  ;;  %v923_v61 = vld [vmem:[%s21082_s18 + $0x1298] sm:$0xff] }
 0x2e2   : > { %13450 = vmatpush1.bf16.msra.mxu0 %v18132_v18  ;;  %13778 = vmatpush1.bf16.msra.mxu1 %v18134_v54  ;;  %v867_v18 = vld [vmem:[%s21082_s18 + $0x10d8] sm:$0xff]  ;;  %v18228_v54 = vcombine.low %v842_v4, %v850_v5  ;;  %v938_v5 = vld [vmem:[%s21082_s18 + $0x1310] sm:$0xff] }
 0x2e3   : > { %13451 = vmatprep.subr.bf16.mxu0 %v18149_v17  ;;  %13779 = vmatprep.subr.bf16.mxu1 %v18151_v21  ;;  %v18230_v17 = vcombine.low %v843_v30, %v851_v7  ;;  %v18245_v21 = vcombine.high %v858_v15, %v866_v16  ;;  %v18247_v22 = vcombine.high %v859_v2, %v867_v18  ;;  %v946_v30 = vld [vmem:[%s21082_s18 + $0x1350] sm:$0xff]  ;;  %v939_v7 = vld [vmem:[%s21082_s18 + $0x1318] sm:$0xff] }
 0x2e6   : > { %13452 = vmatpush1.bf16.msra.mxu0 %v18148_v27  ;;  %13780 = vmatpush1.bf16.msra.mxu1 %v18150_v29  ;;  %v883_v27 = vld [vmem:[%s21082_s18 + $0x1158] sm:$0xff]  ;;  %v18244_v29 = vcombine.low %v858_v15, %v866_v16  ;;  %v954_v16 = vld [vmem:[%s21082_s18 + $0x1390] sm:$0xff] }
 0x2e7   : > { %13453 = vmatprep.subr.bf16.mxu0 %v18165_v31  ;;  %13781 = vmatprep.subr.bf16.mxu1 %v18167_v32  ;;  %v18246_v31 = vcombine.low %v859_v2, %v867_v18  ;;  %v18261_v32 = vcombine.high %v874_v23, %v882_v25  ;;  %v18263_v0 = vcombine.high %v875_v26, %v883_v27  ;;  %v962_v2 = vld [vmem:[%s21082_s18 + $0x13d0] sm:$0xff]  ;;  %v955_v18 = vld [vmem:[%s21082_s18 + $0x1398] sm:$0xff] }
 0x2ea   : > { %13454 = vmatpush1.bf16.msra.mxu0 %v18164_v37  ;;  %13782 = vmatpush1.bf16.msra.mxu1 %v18166_v40  ;;  %v899_v37 = vld [vmem:[%s21082_s18 + $0x11d8] sm:$0xff]  ;;  %v18260_v40 = vcombine.low %v874_v23, %v882_v25  ;;  %v970_v25 = vld [vmem:[%s21082_s18 + $0x1410] sm:$0xff] }
 0x2eb   : > { %13455 = vmatprep.subr.bf16.mxu0 %v18181_v41  ;;  %13783 = vmatprep.subr.bf16.mxu1 %v18183_v42  ;;  %v18262_v41 = vcombine.low %v875_v26, %v883_v27  ;;  %v18277_v42 = vcombine.high %v890_v34, %v898_v35  ;;  %v18279_v43 = vcombine.high %v891_v36, %v899_v37  ;;  %v978_v26 = vld [vmem:[%s21082_s18 + $0x1450] sm:$0xff]  ;;  %v971_v27 = vld [vmem:[%s21082_s18 + $0x1418] sm:$0xff] }
 0x2ee   : > { %13456 = vmatpush1.bf16.msra.mxu0 %v18180_v48  ;;  %13784 = vmatpush1.bf16.msra.mxu1 %v18182_v51  ;;  %v915_v48 = vld [vmem:[%s21082_s18 + $0x1258] sm:$0xff]  ;;  %v18276_v51 = vcombine.low %v890_v34, %v898_v35  ;;  %v986_v35 = vld [vmem:[%s21082_s18 + $0x1490] sm:$0xff] }
 0x2ef   : > { %13457 = vmatprep.subr.bf16.mxu0 %v18197_v53  ;;  %13785 = vmatprep.subr.bf16.mxu1 %v18199_v55  ;;  %v18278_v53 = vcombine.low %v891_v36, %v899_v37  ;;  %v18293_v55 = vcombine.high %v906_v44, %v914_v46  ;;  %v18295_v56 = vcombine.high %v907_v47, %v915_v48  ;;  %v994_v36 = vld [vmem:[%s21082_s18 + $0x14d0] sm:$0xff]  ;;  %v987_v37 = vld [vmem:[%s21082_s18 + $0x1498] sm:$0xff] }
 0x2f2   : > { %13458 = vmatpush1.bf16.msra.mxu0 %v18196_v62  ;;  %13786 = vmatpush1.bf16.msra.mxu1 %v18198_v63  ;;  %v931_v62 = vld [vmem:[%s21082_s18 + $0x12d8] sm:$0xff]  ;;  %v18292_v63 = vcombine.low %v906_v44, %v914_v46  ;;  %v1002_v46 = vld [vmem:[%s21082_s18 + $0x1510] sm:$0xff] }
 0x2f3   : > { %13459 = vmatprep.subr.bf16.mxu0 %v18213_v9  ;;  %13787 = vmatprep.subr.bf16.mxu1 %v18215_v3  ;;  %v18294_v9 = vcombine.low %v907_v47, %v915_v48  ;;  %v18309_v3 = vcombine.high %v922_v57, %v930_v58  ;;  %v18311_v4 = vcombine.high %v923_v61, %v931_v62  ;;  %v1010_v47 = vld [vmem:[%s21082_s18 + $0x1550] sm:$0xff]  ;;  %v1003_v48 = vld [vmem:[%s21082_s18 + $0x1518] sm:$0xff] }
 0x2f6   : > { %13460 = vmatpush1.bf16.msra.mxu0 %v18212_v11  ;;  %13788 = vmatpush1.bf16.msra.mxu1 %v18214_v12  ;;  %v947_v11 = vld [vmem:[%s21082_s18 + $0x1358] sm:$0xff]  ;;  %v18308_v12 = vcombine.low %v922_v57, %v930_v58  ;;  %v1018_v58 = vld [vmem:[%s21082_s18 + $0x1590] sm:$0xff] }
 0x2f7   : > { %13470 = vmatprep.subr.bf16.mxu0 %v18229_v13  ;;  %13798 = vmatprep.subr.bf16.mxu1 %v18231_v14  ;;  %v18310_v13 = vcombine.low %v923_v61, %v931_v62  ;;  %v18325_v14 = vcombine.high %v938_v5, %v946_v30  ;;  %v18327_v15 = vcombine.high %v939_v7, %v947_v11  ;;  %v1026_v61 = vld [vmem:[%s21082_s18 + $0x15d0] sm:$0xff]  ;;  %v1019_v62 = vld [vmem:[%s21082_s18 + $0x1598] sm:$0xff] }
 0x2f9   : > { %13462 = vmatmul.mubr.bf16.vlgmr.msra.gmra.mrb[4].mxu0 %v21273_v39  ;;  %13790 = vmatmul.mubr.bf16.vlgmr.msra.gmra.mrb[4].mxu1 %v21273_v39 }
 0x2fa   : > { %13471 = vmatpush1.bf16.msra.mxu0 %v18228_v54  ;;  %13799 = vmatpush1.bf16.msra.mxu1 %v18230_v17  ;;  %v963_v54 = vld [vmem:[%s21082_s18 + $0x13d8] sm:$0xff]  ;;  %v18324_v17 = vcombine.low %v938_v5, %v946_v30  ;;  %v1034_v30 = vld [vmem:[%s21082_s18 + $0x1610] sm:$0xff] }
 0x2fb   : > { %13472 = vmatprep.subr.bf16.mxu0 %v18245_v21  ;;  %13800 = vmatprep.subr.bf16.mxu1 %v18247_v22  ;;  %v18326_v21 = vcombine.low %v939_v7, %v947_v11  ;;  %v18341_v22 = vcombine.high %v954_v16, %v962_v2  ;;  %v18343_v23 = vcombine.high %v955_v18, %v963_v54  ;;  %v1042_v7 = vld [vmem:[%s21082_s18 + $0x1650] sm:$0xff]  ;;  %v1035_v11 = vld [vmem:[%s21082_s18 + $0x1618] sm:$0xff] }
 0x2fc   : > { %13502 = vmatprep.mubr.bf16.mxu0 %v21280_v49  ;;  %13830 = vmatprep.mubr.bf16.mxu1 %v21280_v49 }
 0x2fe   : > { %13473 = vmatpush1.bf16.msra.mxu0 %v18244_v29  ;;  %13801 = vmatpush1.bf16.msra.mxu1 %v18246_v31  ;;  %v979_v29 = vld [vmem:[%s21082_s18 + $0x1458] sm:$0xff]  ;;  %v18340_v31 = vcombine.low %v954_v16, %v962_v2  ;;  %v1050_v2 = vld [vmem:[%s21082_s18 + $0x1690] sm:$0xff] }
 0x2ff   : > { %13474 = vmatprep.subr.bf16.mxu0 %v18261_v32  ;;  %13802 = vmatprep.subr.bf16.mxu1 %v18263_v0  ;;  %v18342_v32 = vcombine.low %v955_v18, %v963_v54  ;;  %v18357_v0 = vcombine.high %v970_v25, %v978_v26  ;;  %v18359_v34 = vcombine.high %v971_v27, %v979_v29  ;;  %v1058_v18 = vld [vmem:[%s21082_s18 + $0x16d0] sm:$0xff]  ;;  %v1051_v54 = vld [vmem:[%s21082_s18 + $0x1698] sm:$0xff] }
 0x302   : > { %13475 = vmatpush1.bf16.msra.mxu0 %v18260_v40  ;;  %13803 = vmatpush1.bf16.msra.mxu1 %v18262_v41  ;;  %v995_v40 = vld [vmem:[%s21082_s18 + $0x14d8] sm:$0xff]  ;;  %v18356_v41 = vcombine.low %v970_v25, %v978_v26  ;;  %v1066_v26 = vld [vmem:[%s21082_s18 + $0x1710] sm:$0xff] }
 0x303   : > { %13476 = vmatprep.subr.bf16.mxu0 %v18277_v42  ;;  %13804 = vmatprep.subr.bf16.mxu1 %v18279_v43  ;;  %v18358_v42 = vcombine.low %v971_v27, %v979_v29  ;;  %v18373_v43 = vcombine.high %v986_v35, %v994_v36  ;;  %v18375_v44 = vcombine.high %v987_v37, %v995_v40  ;;  %v1074_v27 = vld [vmem:[%s21082_s18 + $0x1750] sm:$0xff]  ;;  %v1067_v29 = vld [vmem:[%s21082_s18 + $0x1718] sm:$0xff] }
 0x306   : > { %13477 = vmatpush1.bf16.msra.mxu0 %v18276_v51  ;;  %13805 = vmatpush1.bf16.msra.mxu1 %v18278_v53  ;;  %v1011_v51 = vld [vmem:[%s21082_s18 + $0x1558] sm:$0xff]  ;;  %v18372_v53 = vcombine.low %v986_v35, %v994_v36  ;;  %v1082_v36 = vld [vmem:[%s21082_s18 + $0x1790] sm:$0xff] }
 0x307   : > { %13478 = vmatprep.subr.bf16.mxu0 %v18293_v55  ;;  %13806 = vmatprep.subr.bf16.mxu1 %v18295_v56  ;;  %v18374_v55 = vcombine.low %v987_v37, %v995_v40  ;;  %v18389_v56 = vcombine.high %v1002_v46, %v1010_v47  ;;  %v18391_v57 = vcombine.high %v1003_v48, %v1011_v51  ;;  %v1090_v37 = vld [vmem:[%s21082_s18 + $0x17d0] sm:$0xff]  ;;  %v1083_v40 = vld [vmem:[%s21082_s18 + $0x1798] sm:$0xff] }
 0x30a   : > { %13479 = vmatpush1.bf16.msra.mxu0 %v18292_v63  ;;  %13807 = vmatpush1.bf16.msra.mxu1 %v18294_v9  ;;  %v1027_v63 = vld [vmem:[%s21082_s18 + $0x15d8] sm:$0xff]  ;;  %v18388_v9 = vcombine.low %v1002_v46, %v1010_v47  ;;  %v1098_v47 = vld [vmem:[%s21082_s18 + $0x1810] sm:$0xff] }
 0x30b   : > { %13480 = vmatprep.subr.bf16.mxu0 %v18309_v3  ;;  %13808 = vmatprep.subr.bf16.mxu1 %v18311_v4  ;;  %v18390_v3 = vcombine.low %v1003_v48, %v1011_v51  ;;  %v18405_v4 = vcombine.high %v1018_v58, %v1026_v61  ;;  %v18407_v5 = vcombine.high %v1019_v62, %v1027_v63  ;;  %v1106_v48 = vld [vmem:[%s21082_s18 + $0x1850] sm:$0xff]  ;;  %v1099_v51 = vld [vmem:[%s21082_s18 + $0x1818] sm:$0xff] }
 0x30e   : > { %13481 = vmatpush1.bf16.msra.mxu0 %v18308_v12  ;;  %13809 = vmatpush1.bf16.msra.mxu1 %v18310_v13  ;;  %v1043_v12 = vld [vmem:[%s21082_s18 + $0x1658] sm:$0xff]  ;;  %v18404_v13 = vcombine.low %v1018_v58, %v1026_v61  ;;  %v1114_v61 = vld [vmem:[%s21082_s18 + $0x1890] sm:$0xff] }
 0x30f   : > { %13482 = vmatprep.subr.bf16.mxu0 %v18325_v14  ;;  %13810 = vmatprep.subr.bf16.mxu1 %v18327_v15  ;;  %v18406_v14 = vcombine.low %v1019_v62, %v1027_v63  ;;  %v18421_v15 = vcombine.high %v1034_v30, %v1042_v7  ;;  %v18423_v16 = vcombine.high %v1035_v11, %v1043_v12  ;;  %v1122_v62 = vld [vmem:[%s21082_s18 + $0x18d0] sm:$0xff]  ;;  %v1115_v63 = vld [vmem:[%s21082_s18 + $0x1898] sm:$0xff] }
 0x312   : > { %13483 = vmatpush1.bf16.msra.mxu0 %v18324_v17  ;;  %13811 = vmatpush1.bf16.msra.mxu1 %v18326_v21  ;;  %v1059_v17 = vld [vmem:[%s21082_s18 + $0x16d8] sm:$0xff]  ;;  %v18420_v21 = vcombine.low %v1034_v30, %v1042_v7  ;;  %v1130_v7 = vld [vmem:[%s21082_s18 + $0x1910] sm:$0xff] }
 0x313   : > { %13484 = vmatprep.subr.bf16.mxu0 %v18341_v22  ;;  %13812 = vmatprep.subr.bf16.mxu1 %v18343_v23  ;;  %v18422_v22 = vcombine.low %v1035_v11, %v1043_v12  ;;  %v18437_v23 = vcombine.high %v1050_v2, %v1058_v18  ;;  %v18439_v25 = vcombine.high %v1051_v54, %v1059_v17  ;;  %v1138_v11 = vld [vmem:[%s21082_s18 + $0x1950] sm:$0xff]  ;;  %v1131_v12 = vld [vmem:[%s21082_s18 + $0x1918] sm:$0xff] }
 0x316   : > { %13485 = vmatpush1.bf16.msra.mxu0 %v18340_v31  ;;  %13813 = vmatpush1.bf16.msra.mxu1 %v18342_v32  ;;  %v1075_v31 = vld [vmem:[%s21082_s18 + $0x1758] sm:$0xff]  ;;  %v18436_v32 = vcombine.low %v1050_v2, %v1058_v18  ;;  %v1146_v18 = vld [vmem:[%s21082_s18 + $0x1990] sm:$0xff] }
 0x317   : > { %13486 = vmatprep.subr.bf16.mxu0 %v18357_v0  ;;  %13814 = vmatprep.subr.bf16.mxu1 %v18359_v34  ;;  %v18438_v0 = vcombine.low %v1051_v54, %v1059_v17  ;;  %v18453_v34 = vcombine.high %v1066_v26, %v1074_v27  ;;  %v18455_v35 = vcombine.high %v1067_v29, %v1075_v31  ;;  %v1154_v54 = vld [vmem:[%s21082_s18 + $0x19d0] sm:$0xff]  ;;  %v1147_v17 = vld [vmem:[%s21082_s18 + $0x1998] sm:$0xff] }
 0x31a   : > { %13487 = vmatpush1.bf16.msra.mxu0 %v18356_v41  ;;  %13815 = vmatpush1.bf16.msra.mxu1 %v18358_v42  ;;  %v1091_v41 = vld [vmem:[%s21082_s18 + $0x17d8] sm:$0xff]  ;;  %v18452_v42 = vcombine.low %v1066_v26, %v1074_v27  ;;  %v1162_v27 = vld [vmem:[%s21082_s18 + $0x1a10] sm:$0xff] }
 0x31b   : > { %13488 = vmatprep.subr.bf16.mxu0 %v18373_v43  ;;  %13816 = vmatprep.subr.bf16.mxu1 %v18375_v44  ;;  %v18454_v43 = vcombine.low %v1067_v29, %v1075_v31  ;;  %v18469_v44 = vcombine.high %v1082_v36, %v1090_v37  ;;  %v18471_v46 = vcombine.high %v1083_v40, %v1091_v41  ;;  %v1170_v29 = vld [vmem:[%s21082_s18 + $0x1a50] sm:$0xff]  ;;  %v1163_v31 = vld [vmem:[%s21082_s18 + $0x1a18] sm:$0xff] }
 0x31e   : > { %13489 = vmatpush1.bf16.msra.mxu0 %v18372_v53  ;;  %13817 = vmatpush1.bf16.msra.mxu1 %v18374_v55  ;;  %v1107_v53 = vld [vmem:[%s21082_s18 + $0x1858] sm:$0xff]  ;;  %v18468_v55 = vcombine.low %v1082_v36, %v1090_v37  ;;  %v20893_v37 = vmov 1983009808  }
 0x31f   : > { %13490 = vmatprep.subr.bf16.mxu0 %v18389_v56  ;;  %13818 = vmatprep.subr.bf16.mxu1 %v18391_v57  ;;  %v18470_v56 = vcombine.low %v1083_v40, %v1091_v41  ;;  %v18485_v57 = vcombine.high %v1098_v47, %v1106_v48  ;;  %v18487_v58 = vcombine.high %v1099_v51, %v1107_v53  ;;  %v15375_v40 = vunpack.c.l.s4 %v20893_v37  ;;  %v1178_v41 = vld [vmem:[%s21082_s18 + $0x1a90] sm:$0xff] }
 0x322   : > { %13491 = vmatpush1.bf16.msra.mxu0 %v18388_v9  ;;  %13819 = vmatpush1.bf16.msra.mxu1 %v18390_v3  ;;  %v1123_v9 = vld [vmem:[%s21082_s18 + $0x18d8] sm:$0xff]  ;;  %v18484_v3 = vcombine.low %v1098_v47, %v1106_v48 }
 0x323   : > { %13492 = vmatprep.subr.bf16.mxu0 %v18405_v4  ;;  %13820 = vmatprep.subr.bf16.mxu1 %v18407_v5  ;;  %v18486_v4 = vcombine.low %v1099_v51, %v1107_v53  ;;  %v18501_v5 = vcombine.high %v1114_v61, %v1122_v62  ;;  %v18503_v30 = vcombine.high %v1115_v63, %v1123_v9  ;;  %v15376_v51 = vunpack.c.0.s8 %v15375_v40 }
 0x326   : > { %13493 = vmatpush1.bf16.msra.mxu0 %v18404_v13  ;;  %13821 = vmatpush1.bf16.msra.mxu1 %v18406_v14  ;;  %v1139_v13 = vld [vmem:[%s21082_s18 + $0x1958] sm:$0xff]  ;;  %v18500_v14 = vcombine.low %v1114_v61, %v1122_v62 }
 0x327   : > { %13494 = vmatprep.subr.bf16.mxu0 %v18421_v15  ;;  %13822 = vmatprep.subr.bf16.mxu1 %v18423_v16  ;;  %v18502_v15 = vcombine.low %v1115_v63, %v1123_v9  ;;  %v18517_v16 = vcombine.high %v1130_v7, %v1138_v11  ;;  %v18519_v2 = vcombine.high %v1131_v12, %v1139_v13 }
 0x32a   : > { %13495 = vmatpush1.bf16.msra.mxu0 %v18420_v21  ;;  %13823 = vmatpush1.bf16.msra.mxu1 %v18422_v22  ;;  %v1155_v21 = vld [vmem:[%s21082_s18 + $0x19d8] sm:$0xff]  ;;  %v18516_v22 = vcombine.low %v1130_v7, %v1138_v11 }
 0x32b   : > { %13496 = vmatprep.subr.bf16.mxu0 %v18437_v23  ;;  %13824 = vmatprep.subr.bf16.mxu1 %v18439_v25  ;;  %v18518_v23 = vcombine.low %v1131_v12, %v1139_v13  ;;  %v18533_v25 = vcombine.high %v1146_v18, %v1154_v54  ;;  %v18535_v26 = vcombine.high %v1147_v17, %v1155_v21  ;;  %v1211_v12 = vld [vmem:[%s21082_s18 + $0x1b98] sm:$0xff] }
 0x32c   : > { %v1219_v13 = vld [vmem:[%s21082_s18 + $0x1bd8] sm:$0xff] }
 0x32d   : > { %v18598_v37 = vcombine.low %v1211_v12, %v1219_v13 }
 0x32e   : > { %13497 = vmatpush1.bf16.msra.mxu0 %v18436_v32  ;;  %13825 = vmatpush1.bf16.msra.mxu1 %v18438_v0  ;;  %v1171_v32 = vld [vmem:[%s21082_s18 + $0x1a58] sm:$0xff]  ;;  %v18532_v0 = vcombine.low %v1146_v18, %v1154_v54 }
 0x32f   : > { %13498 = vmatprep.subr.bf16.mxu0 %v18453_v34  ;;  %13826 = vmatprep.subr.bf16.mxu1 %v18455_v35  ;;  %v18534_v34 = vcombine.low %v1147_v17, %v1155_v21  ;;  %v18549_v35 = vcombine.high %v1162_v27, %v1170_v29  ;;  %v18551_v36 = vcombine.high %v1163_v31, %v1171_v32 }
 0x330   : > { %v18550_v47 = vcombine.low %v1163_v31, %v1171_v32  ;;  %v1227_v32 = vld [vmem:[%s21082_s18 + $0x1c18] sm:$0xff] }
 0x332   : > { %13499 = vmatpush1.bf16.msra.mxu0 %v18452_v42  ;;  %13827 = vmatpush1.bf16.msra.mxu1 %v18454_v43  ;;  %v1186_v42 = vld [vmem:[%s21082_s18 + $0x1ad0] sm:$0xff]  ;;  %v1179_v43 = vld [vmem:[%s21082_s18 + $0x1a98] sm:$0xff] }
 0x333   : > { %13500 = vmatprep.subr.bf16.mxu0 %v18469_v44  ;;  %13828 = vmatprep.subr.bf16.mxu1 %v18471_v46  ;;  %v1187_v44 = vld [vmem:[%s21082_s18 + $0x1ad8] sm:$0xff]  ;;  %v18548_v46 = vcombine.low %v1162_v27, %v1170_v29  ;;  %v18565_v48 = vcombine.high %v1178_v41, %v1186_v42  ;;  %v18564_v61 = vcombine.low %v1178_v41, %v1186_v42  ;;  %v1226_v27 = vld [vmem:[%s21082_s18 + $0x1c10] sm:$0xff] }
 0x334   : > { %v18567_v53 = vcombine.high %v1179_v43, %v1187_v44  ;;  %v18566_v62 = vcombine.low %v1179_v43, %v1187_v44  ;;  %v1234_v29 = vld [vmem:[%s21082_s18 + $0x1c50] sm:$0xff] }
 0x335   : > { %v18613_v40 = vcombine.high %v1226_v27, %v1234_v29  ;;  %v1242_v42 = vld [vmem:[%s21082_s18 + $0x1c90] sm:$0xff] }
 0x336   : > { %13501 = vmatpush1.bf16.msra.mxu0 %v18468_v55  ;;  %13829 = vmatpush1.bf16.msra.mxu1 %v18470_v56  ;;  %v1194_v55 = vld [vmem:[%s21082_s18 + $0x1b10] sm:$0xff] }
 0x337   : > { %13511 = vmatprep.subr.bf16.mxu0 %v18485_v57  ;;  %13839 = vmatprep.subr.bf16.mxu1 %v18487_v58  ;;  %v1202_v56 = vld [vmem:[%s21082_s18 + $0x1b50] sm:$0xff]  ;;  %v1195_v57 = vld [vmem:[%s21082_s18 + $0x1b18] sm:$0xff] }
 0x338   : > { %v1203_v58 = vld [vmem:[%s21082_s18 + $0x1b58] sm:$0xff]  ;;  %v18581_v63 = vcombine.high %v1194_v55, %v1202_v56  ;;  %v1250_v43 = vld [vmem:[%s21082_s18 + $0x1cd0] sm:$0xff] }
 0x339   : > { %13503 = vmatmul.mubr.bf16.vlgmr.msra.gmra.mrb[4].mxu0 %v21348_v59  ;;  %13831 = vmatmul.mubr.bf16.vlgmr.msra.gmra.mrb[4].mxu1 %v21348_v59  ;;  %v18582_v21 = vcombine.low %v1195_v57, %v1203_v58 }
 0x33a   : > { %13512 = vmatpush1.bf16.msra.mxu0 %v18484_v3  ;;  %13840 = vmatpush1.bf16.msra.mxu1 %v18486_v4  ;;  %v21975_v3 = vsub.s32 %v15376_v51, %v21116_v45  ;;  %v18583_v4 = vcombine.high %v1195_v57, %v1203_v58  ;;  %v1266_v57 = vld [vmem:[%s21082_s18 + $0x1d50] sm:$0xff]  ;;  %v1259_v58 = vld [vmem:[%s21082_s18 + $0x1d18] sm:$0xff] }
 0x33b   : > { %13513 = vmatprep.subr.bf16.mxu0 %v18501_v5  ;;  %13841 = vmatprep.subr.bf16.mxu1 %v18503_v30  ;;  %v1210_v5 = vld [vmem:[%s21082_s18 + $0x1b90] sm:$0xff] }
 0x33c   : > { %13543 = vmatprep.mubr.bf16.mxu0 %v21356_v6  ;;  %13871 = vmatprep.mubr.bf16.mxu1 %v21356_v6  ;;  %v1218_v30 = vld [vmem:[%s21082_s18 + $0x1bd0] sm:$0xff] }
 0x33e   : > { %13514 = vmatpush1.bf16.msra.mxu0 %v18500_v14  ;;  %13842 = vmatpush1.bf16.msra.mxu1 %v18502_v15 }
 0x33f   : > { %13515 = vmatprep.subr.bf16.mxu0 %v18517_v16  ;;  %13843 = vmatprep.subr.bf16.mxu1 %v18519_v2  ;;  %v18580_v2 = vcombine.low %v1194_v55, %v1202_v56  ;;  %v1258_v56 = vld [vmem:[%s21082_s18 + $0x1d10] sm:$0xff] }
 0x342   : > { %13516 = vmatpush1.bf16.msra.mxu0 %v18516_v22  ;;  %13844 = vmatpush1.bf16.msra.mxu1 %v18518_v23  ;;  %v18597_v22 = vcombine.high %v1210_v5, %v1218_v30 }
 0x343   : > { %13517 = vmatprep.subr.bf16.mxu0 %v18533_v25  ;;  %13845 = vmatprep.subr.bf16.mxu1 %v18535_v26  ;;  %v18599_v26 = vcombine.high %v1211_v12, %v1219_v13  ;;  %v18644_v12 = vcombine.low %v1258_v56, %v1266_v57 }
 0x346   : > { %13518 = vmatpush1.bf16.msra.mxu0 %v18532_v0  ;;  %13846 = vmatpush1.bf16.msra.mxu1 %v18534_v34  ;;  %v1235_v0 = vld [vmem:[%s21082_s18 + $0x1c58] sm:$0xff]  ;;  %v324_v34 = vld [vmem:[#allocation2] sm:$0xff] }
 0x347   : > { %13519 = vmatprep.subr.bf16.mxu0 %v18549_v35  ;;  %13847 = vmatprep.subr.bf16.mxu1 %v18551_v36  ;;  %v18596_v35 = vcombine.low %v1210_v5, %v1218_v30  ;;  %v18615_v41 = vcombine.high %v1227_v32, %v1235_v0  ;;  %v18614_v51 = vcombine.low %v1227_v32, %v1235_v0  ;;  %v1274_v5 = vld [vmem:[%s21082_s18 + $0x1d90] sm:$0xff] }
 0x348   : > { %v1282_v30 = vld [vmem:[%s21082_s18 + $0x1dd0] sm:$0xff] }
 0x34a   : > { %13520 = vmatpush1.bf16.msra.mxu0 %v18548_v46  ;;  %13848 = vmatpush1.bf16.msra.mxu1 %v18550_v47  ;;  %v1243_v46 = vld [vmem:[%s21082_s18 + $0x1c98] sm:$0xff] }
 0x34b   : > { %13521 = vmatprep.subr.bf16.mxu0 %v18565_v48  ;;  %13849 = vmatprep.subr.bf16.mxu1 %v18567_v53  ;;  %v1251_v47 = vld [vmem:[%s21082_s18 + $0x1cd8] sm:$0xff]  ;;  %v18612_v48 = vcombine.low %v1226_v27, %v1234_v29  ;;  %v18629_v53 = vcombine.high %v1242_v42, %v1250_v43 }
 0x34c   : > { %v13053_v9 = vpop.f32.mrb[0].mxu0  ;;  %v13381_v7 = vpop.f32.mrb[0].mxu1  ;;  %v18631_v55 = vcombine.high %v1243_v46, %v1251_v47  ;;  %v1307_v27 = vld [vmem:[%s21082_s18 + $0x1e98] sm:$0xff] }
 0x34d   : > { %v13055_v11 = vpop.f32.mrb[1].mxu0  ;;  %v13383_v15 = vpop.f32.mrb[1].mxu1  ;;  %v1315_v29 = vld [vmem:[%s21082_s18 + $0x1ed8] sm:$0xff] }
 0x34e   : > { %v15372_v14 = vcombine.low %v13053_v9, %v13055_v11  ;;  %v13057_v16 = vpop.f32.mrb[2].mxu0  ;;  %13522 = vmatpush1.bf16.msra.mxu0 %v18564_v61  ;;  %v15373_v18 = vcombine.low %v13381_v7, %v13383_v15  ;;  %v13385_v54 = vpop.f32.mrb[2].mxu1  ;;  %13850 = vmatpush1.bf16.msra.mxu1 %v18566_v62  ;;  %v1267_v61 = vld [vmem:[%s21082_s18 + $0x1d58] sm:$0xff]  ;;  %v18628_v62 = vcombine.low %v1242_v42, %v1250_v43 }
 0x34f   : > { %v13058_v17 = vpop.f32.mrb[3].mxu0  ;;  %13523 = vmatprep.subr.bf16.mxu0 %v18581_v63  ;;  %v13386_v25 = vpop.f32.mrb[3].mxu1  ;;  %13851 = vmatprep.subr.bf16.mxu1 %v18583_v4  ;;  %v18630_v63 = vcombine.low %v1243_v46, %v1251_v47  ;;  %v18645_v9 = vcombine.high %v1258_v56, %v1266_v57  ;;  %v18647_v4 = vcombine.high %v1259_v58, %v1267_v61  ;;  %v1275_v7 = vld [vmem:[%s21082_s18 + $0x1d98] sm:$0xff]  ;;  %v1290_v16 = vld [vmem:[%s21082_s18 + $0x1e10] sm:$0xff] }
 0x350   : > { %v15380_v23 = vrot.slane %v15372_v14, %v21975_v3  ;;  %v15387_v31 = vrot.slane %v15373_v18, %v21975_v3  ;;  %v1283_v11 = vld [vmem:[%s21082_s18 + $0x1dd8] sm:$0xff]  ;;  %v18646_v13 = vcombine.low %v1259_v58, %v1267_v61  ;;  %v18661_v14 = vcombine.high %v1274_v5, %v1282_v30  ;;  %v1306_v25 = vld [vmem:[%s21082_s18 + $0x1e90] sm:$0xff] }
 0x351   : > { %v18663_v15 = vcombine.high %v1275_v7, %v1283_v11  ;;  %v1291_v18 = vld [vmem:[%s21082_s18 + $0x1e18] sm:$0xff]  ;;  %v18660_v17 = vcombine.low %v1274_v5, %v1282_v30  ;;  %v18694_v42 = vcombine.low %v1307_v27, %v1315_v29  ;;  %v1338_v46 = vld [vmem:[%s21082_s18 + $0x1f90] sm:$0xff] }
 0x352   : > { %13524 = vmatpush1.bf16.msra.mxu0 %v18580_v2  ;;  %v15388_v36 = vcombine.low %v15380_v23, %v15387_v31  ;;  %13852 = vmatpush1.bf16.msra.mxu1 %v18582_v21  ;;  %v1298_v2 = vld [vmem:[%s21082_s18 + $0x1e50] sm:$0xff]  ;;  %v1299_v54 = vld [vmem:[%s21082_s18 + $0x1e58] sm:$0xff]  ;;  %v18662_v21 = vcombine.low %v1275_v7, %v1283_v11 }
 0x353   : > { %13525 = vmatprep.subr.bf16.mxu0 %v18597_v22  ;;  %13853 = vmatprep.subr.bf16.mxu1 %v18599_v26  ;;  %v18677_v22 = vcombine.high %v1290_v16, %v1298_v2  ;;  %v18679_v23 = vcombine.high %v1291_v18, %v1299_v54  ;;  %v1314_v26 = vld [vmem:[%s21082_s18 + $0x1ed0] sm:$0xff]  ;;  %v18676_v31 = vcombine.low %v1290_v16, %v1298_v2 }
 0x354   : > { %v15444_v44 = vadd.f32 %v15388_v36, %v324_v34  ;;  %v18678_v32 = vcombine.low %v1291_v18, %v1299_v54  ;;  %v18693_v0 = vcombine.high %v1306_v25, %v1314_v26  ;;  %v18695_v34 = vcombine.high %v1307_v27, %v1315_v29  ;;  %v1330_v36 = vld [vmem:[%s21082_s18 + $0x1f50] sm:$0xff] }
 0x355   : > { %v1346_v47 = vld [vmem:[%s21082_s18 + $0x1fd0] sm:$0xff] }
 0x356   : > { %13526 = vmatpush1.bf16.msra.mxu0 %v18596_v35  ;;  %15448 = vst [vmem:[#allocation2] sm:$0xff] %v15444_v44  ;;  %13854 = vmatpush1.bf16.msra.mxu1 %v18598_v37  ;;  %v1322_v35 = vld [vmem:[%s21082_s18 + $0x1f10] sm:$0xff]  ;;  %v1323_v37 = vld [vmem:[%s21082_s18 + $0x1f18] sm:$0xff]  ;;  %v18725_v56 = vcombine.high %v1338_v46, %v1346_v47 }
 0x357   : > { %13527 = vmatprep.subr.bf16.mxu0 %v18613_v40  ;;  %13855 = vmatprep.subr.bf16.mxu1 %v18615_v41  ;;  %v1331_v40 = vld [vmem:[%s21082_s18 + $0x1f58] sm:$0xff]  ;;  %v18692_v41 = vcombine.low %v1306_v25, %v1314_v26  ;;  %v18709_v43 = vcombine.high %v1322_v35, %v1330_v36  ;;  %v1354_v58 = vld [vmem:[%s21082_s18 + $0x2010] sm:$0xff] }
 0x358   : > { %v18711_v44 = vcombine.high %v1323_v37, %v1331_v40  ;;  %v1362_v61 = vld [vmem:[%s21082_s18 + $0x2050] sm:$0xff] }
 0x359   : > { %v18741_v5 = vcombine.high %v1354_v58, %v1362_v61  ;;  %v1370_v7 = vld [vmem:[%s21082_s18 + $0x2090] sm:$0xff] }
 0x35a   : > { %13528 = vmatpush1.bf16.msra.mxu0 %v18612_v48  ;;  %13856 = vmatpush1.bf16.msra.mxu1 %v18614_v51  ;;  %v1339_v48 = vld [vmem:[%s21082_s18 + $0x1f98] sm:$0xff]  ;;  %v1378_v11 = vld [vmem:[%s21082_s18 + $0x20d0] sm:$0xff] }
 0x35b   : > { %13529 = vmatprep.subr.bf16.mxu0 %v18629_v53  ;;  %13857 = vmatprep.subr.bf16.mxu1 %v18631_v55  ;;  %v1347_v51 = vld [vmem:[%s21082_s18 + $0x1fd8] sm:$0xff]  ;;  %v18708_v53 = vcombine.low %v1322_v35, %v1330_v36  ;;  %v18710_v55 = vcombine.low %v1323_v37, %v1331_v40  ;;  %v18757_v16 = vcombine.high %v1370_v7, %v1378_v11  ;;  %v1386_v18 = vld [vmem:[%s21082_s18 + $0x2110] sm:$0xff] }
 0x35c   : > { %v18727_v57 = vcombine.high %v1339_v48, %v1347_v51  ;;  %v1394_v54 = vld [vmem:[%s21082_s18 + $0x2150] sm:$0xff] }
 0x35d   : > { %v18773_v25 = vcombine.high %v1386_v18, %v1394_v54  ;;  %v1402_v27 = vld [vmem:[%s21082_s18 + $0x2190] sm:$0xff] }
 0x35e   : > { %13530 = vmatpush1.bf16.msra.mxu0 %v18628_v62  ;;  %13858 = vmatpush1.bf16.msra.mxu1 %v18630_v63  ;;  %v1355_v62 = vld [vmem:[%s21082_s18 + $0x2018] sm:$0xff]  ;;  %v1410_v29 = vld [vmem:[%s21082_s18 + $0x21d0] sm:$0xff] }
 0x35f   : > { %13531 = vmatprep.subr.bf16.mxu0 %v18645_v9  ;;  %13859 = vmatprep.subr.bf16.mxu1 %v18647_v4  ;;  %v1363_v63 = vld [vmem:[%s21082_s18 + $0x2058] sm:$0xff]  ;;  %v18724_v9 = vcombine.low %v1338_v46, %v1346_v47  ;;  %v18726_v4 = vcombine.low %v1339_v48, %v1347_v51  ;;  %v18789_v35 = vcombine.high %v1402_v27, %v1410_v29  ;;  %v1418_v37 = vld [vmem:[%s21082_s18 + $0x2210] sm:$0xff] }
 0x360   : > { %v18743_v30 = vcombine.high %v1355_v62, %v1363_v63  ;;  %v1426_v40 = vld [vmem:[%s21082_s18 + $0x2250] sm:$0xff] }
 0x361   : > { %v18805_v46 = vcombine.high %v1418_v37, %v1426_v40  ;;  %v1434_v48 = vld [vmem:[%s21082_s18 + $0x2290] sm:$0xff] }
 0x362   : > { %13532 = vmatpush1.bf16.msra.mxu0 %v18644_v12  ;;  %13860 = vmatpush1.bf16.msra.mxu1 %v18646_v13  ;;  %v1371_v12 = vld [vmem:[%s21082_s18 + $0x2098] sm:$0xff]  ;;  %v1442_v51 = vld [vmem:[%s21082_s18 + $0x22d0] sm:$0xff] }
 0x363   : > { %13533 = vmatprep.subr.bf16.mxu0 %v18661_v14  ;;  %13861 = vmatprep.subr.bf16.mxu1 %v18663_v15  ;;  %v1379_v13 = vld [vmem:[%s21082_s18 + $0x20d8] sm:$0xff]  ;;  %v18740_v14 = vcombine.low %v1354_v58, %v1362_v61  ;;  %v18742_v15 = vcombine.low %v1355_v62, %v1363_v63  ;;  %v18821_v58 = vcombine.high %v1434_v48, %v1442_v51  ;;  %v1450_v62 = vld [vmem:[%s21082_s18 + $0x2310] sm:$0xff] }
 0x364   : > { %v18759_v2 = vcombine.high %v1371_v12, %v1379_v13  ;;  %v1458_v63 = vld [vmem:[%s21082_s18 + $0x2350] sm:$0xff] }
 0x366   : > { %13534 = vmatpush1.bf16.msra.mxu0 %v18660_v17  ;;  %13862 = vmatpush1.bf16.msra.mxu1 %v18662_v21  ;;  %v1387_v17 = vld [vmem:[%s21082_s18 + $0x2118] sm:$0xff] }
 0x367   : > { %13535 = vmatprep.subr.bf16.mxu0 %v18677_v22  ;;  %13863 = vmatprep.subr.bf16.mxu1 %v18679_v23  ;;  %v1395_v21 = vld [vmem:[%s21082_s18 + $0x2158] sm:$0xff]  ;;  %v18756_v22 = vcombine.low %v1370_v7, %v1378_v11  ;;  %v18758_v23 = vcombine.low %v1371_v12, %v1379_v13  ;;  %v18837_v7 = vcombine.high %v1450_v62, %v1458_v63  ;;  %v1466_v12 = vld [vmem:[%s21082_s18 + $0x2390] sm:$0xff] }
 0x368   : > { %v18775_v26 = vcombine.high %v1387_v17, %v1395_v21  ;;  %v1474_v13 = vld [vmem:[%s21082_s18 + $0x23d0] sm:$0xff] }
 0x36a   : > { %13536 = vmatpush1.bf16.msra.mxu0 %v18676_v31  ;;  %13864 = vmatpush1.bf16.msra.mxu1 %v18678_v32  ;;  %v1403_v31 = vld [vmem:[%s21082_s18 + $0x2198] sm:$0xff] }
 0x36b   : > { %13537 = vmatprep.subr.bf16.mxu0 %v18693_v0  ;;  %13865 = vmatprep.subr.bf16.mxu1 %v18695_v34  ;;  %v1411_v32 = vld [vmem:[%s21082_s18 + $0x21d8] sm:$0xff]  ;;  %v18772_v0 = vcombine.low %v1386_v18, %v1394_v54  ;;  %v18774_v34 = vcombine.low %v1387_v17, %v1395_v21  ;;  %v18853_v18 = vcombine.high %v1466_v12, %v1474_v13  ;;  %v1482_v17 = vld [vmem:[%s21082_s18 + $0x2410] sm:$0xff] }
 0x36c   : > { %v18791_v36 = vcombine.high %v1403_v31, %v1411_v32  ;;  %v1490_v21 = vld [vmem:[%s21082_s18 + $0x2450] sm:$0xff] }
 0x36e   : > { %13538 = vmatpush1.bf16.msra.mxu0 %v18692_v41  ;;  %13866 = vmatpush1.bf16.msra.mxu1 %v18694_v42  ;;  %v1419_v41 = vld [vmem:[%s21082_s18 + $0x2218] sm:$0xff] }
 0x36f   : > { %13539 = vmatprep.subr.bf16.mxu0 %v18709_v43  ;;  %13867 = vmatprep.subr.bf16.mxu1 %v18711_v44  ;;  %v1427_v42 = vld [vmem:[%s21082_s18 + $0x2258] sm:$0xff]  ;;  %v18788_v43 = vcombine.low %v1402_v27, %v1410_v29  ;;  %v18790_v44 = vcombine.low %v1403_v31, %v1411_v32  ;;  %v18869_v27 = vcombine.high %v1482_v17, %v1490_v21  ;;  %v1498_v31 = vld [vmem:[%s21082_s18 + $0x2490] sm:$0xff] }
 0x370   : > { %v18807_v47 = vcombine.high %v1419_v41, %v1427_v42  ;;  %v1506_v32 = vld [vmem:[%s21082_s18 + $0x24d0] sm:$0xff] }
 0x372   : > { %13540 = vmatpush1.bf16.msra.mxu0 %v18708_v53  ;;  %13868 = vmatpush1.bf16.msra.mxu1 %v18710_v55  ;;  %v1435_v53 = vld [vmem:[%s21082_s18 + $0x2298] sm:$0xff] }
 0x373   : > { %13541 = vmatprep.subr.bf16.mxu0 %v18725_v56  ;;  %13869 = vmatprep.subr.bf16.mxu1 %v18727_v57  ;;  %v1443_v55 = vld [vmem:[%s21082_s18 + $0x22d8] sm:$0xff]  ;;  %v18804_v56 = vcombine.low %v1418_v37, %v1426_v40  ;;  %v18806_v57 = vcombine.low %v1419_v41, %v1427_v42  ;;  %v18885_v37 = vcombine.high %v1498_v31, %v1506_v32  ;;  %v1514_v41 = vld [vmem:[%s21082_s18 + $0x2510] sm:$0xff] }
 0x374   : > { %v18823_v61 = vcombine.high %v1435_v53, %v1443_v55  ;;  %v1522_v42 = vld [vmem:[%s21082_s18 + $0x2550] sm:$0xff] }
 0x376   : > { %13542 = vmatpush1.bf16.msra.mxu0 %v18724_v9  ;;  %13870 = vmatpush1.bf16.msra.mxu1 %v18726_v4  ;;  %v1451_v9 = vld [vmem:[%s21082_s18 + $0x2318] sm:$0xff] }
 0x377   : > { %13552 = vmatprep.subr.bf16.mxu0 %v18741_v5  ;;  %13880 = vmatprep.subr.bf16.mxu1 %v18743_v30  ;;  %v1459_v4 = vld [vmem:[%s21082_s18 + $0x2358] sm:$0xff]  ;;  %v18820_v5 = vcombine.low %v1434_v48, %v1442_v51  ;;  %v18822_v30 = vcombine.low %v1435_v53, %v1443_v55  ;;  %v18901_v48 = vcombine.high %v1514_v41, %v1522_v42  ;;  %v1530_v53 = vld [vmem:[%s21082_s18 + $0x2590] sm:$0xff] }
 0x378   : > { %v18839_v11 = vcombine.high %v1451_v9, %v1459_v4  ;;  %v1538_v55 = vld [vmem:[%s21082_s18 + $0x25d0] sm:$0xff] }
 0x379   : > { %13544 = vmatmul.mubr.bf16.vlgmr.msra.gmra.mrb[4].mxu0 %v21433_v20  ;;  %13872 = vmatmul.mubr.bf16.vlgmr.msra.gmra.mrb[4].mxu1 %v21433_v20 }
 0x37a   : > { %13553 = vmatpush1.bf16.msra.mxu0 %v18740_v14  ;;  %13881 = vmatpush1.bf16.msra.mxu1 %v18742_v15  ;;  %v1467_v14 = vld [vmem:[%s21082_s18 + $0x2398] sm:$0xff] }
 0x37b   : > { %13554 = vmatprep.subr.bf16.mxu0 %v18757_v16  ;;  %13882 = vmatprep.subr.bf16.mxu1 %v18759_v2  ;;  %v1475_v15 = vld [vmem:[%s21082_s18 + $0x23d8] sm:$0xff]  ;;  %v18836_v16 = vcombine.low %v1450_v62, %v1458_v63  ;;  %v18838_v2 = vcombine.low %v1451_v9, %v1459_v4  ;;  %v18917_v62 = vcombine.high %v1530_v53, %v1538_v55  ;;  %v1546_v9 = vld [vmem:[%s21082_s18 + $0x2610] sm:$0xff] }
 0x37c   : > { %13584 = vmatprep.mubr.bf16.mxu0 %v21440_v60  ;;  %13912 = vmatprep.mubr.bf16.mxu1 %v21440_v60  ;;  %v18855_v54 = vcombine.high %v1467_v14, %v1475_v15  ;;  %v1554_v4 = vld [vmem:[%s21082_s18 + $0x2650] sm:$0xff] }
 0x37e   : > { %13555 = vmatpush1.bf16.msra.mxu0 %v18756_v22  ;;  %13883 = vmatpush1.bf16.msra.mxu1 %v18758_v23  ;;  %v1483_v22 = vld [vmem:[%s21082_s18 + $0x2418] sm:$0xff] }
 0x37f   : > { %13556 = vmatprep.subr.bf16.mxu0 %v18773_v25  ;;  %13884 = vmatprep.subr.bf16.mxu1 %v18775_v26  ;;  %v1491_v23 = vld [vmem:[%s21082_s18 + $0x2458] sm:$0xff]  ;;  %v18852_v25 = vcombine.low %v1466_v12, %v1474_v13  ;;  %v18854_v26 = vcombine.low %v1467_v14, %v1475_v15  ;;  %v18933_v12 = vcombine.high %v1546_v9, %v1554_v4  ;;  %v1562_v14 = vld [vmem:[%s21082_s18 + $0x2690] sm:$0xff] }
 0x380   : > { %v18871_v29 = vcombine.high %v1483_v22, %v1491_v23  ;;  %v1570_v15 = vld [vmem:[%s21082_s18 + $0x26d0] sm:$0xff] }
 0x382   : > { %13557 = vmatpush1.bf16.msra.mxu0 %v18772_v0  ;;  %13885 = vmatpush1.bf16.msra.mxu1 %v18774_v34  ;;  %v1499_v0 = vld [vmem:[%s21082_s18 + $0x2498] sm:$0xff] }
 0x383   : > { %13558 = vmatprep.subr.bf16.mxu0 %v18789_v35  ;;  %13886 = vmatprep.subr.bf16.mxu1 %v18791_v36  ;;  %v1507_v34 = vld [vmem:[%s21082_s18 + $0x24d8] sm:$0xff]  ;;  %v18868_v35 = vcombine.low %v1482_v17, %v1490_v21  ;;  %v18870_v36 = vcombine.low %v1483_v22, %v1491_v23  ;;  %v18949_v17 = vcombine.high %v1562_v14, %v1570_v15  ;;  %v1578_v22 = vld [vmem:[%s21082_s18 + $0x2710] sm:$0xff] }
 0x384   : > { %v18887_v40 = vcombine.high %v1499_v0, %v1507_v34  ;;  %v1586_v23 = vld [vmem:[%s21082_s18 + $0x2750] sm:$0xff] }
 0x386   : > { %13559 = vmatpush1.bf16.msra.mxu0 %v18788_v43  ;;  %13887 = vmatpush1.bf16.msra.mxu1 %v18790_v44  ;;  %v1515_v43 = vld [vmem:[%s21082_s18 + $0x2518] sm:$0xff] }
 0x387   : > { %13560 = vmatprep.subr.bf16.mxu0 %v18805_v46  ;;  %13888 = vmatprep.subr.bf16.mxu1 %v18807_v47  ;;  %v1523_v44 = vld [vmem:[%s21082_s18 + $0x2558] sm:$0xff]  ;;  %v18884_v46 = vcombine.low %v1498_v31, %v1506_v32  ;;  %v18886_v47 = vcombine.low %v1499_v0, %v1507_v34  ;;  %v18965_v31 = vcombine.high %v1578_v22, %v1586_v23  ;;  %v1594_v0 = vld [vmem:[%s21082_s18 + $0x2790] sm:$0xff] }
 0x388   : > { %v18903_v51 = vcombine.high %v1515_v43, %v1523_v44  ;;  %v1602_v34 = vld [vmem:[%s21082_s18 + $0x27d0] sm:$0xff] }
 0x38a   : > { %13561 = vmatpush1.bf16.msra.mxu0 %v18804_v56  ;;  %13889 = vmatpush1.bf16.msra.mxu1 %v18806_v57  ;;  %v1531_v56 = vld [vmem:[%s21082_s18 + $0x2598] sm:$0xff] }
 0x38b   : > { %13562 = vmatprep.subr.bf16.mxu0 %v18821_v58  ;;  %13890 = vmatprep.subr.bf16.mxu1 %v18823_v61  ;;  %v1539_v57 = vld [vmem:[%s21082_s18 + $0x25d8] sm:$0xff]  ;;  %v18900_v58 = vcombine.low %v1514_v41, %v1522_v42  ;;  %v18902_v61 = vcombine.low %v1515_v43, %v1523_v44  ;;  %v18981_v41 = vcombine.high %v1594_v0, %v1602_v34  ;;  %v1610_v43 = vld [vmem:[%s21082_s18 + $0x2810] sm:$0xff] }
 0x38c   : > { %v18919_v63 = vcombine.high %v1531_v56, %v1539_v57  ;;  %v1618_v44 = vld [vmem:[%s21082_s18 + $0x2850] sm:$0xff] }
 0x38e   : > { %13563 = vmatpush1.bf16.msra.mxu0 %v18820_v5  ;;  %13891 = vmatpush1.bf16.msra.mxu1 %v18822_v30  ;;  %v1547_v5 = vld [vmem:[%s21082_s18 + $0x2618] sm:$0xff] }
 0x38f   : > { %13564 = vmatprep.subr.bf16.mxu0 %v18837_v7  ;;  %13892 = vmatprep.subr.bf16.mxu1 %v18839_v11  ;;  %v1555_v30 = vld [vmem:[%s21082_s18 + $0x2658] sm:$0xff]  ;;  %v18916_v7 = vcombine.low %v1530_v53, %v1538_v55  ;;  %v18918_v11 = vcombine.low %v1531_v56, %v1539_v57  ;;  %v18997_v53 = vcombine.high %v1610_v43, %v1618_v44  ;;  %v1626_v56 = vld [vmem:[%s21082_s18 + $0x2890] sm:$0xff] }
 0x390   : > { %v18935_v13 = vcombine.high %v1547_v5, %v1555_v30  ;;  %v1634_v57 = vld [vmem:[%s21082_s18 + $0x28d0] sm:$0xff] }
 0x392   : > { %13565 = vmatpush1.bf16.msra.mxu0 %v18836_v16  ;;  %13893 = vmatpush1.bf16.msra.mxu1 %v18838_v2  ;;  %v1563_v16 = vld [vmem:[%s21082_s18 + $0x2698] sm:$0xff] }
 0x393   : > { %13566 = vmatprep.subr.bf16.mxu0 %v18853_v18  ;;  %13894 = vmatprep.subr.bf16.mxu1 %v18855_v54  ;;  %v1571_v2 = vld [vmem:[%s21082_s18 + $0x26d8] sm:$0xff]  ;;  %v18932_v18 = vcombine.low %v1546_v9, %v1554_v4  ;;  %v18934_v54 = vcombine.low %v1547_v5, %v1555_v30  ;;  %v19013_v9 = vcombine.high %v1626_v56, %v1634_v57  ;;  %v1642_v5 = vld [vmem:[%s21082_s18 + $0x2910] sm:$0xff] }
 0x394   : > { %v18951_v21 = vcombine.high %v1563_v16, %v1571_v2  ;;  %v1650_v30 = vld [vmem:[%s21082_s18 + $0x2950] sm:$0xff] }
 0x396   : > { %13567 = vmatpush1.bf16.msra.mxu0 %v18852_v25  ;;  %13895 = vmatpush1.bf16.msra.mxu1 %v18854_v26  ;;  %v1579_v25 = vld [vmem:[%s21082_s18 + $0x2718] sm:$0xff] }
 0x397   : > { %13568 = vmatprep.subr.bf16.mxu0 %v18869_v27  ;;  %13896 = vmatprep.subr.bf16.mxu1 %v18871_v29  ;;  %v1587_v26 = vld [vmem:[%s21082_s18 + $0x2758] sm:$0xff]  ;;  %v18948_v27 = vcombine.low %v1562_v14, %v1570_v15  ;;  %v18950_v29 = vcombine.low %v1563_v16, %v1571_v2  ;;  %v19029_v14 = vcombine.high %v1642_v5, %v1650_v30  ;;  %v1658_v16 = vld [vmem:[%s21082_s18 + $0x2990] sm:$0xff] }
 0x398   : > { %v18967_v32 = vcombine.high %v1579_v25, %v1587_v26  ;;  %v1666_v2 = vld [vmem:[%s21082_s18 + $0x29d0] sm:$0xff] }
 0x39a   : > { %13569 = vmatpush1.bf16.msra.mxu0 %v18868_v35  ;;  %13897 = vmatpush1.bf16.msra.mxu1 %v18870_v36  ;;  %v1595_v35 = vld [vmem:[%s21082_s18 + $0x2798] sm:$0xff] }
 0x39b   : > { %13570 = vmatprep.subr.bf16.mxu0 %v18885_v37  ;;  %13898 = vmatprep.subr.bf16.mxu1 %v18887_v40  ;;  %v1603_v36 = vld [vmem:[%s21082_s18 + $0x27d8] sm:$0xff]  ;;  %v18964_v37 = vcombine.low %v1578_v22, %v1586_v23  ;;  %v18966_v40 = vcombine.low %v1579_v25, %v1587_v26  ;;  %v19045_v22 = vcombine.high %v1658_v16, %v1666_v2  ;;  %v1674_v25 = vld [vmem:[%s21082_s18 + $0x2a10] sm:$0xff] }
 0x39c   : > { %v18983_v42 = vcombine.high %v1595_v35, %v1603_v36  ;;  %v1682_v26 = vld [vmem:[%s21082_s18 + $0x2a50] sm:$0xff] }
 0x39e   : > { %13571 = vmatpush1.bf16.msra.mxu0 %v18884_v46  ;;  %13899 = vmatpush1.bf16.msra.mxu1 %v18886_v47  ;;  %v1611_v46 = vld [vmem:[%s21082_s18 + $0x2818] sm:$0xff] }
 0x39f   : > { %13572 = vmatprep.subr.bf16.mxu0 %v18901_v48  ;;  %13900 = vmatprep.subr.bf16.mxu1 %v18903_v51  ;;  %v1619_v47 = vld [vmem:[%s21082_s18 + $0x2858] sm:$0xff]  ;;  %v18980_v48 = vcombine.low %v1594_v0, %v1602_v34  ;;  %v18982_v51 = vcombine.low %v1595_v35, %v1603_v36  ;;  %v19061_v0 = vcombine.high %v1674_v25, %v1682_v26  ;;  %v1690_v35 = vld [vmem:[%s21082_s18 + $0x2a90] sm:$0xff] }
 0x3a0   : > { %v18999_v55 = vcombine.high %v1611_v46, %v1619_v47  ;;  %v1698_v36 = vld [vmem:[%s21082_s18 + $0x2ad0] sm:$0xff] }
 0x3a2   : > { %13573 = vmatpush1.bf16.msra.mxu0 %v18900_v58  ;;  %13901 = vmatpush1.bf16.msra.mxu1 %v18902_v61  ;;  %v1627_v58 = vld [vmem:[%s21082_s18 + $0x2898] sm:$0xff] }
 0x3a3   : > { %13574 = vmatprep.subr.bf16.mxu0 %v18917_v62  ;;  %13902 = vmatprep.subr.bf16.mxu1 %v18919_v63  ;;  %v1635_v61 = vld [vmem:[%s21082_s18 + $0x28d8] sm:$0xff]  ;;  %v18996_v62 = vcombine.low %v1610_v43, %v1618_v44  ;;  %v18998_v63 = vcombine.low %v1611_v46, %v1619_v47  ;;  %v19077_v43 = vcombine.high %v1690_v35, %v1698_v36  ;;  %v1706_v46 = vld [vmem:[%s21082_s18 + $0x2b10] sm:$0xff] }
 0x3a4   : > { %v19015_v4 = vcombine.high %v1627_v58, %v1635_v61  ;;  %v1714_v47 = vld [vmem:[%s21082_s18 + $0x2b50] sm:$0xff] }
 0x3a6   : > { %13575 = vmatpush1.bf16.msra.mxu0 %v18916_v7  ;;  %13903 = vmatpush1.bf16.msra.mxu1 %v18918_v11  ;;  %v1643_v7 = vld [vmem:[%s21082_s18 + $0x2918] sm:$0xff] }
 0x3a7   : > { %13576 = vmatprep.subr.bf16.mxu0 %v18933_v12  ;;  %13904 = vmatprep.subr.bf16.mxu1 %v18935_v13  ;;  %v1651_v11 = vld [vmem:[%s21082_s18 + $0x2958] sm:$0xff]  ;;  %v19012_v12 = vcombine.low %v1626_v56, %v1634_v57  ;;  %v19014_v13 = vcombine.low %v1627_v58, %v1635_v61  ;;  %v19093_v56 = vcombine.high %v1706_v46, %v1714_v47  ;;  %v1722_v58 = vld [vmem:[%s21082_s18 + $0x2b90] sm:$0xff] }
 0x3a8   : > { %v19031_v15 = vcombine.high %v1643_v7, %v1651_v11  ;;  %v1730_v61 = vld [vmem:[%s21082_s18 + $0x2bd0] sm:$0xff] }
 0x3aa   : > { %13577 = vmatpush1.bf16.msra.mxu0 %v18932_v18  ;;  %13905 = vmatpush1.bf16.msra.mxu1 %v18934_v54  ;;  %v1659_v18 = vld [vmem:[%s21082_s18 + $0x2998] sm:$0xff] }
 0x3ab   : > { %13578 = vmatprep.subr.bf16.mxu0 %v18949_v17  ;;  %13906 = vmatprep.subr.bf16.mxu1 %v18951_v21  ;;  %v1667_v54 = vld [vmem:[%s21082_s18 + $0x29d8] sm:$0xff]  ;;  %v19028_v17 = vcombine.low %v1642_v5, %v1650_v30  ;;  %v19030_v21 = vcombine.low %v1643_v7, %v1651_v11  ;;  %v19109_v5 = vcombine.high %v1722_v58, %v1730_v61  ;;  %v1738_v7 = vld [vmem:[%s21082_s18 + $0x2c10] sm:$0xff] }
 0x3ac   : > { %v19047_v23 = vcombine.high %v1659_v18, %v1667_v54  ;;  %v1746_v11 = vld [vmem:[%s21082_s18 + $0x2c50] sm:$0xff] }
 0x3ae   : > { %13579 = vmatpush1.bf16.msra.mxu0 %v18948_v27  ;;  %13907 = vmatpush1.bf16.msra.mxu1 %v18950_v29  ;;  %v1675_v27 = vld [vmem:[%s21082_s18 + $0x2a18] sm:$0xff] }
 0x3af   : > { %13580 = vmatprep.subr.bf16.mxu0 %v18965_v31  ;;  %13908 = vmatprep.subr.bf16.mxu1 %v18967_v32  ;;  %v1683_v29 = vld [vmem:[%s21082_s18 + $0x2a58] sm:$0xff]  ;;  %v19044_v31 = vcombine.low %v1658_v16, %v1666_v2  ;;  %v19046_v32 = vcombine.low %v1659_v18, %v1667_v54  ;;  %v19125_v16 = vcombine.high %v1738_v7, %v1746_v11  ;;  %v1754_v18 = vld [vmem:[%s21082_s18 + $0x2c90] sm:$0xff] }
 0x3b0   : > { %v19063_v34 = vcombine.high %v1675_v27, %v1683_v29  ;;  %v1762_v54 = vld [vmem:[%s21082_s18 + $0x2cd0] sm:$0xff] }
 0x3b2   : > { %13581 = vmatpush1.bf16.msra.mxu0 %v18964_v37  ;;  %13909 = vmatpush1.bf16.msra.mxu1 %v18966_v40  ;;  %v1691_v37 = vld [vmem:[%s21082_s18 + $0x2a98] sm:$0xff] }
 0x3b3   : > { %13582 = vmatprep.subr.bf16.mxu0 %v18981_v41  ;;  %13910 = vmatprep.subr.bf16.mxu1 %v18983_v42  ;;  %v1699_v40 = vld [vmem:[%s21082_s18 + $0x2ad8] sm:$0xff]  ;;  %v19060_v41 = vcombine.low %v1674_v25, %v1682_v26  ;;  %v19062_v42 = vcombine.low %v1675_v27, %v1683_v29  ;;  %v19141_v25 = vcombine.high %v1754_v18, %v1762_v54  ;;  %v1770_v27 = vld [vmem:[%s21082_s18 + $0x2d10] sm:$0xff] }
 0x3b4   : > { %v19079_v44 = vcombine.high %v1691_v37, %v1699_v40  ;;  %v1778_v29 = vld [vmem:[%s21082_s18 + $0x2d50] sm:$0xff] }
 0x3b6   : > { %13583 = vmatpush1.bf16.msra.mxu0 %v18980_v48  ;;  %13911 = vmatpush1.bf16.msra.mxu1 %v18982_v51  ;;  %v1707_v48 = vld [vmem:[%s21082_s18 + $0x2b18] sm:$0xff] }
 0x3b7   : > { %13593 = vmatprep.subr.bf16.mxu0 %v18997_v53  ;;  %13921 = vmatprep.subr.bf16.mxu1 %v18999_v55  ;;  %v1715_v51 = vld [vmem:[%s21082_s18 + $0x2b58] sm:$0xff]  ;;  %v19076_v53 = vcombine.low %v1690_v35, %v1698_v36  ;;  %v19078_v55 = vcombine.low %v1691_v37, %v1699_v40  ;;  %v19157_v35 = vcombine.high %v1770_v27, %v1778_v29  ;;  %v1786_v37 = vld [vmem:[%s21082_s18 + $0x2d90] sm:$0xff] }
 0x3b8   : > { %v19095_v57 = vcombine.high %v1707_v48, %v1715_v51  ;;  %v1794_v40 = vld [vmem:[%s21082_s18 + $0x2dd0] sm:$0xff] }
 0x3b9   : > { %13585 = vmatmul.mubr.bf16.vlgmr.msra.gmra.mrb[4].mxu0 %v21508_v52  ;;  %13913 = vmatmul.mubr.bf16.vlgmr.msra.gmra.mrb[4].mxu1 %v21508_v52 }
 0x3ba   : > { %13594 = vmatpush1.bf16.msra.mxu0 %v18996_v62  ;;  %13922 = vmatpush1.bf16.msra.mxu1 %v18998_v63  ;;  %v1723_v62 = vld [vmem:[%s21082_s18 + $0x2b98] sm:$0xff] }
 0x3bb   : > { %13595 = vmatprep.subr.bf16.mxu0 %v19013_v9  ;;  %13923 = vmatprep.subr.bf16.mxu1 %v19015_v4  ;;  %v1731_v63 = vld [vmem:[%s21082_s18 + $0x2bd8] sm:$0xff]  ;;  %v19092_v9 = vcombine.low %v1706_v46, %v1714_v47  ;;  %v19094_v4 = vcombine.low %v1707_v48, %v1715_v51  ;;  %v19173_v46 = vcombine.high %v1786_v37, %v1794_v40  ;;  %v1802_v48 = vld [vmem:[%s21082_s18 + $0x2e10] sm:$0xff] }
 0x3bc   : > { %13625 = vmatprep.mubr.bf16.mxu0 %v21516_v1  ;;  %13953 = vmatprep.mubr.bf16.mxu1 %v21516_v1  ;;  %v19111_v30 = vcombine.high %v1723_v62, %v1731_v63  ;;  %v1810_v51 = vld [vmem:[%s21082_s18 + $0x2e50] sm:$0xff] }
 0x3be   : > { %13596 = vmatpush1.bf16.msra.mxu0 %v19012_v12  ;;  %13924 = vmatpush1.bf16.msra.mxu1 %v19014_v13  ;;  %v1739_v12 = vld [vmem:[%s21082_s18 + $0x2c18] sm:$0xff] }
 0x3bf   : > { %13597 = vmatprep.subr.bf16.mxu0 %v19029_v14  ;;  %13925 = vmatprep.subr.bf16.mxu1 %v19031_v15  ;;  %v1747_v13 = vld [vmem:[%s21082_s18 + $0x2c58] sm:$0xff]  ;;  %v19108_v14 = vcombine.low %v1722_v58, %v1730_v61  ;;  %v19110_v15 = vcombine.low %v1723_v62, %v1731_v63  ;;  %v19189_v58 = vcombine.high %v1802_v48, %v1810_v51  ;;  %v1818_v62 = vld [vmem:[%s21082_s18 + $0x2e90] sm:$0xff] }
 0x3c0   : > { %v19127_v2 = vcombine.high %v1739_v12, %v1747_v13  ;;  %v1826_v63 = vld [vmem:[%s21082_s18 + $0x2ed0] sm:$0xff] }
 0x3c2   : > { %13598 = vmatpush1.bf16.msra.mxu0 %v19028_v17  ;;  %13926 = vmatpush1.bf16.msra.mxu1 %v19030_v21  ;;  %v1755_v17 = vld [vmem:[%s21082_s18 + $0x2c98] sm:$0xff] }
 0x3c3   : > { %13599 = vmatprep.subr.bf16.mxu0 %v19045_v22  ;;  %13927 = vmatprep.subr.bf16.mxu1 %v19047_v23  ;;  %v1763_v21 = vld [vmem:[%s21082_s18 + $0x2cd8] sm:$0xff]  ;;  %v19124_v22 = vcombine.low %v1738_v7, %v1746_v11  ;;  %v19126_v23 = vcombine.low %v1739_v12, %v1747_v13  ;;  %v19205_v7 = vcombine.high %v1818_v62, %v1826_v63  ;;  %v1834_v12 = vld [vmem:[%s21082_s18 + $0x2f10] sm:$0xff] }
 0x3c4   : > { %v19143_v26 = vcombine.high %v1755_v17, %v1763_v21  ;;  %v1842_v13 = vld [vmem:[%s21082_s18 + $0x2f50] sm:$0xff] }
 0x3c6   : > { %13600 = vmatpush1.bf16.msra.mxu0 %v19044_v31  ;;  %13928 = vmatpush1.bf16.msra.mxu1 %v19046_v32  ;;  %v1771_v31 = vld [vmem:[%s21082_s18 + $0x2d18] sm:$0xff] }
 0x3c7   : > { %13601 = vmatprep.subr.bf16.mxu0 %v19061_v0  ;;  %13929 = vmatprep.subr.bf16.mxu1 %v19063_v34  ;;  %v1779_v32 = vld [vmem:[%s21082_s18 + $0x2d58] sm:$0xff]  ;;  %v19140_v0 = vcombine.low %v1754_v18, %v1762_v54  ;;  %v19142_v34 = vcombine.low %v1755_v17, %v1763_v21  ;;  %v19221_v18 = vcombine.high %v1834_v12, %v1842_v13  ;;  %v1850_v17 = vld [vmem:[%s21082_s18 + $0x2f90] sm:$0xff] }
 0x3c8   : > { %v19159_v36 = vcombine.high %v1771_v31, %v1779_v32  ;;  %v1858_v21 = vld [vmem:[%s21082_s18 + $0x2fd0] sm:$0xff] }
 0x3ca   : > { %13602 = vmatpush1.bf16.msra.mxu0 %v19060_v41  ;;  %13930 = vmatpush1.bf16.msra.mxu1 %v19062_v42  ;;  %v1787_v41 = vld [vmem:[%s21082_s18 + $0x2d98] sm:$0xff] }
 0x3cb   : > { %13603 = vmatprep.subr.bf16.mxu0 %v19077_v43  ;;  %13931 = vmatprep.subr.bf16.mxu1 %v19079_v44  ;;  %v1795_v42 = vld [vmem:[%s21082_s18 + $0x2dd8] sm:$0xff]  ;;  %v19156_v43 = vcombine.low %v1770_v27, %v1778_v29  ;;  %v19158_v44 = vcombine.low %v1771_v31, %v1779_v32  ;;  %v19237_v27 = vcombine.high %v1850_v17, %v1858_v21  ;;  %v1866_v31 = vld [vmem:[%s21082_s18 + $0x3010] sm:$0xff] }
 0x3cc   : > { %v19175_v47 = vcombine.high %v1787_v41, %v1795_v42  ;;  %v1874_v32 = vld [vmem:[%s21082_s18 + $0x3050] sm:$0xff] }
 0x3ce   : > { %13604 = vmatpush1.bf16.msra.mxu0 %v19076_v53  ;;  %13932 = vmatpush1.bf16.msra.mxu1 %v19078_v55  ;;  %v1803_v53 = vld [vmem:[%s21082_s18 + $0x2e18] sm:$0xff] }
 0x3cf   : > { %13605 = vmatprep.subr.bf16.mxu0 %v19093_v56  ;;  %13933 = vmatprep.subr.bf16.mxu1 %v19095_v57  ;;  %v1811_v55 = vld [vmem:[%s21082_s18 + $0x2e58] sm:$0xff]  ;;  %v19172_v56 = vcombine.low %v1786_v37, %v1794_v40  ;;  %v19174_v57 = vcombine.low %v1787_v41, %v1795_v42  ;;  %v19253_v37 = vcombine.high %v1866_v31, %v1874_v32  ;;  %v1882_v41 = vld [vmem:[%s21082_s18 + $0x3090] sm:$0xff] }
 0x3d0   : > { %v19191_v61 = vcombine.high %v1803_v53, %v1811_v55  ;;  %v1890_v42 = vld [vmem:[%s21082_s18 + $0x30d0] sm:$0xff] }
 0x3d2   : > { %13606 = vmatpush1.bf16.msra.mxu0 %v19092_v9  ;;  %13934 = vmatpush1.bf16.msra.mxu1 %v19094_v4  ;;  %v1819_v9 = vld [vmem:[%s21082_s18 + $0x2e98] sm:$0xff] }
 0x3d3   : > { %13607 = vmatprep.subr.bf16.mxu0 %v19109_v5  ;;  %13935 = vmatprep.subr.bf16.mxu1 %v19111_v30  ;;  %v1827_v4 = vld [vmem:[%s21082_s18 + $0x2ed8] sm:$0xff]  ;;  %v19188_v5 = vcombine.low %v1802_v48, %v1810_v51  ;;  %v19190_v30 = vcombine.low %v1803_v53, %v1811_v55  ;;  %v19269_v48 = vcombine.high %v1882_v41, %v1890_v42  ;;  %v1898_v53 = vld [vmem:[%s21082_s18 + $0x3110] sm:$0xff] }
 0x3d4   : > { %v19207_v11 = vcombine.high %v1819_v9, %v1827_v4  ;;  %v1906_v55 = vld [vmem:[%s21082_s18 + $0x3150] sm:$0xff] }
 0x3d6   : > { %13608 = vmatpush1.bf16.msra.mxu0 %v19108_v14  ;;  %13936 = vmatpush1.bf16.msra.mxu1 %v19110_v15  ;;  %v1835_v14 = vld [vmem:[%s21082_s18 + $0x2f18] sm:$0xff] }
 0x3d7   : > { %13609 = vmatprep.subr.bf16.mxu0 %v19125_v16  ;;  %13937 = vmatprep.subr.bf16.mxu1 %v19127_v2  ;;  %v1843_v15 = vld [vmem:[%s21082_s18 + $0x2f58] sm:$0xff]  ;;  %v19204_v16 = vcombine.low %v1818_v62, %v1826_v63  ;;  %v19206_v2 = vcombine.low %v1819_v9, %v1827_v4  ;;  %v19285_v62 = vcombine.high %v1898_v53, %v1906_v55  ;;  %v1914_v9 = vld [vmem:[%s21082_s18 + $0x3190] sm:$0xff] }
 0x3d8   : > { %v19223_v54 = vcombine.high %v1835_v14, %v1843_v15  ;;  %v1922_v4 = vld [vmem:[%s21082_s18 + $0x31d0] sm:$0xff] }
 0x3da   : > { %13610 = vmatpush1.bf16.msra.mxu0 %v19124_v22  ;;  %13938 = vmatpush1.bf16.msra.mxu1 %v19126_v23  ;;  %v1851_v22 = vld [vmem:[%s21082_s18 + $0x2f98] sm:$0xff] }
 0x3db   : > { %13611 = vmatprep.subr.bf16.mxu0 %v19141_v25  ;;  %13939 = vmatprep.subr.bf16.mxu1 %v19143_v26  ;;  %v1859_v23 = vld [vmem:[%s21082_s18 + $0x2fd8] sm:$0xff]  ;;  %v19220_v25 = vcombine.low %v1834_v12, %v1842_v13  ;;  %v19222_v26 = vcombine.low %v1835_v14, %v1843_v15  ;;  %v19301_v12 = vcombine.high %v1914_v9, %v1922_v4  ;;  %v1930_v14 = vld [vmem:[%s21082_s18 + $0x3210] sm:$0xff] }
 0x3dc   : > { %v19239_v29 = vcombine.high %v1851_v22, %v1859_v23  ;;  %v1938_v15 = vld [vmem:[%s21082_s18 + $0x3250] sm:$0xff] }
 0x3de   : > { %13612 = vmatpush1.bf16.msra.mxu0 %v19140_v0  ;;  %13940 = vmatpush1.bf16.msra.mxu1 %v19142_v34  ;;  %v1867_v0 = vld [vmem:[%s21082_s18 + $0x3018] sm:$0xff] }
 0x3df   : > { %13613 = vmatprep.subr.bf16.mxu0 %v19157_v35  ;;  %13941 = vmatprep.subr.bf16.mxu1 %v19159_v36  ;;  %v1875_v34 = vld [vmem:[%s21082_s18 + $0x3058] sm:$0xff]  ;;  %v19236_v35 = vcombine.low %v1850_v17, %v1858_v21  ;;  %v19238_v36 = vcombine.low %v1851_v22, %v1859_v23  ;;  %v19317_v17 = vcombine.high %v1930_v14, %v1938_v15  ;;  %v1946_v22 = vld [vmem:[%s21082_s18 + $0x3290] sm:$0xff] }
 0x3e0   : > { %v19255_v40 = vcombine.high %v1867_v0, %v1875_v34  ;;  %v1954_v23 = vld [vmem:[%s21082_s18 + $0x32d0] sm:$0xff] }
 0x3e2   : > { %13614 = vmatpush1.bf16.msra.mxu0 %v19156_v43  ;;  %13942 = vmatpush1.bf16.msra.mxu1 %v19158_v44  ;;  %v1883_v43 = vld [vmem:[%s21082_s18 + $0x3098] sm:$0xff] }
 0x3e3   : > { %13615 = vmatprep.subr.bf16.mxu0 %v19173_v46  ;;  %13943 = vmatprep.subr.bf16.mxu1 %v19175_v47  ;;  %v1891_v44 = vld [vmem:[%s21082_s18 + $0x30d8] sm:$0xff]  ;;  %v19252_v46 = vcombine.low %v1866_v31, %v1874_v32  ;;  %v19254_v47 = vcombine.low %v1867_v0, %v1875_v34  ;;  %v19333_v31 = vcombine.high %v1946_v22, %v1954_v23  ;;  %v1962_v0 = vld [vmem:[%s21082_s18 + $0x3310] sm:$0xff] }
 0x3e4   : > { %v19271_v51 = vcombine.high %v1883_v43, %v1891_v44  ;;  %v1970_v34 = vld [vmem:[%s21082_s18 + $0x3350] sm:$0xff] }
 0x3e6   : > { %13616 = vmatpush1.bf16.msra.mxu0 %v19172_v56  ;;  %13944 = vmatpush1.bf16.msra.mxu1 %v19174_v57  ;;  %v1899_v56 = vld [vmem:[%s21082_s18 + $0x3118] sm:$0xff] }
 0x3e7   : > { %13617 = vmatprep.subr.bf16.mxu0 %v19189_v58  ;;  %13945 = vmatprep.subr.bf16.mxu1 %v19191_v61  ;;  %v1907_v57 = vld [vmem:[%s21082_s18 + $0x3158] sm:$0xff]  ;;  %v19268_v58 = vcombine.low %v1882_v41, %v1890_v42  ;;  %v19270_v61 = vcombine.low %v1883_v43, %v1891_v44  ;;  %v19349_v41 = vcombine.high %v1962_v0, %v1970_v34  ;;  %v1978_v43 = vld [vmem:[%s21082_s18 + $0x3390] sm:$0xff] }
 0x3e8   : > { %v19287_v63 = vcombine.high %v1899_v56, %v1907_v57  ;;  %v1986_v44 = vld [vmem:[%s21082_s18 + $0x33d0] sm:$0xff] }
 0x3ea   : > { %13618 = vmatpush1.bf16.msra.mxu0 %v19188_v5  ;;  %13946 = vmatpush1.bf16.msra.mxu1 %v19190_v30  ;;  %v1915_v5 = vld [vmem:[%s21082_s18 + $0x3198] sm:$0xff] }
 0x3eb   : > { %13619 = vmatprep.subr.bf16.mxu0 %v19205_v7  ;;  %13947 = vmatprep.subr.bf16.mxu1 %v19207_v11  ;;  %v1923_v30 = vld [vmem:[%s21082_s18 + $0x31d8] sm:$0xff]  ;;  %v19284_v7 = vcombine.low %v1898_v53, %v1906_v55  ;;  %v19286_v11 = vcombine.low %v1899_v56, %v1907_v57  ;;  %v19365_v53 = vcombine.high %v1978_v43, %v1986_v44  ;;  %v1994_v56 = vld [vmem:[%s21082_s18 + $0x3410] sm:$0xff] }
 0x3ec   : > { %v19303_v13 = vcombine.high %v1915_v5, %v1923_v30  ;;  %v2002_v57 = vld [vmem:[%s21082_s18 + $0x3450] sm:$0xff] }
 0x3ee   : > { %13620 = vmatpush1.bf16.msra.mxu0 %v19204_v16  ;;  %13948 = vmatpush1.bf16.msra.mxu1 %v19206_v2  ;;  %v1931_v16 = vld [vmem:[%s21082_s18 + $0x3218] sm:$0xff] }
 0x3ef   : > { %13621 = vmatprep.subr.bf16.mxu0 %v19221_v18  ;;  %13949 = vmatprep.subr.bf16.mxu1 %v19223_v54  ;;  %v1939_v2 = vld [vmem:[%s21082_s18 + $0x3258] sm:$0xff]  ;;  %v19300_v18 = vcombine.low %v1914_v9, %v1922_v4  ;;  %v19302_v54 = vcombine.low %v1915_v5, %v1923_v30  ;;  %v19381_v9 = vcombine.high %v1994_v56, %v2002_v57  ;;  %v2010_v5 = vld [vmem:[%s21082_s18 + $0x3490] sm:$0xff] }
 0x3f0   : > { %v19319_v21 = vcombine.high %v1931_v16, %v1939_v2  ;;  %v2018_v30 = vld [vmem:[%s21082_s18 + $0x34d0] sm:$0xff] }
 0x3f2   : > { %13622 = vmatpush1.bf16.msra.mxu0 %v19220_v25  ;;  %13950 = vmatpush1.bf16.msra.mxu1 %v19222_v26  ;;  %v1947_v25 = vld [vmem:[%s21082_s18 + $0x3298] sm:$0xff] }
 0x3f3   : > { %13623 = vmatprep.subr.bf16.mxu0 %v19237_v27  ;;  %13951 = vmatprep.subr.bf16.mxu1 %v19239_v29  ;;  %v1955_v26 = vld [vmem:[%s21082_s18 + $0x32d8] sm:$0xff]  ;;  %v19316_v27 = vcombine.low %v1930_v14, %v1938_v15  ;;  %v19318_v29 = vcombine.low %v1931_v16, %v1939_v2  ;;  %v19397_v14 = vcombine.high %v2010_v5, %v2018_v30  ;;  %v2026_v16 = vld [vmem:[%s21082_s18 + $0x3510] sm:$0xff] }
 0x3f4   : > { %v19335_v32 = vcombine.high %v1947_v25, %v1955_v26  ;;  %v2034_v2 = vld [vmem:[%s21082_s18 + $0x3550] sm:$0xff] }
 0x3f6   : > { %13624 = vmatpush1.bf16.msra.mxu0 %v19236_v35  ;;  %13952 = vmatpush1.bf16.msra.mxu1 %v19238_v36  ;;  %v1963_v35 = vld [vmem:[%s21082_s18 + $0x3318] sm:$0xff] }
 0x3f7   : > { %13634 = vmatprep.subr.bf16.mxu0 %v19253_v37  ;;  %13962 = vmatprep.subr.bf16.mxu1 %v19255_v40  ;;  %v1971_v36 = vld [vmem:[%s21082_s18 + $0x3358] sm:$0xff]  ;;  %v19332_v37 = vcombine.low %v1946_v22, %v1954_v23  ;;  %v19334_v40 = vcombine.low %v1947_v25, %v1955_v26  ;;  %v19413_v22 = vcombine.high %v2026_v16, %v2034_v2  ;;  %v2042_v25 = vld [vmem:[%s21082_s18 + $0x3590] sm:$0xff] }
 0x3f8   : > { %v19351_v42 = vcombine.high %v1963_v35, %v1971_v36  ;;  %v2050_v26 = vld [vmem:[%s21082_s18 + $0x35d0] sm:$0xff] }
 0x3f9   : > { %13626 = vmatmul.mubr.bf16.vlgmr.msra.gmra.mrb[4].mxu0 %v21591_v28  ;;  %13954 = vmatmul.mubr.bf16.vlgmr.msra.gmra.mrb[4].mxu1 %v21591_v28 }
 0x3fa   : > { %13635 = vmatpush1.bf16.msra.mxu0 %v19252_v46  ;;  %13963 = vmatpush1.bf16.msra.mxu1 %v19254_v47  ;;  %v1979_v46 = vld [vmem:[%s21082_s18 + $0x3398] sm:$0xff] }
 0x3fb   : > { %13636 = vmatprep.subr.bf16.mxu0 %v19269_v48  ;;  %13964 = vmatprep.subr.bf16.mxu1 %v19271_v51  ;;  %v1987_v47 = vld [vmem:[%s21082_s18 + $0x33d8] sm:$0xff]  ;;  %v19348_v48 = vcombine.low %v1962_v0, %v1970_v34  ;;  %v19350_v51 = vcombine.low %v1963_v35, %v1971_v36  ;;  %v19429_v0 = vcombine.high %v2042_v25, %v2050_v26  ;;  %v2058_v35 = vld [vmem:[%s21082_s18 + $0x3610] sm:$0xff] }
 0x3fc   : > { %13666 = vmatprep.mubr.bf16.mxu0 %v21598_v38  ;;  %13994 = vmatprep.mubr.bf16.mxu1 %v21598_v38  ;;  %v19367_v55 = vcombine.high %v1979_v46, %v1987_v47  ;;  %v2066_v36 = vld [vmem:[%s21082_s18 + $0x3650] sm:$0xff] }
 0x3fe   : > { %13637 = vmatpush1.bf16.msra.mxu0 %v19268_v58  ;;  %13965 = vmatpush1.bf16.msra.mxu1 %v19270_v61  ;;  %v1995_v58 = vld [vmem:[%s21082_s18 + $0x3418] sm:$0xff] }
 0x3ff   : > { %13638 = vmatprep.subr.bf16.mxu0 %v19285_v62  ;;  %13966 = vmatprep.subr.bf16.mxu1 %v19287_v63  ;;  %v2003_v61 = vld [vmem:[%s21082_s18 + $0x3458] sm:$0xff]  ;;  %v19364_v62 = vcombine.low %v1978_v43, %v1986_v44  ;;  %v19366_v63 = vcombine.low %v1979_v46, %v1987_v47  ;;  %v19445_v43 = vcombine.high %v2058_v35, %v2066_v36  ;;  %v2074_v46 = vld [vmem:[%s21082_s18 + $0x3690] sm:$0xff] }
 0x400   : > { %v19383_v4 = vcombine.high %v1995_v58, %v2003_v61  ;;  %v2082_v47 = vld [vmem:[%s21082_s18 + $0x36d0] sm:$0xff] }
 0x402   : > { %13639 = vmatpush1.bf16.msra.mxu0 %v19284_v7  ;;  %13967 = vmatpush1.bf16.msra.mxu1 %v19286_v11  ;;  %v2011_v7 = vld [vmem:[%s21082_s18 + $0x3498] sm:$0xff] }
 0x403   : > { %13640 = vmatprep.subr.bf16.mxu0 %v19301_v12  ;;  %13968 = vmatprep.subr.bf16.mxu1 %v19303_v13  ;;  %v2019_v11 = vld [vmem:[%s21082_s18 + $0x34d8] sm:$0xff]  ;;  %v19380_v12 = vcombine.low %v1994_v56, %v2002_v57  ;;  %v19382_v13 = vcombine.low %v1995_v58, %v2003_v61  ;;  %v19461_v56 = vcombine.high %v2074_v46, %v2082_v47  ;;  %v2090_v58 = vld [vmem:[%s21082_s18 + $0x3710] sm:$0xff] }
 0x404   : > { %v19399_v15 = vcombine.high %v2011_v7, %v2019_v11  ;;  %v2098_v61 = vld [vmem:[%s21082_s18 + $0x3750] sm:$0xff] }
 0x406   : > { %13641 = vmatpush1.bf16.msra.mxu0 %v19300_v18  ;;  %13969 = vmatpush1.bf16.msra.mxu1 %v19302_v54  ;;  %v2027_v18 = vld [vmem:[%s21082_s18 + $0x3518] sm:$0xff] }
 0x407   : > { %13642 = vmatprep.subr.bf16.mxu0 %v19317_v17  ;;  %13970 = vmatprep.subr.bf16.mxu1 %v19319_v21  ;;  %v2035_v54 = vld [vmem:[%s21082_s18 + $0x3558] sm:$0xff]  ;;  %v19396_v17 = vcombine.low %v2010_v5, %v2018_v30  ;;  %v19398_v21 = vcombine.low %v2011_v7, %v2019_v11  ;;  %v19477_v5 = vcombine.high %v2090_v58, %v2098_v61  ;;  %v2106_v7 = vld [vmem:[%s21082_s18 + $0x3790] sm:$0xff] }
 0x408   : > { %v19415_v23 = vcombine.high %v2027_v18, %v2035_v54  ;;  %v2114_v11 = vld [vmem:[%s21082_s18 + $0x37d0] sm:$0xff] }
 0x40a   : > { %13643 = vmatpush1.bf16.msra.mxu0 %v19316_v27  ;;  %13971 = vmatpush1.bf16.msra.mxu1 %v19318_v29  ;;  %v2043_v27 = vld [vmem:[%s21082_s18 + $0x3598] sm:$0xff] }
 0x40b   : > { %13644 = vmatprep.subr.bf16.mxu0 %v19333_v31  ;;  %13972 = vmatprep.subr.bf16.mxu1 %v19335_v32  ;;  %v2051_v29 = vld [vmem:[%s21082_s18 + $0x35d8] sm:$0xff]  ;;  %v19412_v31 = vcombine.low %v2026_v16, %v2034_v2  ;;  %v19414_v32 = vcombine.low %v2027_v18, %v2035_v54  ;;  %v19493_v16 = vcombine.high %v2106_v7, %v2114_v11  ;;  %v2122_v18 = vld [vmem:[%s21082_s18 + $0x3810] sm:$0xff] }
 0x40c   : > { %v19431_v34 = vcombine.high %v2043_v27, %v2051_v29  ;;  %v2130_v54 = vld [vmem:[%s21082_s18 + $0x3850] sm:$0xff] }
 0x40e   : > { %13645 = vmatpush1.bf16.msra.mxu0 %v19332_v37  ;;  %13973 = vmatpush1.bf16.msra.mxu1 %v19334_v40  ;;  %v2059_v37 = vld [vmem:[%s21082_s18 + $0x3618] sm:$0xff] }
 0x40f   : > { %13646 = vmatprep.subr.bf16.mxu0 %v19349_v41  ;;  %13974 = vmatprep.subr.bf16.mxu1 %v19351_v42  ;;  %v2067_v40 = vld [vmem:[%s21082_s18 + $0x3658] sm:$0xff]  ;;  %v19428_v41 = vcombine.low %v2042_v25, %v2050_v26  ;;  %v19430_v42 = vcombine.low %v2043_v27, %v2051_v29  ;;  %v19509_v25 = vcombine.high %v2122_v18, %v2130_v54  ;;  %v2138_v27 = vld [vmem:[%s21082_s18 + $0x3890] sm:$0xff] }
 0x410   : > { %v19447_v44 = vcombine.high %v2059_v37, %v2067_v40  ;;  %v2146_v29 = vld [vmem:[%s21082_s18 + $0x38d0] sm:$0xff] }
 0x412   : > { %13647 = vmatpush1.bf16.msra.mxu0 %v19348_v48  ;;  %13975 = vmatpush1.bf16.msra.mxu1 %v19350_v51  ;;  %v2075_v48 = vld [vmem:[%s21082_s18 + $0x3698] sm:$0xff] }
 0x413   : > { %13648 = vmatprep.subr.bf16.mxu0 %v19365_v53  ;;  %13976 = vmatprep.subr.bf16.mxu1 %v19367_v55  ;;  %v2083_v51 = vld [vmem:[%s21082_s18 + $0x36d8] sm:$0xff]  ;;  %v19444_v53 = vcombine.low %v2058_v35, %v2066_v36  ;;  %v19446_v55 = vcombine.low %v2059_v37, %v2067_v40  ;;  %v19525_v35 = vcombine.high %v2138_v27, %v2146_v29  ;;  %v2154_v37 = vld [vmem:[%s21082_s18 + $0x3910] sm:$0xff] }
 0x414   : > { %v19463_v57 = vcombine.high %v2075_v48, %v2083_v51  ;;  %v2162_v40 = vld [vmem:[%s21082_s18 + $0x3950] sm:$0xff] }
 0x416   : > { %13649 = vmatpush1.bf16.msra.mxu0 %v19364_v62  ;;  %13977 = vmatpush1.bf16.msra.mxu1 %v19366_v63  ;;  %v2091_v62 = vld [vmem:[%s21082_s18 + $0x3718] sm:$0xff] }
 0x417   : > { %13650 = vmatprep.subr.bf16.mxu0 %v19381_v9  ;;  %13978 = vmatprep.subr.bf16.mxu1 %v19383_v4  ;;  %v2099_v63 = vld [vmem:[%s21082_s18 + $0x3758] sm:$0xff]  ;;  %v19460_v9 = vcombine.low %v2074_v46, %v2082_v47  ;;  %v19462_v4 = vcombine.low %v2075_v48, %v2083_v51  ;;  %v19541_v46 = vcombine.high %v2154_v37, %v2162_v40  ;;  %v2170_v48 = vld [vmem:[%s21082_s18 + $0x3990] sm:$0xff] }
 0x418   : > { %v19479_v30 = vcombine.high %v2091_v62, %v2099_v63  ;;  %v2178_v51 = vld [vmem:[%s21082_s18 + $0x39d0] sm:$0xff] }
 0x41a   : > { %13651 = vmatpush1.bf16.msra.mxu0 %v19380_v12  ;;  %13979 = vmatpush1.bf16.msra.mxu1 %v19382_v13  ;;  %v2107_v12 = vld [vmem:[%s21082_s18 + $0x3798] sm:$0xff] }
 0x41b   : > { %13652 = vmatprep.subr.bf16.mxu0 %v19397_v14  ;;  %13980 = vmatprep.subr.bf16.mxu1 %v19399_v15  ;;  %v2115_v13 = vld [vmem:[%s21082_s18 + $0x37d8] sm:$0xff]  ;;  %v19476_v14 = vcombine.low %v2090_v58, %v2098_v61  ;;  %v19478_v15 = vcombine.low %v2091_v62, %v2099_v63  ;;  %v19557_v58 = vcombine.high %v2170_v48, %v2178_v51  ;;  %v2186_v62 = vld [vmem:[%s21082_s18 + $0x3a10] sm:$0xff] }
 0x41c   : > { %v19495_v2 = vcombine.high %v2107_v12, %v2115_v13  ;;  %v2194_v63 = vld [vmem:[%s21082_s18 + $0x3a50] sm:$0xff] }
 0x41e   : > { %13653 = vmatpush1.bf16.msra.mxu0 %v19396_v17  ;;  %13981 = vmatpush1.bf16.msra.mxu1 %v19398_v21  ;;  %v2123_v17 = vld [vmem:[%s21082_s18 + $0x3818] sm:$0xff] }
 0x41f   : > { %13654 = vmatprep.subr.bf16.mxu0 %v19413_v22  ;;  %13982 = vmatprep.subr.bf16.mxu1 %v19415_v23  ;;  %v2131_v21 = vld [vmem:[%s21082_s18 + $0x3858] sm:$0xff]  ;;  %v19492_v22 = vcombine.low %v2106_v7, %v2114_v11  ;;  %v19494_v23 = vcombine.low %v2107_v12, %v2115_v13  ;;  %v19573_v7 = vcombine.high %v2186_v62, %v2194_v63  ;;  %v2202_v12 = vld [vmem:[%s21082_s18 + $0x3a90] sm:$0xff] }
 0x420   : > { %v19511_v26 = vcombine.high %v2123_v17, %v2131_v21  ;;  %v2210_v13 = vld [vmem:[%s21082_s18 + $0x3ad0] sm:$0xff] }
 0x422   : > { %13655 = vmatpush1.bf16.msra.mxu0 %v19412_v31  ;;  %13983 = vmatpush1.bf16.msra.mxu1 %v19414_v32  ;;  %v2139_v31 = vld [vmem:[%s21082_s18 + $0x3898] sm:$0xff] }
 0x423   : > { %13656 = vmatprep.subr.bf16.mxu0 %v19429_v0  ;;  %13984 = vmatprep.subr.bf16.mxu1 %v19431_v34  ;;  %v2147_v32 = vld [vmem:[%s21082_s18 + $0x38d8] sm:$0xff]  ;;  %v19508_v0 = vcombine.low %v2122_v18, %v2130_v54  ;;  %v19510_v34 = vcombine.low %v2123_v17, %v2131_v21  ;;  %v19589_v18 = vcombine.high %v2202_v12, %v2210_v13  ;;  %v2218_v17 = vld [vmem:[%s21082_s18 + $0x3b10] sm:$0xff] }
 0x424   : > { %v19527_v36 = vcombine.high %v2139_v31, %v2147_v32  ;;  %v2226_v21 = vld [vmem:[%s21082_s18 + $0x3b50] sm:$0xff] }
 0x426   : > { %13657 = vmatpush1.bf16.msra.mxu0 %v19428_v41  ;;  %13985 = vmatpush1.bf16.msra.mxu1 %v19430_v42  ;;  %v2155_v41 = vld [vmem:[%s21082_s18 + $0x3918] sm:$0xff] }
 0x427   : > { %13658 = vmatprep.subr.bf16.mxu0 %v19445_v43  ;;  %13986 = vmatprep.subr.bf16.mxu1 %v19447_v44  ;;  %v2163_v42 = vld [vmem:[%s21082_s18 + $0x3958] sm:$0xff]  ;;  %v19524_v43 = vcombine.low %v2138_v27, %v2146_v29  ;;  %v19526_v44 = vcombine.low %v2139_v31, %v2147_v32  ;;  %v19605_v27 = vcombine.high %v2218_v17, %v2226_v21  ;;  %v2234_v31 = vld [vmem:[%s21082_s18 + $0x3b90] sm:$0xff] }
 0x428   : > { %v19543_v47 = vcombine.high %v2155_v41, %v2163_v42  ;;  %v2242_v32 = vld [vmem:[%s21082_s18 + $0x3bd0] sm:$0xff] }
 0x42a   : > { %13659 = vmatpush1.bf16.msra.mxu0 %v19444_v53  ;;  %13987 = vmatpush1.bf16.msra.mxu1 %v19446_v55  ;;  %v2171_v53 = vld [vmem:[%s21082_s18 + $0x3998] sm:$0xff] }
 0x42b   : > { %13660 = vmatprep.subr.bf16.mxu0 %v19461_v56  ;;  %13988 = vmatprep.subr.bf16.mxu1 %v19463_v57  ;;  %v2179_v55 = vld [vmem:[%s21082_s18 + $0x39d8] sm:$0xff]  ;;  %v19540_v56 = vcombine.low %v2154_v37, %v2162_v40  ;;  %v19542_v57 = vcombine.low %v2155_v41, %v2163_v42  ;;  %v19621_v37 = vcombine.high %v2234_v31, %v2242_v32  ;;  %v2250_v41 = vld [vmem:[%s21082_s18 + $0x3c10] sm:$0xff] }
 0x42c   : > { %v19559_v61 = vcombine.high %v2171_v53, %v2179_v55  ;;  %v2258_v42 = vld [vmem:[%s21082_s18 + $0x3c50] sm:$0xff] }
 0x42e   : > { %13661 = vmatpush1.bf16.msra.mxu0 %v19460_v9  ;;  %13989 = vmatpush1.bf16.msra.mxu1 %v19462_v4  ;;  %v2187_v9 = vld [vmem:[%s21082_s18 + $0x3a18] sm:$0xff] }
 0x42f   : > { %13662 = vmatprep.subr.bf16.mxu0 %v19477_v5  ;;  %13990 = vmatprep.subr.bf16.mxu1 %v19479_v30  ;;  %v2195_v4 = vld [vmem:[%s21082_s18 + $0x3a58] sm:$0xff]  ;;  %v19556_v5 = vcombine.low %v2170_v48, %v2178_v51  ;;  %v19558_v30 = vcombine.low %v2171_v53, %v2179_v55  ;;  %v19637_v48 = vcombine.high %v2250_v41, %v2258_v42  ;;  %v2266_v53 = vld [vmem:[%s21082_s18 + $0x3c90] sm:$0xff] }
 0x430   : > { %v19575_v11 = vcombine.high %v2187_v9, %v2195_v4  ;;  %v2274_v55 = vld [vmem:[%s21082_s18 + $0x3cd0] sm:$0xff] }
 0x432   : > { %13663 = vmatpush1.bf16.msra.mxu0 %v19476_v14  ;;  %13991 = vmatpush1.bf16.msra.mxu1 %v19478_v15  ;;  %v2203_v14 = vld [vmem:[%s21082_s18 + $0x3a98] sm:$0xff] }
 0x433   : > { %13664 = vmatprep.subr.bf16.mxu0 %v19493_v16  ;;  %13992 = vmatprep.subr.bf16.mxu1 %v19495_v2  ;;  %v2211_v15 = vld [vmem:[%s21082_s18 + $0x3ad8] sm:$0xff]  ;;  %v19572_v16 = vcombine.low %v2186_v62, %v2194_v63  ;;  %v19574_v2 = vcombine.low %v2187_v9, %v2195_v4  ;;  %v19653_v62 = vcombine.high %v2266_v53, %v2274_v55  ;;  %v2282_v9 = vld [vmem:[%s21082_s18 + $0x3d10] sm:$0xff] }
 0x434   : > { %v19591_v54 = vcombine.high %v2203_v14, %v2211_v15  ;;  %v2290_v4 = vld [vmem:[%s21082_s18 + $0x3d50] sm:$0xff] }
 0x436   : > { %13665 = vmatpush1.bf16.msra.mxu0 %v19492_v22  ;;  %13993 = vmatpush1.bf16.msra.mxu1 %v19494_v23  ;;  %v2219_v22 = vld [vmem:[%s21082_s18 + $0x3b18] sm:$0xff] }
 0x437   : > { %13675 = vmatprep.subr.bf16.mxu0 %v19509_v25  ;;  %14003 = vmatprep.subr.bf16.mxu1 %v19511_v26  ;;  %v2227_v23 = vld [vmem:[%s21082_s18 + $0x3b58] sm:$0xff]  ;;  %v19588_v25 = vcombine.low %v2202_v12, %v2210_v13  ;;  %v19590_v26 = vcombine.low %v2203_v14, %v2211_v15  ;;  %v19669_v12 = vcombine.high %v2282_v9, %v2290_v4  ;;  %v2298_v14 = vld [vmem:[%s21082_s18 + $0x3d90] sm:$0xff] }
 0x438   : > { %v19607_v29 = vcombine.high %v2219_v22, %v2227_v23  ;;  %v2306_v15 = vld [vmem:[%s21082_s18 + $0x3dd0] sm:$0xff] }
 0x439   : > { %13667 = vmatmul.mubr.bf16.vlgmr.msra.gmra.mrb[4].mxu0 %v21666_v8  ;;  %13995 = vmatmul.mubr.bf16.vlgmr.msra.gmra.mrb[4].mxu1 %v21666_v8 }
 0x43a   : > { %13676 = vmatpush1.bf16.msra.mxu0 %v19508_v0  ;;  %14004 = vmatpush1.bf16.msra.mxu1 %v19510_v34  ;;  %v2235_v0 = vld [vmem:[%s21082_s18 + $0x3b98] sm:$0xff] }
 0x43b   : > { %13677 = vmatprep.subr.bf16.mxu0 %v19525_v35  ;;  %14005 = vmatprep.subr.bf16.mxu1 %v19527_v36  ;;  %v2243_v34 = vld [vmem:[%s21082_s18 + $0x3bd8] sm:$0xff]  ;;  %v19604_v35 = vcombine.low %v2218_v17, %v2226_v21  ;;  %v19606_v36 = vcombine.low %v2219_v22, %v2227_v23  ;;  %v19685_v17 = vcombine.high %v2298_v14, %v2306_v15  ;;  %v2314_v22 = vld [vmem:[%s21082_s18 + $0x3e10] sm:$0xff] }
 0x43c   : > { %13707 = vmatprep.mubr.bf16.mxu0 %v21674_v19  ;;  %14035 = vmatprep.mubr.bf16.mxu1 %v21674_v19  ;;  %v19623_v40 = vcombine.high %v2235_v0, %v2243_v34  ;;  %v2322_v23 = vld [vmem:[%s21082_s18 + $0x3e50] sm:$0xff] }
 0x43e   : > { %13678 = vmatpush1.bf16.msra.mxu0 %v19524_v43  ;;  %14006 = vmatpush1.bf16.msra.mxu1 %v19526_v44  ;;  %v2251_v43 = vld [vmem:[%s21082_s18 + $0x3c18] sm:$0xff] }
 0x43f   : > { %13679 = vmatprep.subr.bf16.mxu0 %v19541_v46  ;;  %14007 = vmatprep.subr.bf16.mxu1 %v19543_v47  ;;  %v2259_v44 = vld [vmem:[%s21082_s18 + $0x3c58] sm:$0xff]  ;;  %v19620_v46 = vcombine.low %v2234_v31, %v2242_v32  ;;  %v19622_v47 = vcombine.low %v2235_v0, %v2243_v34  ;;  %v19701_v31 = vcombine.high %v2314_v22, %v2322_v23  ;;  %v2330_v0 = vld [vmem:[%s21082_s18 + $0x3e90] sm:$0xff] }
 0x440   : > { %v19639_v51 = vcombine.high %v2251_v43, %v2259_v44  ;;  %v2338_v34 = vld [vmem:[%s21082_s18 + $0x3ed0] sm:$0xff] }
 0x442   : > { %13680 = vmatpush1.bf16.msra.mxu0 %v19540_v56  ;;  %14008 = vmatpush1.bf16.msra.mxu1 %v19542_v57  ;;  %v2267_v56 = vld [vmem:[%s21082_s18 + $0x3c98] sm:$0xff] }
 0x443   : > { %13681 = vmatprep.subr.bf16.mxu0 %v19557_v58  ;;  %14009 = vmatprep.subr.bf16.mxu1 %v19559_v61  ;;  %v2275_v57 = vld [vmem:[%s21082_s18 + $0x3cd8] sm:$0xff]  ;;  %v19636_v58 = vcombine.low %v2250_v41, %v2258_v42  ;;  %v19638_v61 = vcombine.low %v2251_v43, %v2259_v44  ;;  %v19717_v41 = vcombine.high %v2330_v0, %v2338_v34  ;;  %v2346_v43 = vld [vmem:[%s21082_s18 + $0x3f10] sm:$0xff] }
 0x444   : > { %v19655_v63 = vcombine.high %v2267_v56, %v2275_v57  ;;  %v2354_v44 = vld [vmem:[%s21082_s18 + $0x3f50] sm:$0xff] }
 0x446   : > { %13682 = vmatpush1.bf16.msra.mxu0 %v19556_v5  ;;  %14010 = vmatpush1.bf16.msra.mxu1 %v19558_v30  ;;  %v2283_v5 = vld [vmem:[%s21082_s18 + $0x3d18] sm:$0xff] }
 0x447   : > { %13683 = vmatprep.subr.bf16.mxu0 %v19573_v7  ;;  %14011 = vmatprep.subr.bf16.mxu1 %v19575_v11  ;;  %v2291_v30 = vld [vmem:[%s21082_s18 + $0x3d58] sm:$0xff]  ;;  %v19652_v7 = vcombine.low %v2266_v53, %v2274_v55  ;;  %v19654_v11 = vcombine.low %v2267_v56, %v2275_v57  ;;  %v19733_v53 = vcombine.high %v2346_v43, %v2354_v44  ;;  %v2362_v56 = vld [vmem:[%s21082_s18 + $0x3f90] sm:$0xff] }
 0x448   : > { %v19671_v13 = vcombine.high %v2283_v5, %v2291_v30  ;;  %v2370_v57 = vld [vmem:[%s21082_s18 + $0x3fd0] sm:$0xff] }
 0x44a   : > { %13684 = vmatpush1.bf16.msra.mxu0 %v19572_v16  ;;  %14012 = vmatpush1.bf16.msra.mxu1 %v19574_v2  ;;  %v2299_v16 = vld [vmem:[%s21082_s18 + $0x3d98] sm:$0xff] }
 0x44b   : > { %13685 = vmatprep.subr.bf16.mxu0 %v19589_v18  ;;  %14013 = vmatprep.subr.bf16.mxu1 %v19591_v54  ;;  %v2307_v2 = vld [vmem:[%s21082_s18 + $0x3dd8] sm:$0xff]  ;;  %v19668_v18 = vcombine.low %v2282_v9, %v2290_v4  ;;  %v19670_v54 = vcombine.low %v2283_v5, %v2291_v30  ;;  %v19749_v9 = vcombine.high %v2362_v56, %v2370_v57  ;;  %v332_v5 = vld [vmem:[%s21082_s18 + $0x20] sm:$0xff] }
 0x44c   : > { %v19687_v21 = vcombine.high %v2299_v16, %v2307_v2  ;;  %v340_v30 = vld [vmem:[%s21082_s18 + $0x60] sm:$0xff] }
 0x44e   : > { %13686 = vmatpush1.bf16.msra.mxu0 %v19588_v25  ;;  %14014 = vmatpush1.bf16.msra.mxu1 %v19590_v26  ;;  %v2315_v25 = vld [vmem:[%s21082_s18 + $0x3e18] sm:$0xff] }
 0x44f   : > { %13687 = vmatprep.subr.bf16.mxu0 %v19605_v27  ;;  %14015 = vmatprep.subr.bf16.mxu1 %v19607_v29  ;;  %v2323_v26 = vld [vmem:[%s21082_s18 + $0x3e58] sm:$0xff]  ;;  %v19684_v27 = vcombine.low %v2298_v14, %v2306_v15  ;;  %v19686_v29 = vcombine.low %v2299_v16, %v2307_v2  ;;  %v17721_v14 = vcombine.high %v332_v5, %v340_v30  ;;  %v348_v16 = vld [vmem:[%s21082_s18 + $0xa0] sm:$0xff] }
 0x450   : > { %v19703_v32 = vcombine.high %v2315_v25, %v2323_v26  ;;  %v356_v2 = vld [vmem:[%s21082_s18 + $0xe0] sm:$0xff] }
 0x452   : > { %13688 = vmatpush1.bf16.msra.mxu0 %v19604_v35  ;;  %14016 = vmatpush1.bf16.msra.mxu1 %v19606_v36  ;;  %v2331_v35 = vld [vmem:[%s21082_s18 + $0x3e98] sm:$0xff] }
 0x453   : > { %13689 = vmatprep.subr.bf16.mxu0 %v19621_v37  ;;  %14017 = vmatprep.subr.bf16.mxu1 %v19623_v40  ;;  %v2339_v36 = vld [vmem:[%s21082_s18 + $0x3ed8] sm:$0xff]  ;;  %v19700_v37 = vcombine.low %v2314_v22, %v2322_v23  ;;  %v19702_v40 = vcombine.low %v2315_v25, %v2323_v26  ;;  %v17737_v22 = vcombine.high %v348_v16, %v356_v2  ;;  %v364_v25 = vld [vmem:[%s21082_s18 + $0x120] sm:$0xff] }
 0x454   : > { %v19719_v42 = vcombine.high %v2331_v35, %v2339_v36  ;;  %v372_v26 = vld [vmem:[%s21082_s18 + $0x160] sm:$0xff] }
 0x456   : > { %13690 = vmatpush1.bf16.msra.mxu0 %v19620_v46  ;;  %14018 = vmatpush1.bf16.msra.mxu1 %v19622_v47  ;;  %v2347_v46 = vld [vmem:[%s21082_s18 + $0x3f18] sm:$0xff] }
 0x457   : > { %13691 = vmatprep.subr.bf16.mxu0 %v19637_v48  ;;  %14019 = vmatprep.subr.bf16.mxu1 %v19639_v51  ;;  %v2355_v47 = vld [vmem:[%s21082_s18 + $0x3f58] sm:$0xff]  ;;  %v19716_v48 = vcombine.low %v2330_v0, %v2338_v34  ;;  %v19718_v51 = vcombine.low %v2331_v35, %v2339_v36  ;;  %v17753_v0 = vcombine.high %v364_v25, %v372_v26  ;;  %v380_v35 = vld [vmem:[%s21082_s18 + $0x1a0] sm:$0xff] }
 0x458   : > { %v19735_v55 = vcombine.high %v2347_v46, %v2355_v47  ;;  %v388_v36 = vld [vmem:[%s21082_s18 + $0x1e0] sm:$0xff] }
 0x45a   : > { %13692 = vmatpush1.bf16.msra.mxu0 %v19636_v58  ;;  %14020 = vmatpush1.bf16.msra.mxu1 %v19638_v61  ;;  %v2363_v58 = vld [vmem:[%s21082_s18 + $0x3f98] sm:$0xff] }
 0x45b   : > { %13693 = vmatprep.subr.bf16.mxu0 %v19653_v62  ;;  %14021 = vmatprep.subr.bf16.mxu1 %v19655_v63  ;;  %v2371_v61 = vld [vmem:[%s21082_s18 + $0x3fd8] sm:$0xff]  ;;  %v19732_v62 = vcombine.low %v2346_v43, %v2354_v44  ;;  %v19734_v63 = vcombine.low %v2347_v46, %v2355_v47  ;;  %v17769_v43 = vcombine.high %v380_v35, %v388_v36  ;;  %v396_v46 = vld [vmem:[%s21082_s18 + $0x220] sm:$0xff] }
 0x45c   : > { %v19751_v4 = vcombine.high %v2363_v58, %v2371_v61  ;;  %v404_v47 = vld [vmem:[%s21082_s18 + $0x260] sm:$0xff] }
 0x45e   : > { %13694 = vmatpush1.bf16.msra.mxu0 %v19652_v7  ;;  %14022 = vmatpush1.bf16.msra.mxu1 %v19654_v11  ;;  %v333_v7 = vld [vmem:[%s21082_s18 + $0x28] sm:$0xff] }
 0x45f   : > { %13695 = vmatprep.subr.bf16.mxu0 %v19669_v12  ;;  %14023 = vmatprep.subr.bf16.mxu1 %v19671_v13  ;;  %v341_v11 = vld [vmem:[%s21082_s18 + $0x68] sm:$0xff]  ;;  %v19748_v12 = vcombine.low %v2362_v56, %v2370_v57  ;;  %v19750_v13 = vcombine.low %v2363_v58, %v2371_v61  ;;  %v17785_v56 = vcombine.high %v396_v46, %v404_v47  ;;  %v412_v58 = vld [vmem:[%s21082_s18 + $0x2a0] sm:$0xff] }
 0x460   : > { %v17723_v15 = vcombine.high %v333_v7, %v341_v11  ;;  %v420_v61 = vld [vmem:[%s21082_s18 + $0x2e0] sm:$0xff] }
 0x462   : > { %13696 = vmatpush1.bf16.msra.mxu0 %v19668_v18  ;;  %14024 = vmatpush1.bf16.msra.mxu1 %v19670_v54  ;;  %v349_v18 = vld [vmem:[%s21082_s18 + $0xa8] sm:$0xff] }
 0x463   : > { %13697 = vmatprep.subr.bf16.mxu0 %v19685_v17  ;;  %14025 = vmatprep.subr.bf16.mxu1 %v19687_v21  ;;  %v357_v54 = vld [vmem:[%s21082_s18 + $0xe8] sm:$0xff]  ;;  %v17720_v17 = vcombine.low %v332_v5, %v340_v30  ;;  %v17722_v21 = vcombine.low %v333_v7, %v341_v11  ;;  %v17801_v5 = vcombine.high %v412_v58, %v420_v61  ;;  %v428_v7 = vld [vmem:[%s21082_s18 + $0x320] sm:$0xff] }
 0x464   : > { %v17739_v23 = vcombine.high %v349_v18, %v357_v54  ;;  %v436_v11 = vld [vmem:[%s21082_s18 + $0x360] sm:$0xff] }
 0x466   : > { %13698 = vmatpush1.bf16.msra.mxu0 %v19684_v27  ;;  %14026 = vmatpush1.bf16.msra.mxu1 %v19686_v29  ;;  %v365_v27 = vld [vmem:[%s21082_s18 + $0x128] sm:$0xff] }
 0x467   : > { %13699 = vmatprep.subr.bf16.mxu0 %v19701_v31  ;;  %14027 = vmatprep.subr.bf16.mxu1 %v19703_v32  ;;  %v373_v29 = vld [vmem:[%s21082_s18 + $0x168] sm:$0xff]  ;;  %v17736_v31 = vcombine.low %v348_v16, %v356_v2  ;;  %v17738_v32 = vcombine.low %v349_v18, %v357_v54  ;;  %v17817_v16 = vcombine.high %v428_v7, %v436_v11  ;;  %v444_v18 = vld [vmem:[%s21082_s18 + $0x3a0] sm:$0xff] }
 0x468   : > { %v17755_v34 = vcombine.high %v365_v27, %v373_v29  ;;  %v452_v54 = vld [vmem:[%s21082_s18 + $0x3e0] sm:$0xff] }
 0x46a   : > { %13700 = vmatpush1.bf16.msra.mxu0 %v19700_v37  ;;  %14028 = vmatpush1.bf16.msra.mxu1 %v19702_v40  ;;  %v381_v37 = vld [vmem:[%s21082_s18 + $0x1a8] sm:$0xff] }
 0x46b   : > { %13701 = vmatprep.subr.bf16.mxu0 %v19717_v41  ;;  %14029 = vmatprep.subr.bf16.mxu1 %v19719_v42  ;;  %v389_v40 = vld [vmem:[%s21082_s18 + $0x1e8] sm:$0xff]  ;;  %v17752_v41 = vcombine.low %v364_v25, %v372_v26  ;;  %v17754_v42 = vcombine.low %v365_v27, %v373_v29  ;;  %v17833_v25 = vcombine.high %v444_v18, %v452_v54  ;;  %v460_v27 = vld [vmem:[%s21082_s18 + $0x420] sm:$0xff] }
 0x46c   : > { %v17771_v44 = vcombine.high %v381_v37, %v389_v40  ;;  %v468_v29 = vld [vmem:[%s21082_s18 + $0x460] sm:$0xff] }
 0x46e   : > { %13702 = vmatpush1.bf16.msra.mxu0 %v19716_v48  ;;  %14030 = vmatpush1.bf16.msra.mxu1 %v19718_v51  ;;  %v397_v48 = vld [vmem:[%s21082_s18 + $0x228] sm:$0xff] }
 0x46f   : > { %13703 = vmatprep.subr.bf16.mxu0 %v19733_v53  ;;  %14031 = vmatprep.subr.bf16.mxu1 %v19735_v55  ;;  %v405_v51 = vld [vmem:[%s21082_s18 + $0x268] sm:$0xff]  ;;  %v17768_v53 = vcombine.low %v380_v35, %v388_v36  ;;  %v17770_v55 = vcombine.low %v381_v37, %v389_v40  ;;  %v17849_v35 = vcombine.high %v460_v27, %v468_v29  ;;  %v476_v37 = vld [vmem:[%s21082_s18 + $0x4a0] sm:$0xff] }
 0x470   : > { %v17787_v57 = vcombine.high %v397_v48, %v405_v51  ;;  %v484_v40 = vld [vmem:[%s21082_s18 + $0x4e0] sm:$0xff] }
 0x472   : > { %13704 = vmatpush1.bf16.msra.mxu0 %v19732_v62  ;;  %14032 = vmatpush1.bf16.msra.mxu1 %v19734_v63  ;;  %v413_v62 = vld [vmem:[%s21082_s18 + $0x2a8] sm:$0xff] }
 0x473   : > { %13705 = vmatprep.subr.bf16.mxu0 %v19749_v9  ;;  %14033 = vmatprep.subr.bf16.mxu1 %v19751_v4  ;;  %v421_v63 = vld [vmem:[%s21082_s18 + $0x2e8] sm:$0xff]  ;;  %v17784_v9 = vcombine.low %v396_v46, %v404_v47  ;;  %v17786_v4 = vcombine.low %v397_v48, %v405_v51  ;;  %v17865_v46 = vcombine.high %v476_v37, %v484_v40  ;;  %v492_v48 = vld [vmem:[%s21082_s18 + $0x520] sm:$0xff] }
 0x474   : > { %v17803_v30 = vcombine.high %v413_v62, %v421_v63  ;;  %v500_v51 = vld [vmem:[%s21082_s18 + $0x560] sm:$0xff] }
 0x476   : > { %13706 = vmatpush1.bf16.msra.mxu0 %v19748_v12  ;;  %14034 = vmatpush1.bf16.msra.mxu1 %v19750_v13  ;;  %v429_v12 = vld [vmem:[%s21082_s18 + $0x328] sm:$0xff] }
 0x477   : > { %14044 = vmatprep.subr.bf16.mxu0 %v17721_v14  ;;  %14372 = vmatprep.subr.bf16.mxu1 %v17723_v15  ;;  %v437_v13 = vld [vmem:[%s21082_s18 + $0x368] sm:$0xff]  ;;  %v17800_v14 = vcombine.low %v412_v58, %v420_v61  ;;  %v17802_v15 = vcombine.low %v413_v62, %v421_v63  ;;  %v17881_v58 = vcombine.high %v492_v48, %v500_v51  ;;  %v508_v62 = vld [vmem:[%s21082_s18 + $0x5a0] sm:$0xff] }
 0x478   : > { %v17819_v2 = vcombine.high %v429_v12, %v437_v13  ;;  %v516_v63 = vld [vmem:[%s21082_s18 + $0x5e0] sm:$0xff] }
 0x479   : > { %13708 = vmatmul.mubr.bf16.vlgmr.msra.gmra.mrb[4].mxu0 %v21742_v50  ;;  %14036 = vmatmul.mubr.bf16.vlgmr.msra.gmra.mrb[4].mxu1 %v21742_v50 }
 0x47a   : > { %14045 = vmatpush1.bf16.msra.mxu0 %v17720_v17  ;;  %14373 = vmatpush1.bf16.msra.mxu1 %v17722_v21  ;;  %v445_v17 = vld [vmem:[%s21082_s18 + $0x3a8] sm:$0xff] }
 0x47b   : > { %14046 = vmatprep.subr.bf16.mxu0 %v17737_v22  ;;  %14374 = vmatprep.subr.bf16.mxu1 %v17739_v23  ;;  %v453_v21 = vld [vmem:[%s21082_s18 + $0x3e8] sm:$0xff]  ;;  %v17816_v22 = vcombine.low %v428_v7, %v436_v11  ;;  %v17818_v23 = vcombine.low %v429_v12, %v437_v13  ;;  %v17897_v7 = vcombine.high %v508_v62, %v516_v63  ;;  %v524_v12 = vld [vmem:[%s21082_s18 + $0x620] sm:$0xff] }
 0x47c   : > { %14076 = vmatprep.mubr.bf16.mxu0 %v21148_v10  ;;  %14404 = vmatprep.mubr.bf16.mxu1 %v21148_v10  ;;  %v17835_v26 = vcombine.high %v445_v17, %v453_v21  ;;  %v532_v13 = vld [vmem:[%s21082_s18 + $0x660] sm:$0xff] }
 0x47e   : > { %14047 = vmatpush1.bf16.msra.mxu0 %v17736_v31  ;;  %14375 = vmatpush1.bf16.msra.mxu1 %v17738_v32  ;;  %v461_v31 = vld [vmem:[%s21082_s18 + $0x428] sm:$0xff] }
 0x47f   : > { %14048 = vmatprep.subr.bf16.mxu0 %v17753_v0  ;;  %14376 = vmatprep.subr.bf16.mxu1 %v17755_v34  ;;  %v469_v32 = vld [vmem:[%s21082_s18 + $0x468] sm:$0xff]  ;;  %v17832_v0 = vcombine.low %v444_v18, %v452_v54  ;;  %v17834_v34 = vcombine.low %v445_v17, %v453_v21  ;;  %v17913_v18 = vcombine.high %v524_v12, %v532_v13  ;;  %v540_v17 = vld [vmem:[%s21082_s18 + $0x6a0] sm:$0xff] }
 0x480   : > { %v17851_v36 = vcombine.high %v461_v31, %v469_v32  ;;  %v548_v21 = vld [vmem:[%s21082_s18 + $0x6e0] sm:$0xff] }
 0x482   : > { %14049 = vmatpush1.bf16.msra.mxu0 %v17752_v41  ;;  %14377 = vmatpush1.bf16.msra.mxu1 %v17754_v42  ;;  %v477_v41 = vld [vmem:[%s21082_s18 + $0x4a8] sm:$0xff] }
 0x483   : > { %14050 = vmatprep.subr.bf16.mxu0 %v17769_v43  ;;  %14378 = vmatprep.subr.bf16.mxu1 %v17771_v44  ;;  %v485_v42 = vld [vmem:[%s21082_s18 + $0x4e8] sm:$0xff]  ;;  %v17848_v43 = vcombine.low %v460_v27, %v468_v29  ;;  %v17850_v44 = vcombine.low %v461_v31, %v469_v32  ;;  %v17929_v27 = vcombine.high %v540_v17, %v548_v21  ;;  %v556_v31 = vld [vmem:[%s21082_s18 + $0x720] sm:$0xff] }
 0x484   : > { %v17867_v47 = vcombine.high %v477_v41, %v485_v42  ;;  %v564_v32 = vld [vmem:[%s21082_s18 + $0x760] sm:$0xff] }
 0x486   : > { %14051 = vmatpush1.bf16.msra.mxu0 %v17768_v53  ;;  %14379 = vmatpush1.bf16.msra.mxu1 %v17770_v55  ;;  %v493_v53 = vld [vmem:[%s21082_s18 + $0x528] sm:$0xff] }
 0x487   : > { %14052 = vmatprep.subr.bf16.mxu0 %v17785_v56  ;;  %14380 = vmatprep.subr.bf16.mxu1 %v17787_v57  ;;  %v501_v55 = vld [vmem:[%s21082_s18 + $0x568] sm:$0xff]  ;;  %v17864_v56 = vcombine.low %v476_v37, %v484_v40  ;;  %v17866_v57 = vcombine.low %v477_v41, %v485_v42  ;;  %v17945_v37 = vcombine.high %v556_v31, %v564_v32  ;;  %v572_v41 = vld [vmem:[%s21082_s18 + $0x7a0] sm:$0xff] }
 0x488   : > { %v17883_v61 = vcombine.high %v493_v53, %v501_v55  ;;  %v580_v42 = vld [vmem:[%s21082_s18 + $0x7e0] sm:$0xff] }
 0x48a   : > { %14053 = vmatpush1.bf16.msra.mxu0 %v17784_v9  ;;  %14381 = vmatpush1.bf16.msra.mxu1 %v17786_v4  ;;  %v509_v9 = vld [vmem:[%s21082_s18 + $0x5a8] sm:$0xff] }
 0x48b   : > { %14054 = vmatprep.subr.bf16.mxu0 %v17801_v5  ;;  %14382 = vmatprep.subr.bf16.mxu1 %v17803_v30  ;;  %v517_v4 = vld [vmem:[%s21082_s18 + $0x5e8] sm:$0xff]  ;;  %v17880_v5 = vcombine.low %v492_v48, %v500_v51  ;;  %v17882_v30 = vcombine.low %v493_v53, %v501_v55  ;;  %v17961_v48 = vcombine.high %v572_v41, %v580_v42  ;;  %v588_v53 = vld [vmem:[%s21082_s18 + $0x820] sm:$0xff] }
 0x48c   : > { %v17899_v11 = vcombine.high %v509_v9, %v517_v4  ;;  %v596_v55 = vld [vmem:[%s21082_s18 + $0x860] sm:$0xff] }
 0x48e   : > { %14055 = vmatpush1.bf16.msra.mxu0 %v17800_v14  ;;  %14383 = vmatpush1.bf16.msra.mxu1 %v17802_v15  ;;  %v525_v14 = vld [vmem:[%s21082_s18 + $0x628] sm:$0xff] }
 0x48f   : > { %14056 = vmatprep.subr.bf16.mxu0 %v17817_v16  ;;  %14384 = vmatprep.subr.bf16.mxu1 %v17819_v2  ;;  %v533_v15 = vld [vmem:[%s21082_s18 + $0x668] sm:$0xff]  ;;  %v17896_v16 = vcombine.low %v508_v62, %v516_v63  ;;  %v17898_v2 = vcombine.low %v509_v9, %v517_v4  ;;  %v17977_v62 = vcombine.high %v588_v53, %v596_v55  ;;  %v604_v9 = vld [vmem:[%s21082_s18 + $0x8a0] sm:$0xff] }
 0x490   : > { %v17915_v54 = vcombine.high %v525_v14, %v533_v15  ;;  %v612_v4 = vld [vmem:[%s21082_s18 + $0x8e0] sm:$0xff] }
 0x492   : > { %14057 = vmatpush1.bf16.msra.mxu0 %v17816_v22  ;;  %14385 = vmatpush1.bf16.msra.mxu1 %v17818_v23  ;;  %v541_v22 = vld [vmem:[%s21082_s18 + $0x6a8] sm:$0xff] }
 0x493   : > { %14058 = vmatprep.subr.bf16.mxu0 %v17833_v25  ;;  %14386 = vmatprep.subr.bf16.mxu1 %v17835_v26  ;;  %v549_v23 = vld [vmem:[%s21082_s18 + $0x6e8] sm:$0xff]  ;;  %v17912_v25 = vcombine.low %v524_v12, %v532_v13  ;;  %v17914_v26 = vcombine.low %v525_v14, %v533_v15  ;;  %v17993_v12 = vcombine.high %v604_v9, %v612_v4  ;;  %v620_v14 = vld [vmem:[%s21082_s18 + $0x920] sm:$0xff] }
 0x494   : > { %v17931_v29 = vcombine.high %v541_v22, %v549_v23  ;;  %v628_v15 = vld [vmem:[%s21082_s18 + $0x960] sm:$0xff] }
 0x496   : > { %14059 = vmatpush1.bf16.msra.mxu0 %v17832_v0  ;;  %14387 = vmatpush1.bf16.msra.mxu1 %v17834_v34  ;;  %v557_v0 = vld [vmem:[%s21082_s18 + $0x728] sm:$0xff] }
 0x497   : > { %14060 = vmatprep.subr.bf16.mxu0 %v17849_v35  ;;  %14388 = vmatprep.subr.bf16.mxu1 %v17851_v36  ;;  %v565_v34 = vld [vmem:[%s21082_s18 + $0x768] sm:$0xff]  ;;  %v17928_v35 = vcombine.low %v540_v17, %v548_v21  ;;  %v17930_v36 = vcombine.low %v541_v22, %v549_v23  ;;  %v18009_v17 = vcombine.high %v620_v14, %v628_v15  ;;  %v636_v22 = vld [vmem:[%s21082_s18 + $0x9a0] sm:$0xff] }
 0x498   : > { %v17947_v40 = vcombine.high %v557_v0, %v565_v34  ;;  %v644_v23 = vld [vmem:[%s21082_s18 + $0x9e0] sm:$0xff] }
 0x49a   : > { %14061 = vmatpush1.bf16.msra.mxu0 %v17848_v43  ;;  %14389 = vmatpush1.bf16.msra.mxu1 %v17850_v44  ;;  %v573_v43 = vld [vmem:[%s21082_s18 + $0x7a8] sm:$0xff] }
 0x49b   : > { %14062 = vmatprep.subr.bf16.mxu0 %v17865_v46  ;;  %14390 = vmatprep.subr.bf16.mxu1 %v17867_v47  ;;  %v581_v44 = vld [vmem:[%s21082_s18 + $0x7e8] sm:$0xff]  ;;  %v17944_v46 = vcombine.low %v556_v31, %v564_v32  ;;  %v17946_v47 = vcombine.low %v557_v0, %v565_v34  ;;  %v18025_v31 = vcombine.high %v636_v22, %v644_v23  ;;  %v652_v0 = vld [vmem:[%s21082_s18 + $0xa20] sm:$0xff] }
 0x49c   : > { %v17963_v51 = vcombine.high %v573_v43, %v581_v44  ;;  %v660_v34 = vld [vmem:[%s21082_s18 + $0xa60] sm:$0xff] }
 0x49e   : > { %14063 = vmatpush1.bf16.msra.mxu0 %v17864_v56  ;;  %14391 = vmatpush1.bf16.msra.mxu1 %v17866_v57  ;;  %v589_v56 = vld [vmem:[%s21082_s18 + $0x828] sm:$0xff] }
 0x49f   : > { %14064 = vmatprep.subr.bf16.mxu0 %v17881_v58  ;;  %14392 = vmatprep.subr.bf16.mxu1 %v17883_v61  ;;  %v597_v57 = vld [vmem:[%s21082_s18 + $0x868] sm:$0xff]  ;;  %v17960_v58 = vcombine.low %v572_v41, %v580_v42  ;;  %v17962_v61 = vcombine.low %v573_v43, %v581_v44  ;;  %v18041_v41 = vcombine.high %v652_v0, %v660_v34  ;;  %v668_v43 = vld [vmem:[%s21082_s18 + $0xaa0] sm:$0xff] }
 0x4a0   : > { %v17979_v63 = vcombine.high %v589_v56, %v597_v57  ;;  %v676_v44 = vld [vmem:[%s21082_s18 + $0xae0] sm:$0xff] }
 0x4a2   : > { %14065 = vmatpush1.bf16.msra.mxu0 %v17880_v5  ;;  %14393 = vmatpush1.bf16.msra.mxu1 %v17882_v30  ;;  %v605_v5 = vld [vmem:[%s21082_s18 + $0x8a8] sm:$0xff] }
 0x4a3   : > { %14066 = vmatprep.subr.bf16.mxu0 %v17897_v7  ;;  %14394 = vmatprep.subr.bf16.mxu1 %v17899_v11  ;;  %v613_v30 = vld [vmem:[%s21082_s18 + $0x8e8] sm:$0xff]  ;;  %v17976_v7 = vcombine.low %v588_v53, %v596_v55  ;;  %v17978_v11 = vcombine.low %v589_v56, %v597_v57  ;;  %v18057_v53 = vcombine.high %v668_v43, %v676_v44  ;;  %v684_v56 = vld [vmem:[%s21082_s18 + $0xb20] sm:$0xff] }
 0x4a4   : > { %v17995_v13 = vcombine.high %v605_v5, %v613_v30  ;;  %v692_v57 = vld [vmem:[%s21082_s18 + $0xb60] sm:$0xff] }
 0x4a6   : > { %14067 = vmatpush1.bf16.msra.mxu0 %v17896_v16  ;;  %14395 = vmatpush1.bf16.msra.mxu1 %v17898_v2  ;;  %v621_v16 = vld [vmem:[%s21082_s18 + $0x928] sm:$0xff] }
 0x4a7   : > { %14068 = vmatprep.subr.bf16.mxu0 %v17913_v18  ;;  %14396 = vmatprep.subr.bf16.mxu1 %v17915_v54  ;;  %v629_v2 = vld [vmem:[%s21082_s18 + $0x968] sm:$0xff]  ;;  %v17992_v18 = vcombine.low %v604_v9, %v612_v4  ;;  %v17994_v54 = vcombine.low %v605_v5, %v613_v30  ;;  %v18073_v9 = vcombine.high %v684_v56, %v692_v57  ;;  %v700_v5 = vld [vmem:[%s21082_s18 + $0xba0] sm:$0xff] }
 0x4a8   : > { %v18011_v21 = vcombine.high %v621_v16, %v629_v2  ;;  %v708_v30 = vld [vmem:[%s21082_s18 + $0xbe0] sm:$0xff] }
 0x4aa   : > { %14069 = vmatpush1.bf16.msra.mxu0 %v17912_v25  ;;  %14397 = vmatpush1.bf16.msra.mxu1 %v17914_v26  ;;  %v637_v25 = vld [vmem:[%s21082_s18 + $0x9a8] sm:$0xff] }
 0x4ab   : > { %14070 = vmatprep.subr.bf16.mxu0 %v17929_v27  ;;  %14398 = vmatprep.subr.bf16.mxu1 %v17931_v29  ;;  %v645_v26 = vld [vmem:[%s21082_s18 + $0x9e8] sm:$0xff]  ;;  %v18008_v27 = vcombine.low %v620_v14, %v628_v15  ;;  %v18010_v29 = vcombine.low %v621_v16, %v629_v2  ;;  %v18089_v14 = vcombine.high %v700_v5, %v708_v30  ;;  %v716_v16 = vld [vmem:[%s21082_s18 + $0xc20] sm:$0xff] }
 0x4ac   : > { %v18027_v32 = vcombine.high %v637_v25, %v645_v26  ;;  %v724_v2 = vld [vmem:[%s21082_s18 + $0xc60] sm:$0xff] }
 0x4ae   : > { %14071 = vmatpush1.bf16.msra.mxu0 %v17928_v35  ;;  %14399 = vmatpush1.bf16.msra.mxu1 %v17930_v36  ;;  %v653_v35 = vld [vmem:[%s21082_s18 + $0xa28] sm:$0xff] }
 0x4af   : > { %14072 = vmatprep.subr.bf16.mxu0 %v17945_v37  ;;  %14400 = vmatprep.subr.bf16.mxu1 %v17947_v40  ;;  %v661_v36 = vld [vmem:[%s21082_s18 + $0xa68] sm:$0xff]  ;;  %v18024_v37 = vcombine.low %v636_v22, %v644_v23  ;;  %v18026_v40 = vcombine.low %v637_v25, %v645_v26  ;;  %v18105_v22 = vcombine.high %v716_v16, %v724_v2  ;;  %v732_v25 = vld [vmem:[%s21082_s18 + $0xca0] sm:$0xff] }
 0x4b0   : > { %v18043_v42 = vcombine.high %v653_v35, %v661_v36  ;;  %v740_v26 = vld [vmem:[%s21082_s18 + $0xce0] sm:$0xff] }
 0x4b2   : > { %14073 = vmatpush1.bf16.msra.mxu0 %v17944_v46  ;;  %14401 = vmatpush1.bf16.msra.mxu1 %v17946_v47  ;;  %v669_v46 = vld [vmem:[%s21082_s18 + $0xaa8] sm:$0xff] }
 0x4b3   : > { %14074 = vmatprep.subr.bf16.mxu0 %v17961_v48  ;;  %14402 = vmatprep.subr.bf16.mxu1 %v17963_v51  ;;  %v677_v47 = vld [vmem:[%s21082_s18 + $0xae8] sm:$0xff]  ;;  %v18040_v48 = vcombine.low %v652_v0, %v660_v34  ;;  %v18042_v51 = vcombine.low %v653_v35, %v661_v36  ;;  %v18121_v0 = vcombine.high %v732_v25, %v740_v26  ;;  %v748_v35 = vld [vmem:[%s21082_s18 + $0xd20] sm:$0xff] }
 0x4b4   : > { %v18059_v55 = vcombine.high %v669_v46, %v677_v47  ;;  %v756_v36 = vld [vmem:[%s21082_s18 + $0xd60] sm:$0xff] }
 0x4b6   : > { %14075 = vmatpush1.bf16.msra.mxu0 %v17960_v58  ;;  %14403 = vmatpush1.bf16.msra.mxu1 %v17962_v61  ;;  %v685_v58 = vld [vmem:[%s21082_s18 + $0xb28] sm:$0xff] }
 0x4b7   : > { %14085 = vmatprep.subr.bf16.mxu0 %v17977_v62  ;;  %14413 = vmatprep.subr.bf16.mxu1 %v17979_v63  ;;  %v693_v61 = vld [vmem:[%s21082_s18 + $0xb68] sm:$0xff]  ;;  %v18056_v62 = vcombine.low %v668_v43, %v676_v44  ;;  %v18058_v63 = vcombine.low %v669_v46, %v677_v47  ;;  %v18137_v43 = vcombine.high %v748_v35, %v756_v36  ;;  %v764_v46 = vld [vmem:[%s21082_s18 + $0xda0] sm:$0xff] }
 0x4b8   : > { %v18075_v4 = vcombine.high %v685_v58, %v693_v61  ;;  %v772_v47 = vld [vmem:[%s21082_s18 + $0xde0] sm:$0xff] }
 0x4b9   : > { %14077 = vmatmul.mubr.bf16.vlgmr.msra.gmra.mrb[8].mxu0 %v21190_v24  ;;  %14405 = vmatmul.mubr.bf16.vlgmr.msra.gmra.mrb[8].mxu1 %v21190_v24 }
 0x4ba   : > { %14086 = vmatpush1.bf16.msra.mxu0 %v17976_v7  ;;  %14414 = vmatpush1.bf16.msra.mxu1 %v17978_v11  ;;  %v701_v7 = vld [vmem:[%s21082_s18 + $0xba8] sm:$0xff] }
 0x4bb   : > { %14087 = vmatprep.subr.bf16.mxu0 %v17993_v12  ;;  %14415 = vmatprep.subr.bf16.mxu1 %v17995_v13  ;;  %v709_v11 = vld [vmem:[%s21082_s18 + $0xbe8] sm:$0xff]  ;;  %v18072_v12 = vcombine.low %v684_v56, %v692_v57  ;;  %v18074_v13 = vcombine.low %v685_v58, %v693_v61  ;;  %v18153_v56 = vcombine.high %v764_v46, %v772_v47  ;;  %v780_v58 = vld [vmem:[%s21082_s18 + $0xe20] sm:$0xff] }
 0x4bc   : > { %14117 = vmatprep.mubr.bf16.mxu0 %v21198_v33  ;;  %14445 = vmatprep.mubr.bf16.mxu1 %v21198_v33  ;;  %v18091_v15 = vcombine.high %v701_v7, %v709_v11  ;;  %v788_v61 = vld [vmem:[%s21082_s18 + $0xe60] sm:$0xff] }
 0x4be   : > { %14088 = vmatpush1.bf16.msra.mxu0 %v17992_v18  ;;  %14416 = vmatpush1.bf16.msra.mxu1 %v17994_v54  ;;  %v717_v18 = vld [vmem:[%s21082_s18 + $0xc28] sm:$0xff] }
 0x4bf   : > { %14089 = vmatprep.subr.bf16.mxu0 %v18009_v17  ;;  %14417 = vmatprep.subr.bf16.mxu1 %v18011_v21  ;;  %v725_v54 = vld [vmem:[%s21082_s18 + $0xc68] sm:$0xff]  ;;  %v18088_v17 = vcombine.low %v700_v5, %v708_v30  ;;  %v18090_v21 = vcombine.low %v701_v7, %v709_v11  ;;  %v18169_v5 = vcombine.high %v780_v58, %v788_v61  ;;  %v796_v7 = vld [vmem:[%s21082_s18 + $0xea0] sm:$0xff] }
 0x4c0   : > { %v18107_v23 = vcombine.high %v717_v18, %v725_v54  ;;  %v804_v11 = vld [vmem:[%s21082_s18 + $0xee0] sm:$0xff] }
 0x4c2   : > { %14090 = vmatpush1.bf16.msra.mxu0 %v18008_v27  ;;  %14418 = vmatpush1.bf16.msra.mxu1 %v18010_v29  ;;  %v733_v27 = vld [vmem:[%s21082_s18 + $0xca8] sm:$0xff] }
 0x4c3   : > { %14091 = vmatprep.subr.bf16.mxu0 %v18025_v31  ;;  %14419 = vmatprep.subr.bf16.mxu1 %v18027_v32  ;;  %v741_v29 = vld [vmem:[%s21082_s18 + $0xce8] sm:$0xff]  ;;  %v18104_v31 = vcombine.low %v716_v16, %v724_v2  ;;  %v18106_v32 = vcombine.low %v717_v18, %v725_v54  ;;  %v18185_v16 = vcombine.high %v796_v7, %v804_v11  ;;  %v812_v18 = vld [vmem:[%s21082_s18 + $0xf20] sm:$0xff] }
 0x4c4   : > { %v18123_v34 = vcombine.high %v733_v27, %v741_v29  ;;  %v820_v54 = vld [vmem:[%s21082_s18 + $0xf60] sm:$0xff] }
 0x4c6   : > { %14092 = vmatpush1.bf16.msra.mxu0 %v18024_v37  ;;  %14420 = vmatpush1.bf16.msra.mxu1 %v18026_v40  ;;  %v749_v37 = vld [vmem:[%s21082_s18 + $0xd28] sm:$0xff] }
 0x4c7   : > { %14093 = vmatprep.subr.bf16.mxu0 %v18041_v41  ;;  %14421 = vmatprep.subr.bf16.mxu1 %v18043_v42  ;;  %v757_v40 = vld [vmem:[%s21082_s18 + $0xd68] sm:$0xff]  ;;  %v18120_v41 = vcombine.low %v732_v25, %v740_v26  ;;  %v18122_v42 = vcombine.low %v733_v27, %v741_v29  ;;  %v18201_v25 = vcombine.high %v812_v18, %v820_v54  ;;  %v828_v27 = vld [vmem:[%s21082_s18 + $0xfa0] sm:$0xff] }
 0x4c8   : > { %v18139_v44 = vcombine.high %v749_v37, %v757_v40  ;;  %v836_v29 = vld [vmem:[%s21082_s18 + $0xfe0] sm:$0xff] }
 0x4ca   : > { %14094 = vmatpush1.bf16.msra.mxu0 %v18040_v48  ;;  %14422 = vmatpush1.bf16.msra.mxu1 %v18042_v51  ;;  %v765_v48 = vld [vmem:[%s21082_s18 + $0xda8] sm:$0xff] }
 0x4cb   : > { %14095 = vmatprep.subr.bf16.mxu0 %v18057_v53  ;;  %14423 = vmatprep.subr.bf16.mxu1 %v18059_v55  ;;  %v773_v51 = vld [vmem:[%s21082_s18 + $0xde8] sm:$0xff]  ;;  %v18136_v53 = vcombine.low %v748_v35, %v756_v36  ;;  %v18138_v55 = vcombine.low %v749_v37, %v757_v40  ;;  %v18217_v35 = vcombine.high %v828_v27, %v836_v29  ;;  %v844_v37 = vld [vmem:[%s21082_s18 + $0x1020] sm:$0xff] }
 0x4cc   : > { %v18155_v57 = vcombine.high %v765_v48, %v773_v51  ;;  %v852_v40 = vld [vmem:[%s21082_s18 + $0x1060] sm:$0xff] }
 0x4ce   : > { %14096 = vmatpush1.bf16.msra.mxu0 %v18056_v62  ;;  %14424 = vmatpush1.bf16.msra.mxu1 %v18058_v63  ;;  %v781_v62 = vld [vmem:[%s21082_s18 + $0xe28] sm:$0xff] }
 0x4cf   : > { %14097 = vmatprep.subr.bf16.mxu0 %v18073_v9  ;;  %14425 = vmatprep.subr.bf16.mxu1 %v18075_v4  ;;  %v789_v63 = vld [vmem:[%s21082_s18 + $0xe68] sm:$0xff]  ;;  %v18152_v9 = vcombine.low %v764_v46, %v772_v47  ;;  %v18154_v4 = vcombine.low %v765_v48, %v773_v51  ;;  %v18233_v46 = vcombine.high %v844_v37, %v852_v40  ;;  %v860_v48 = vld [vmem:[%s21082_s18 + $0x10a0] sm:$0xff] }
 0x4d0   : > { %v18171_v30 = vcombine.high %v781_v62, %v789_v63  ;;  %v868_v51 = vld [vmem:[%s21082_s18 + $0x10e0] sm:$0xff] }
 0x4d2   : > { %14098 = vmatpush1.bf16.msra.mxu0 %v18072_v12  ;;  %14426 = vmatpush1.bf16.msra.mxu1 %v18074_v13  ;;  %v797_v12 = vld [vmem:[%s21082_s18 + $0xea8] sm:$0xff] }
 0x4d3   : > { %14099 = vmatprep.subr.bf16.mxu0 %v18089_v14  ;;  %14427 = vmatprep.subr.bf16.mxu1 %v18091_v15  ;;  %v805_v13 = vld [vmem:[%s21082_s18 + $0xee8] sm:$0xff]  ;;  %v18168_v14 = vcombine.low %v780_v58, %v788_v61  ;;  %v18170_v15 = vcombine.low %v781_v62, %v789_v63  ;;  %v18249_v58 = vcombine.high %v860_v48, %v868_v51  ;;  %v876_v62 = vld [vmem:[%s21082_s18 + $0x1120] sm:$0xff] }
 0x4d4   : > { %v18187_v2 = vcombine.high %v797_v12, %v805_v13  ;;  %v884_v63 = vld [vmem:[%s21082_s18 + $0x1160] sm:$0xff] }
 0x4d6   : > { %14100 = vmatpush1.bf16.msra.mxu0 %v18088_v17  ;;  %14428 = vmatpush1.bf16.msra.mxu1 %v18090_v21  ;;  %v813_v17 = vld [vmem:[%s21082_s18 + $0xf28] sm:$0xff] }
 0x4d7   : > { %14101 = vmatprep.subr.bf16.mxu0 %v18105_v22  ;;  %14429 = vmatprep.subr.bf16.mxu1 %v18107_v23  ;;  %v821_v21 = vld [vmem:[%s21082_s18 + $0xf68] sm:$0xff]  ;;  %v18184_v22 = vcombine.low %v796_v7, %v804_v11  ;;  %v18186_v23 = vcombine.low %v797_v12, %v805_v13  ;;  %v18265_v7 = vcombine.high %v876_v62, %v884_v63  ;;  %v892_v12 = vld [vmem:[%s21082_s18 + $0x11a0] sm:$0xff] }
 0x4d8   : > { %v18203_v26 = vcombine.high %v813_v17, %v821_v21  ;;  %v900_v13 = vld [vmem:[%s21082_s18 + $0x11e0] sm:$0xff] }
 0x4da   : > { %14102 = vmatpush1.bf16.msra.mxu0 %v18104_v31  ;;  %14430 = vmatpush1.bf16.msra.mxu1 %v18106_v32  ;;  %v829_v31 = vld [vmem:[%s21082_s18 + $0xfa8] sm:$0xff] }
 0x4db   : > { %14103 = vmatprep.subr.bf16.mxu0 %v18121_v0  ;;  %14431 = vmatprep.subr.bf16.mxu1 %v18123_v34  ;;  %v837_v32 = vld [vmem:[%s21082_s18 + $0xfe8] sm:$0xff]  ;;  %v18200_v0 = vcombine.low %v812_v18, %v820_v54  ;;  %v18202_v34 = vcombine.low %v813_v17, %v821_v21  ;;  %v18281_v18 = vcombine.high %v892_v12, %v900_v13  ;;  %v908_v17 = vld [vmem:[%s21082_s18 + $0x1220] sm:$0xff] }
 0x4dc   : > { %v18219_v36 = vcombine.high %v829_v31, %v837_v32  ;;  %v916_v21 = vld [vmem:[%s21082_s18 + $0x1260] sm:$0xff] }
 0x4de   : > { %14104 = vmatpush1.bf16.msra.mxu0 %v18120_v41  ;;  %14432 = vmatpush1.bf16.msra.mxu1 %v18122_v42  ;;  %v845_v41 = vld [vmem:[%s21082_s18 + $0x1028] sm:$0xff] }
 0x4df   : > { %14105 = vmatprep.subr.bf16.mxu0 %v18137_v43  ;;  %14433 = vmatprep.subr.bf16.mxu1 %v18139_v44  ;;  %v853_v42 = vld [vmem:[%s21082_s18 + $0x1068] sm:$0xff]  ;;  %v18216_v43 = vcombine.low %v828_v27, %v836_v29  ;;  %v18218_v44 = vcombine.low %v829_v31, %v837_v32  ;;  %v18297_v27 = vcombine.high %v908_v17, %v916_v21  ;;  %v924_v31 = vld [vmem:[%s21082_s18 + $0x12a0] sm:$0xff] }
 0x4e0   : > { %v18235_v47 = vcombine.high %v845_v41, %v853_v42  ;;  %v932_v32 = vld [vmem:[%s21082_s18 + $0x12e0] sm:$0xff] }
 0x4e2   : > { %14106 = vmatpush1.bf16.msra.mxu0 %v18136_v53  ;;  %14434 = vmatpush1.bf16.msra.mxu1 %v18138_v55  ;;  %v861_v53 = vld [vmem:[%s21082_s18 + $0x10a8] sm:$0xff] }
 0x4e3   : > { %14107 = vmatprep.subr.bf16.mxu0 %v18153_v56  ;;  %14435 = vmatprep.subr.bf16.mxu1 %v18155_v57  ;;  %v869_v55 = vld [vmem:[%s21082_s18 + $0x10e8] sm:$0xff]  ;;  %v18232_v56 = vcombine.low %v844_v37, %v852_v40  ;;  %v18234_v57 = vcombine.low %v845_v41, %v853_v42  ;;  %v18313_v37 = vcombine.high %v924_v31, %v932_v32  ;;  %v940_v41 = vld [vmem:[%s21082_s18 + $0x1320] sm:$0xff] }
 0x4e4   : > { %v18251_v61 = vcombine.high %v861_v53, %v869_v55  ;;  %v948_v42 = vld [vmem:[%s21082_s18 + $0x1360] sm:$0xff] }
 0x4e6   : > { %14108 = vmatpush1.bf16.msra.mxu0 %v18152_v9  ;;  %14436 = vmatpush1.bf16.msra.mxu1 %v18154_v4  ;;  %v877_v9 = vld [vmem:[%s21082_s18 + $0x1128] sm:$0xff] }
 0x4e7   : > { %14109 = vmatprep.subr.bf16.mxu0 %v18169_v5  ;;  %14437 = vmatprep.subr.bf16.mxu1 %v18171_v30  ;;  %v885_v4 = vld [vmem:[%s21082_s18 + $0x1168] sm:$0xff]  ;;  %v18248_v5 = vcombine.low %v860_v48, %v868_v51  ;;  %v18250_v30 = vcombine.low %v861_v53, %v869_v55  ;;  %v18329_v48 = vcombine.high %v940_v41, %v948_v42  ;;  %v956_v53 = vld [vmem:[%s21082_s18 + $0x13a0] sm:$0xff] }
 0x4e8   : > { %v18267_v11 = vcombine.high %v877_v9, %v885_v4  ;;  %v964_v55 = vld [vmem:[%s21082_s18 + $0x13e0] sm:$0xff] }
 0x4ea   : > { %14110 = vmatpush1.bf16.msra.mxu0 %v18168_v14  ;;  %14438 = vmatpush1.bf16.msra.mxu1 %v18170_v15  ;;  %v893_v14 = vld [vmem:[%s21082_s18 + $0x11a8] sm:$0xff] }
 0x4eb   : > { %14111 = vmatprep.subr.bf16.mxu0 %v18185_v16  ;;  %14439 = vmatprep.subr.bf16.mxu1 %v18187_v2  ;;  %v901_v15 = vld [vmem:[%s21082_s18 + $0x11e8] sm:$0xff]  ;;  %v18264_v16 = vcombine.low %v876_v62, %v884_v63  ;;  %v18266_v2 = vcombine.low %v877_v9, %v885_v4  ;;  %v18345_v62 = vcombine.high %v956_v53, %v964_v55  ;;  %v972_v9 = vld [vmem:[%s21082_s18 + $0x1420] sm:$0xff] }
 0x4ec   : > { %v18283_v54 = vcombine.high %v893_v14, %v901_v15  ;;  %v980_v4 = vld [vmem:[%s21082_s18 + $0x1460] sm:$0xff] }
 0x4ee   : > { %14112 = vmatpush1.bf16.msra.mxu0 %v18184_v22  ;;  %14440 = vmatpush1.bf16.msra.mxu1 %v18186_v23  ;;  %v909_v22 = vld [vmem:[%s21082_s18 + $0x1228] sm:$0xff] }
 0x4ef   : > { %14113 = vmatprep.subr.bf16.mxu0 %v18201_v25  ;;  %14441 = vmatprep.subr.bf16.mxu1 %v18203_v26  ;;  %v917_v23 = vld [vmem:[%s21082_s18 + $0x1268] sm:$0xff]  ;;  %v18280_v25 = vcombine.low %v892_v12, %v900_v13  ;;  %v18282_v26 = vcombine.low %v893_v14, %v901_v15  ;;  %v18361_v12 = vcombine.high %v972_v9, %v980_v4  ;;  %v988_v14 = vld [vmem:[%s21082_s18 + $0x14a0] sm:$0xff] }
 0x4f0   : > { %v18299_v29 = vcombine.high %v909_v22, %v917_v23  ;;  %v996_v15 = vld [vmem:[%s21082_s18 + $0x14e0] sm:$0xff] }
 0x4f2   : > { %14114 = vmatpush1.bf16.msra.mxu0 %v18200_v0  ;;  %14442 = vmatpush1.bf16.msra.mxu1 %v18202_v34  ;;  %v925_v0 = vld [vmem:[%s21082_s18 + $0x12a8] sm:$0xff] }
 0x4f3   : > { %14115 = vmatprep.subr.bf16.mxu0 %v18217_v35  ;;  %14443 = vmatprep.subr.bf16.mxu1 %v18219_v36  ;;  %v933_v34 = vld [vmem:[%s21082_s18 + $0x12e8] sm:$0xff]  ;;  %v18296_v35 = vcombine.low %v908_v17, %v916_v21  ;;  %v18298_v36 = vcombine.low %v909_v22, %v917_v23  ;;  %v18377_v17 = vcombine.high %v988_v14, %v996_v15  ;;  %v1004_v22 = vld [vmem:[%s21082_s18 + $0x1520] sm:$0xff] }
 0x4f4   : > { %v18315_v40 = vcombine.high %v925_v0, %v933_v34  ;;  %v1012_v23 = vld [vmem:[%s21082_s18 + $0x1560] sm:$0xff] }
 0x4f6   : > { %14116 = vmatpush1.bf16.msra.mxu0 %v18216_v43  ;;  %14444 = vmatpush1.bf16.msra.mxu1 %v18218_v44  ;;  %v941_v43 = vld [vmem:[%s21082_s18 + $0x1328] sm:$0xff] }
 0x4f7   : > { %14126 = vmatprep.subr.bf16.mxu0 %v18233_v46  ;;  %14454 = vmatprep.subr.bf16.mxu1 %v18235_v47  ;;  %v949_v44 = vld [vmem:[%s21082_s18 + $0x1368] sm:$0xff]  ;;  %v18312_v46 = vcombine.low %v924_v31, %v932_v32  ;;  %v18314_v47 = vcombine.low %v925_v0, %v933_v34  ;;  %v18393_v31 = vcombine.high %v1004_v22, %v1012_v23  ;;  %v1020_v0 = vld [vmem:[%s21082_s18 + $0x15a0] sm:$0xff] }
 0x4f8   : > { %v18331_v51 = vcombine.high %v941_v43, %v949_v44  ;;  %v1028_v34 = vld [vmem:[%s21082_s18 + $0x15e0] sm:$0xff] }
 0x4f9   : > { %14118 = vmatmul.mubr.bf16.vlgmr.msra.gmra.mrb[8].mxu0 %v21273_v39  ;;  %14446 = vmatmul.mubr.bf16.vlgmr.msra.gmra.mrb[8].mxu1 %v21273_v39 }
 0x4fa   : > { %14127 = vmatpush1.bf16.msra.mxu0 %v18232_v56  ;;  %14455 = vmatpush1.bf16.msra.mxu1 %v18234_v57  ;;  %v957_v56 = vld [vmem:[%s21082_s18 + $0x13a8] sm:$0xff] }
 0x4fb   : > { %14128 = vmatprep.subr.bf16.mxu0 %v18249_v58  ;;  %14456 = vmatprep.subr.bf16.mxu1 %v18251_v61  ;;  %v965_v57 = vld [vmem:[%s21082_s18 + $0x13e8] sm:$0xff]  ;;  %v18328_v58 = vcombine.low %v940_v41, %v948_v42  ;;  %v18330_v61 = vcombine.low %v941_v43, %v949_v44  ;;  %v18409_v41 = vcombine.high %v1020_v0, %v1028_v34  ;;  %v1036_v43 = vld [vmem:[%s21082_s18 + $0x1620] sm:$0xff] }
 0x4fc   : > { %14158 = vmatprep.mubr.bf16.mxu0 %v21280_v49  ;;  %14486 = vmatprep.mubr.bf16.mxu1 %v21280_v49  ;;  %v18347_v63 = vcombine.high %v957_v56, %v965_v57  ;;  %v1044_v44 = vld [vmem:[%s21082_s18 + $0x1660] sm:$0xff] }
 0x4fe   : > { %14129 = vmatpush1.bf16.msra.mxu0 %v18248_v5  ;;  %14457 = vmatpush1.bf16.msra.mxu1 %v18250_v30  ;;  %v973_v5 = vld [vmem:[%s21082_s18 + $0x1428] sm:$0xff] }
 0x4ff   : > { %14130 = vmatprep.subr.bf16.mxu0 %v18265_v7  ;;  %14458 = vmatprep.subr.bf16.mxu1 %v18267_v11  ;;  %v981_v30 = vld [vmem:[%s21082_s18 + $0x1468] sm:$0xff]  ;;  %v18344_v7 = vcombine.low %v956_v53, %v964_v55  ;;  %v18346_v11 = vcombine.low %v957_v56, %v965_v57  ;;  %v18425_v53 = vcombine.high %v1036_v43, %v1044_v44  ;;  %v1052_v56 = vld [vmem:[%s21082_s18 + $0x16a0] sm:$0xff] }
 0x500   : > { %v18363_v13 = vcombine.high %v973_v5, %v981_v30  ;;  %v1060_v57 = vld [vmem:[%s21082_s18 + $0x16e0] sm:$0xff] }
 0x502   : > { %14131 = vmatpush1.bf16.msra.mxu0 %v18264_v16  ;;  %14459 = vmatpush1.bf16.msra.mxu1 %v18266_v2  ;;  %v989_v16 = vld [vmem:[%s21082_s18 + $0x14a8] sm:$0xff] }
 0x503   : > { %14132 = vmatprep.subr.bf16.mxu0 %v18281_v18  ;;  %14460 = vmatprep.subr.bf16.mxu1 %v18283_v54  ;;  %v997_v2 = vld [vmem:[%s21082_s18 + $0x14e8] sm:$0xff]  ;;  %v18360_v18 = vcombine.low %v972_v9, %v980_v4  ;;  %v18362_v54 = vcombine.low %v973_v5, %v981_v30  ;;  %v18441_v9 = vcombine.high %v1052_v56, %v1060_v57  ;;  %v1068_v5 = vld [vmem:[%s21082_s18 + $0x1720] sm:$0xff] }
 0x504   : > { %v18379_v21 = vcombine.high %v989_v16, %v997_v2  ;;  %v1076_v30 = vld [vmem:[%s21082_s18 + $0x1760] sm:$0xff] }
 0x506   : > { %14133 = vmatpush1.bf16.msra.mxu0 %v18280_v25  ;;  %14461 = vmatpush1.bf16.msra.mxu1 %v18282_v26  ;;  %v1005_v25 = vld [vmem:[%s21082_s18 + $0x1528] sm:$0xff] }
 0x507   : > { %14134 = vmatprep.subr.bf16.mxu0 %v18297_v27  ;;  %14462 = vmatprep.subr.bf16.mxu1 %v18299_v29  ;;  %v1013_v26 = vld [vmem:[%s21082_s18 + $0x1568] sm:$0xff]  ;;  %v18376_v27 = vcombine.low %v988_v14, %v996_v15  ;;  %v18378_v29 = vcombine.low %v989_v16, %v997_v2  ;;  %v18457_v14 = vcombine.high %v1068_v5, %v1076_v30  ;;  %v1084_v16 = vld [vmem:[%s21082_s18 + $0x17a0] sm:$0xff] }
 0x508   : > { %v18395_v32 = vcombine.high %v1005_v25, %v1013_v26  ;;  %v1092_v2 = vld [vmem:[%s21082_s18 + $0x17e0] sm:$0xff] }
 0x50a   : > { %14135 = vmatpush1.bf16.msra.mxu0 %v18296_v35  ;;  %14463 = vmatpush1.bf16.msra.mxu1 %v18298_v36  ;;  %v1021_v35 = vld [vmem:[%s21082_s18 + $0x15a8] sm:$0xff] }
 0x50b   : > { %14136 = vmatprep.subr.bf16.mxu0 %v18313_v37  ;;  %14464 = vmatprep.subr.bf16.mxu1 %v18315_v40  ;;  %v1029_v36 = vld [vmem:[%s21082_s18 + $0x15e8] sm:$0xff]  ;;  %v18392_v37 = vcombine.low %v1004_v22, %v1012_v23  ;;  %v18394_v40 = vcombine.low %v1005_v25, %v1013_v26  ;;  %v18473_v22 = vcombine.high %v1084_v16, %v1092_v2  ;;  %v1100_v25 = vld [vmem:[%s21082_s18 + $0x1820] sm:$0xff] }
 0x50c   : > { %v18411_v42 = vcombine.high %v1021_v35, %v1029_v36  ;;  %v1108_v26 = vld [vmem:[%s21082_s18 + $0x1860] sm:$0xff] }
 0x50e   : > { %14137 = vmatpush1.bf16.msra.mxu0 %v18312_v46  ;;  %14465 = vmatpush1.bf16.msra.mxu1 %v18314_v47  ;;  %v1037_v46 = vld [vmem:[%s21082_s18 + $0x1628] sm:$0xff] }
 0x50f   : > { %14138 = vmatprep.subr.bf16.mxu0 %v18329_v48  ;;  %14466 = vmatprep.subr.bf16.mxu1 %v18331_v51  ;;  %v1045_v47 = vld [vmem:[%s21082_s18 + $0x1668] sm:$0xff]  ;;  %v18408_v48 = vcombine.low %v1020_v0, %v1028_v34  ;;  %v18410_v51 = vcombine.low %v1021_v35, %v1029_v36  ;;  %v18489_v0 = vcombine.high %v1100_v25, %v1108_v26  ;;  %v1116_v35 = vld [vmem:[%s21082_s18 + $0x18a0] sm:$0xff] }
 0x510   : > { %v18427_v55 = vcombine.high %v1037_v46, %v1045_v47  ;;  %v1124_v36 = vld [vmem:[%s21082_s18 + $0x18e0] sm:$0xff] }
 0x512   : > { %14139 = vmatpush1.bf16.msra.mxu0 %v18328_v58  ;;  %14467 = vmatpush1.bf16.msra.mxu1 %v18330_v61  ;;  %v1053_v58 = vld [vmem:[%s21082_s18 + $0x16a8] sm:$0xff] }
 0x513   : > { %14140 = vmatprep.subr.bf16.mxu0 %v18345_v62  ;;  %14468 = vmatprep.subr.bf16.mxu1 %v18347_v63  ;;  %v1061_v61 = vld [vmem:[%s21082_s18 + $0x16e8] sm:$0xff]  ;;  %v18424_v62 = vcombine.low %v1036_v43, %v1044_v44  ;;  %v18426_v63 = vcombine.low %v1037_v46, %v1045_v47  ;;  %v18505_v43 = vcombine.high %v1116_v35, %v1124_v36  ;;  %v1132_v46 = vld [vmem:[%s21082_s18 + $0x1920] sm:$0xff] }
 0x514   : > { %v18443_v4 = vcombine.high %v1053_v58, %v1061_v61  ;;  %v1140_v47 = vld [vmem:[%s21082_s18 + $0x1960] sm:$0xff] }
 0x516   : > { %14141 = vmatpush1.bf16.msra.mxu0 %v18344_v7  ;;  %14469 = vmatpush1.bf16.msra.mxu1 %v18346_v11  ;;  %v1069_v7 = vld [vmem:[%s21082_s18 + $0x1728] sm:$0xff] }
 0x517   : > { %14142 = vmatprep.subr.bf16.mxu0 %v18361_v12  ;;  %14470 = vmatprep.subr.bf16.mxu1 %v18363_v13  ;;  %v1077_v11 = vld [vmem:[%s21082_s18 + $0x1768] sm:$0xff]  ;;  %v18440_v12 = vcombine.low %v1052_v56, %v1060_v57  ;;  %v18442_v13 = vcombine.low %v1053_v58, %v1061_v61  ;;  %v18521_v56 = vcombine.high %v1132_v46, %v1140_v47  ;;  %v1148_v58 = vld [vmem:[%s21082_s18 + $0x19a0] sm:$0xff] }
 0x518   : > { %v18459_v15 = vcombine.high %v1069_v7, %v1077_v11  ;;  %v1156_v61 = vld [vmem:[%s21082_s18 + $0x19e0] sm:$0xff] }
 0x51a   : > { %14143 = vmatpush1.bf16.msra.mxu0 %v18360_v18  ;;  %14471 = vmatpush1.bf16.msra.mxu1 %v18362_v54  ;;  %v1085_v18 = vld [vmem:[%s21082_s18 + $0x17a8] sm:$0xff] }
 0x51b   : > { %14144 = vmatprep.subr.bf16.mxu0 %v18377_v17  ;;  %14472 = vmatprep.subr.bf16.mxu1 %v18379_v21  ;;  %v1093_v54 = vld [vmem:[%s21082_s18 + $0x17e8] sm:$0xff]  ;;  %v18456_v17 = vcombine.low %v1068_v5, %v1076_v30  ;;  %v18458_v21 = vcombine.low %v1069_v7, %v1077_v11  ;;  %v18537_v5 = vcombine.high %v1148_v58, %v1156_v61  ;;  %v1164_v7 = vld [vmem:[%s21082_s18 + $0x1a20] sm:$0xff] }
 0x51c   : > { %v18475_v23 = vcombine.high %v1085_v18, %v1093_v54  ;;  %v1172_v11 = vld [vmem:[%s21082_s18 + $0x1a60] sm:$0xff] }
 0x51e   : > { %14145 = vmatpush1.bf16.msra.mxu0 %v18376_v27  ;;  %14473 = vmatpush1.bf16.msra.mxu1 %v18378_v29  ;;  %v1101_v27 = vld [vmem:[%s21082_s18 + $0x1828] sm:$0xff] }
 0x51f   : > { %14146 = vmatprep.subr.bf16.mxu0 %v18393_v31  ;;  %14474 = vmatprep.subr.bf16.mxu1 %v18395_v32  ;;  %v1109_v29 = vld [vmem:[%s21082_s18 + $0x1868] sm:$0xff]  ;;  %v18472_v31 = vcombine.low %v1084_v16, %v1092_v2  ;;  %v18474_v32 = vcombine.low %v1085_v18, %v1093_v54  ;;  %v18553_v16 = vcombine.high %v1164_v7, %v1172_v11  ;;  %v1180_v18 = vld [vmem:[%s21082_s18 + $0x1aa0] sm:$0xff] }
 0x520   : > { %v18491_v34 = vcombine.high %v1101_v27, %v1109_v29  ;;  %v1188_v54 = vld [vmem:[%s21082_s18 + $0x1ae0] sm:$0xff] }
 0x522   : > { %14147 = vmatpush1.bf16.msra.mxu0 %v18392_v37  ;;  %14475 = vmatpush1.bf16.msra.mxu1 %v18394_v40  ;;  %v1117_v37 = vld [vmem:[%s21082_s18 + $0x18a8] sm:$0xff] }
 0x523   : > { %14148 = vmatprep.subr.bf16.mxu0 %v18409_v41  ;;  %14476 = vmatprep.subr.bf16.mxu1 %v18411_v42  ;;  %v1125_v40 = vld [vmem:[%s21082_s18 + $0x18e8] sm:$0xff]  ;;  %v18488_v41 = vcombine.low %v1100_v25, %v1108_v26  ;;  %v18490_v42 = vcombine.low %v1101_v27, %v1109_v29  ;;  %v18569_v25 = vcombine.high %v1180_v18, %v1188_v54  ;;  %v1196_v27 = vld [vmem:[%s21082_s18 + $0x1b20] sm:$0xff] }
 0x524   : > { %v18507_v44 = vcombine.high %v1117_v37, %v1125_v40  ;;  %v1204_v29 = vld [vmem:[%s21082_s18 + $0x1b60] sm:$0xff] }
 0x526   : > { %14149 = vmatpush1.bf16.msra.mxu0 %v18408_v48  ;;  %14477 = vmatpush1.bf16.msra.mxu1 %v18410_v51  ;;  %v1133_v48 = vld [vmem:[%s21082_s18 + $0x1928] sm:$0xff] }
 0x527   : > { %14150 = vmatprep.subr.bf16.mxu0 %v18425_v53  ;;  %14478 = vmatprep.subr.bf16.mxu1 %v18427_v55  ;;  %v1141_v51 = vld [vmem:[%s21082_s18 + $0x1968] sm:$0xff]  ;;  %v18504_v53 = vcombine.low %v1116_v35, %v1124_v36  ;;  %v18506_v55 = vcombine.low %v1117_v37, %v1125_v40  ;;  %v18585_v35 = vcombine.high %v1196_v27, %v1204_v29  ;;  %v1212_v40 = vld [vmem:[%s21082_s18 + $0x1ba0] sm:$0xff] }
 0x528   : > { %v18523_v57 = vcombine.high %v1133_v48, %v1141_v51 }
 0x52a   : > { %14151 = vmatpush1.bf16.msra.mxu0 %v18424_v62  ;;  %14479 = vmatpush1.bf16.msra.mxu1 %v18426_v63  ;;  %v1149_v62 = vld [vmem:[%s21082_s18 + $0x19a8] sm:$0xff] }
 0x52b   : > { %14152 = vmatprep.subr.bf16.mxu0 %v18441_v9  ;;  %14480 = vmatprep.subr.bf16.mxu1 %v18443_v4  ;;  %v1157_v63 = vld [vmem:[%s21082_s18 + $0x19e8] sm:$0xff]  ;;  %v18520_v9 = vcombine.low %v1132_v46, %v1140_v47  ;;  %v18522_v4 = vcombine.low %v1133_v48, %v1141_v51 }
 0x52c   : > { %v18539_v30 = vcombine.high %v1149_v62, %v1157_v63  ;;  %v1221_v46 = vld [vmem:[%s21082_s18 + $0x1be8] sm:$0xff] }
 0x52e   : > { %14153 = vmatpush1.bf16.msra.mxu0 %v18440_v12  ;;  %14481 = vmatpush1.bf16.msra.mxu1 %v18442_v13  ;;  %v1165_v12 = vld [vmem:[%s21082_s18 + $0x1a28] sm:$0xff] }
 0x52f   : > { %14154 = vmatprep.subr.bf16.mxu0 %v18457_v14  ;;  %14482 = vmatprep.subr.bf16.mxu1 %v18459_v15  ;;  %v1173_v13 = vld [vmem:[%s21082_s18 + $0x1a68] sm:$0xff]  ;;  %v18536_v14 = vcombine.low %v1148_v58, %v1156_v61  ;;  %v18538_v15 = vcombine.low %v1149_v62, %v1157_v63 }
 0x530   : > { %v18555_v2 = vcombine.high %v1165_v12, %v1173_v13 }
 0x532   : > { %14155 = vmatpush1.bf16.msra.mxu0 %v18456_v17  ;;  %14483 = vmatpush1.bf16.msra.mxu1 %v18458_v21  ;;  %v1181_v17 = vld [vmem:[%s21082_s18 + $0x1aa8] sm:$0xff] }
 0x533   : > { %14156 = vmatprep.subr.bf16.mxu0 %v18473_v22  ;;  %14484 = vmatprep.subr.bf16.mxu1 %v18475_v23  ;;  %v1189_v21 = vld [vmem:[%s21082_s18 + $0x1ae8] sm:$0xff]  ;;  %v18552_v22 = vcombine.low %v1164_v7, %v1172_v11  ;;  %v18554_v23 = vcombine.low %v1165_v12, %v1173_v13 }
 0x534   : > { %v18571_v26 = vcombine.high %v1181_v17, %v1189_v21  ;;  %v1229_v7 = vld [vmem:[%s21082_s18 + $0x1c28] sm:$0xff] }
 0x535   : > { %v1237_v11 = vld [vmem:[%s21082_s18 + $0x1c68] sm:$0xff] }
 0x536   : > { %14157 = vmatpush1.bf16.msra.mxu0 %v18472_v31  ;;  %14485 = vmatpush1.bf16.msra.mxu1 %v18474_v32  ;;  %v1197_v31 = vld [vmem:[%s21082_s18 + $0x1b28] sm:$0xff] }
 0x537   : > { %14167 = vmatprep.subr.bf16.mxu0 %v18489_v0  ;;  %14495 = vmatprep.subr.bf16.mxu1 %v18491_v34  ;;  %v1205_v32 = vld [vmem:[%s21082_s18 + $0x1b68] sm:$0xff]  ;;  %v18568_v0 = vcombine.low %v1180_v18, %v1188_v54  ;;  %v18570_v34 = vcombine.low %v1181_v17, %v1189_v21  ;;  %v1244_v18 = vld [vmem:[%s21082_s18 + $0x1ca0] sm:$0xff] }
 0x538   : > { %v18587_v37 = vcombine.high %v1197_v31, %v1205_v32  ;;  %v18586_v58 = vcombine.low %v1197_v31, %v1205_v32  ;;  %v325_v12 = vld [vmem:[#allocation2 + $0x8] sm:$0xff]  ;;  %v1252_v54 = vld [vmem:[%s21082_s18 + $0x1ce0] sm:$0xff] }
 0x539   : > { %14159 = vmatmul.mubr.bf16.vlgmr.msra.gmra.mrb[8].mxu0 %v21348_v59  ;;  %14487 = vmatmul.mubr.bf16.vlgmr.msra.gmra.mrb[8].mxu1 %v21348_v59  ;;  %v1245_v21 = vld [vmem:[%s21082_s18 + $0x1ca8] sm:$0xff]  ;;  %v1268_v31 = vld [vmem:[%s21082_s18 + $0x1d60] sm:$0xff] }
 0x53a   : > { %14168 = vmatpush1.bf16.msra.mxu0 %v18488_v41  ;;  %14496 = vmatpush1.bf16.msra.mxu1 %v18490_v42  ;;  %v1220_v41 = vld [vmem:[%s21082_s18 + $0x1be0] sm:$0xff]  ;;  %v1261_v32 = vld [vmem:[%s21082_s18 + $0x1d28] sm:$0xff] }
 0x53b   : > { %14169 = vmatprep.subr.bf16.mxu0 %v18505_v43  ;;  %14497 = vmatprep.subr.bf16.mxu1 %v18507_v44  ;;  %v1213_v44 = vld [vmem:[%s21082_s18 + $0x1ba8] sm:$0xff]  ;;  %v18601_v61 = vcombine.high %v1212_v40, %v1220_v41  ;;  %v18600_v13 = vcombine.low %v1212_v40, %v1220_v41  ;;  %v1276_v40 = vld [vmem:[%s21082_s18 + $0x1da0] sm:$0xff] }
 0x53c   : > { %14199 = vmatprep.mubr.bf16.mxu0 %v21356_v6  ;;  %14527 = vmatprep.mubr.bf16.mxu1 %v21356_v6  ;;  %v1284_v41 = vld [vmem:[%s21082_s18 + $0x1de0] sm:$0xff] }
 0x53e   : > { %14170 = vmatpush1.bf16.msra.mxu0 %v18504_v53  ;;  %14498 = vmatpush1.bf16.msra.mxu1 %v18506_v55  ;;  %v18584_v53 = vcombine.low %v1196_v27, %v1204_v29  ;;  %v1260_v29 = vld [vmem:[%s21082_s18 + $0x1d20] sm:$0xff] }
 0x53f   : > { %14171 = vmatprep.subr.bf16.mxu0 %v18521_v56  ;;  %14499 = vmatprep.subr.bf16.mxu1 %v18523_v57 }
 0x542   : > { %14172 = vmatpush1.bf16.msra.mxu0 %v18520_v9  ;;  %14500 = vmatpush1.bf16.msra.mxu1 %v18522_v4  ;;  %v18603_v9 = vcombine.high %v1213_v44, %v1221_v46  ;;  %v1228_v4 = vld [vmem:[%s21082_s18 + $0x1c20] sm:$0xff] }
 0x543   : > { %14173 = vmatprep.subr.bf16.mxu0 %v18537_v5  ;;  %14501 = vmatprep.subr.bf16.mxu1 %v18539_v30  ;;  %v1236_v5 = vld [vmem:[%s21082_s18 + $0x1c60] sm:$0xff] }
 0x546   : > { %14174 = vmatpush1.bf16.msra.mxu0 %v18536_v14  ;;  %14502 = vmatpush1.bf16.msra.mxu1 %v18538_v15  ;;  %v18602_v15 = vcombine.low %v1213_v44, %v1221_v46  ;;  %v18648_v44 = vcombine.low %v1260_v29, %v1268_v31 }
 0x547   : > { %14175 = vmatprep.subr.bf16.mxu0 %v18553_v16  ;;  %14503 = vmatprep.subr.bf16.mxu1 %v18555_v2  ;;  %v18617_v16 = vcombine.high %v1228_v4, %v1236_v5  ;;  %v18619_v2 = vcombine.high %v1229_v7, %v1237_v11 }
 0x54a   : > { %14176 = vmatpush1.bf16.msra.mxu0 %v18552_v22  ;;  %14504 = vmatpush1.bf16.msra.mxu1 %v18554_v23  ;;  %v1253_v22 = vld [vmem:[%s21082_s18 + $0x1ce8] sm:$0xff]  ;;  %v18616_v23 = vcombine.low %v1228_v4, %v1236_v5 }
 0x54b   : > { %14177 = vmatprep.subr.bf16.mxu0 %v18569_v25  ;;  %14505 = vmatprep.subr.bf16.mxu1 %v18571_v26  ;;  %v18618_v25 = vcombine.low %v1229_v7, %v1237_v11  ;;  %v18633_v26 = vcombine.high %v1244_v18, %v1252_v54  ;;  %v18635_v27 = vcombine.high %v1245_v21, %v1253_v22  ;;  %v1309_v4 = vld [vmem:[%s21082_s18 + $0x1ea8] sm:$0xff] }
 0x54c   : > { %v13709_v36 = vpop.f32.mrb[4].mxu0  ;;  %v14037_v42 = vpop.f32.mrb[4].mxu1  ;;  %v1317_v5 = vld [vmem:[%s21082_s18 + $0x1ee8] sm:$0xff] }
 0x54d   : > { %v13711_v43 = vpop.f32.mrb[5].mxu0  ;;  %v14039_v48 = vpop.f32.mrb[5].mxu1 }
 0x54e   : > { %v15389_v47 = vcombine.low %v13709_v36, %v13711_v43  ;;  %v13713_v51 = vpop.f32.mrb[6].mxu0  ;;  %14178 = vmatpush1.bf16.msra.mxu0 %v18568_v0  ;;  %v15390_v55 = vcombine.low %v14037_v42, %v14039_v48  ;;  %v14041_v56 = vpop.f32.mrb[6].mxu1  ;;  %14506 = vmatpush1.bf16.msra.mxu1 %v18570_v34  ;;  %v1269_v0 = vld [vmem:[%s21082_s18 + $0x1d68] sm:$0xff]  ;;  %v18632_v34 = vcombine.low %v1244_v18, %v1252_v54 }
 0x54f   : > { %v13714_v57 = vpop.f32.mrb[7].mxu0  ;;  %14179 = vmatprep.subr.bf16.mxu0 %v18585_v35  ;;  %v14042_v63 = vpop.f32.mrb[7].mxu1  ;;  %14507 = vmatprep.subr.bf16.mxu1 %v18587_v37  ;;  %v18634_v35 = vcombine.low %v1245_v21, %v1253_v22  ;;  %v18649_v36 = vcombine.high %v1260_v29, %v1268_v31  ;;  %v18651_v37 = vcombine.high %v1261_v32, %v1269_v0  ;;  %v1277_v42 = vld [vmem:[%s21082_s18 + $0x1da8] sm:$0xff]  ;;  %v1292_v51 = vld [vmem:[%s21082_s18 + $0x1e20] sm:$0xff] }
 0x550   : > { %v15397_v62 = vrot.slane %v15389_v47, %v21975_v3  ;;  %v15404_v30 = vrot.slane %v15390_v55, %v21975_v3  ;;  %v1285_v43 = vld [vmem:[%s21082_s18 + $0x1de8] sm:$0xff]  ;;  %v18650_v46 = vcombine.low %v1261_v32, %v1269_v0  ;;  %v18665_v47 = vcombine.high %v1276_v40, %v1284_v41  ;;  %v1308_v63 = vld [vmem:[%s21082_s18 + $0x1ea0] sm:$0xff] }
 0x551   : > { %v18667_v48 = vcombine.high %v1277_v42, %v1285_v43  ;;  %v1293_v55 = vld [vmem:[%s21082_s18 + $0x1e28] sm:$0xff]  ;;  %v18664_v57 = vcombine.low %v1276_v40, %v1284_v41  ;;  %v18698_v18 = vcombine.low %v1309_v4, %v1317_v5  ;;  %v1340_v21 = vld [vmem:[%s21082_s18 + $0x1fa0] sm:$0xff] }
 0x552   : > { %14180 = vmatpush1.bf16.msra.mxu0 %v18584_v53  ;;  %v15405_v14 = vcombine.low %v15397_v62, %v15404_v30  ;;  %14508 = vmatpush1.bf16.msra.mxu1 %v18586_v58  ;;  %v1300_v53 = vld [vmem:[%s21082_s18 + $0x1e60] sm:$0xff]  ;;  %v1301_v56 = vld [vmem:[%s21082_s18 + $0x1e68] sm:$0xff]  ;;  %v18666_v58 = vcombine.low %v1277_v42, %v1285_v43 }
 0x553   : > { %14181 = vmatprep.subr.bf16.mxu0 %v18601_v61  ;;  %14509 = vmatprep.subr.bf16.mxu1 %v18603_v9  ;;  %v18681_v61 = vcombine.high %v1292_v51, %v1300_v53  ;;  %v18683_v62 = vcombine.high %v1293_v55, %v1301_v56  ;;  %v1316_v9 = vld [vmem:[%s21082_s18 + $0x1ee0] sm:$0xff]  ;;  %v18680_v30 = vcombine.low %v1292_v51, %v1300_v53 }
 0x554   : > { %v15445_v17 = vadd.f32 %v15405_v14, %v325_v12  ;;  %v18682_v7 = vcombine.low %v1293_v55, %v1301_v56  ;;  %v18697_v11 = vcombine.high %v1308_v63, %v1316_v9  ;;  %v18699_v12 = vcombine.high %v1309_v4, %v1317_v5  ;;  %v1332_v14 = vld [vmem:[%s21082_s18 + $0x1f60] sm:$0xff] }
 0x555   : > { %v1348_v22 = vld [vmem:[%s21082_s18 + $0x1fe0] sm:$0xff] }
 0x556   : > { %14182 = vmatpush1.bf16.msra.mxu0 %v18600_v13  ;;  %15449 = vst [vmem:[#allocation2 + $0x8] sm:$0xff] %v15445_v17  ;;  %14510 = vmatpush1.bf16.msra.mxu1 %v18602_v15  ;;  %v1324_v13 = vld [vmem:[%s21082_s18 + $0x1f20] sm:$0xff]  ;;  %v1325_v15 = vld [vmem:[%s21082_s18 + $0x1f28] sm:$0xff]  ;;  %v18729_v29 = vcombine.high %v1340_v21, %v1348_v22 }
 0x557   : > { %14183 = vmatprep.subr.bf16.mxu0 %v18617_v16  ;;  %14511 = vmatprep.subr.bf16.mxu1 %v18619_v2  ;;  %v1333_v16 = vld [vmem:[%s21082_s18 + $0x1f68] sm:$0xff]  ;;  %v18696_v2 = vcombine.low %v1308_v63, %v1316_v9  ;;  %v18713_v54 = vcombine.high %v1324_v13, %v1332_v14  ;;  %v1356_v32 = vld [vmem:[%s21082_s18 + $0x2020] sm:$0xff] }
 0x558   : > { %v18715_v17 = vcombine.high %v1325_v15, %v1333_v16  ;;  %v1364_v0 = vld [vmem:[%s21082_s18 + $0x2060] sm:$0xff] }
 0x559   : > { %v18745_v40 = vcombine.high %v1356_v32, %v1364_v0  ;;  %v1372_v42 = vld [vmem:[%s21082_s18 + $0x20a0] sm:$0xff] }
 0x55a   : > { %14184 = vmatpush1.bf16.msra.mxu0 %v18616_v23  ;;  %14512 = vmatpush1.bf16.msra.mxu1 %v18618_v25  ;;  %v1341_v23 = vld [vmem:[%s21082_s18 + $0x1fa8] sm:$0xff]  ;;  %v1380_v43 = vld [vmem:[%s21082_s18 + $0x20e0] sm:$0xff] }
 0x55b   : > { %14185 = vmatprep.subr.bf16.mxu0 %v18633_v26  ;;  %14513 = vmatprep.subr.bf16.mxu1 %v18635_v27  ;;  %v1349_v25 = vld [vmem:[%s21082_s18 + $0x1fe8] sm:$0xff]  ;;  %v18712_v26 = vcombine.low %v1324_v13, %v1332_v14  ;;  %v18714_v27 = vcombine.low %v1325_v15, %v1333_v16  ;;  %v18761_v51 = vcombine.high %v1372_v42, %v1380_v43  ;;  %v1388_v55 = vld [vmem:[%s21082_s18 + $0x2120] sm:$0xff] }
 0x55c   : > { %v18731_v31 = vcombine.high %v1341_v23, %v1349_v25  ;;  %v1396_v56 = vld [vmem:[%s21082_s18 + $0x2160] sm:$0xff] }
 0x55d   : > { %v18777_v63 = vcombine.high %v1388_v55, %v1396_v56  ;;  %v1404_v4 = vld [vmem:[%s21082_s18 + $0x21a0] sm:$0xff] }
 0x55e   : > { %14186 = vmatpush1.bf16.msra.mxu0 %v18632_v34  ;;  %14514 = vmatpush1.bf16.msra.mxu1 %v18634_v35  ;;  %v1357_v34 = vld [vmem:[%s21082_s18 + $0x2028] sm:$0xff]  ;;  %v1412_v5 = vld [vmem:[%s21082_s18 + $0x21e0] sm:$0xff] }
 0x55f   : > { %14187 = vmatprep.subr.bf16.mxu0 %v18649_v36  ;;  %14515 = vmatprep.subr.bf16.mxu1 %v18651_v37  ;;  %v1365_v35 = vld [vmem:[%s21082_s18 + $0x2068] sm:$0xff]  ;;  %v18728_v36 = vcombine.low %v1340_v21, %v1348_v22  ;;  %v18730_v37 = vcombine.low %v1341_v23, %v1349_v25  ;;  %v18793_v13 = vcombine.high %v1404_v4, %v1412_v5  ;;  %v1420_v15 = vld [vmem:[%s21082_s18 + $0x2220] sm:$0xff] }
 0x560   : > { %v18747_v41 = vcombine.high %v1357_v34, %v1365_v35  ;;  %v1428_v16 = vld [vmem:[%s21082_s18 + $0x2260] sm:$0xff] }
 0x561   : > { %v18809_v21 = vcombine.high %v1420_v15, %v1428_v16  ;;  %v1436_v23 = vld [vmem:[%s21082_s18 + $0x22a0] sm:$0xff] }
 0x562   : > { %14188 = vmatpush1.bf16.msra.mxu0 %v18648_v44  ;;  %14516 = vmatpush1.bf16.msra.mxu1 %v18650_v46  ;;  %v1373_v44 = vld [vmem:[%s21082_s18 + $0x20a8] sm:$0xff]  ;;  %v1444_v25 = vld [vmem:[%s21082_s18 + $0x22e0] sm:$0xff] }
 0x563   : > { %14189 = vmatprep.subr.bf16.mxu0 %v18665_v47  ;;  %14517 = vmatprep.subr.bf16.mxu1 %v18667_v48  ;;  %v1381_v46 = vld [vmem:[%s21082_s18 + $0x20e8] sm:$0xff]  ;;  %v18744_v47 = vcombine.low %v1356_v32, %v1364_v0  ;;  %v18746_v48 = vcombine.low %v1357_v34, %v1365_v35  ;;  %v18825_v32 = vcombine.high %v1436_v23, %v1444_v25  ;;  %v1452_v34 = vld [vmem:[%s21082_s18 + $0x2320] sm:$0xff] }
 0x564   : > { %v18763_v53 = vcombine.high %v1373_v44, %v1381_v46  ;;  %v1460_v35 = vld [vmem:[%s21082_s18 + $0x2360] sm:$0xff] }
 0x566   : > { %14190 = vmatpush1.bf16.msra.mxu0 %v18664_v57  ;;  %14518 = vmatpush1.bf16.msra.mxu1 %v18666_v58  ;;  %v1389_v57 = vld [vmem:[%s21082_s18 + $0x2128] sm:$0xff] }
 0x567   : > { %14191 = vmatprep.subr.bf16.mxu0 %v18681_v61  ;;  %14519 = vmatprep.subr.bf16.mxu1 %v18683_v62  ;;  %v1397_v58 = vld [vmem:[%s21082_s18 + $0x2168] sm:$0xff]  ;;  %v18760_v61 = vcombine.low %v1372_v42, %v1380_v43  ;;  %v18762_v62 = vcombine.low %v1373_v44, %v1381_v46  ;;  %v18841_v42 = vcombine.high %v1452_v34, %v1460_v35  ;;  %v1468_v44 = vld [vmem:[%s21082_s18 + $0x23a0] sm:$0xff] }
 0x568   : > { %v18779_v9 = vcombine.high %v1389_v57, %v1397_v58  ;;  %v1476_v46 = vld [vmem:[%s21082_s18 + $0x23e0] sm:$0xff] }
 0x56a   : > { %14192 = vmatpush1.bf16.msra.mxu0 %v18680_v30  ;;  %14520 = vmatpush1.bf16.msra.mxu1 %v18682_v7  ;;  %v1405_v30 = vld [vmem:[%s21082_s18 + $0x21a8] sm:$0xff] }
 0x56b   : > { %14193 = vmatprep.subr.bf16.mxu0 %v18697_v11  ;;  %14521 = vmatprep.subr.bf16.mxu1 %v18699_v12  ;;  %v1413_v7 = vld [vmem:[%s21082_s18 + $0x21e8] sm:$0xff]  ;;  %v18776_v11 = vcombine.low %v1388_v55, %v1396_v56  ;;  %v18778_v12 = vcombine.low %v1389_v57, %v1397_v58  ;;  %v18857_v55 = vcombine.high %v1468_v44, %v1476_v46  ;;  %v1484_v57 = vld [vmem:[%s21082_s18 + $0x2420] sm:$0xff] }
 0x56c   : > { %v18795_v14 = vcombine.high %v1405_v30, %v1413_v7  ;;  %v1492_v58 = vld [vmem:[%s21082_s18 + $0x2460] sm:$0xff] }
 0x56e   : > { %14194 = vmatpush1.bf16.msra.mxu0 %v18696_v2  ;;  %14522 = vmatpush1.bf16.msra.mxu1 %v18698_v18  ;;  %v1421_v2 = vld [vmem:[%s21082_s18 + $0x2228] sm:$0xff] }
 0x56f   : > { %14195 = vmatprep.subr.bf16.mxu0 %v18713_v54  ;;  %14523 = vmatprep.subr.bf16.mxu1 %v18715_v17  ;;  %v1429_v18 = vld [vmem:[%s21082_s18 + $0x2268] sm:$0xff]  ;;  %v18792_v54 = vcombine.low %v1404_v4, %v1412_v5  ;;  %v18794_v17 = vcombine.low %v1405_v30, %v1413_v7  ;;  %v18873_v4 = vcombine.high %v1484_v57, %v1492_v58  ;;  %v1500_v30 = vld [vmem:[%s21082_s18 + $0x24a0] sm:$0xff] }
 0x570   : > { %v18811_v22 = vcombine.high %v1421_v2, %v1429_v18  ;;  %v1508_v7 = vld [vmem:[%s21082_s18 + $0x24e0] sm:$0xff] }
 0x572   : > { %14196 = vmatpush1.bf16.msra.mxu0 %v18712_v26  ;;  %14524 = vmatpush1.bf16.msra.mxu1 %v18714_v27  ;;  %v1437_v26 = vld [vmem:[%s21082_s18 + $0x22a8] sm:$0xff] }
 0x573   : > { %14197 = vmatprep.subr.bf16.mxu0 %v18729_v29  ;;  %14525 = vmatprep.subr.bf16.mxu1 %v18731_v31  ;;  %v1445_v27 = vld [vmem:[%s21082_s18 + $0x22e8] sm:$0xff]  ;;  %v18808_v29 = vcombine.low %v1420_v15, %v1428_v16  ;;  %v18810_v31 = vcombine.low %v1421_v2, %v1429_v18  ;;  %v18889_v15 = vcombine.high %v1500_v30, %v1508_v7  ;;  %v1516_v2 = vld [vmem:[%s21082_s18 + $0x2520] sm:$0xff] }
 0x574   : > { %v18827_v0 = vcombine.high %v1437_v26, %v1445_v27  ;;  %v1524_v18 = vld [vmem:[%s21082_s18 + $0x2560] sm:$0xff] }
 0x576   : > { %14198 = vmatpush1.bf16.msra.mxu0 %v18728_v36  ;;  %14526 = vmatpush1.bf16.msra.mxu1 %v18730_v37  ;;  %v1453_v36 = vld [vmem:[%s21082_s18 + $0x2328] sm:$0xff] }
 0x577   : > { %14208 = vmatprep.subr.bf16.mxu0 %v18745_v40  ;;  %14536 = vmatprep.subr.bf16.mxu1 %v18747_v41  ;;  %v1461_v37 = vld [vmem:[%s21082_s18 + $0x2368] sm:$0xff]  ;;  %v18824_v40 = vcombine.low %v1436_v23, %v1444_v25  ;;  %v18826_v41 = vcombine.low %v1437_v26, %v1445_v27  ;;  %v18905_v23 = vcombine.high %v1516_v2, %v1524_v18  ;;  %v1532_v26 = vld [vmem:[%s21082_s18 + $0x25a0] sm:$0xff] }
 0x578   : > { %v18843_v43 = vcombine.high %v1453_v36, %v1461_v37  ;;  %v1540_v27 = vld [vmem:[%s21082_s18 + $0x25e0] sm:$0xff] }
 0x579   : > { %14200 = vmatmul.mubr.bf16.vlgmr.msra.gmra.mrb[8].mxu0 %v21433_v20  ;;  %14528 = vmatmul.mubr.bf16.vlgmr.msra.gmra.mrb[8].mxu1 %v21433_v20 }
 0x57a   : > { %14209 = vmatpush1.bf16.msra.mxu0 %v18744_v47  ;;  %14537 = vmatpush1.bf16.msra.mxu1 %v18746_v48  ;;  %v1469_v47 = vld [vmem:[%s21082_s18 + $0x23a8] sm:$0xff] }
 0x57b   : > { %14210 = vmatprep.subr.bf16.mxu0 %v18761_v51  ;;  %14538 = vmatprep.subr.bf16.mxu1 %v18763_v53  ;;  %v1477_v48 = vld [vmem:[%s21082_s18 + $0x23e8] sm:$0xff]  ;;  %v18840_v51 = vcombine.low %v1452_v34, %v1460_v35  ;;  %v18842_v53 = vcombine.low %v1453_v36, %v1461_v37  ;;  %v18921_v34 = vcombine.high %v1532_v26, %v1540_v27  ;;  %v1548_v36 = vld [vmem:[%s21082_s18 + $0x2620] sm:$0xff] }
 0x57c   : > { %14240 = vmatprep.mubr.bf16.mxu0 %v21440_v60  ;;  %14568 = vmatprep.mubr.bf16.mxu1 %v21440_v60  ;;  %v18859_v56 = vcombine.high %v1469_v47, %v1477_v48  ;;  %v1556_v37 = vld [vmem:[%s21082_s18 + $0x2660] sm:$0xff] }
 0x57e   : > { %14211 = vmatpush1.bf16.msra.mxu0 %v18760_v61  ;;  %14539 = vmatpush1.bf16.msra.mxu1 %v18762_v62  ;;  %v1485_v61 = vld [vmem:[%s21082_s18 + $0x2428] sm:$0xff] }
 0x57f   : > { %14212 = vmatprep.subr.bf16.mxu0 %v18777_v63  ;;  %14540 = vmatprep.subr.bf16.mxu1 %v18779_v9  ;;  %v1493_v62 = vld [vmem:[%s21082_s18 + $0x2468] sm:$0xff]  ;;  %v18856_v63 = vcombine.low %v1468_v44, %v1476_v46  ;;  %v18858_v9 = vcombine.low %v1469_v47, %v1477_v48  ;;  %v18937_v44 = vcombine.high %v1548_v36, %v1556_v37  ;;  %v1564_v47 = vld [vmem:[%s21082_s18 + $0x26a0] sm:$0xff] }
 0x580   : > { %v18875_v5 = vcombine.high %v1485_v61, %v1493_v62  ;;  %v1572_v48 = vld [vmem:[%s21082_s18 + $0x26e0] sm:$0xff] }
 0x582   : > { %14213 = vmatpush1.bf16.msra.mxu0 %v18776_v11  ;;  %14541 = vmatpush1.bf16.msra.mxu1 %v18778_v12  ;;  %v1501_v11 = vld [vmem:[%s21082_s18 + $0x24a8] sm:$0xff] }
 0x583   : > { %14214 = vmatprep.subr.bf16.mxu0 %v18793_v13  ;;  %14542 = vmatprep.subr.bf16.mxu1 %v18795_v14  ;;  %v1509_v12 = vld [vmem:[%s21082_s18 + $0x24e8] sm:$0xff]  ;;  %v18872_v13 = vcombine.low %v1484_v57, %v1492_v58  ;;  %v18874_v14 = vcombine.low %v1485_v61, %v1493_v62  ;;  %v18953_v57 = vcombine.high %v1564_v47, %v1572_v48  ;;  %v1580_v61 = vld [vmem:[%s21082_s18 + $0x2720] sm:$0xff] }
 0x584   : > { %v18891_v16 = vcombine.high %v1501_v11, %v1509_v12  ;;  %v1588_v62 = vld [vmem:[%s21082_s18 + $0x2760] sm:$0xff] }
 0x586   : > { %14215 = vmatpush1.bf16.msra.mxu0 %v18792_v54  ;;  %14543 = vmatpush1.bf16.msra.mxu1 %v18794_v17  ;;  %v1517_v54 = vld [vmem:[%s21082_s18 + $0x2528] sm:$0xff] }
 0x587   : > { %14216 = vmatprep.subr.bf16.mxu0 %v18809_v21  ;;  %14544 = vmatprep.subr.bf16.mxu1 %v18811_v22  ;;  %v1525_v17 = vld [vmem:[%s21082_s18 + $0x2568] sm:$0xff]  ;;  %v18888_v21 = vcombine.low %v1500_v30, %v1508_v7  ;;  %v18890_v22 = vcombine.low %v1501_v11, %v1509_v12  ;;  %v18969_v30 = vcombine.high %v1580_v61, %v1588_v62  ;;  %v1596_v11 = vld [vmem:[%s21082_s18 + $0x27a0] sm:$0xff] }
 0x588   : > { %v18907_v25 = vcombine.high %v1517_v54, %v1525_v17  ;;  %v1604_v12 = vld [vmem:[%s21082_s18 + $0x27e0] sm:$0xff] }
 0x58a   : > { %14217 = vmatpush1.bf16.msra.mxu0 %v18808_v29  ;;  %14545 = vmatpush1.bf16.msra.mxu1 %v18810_v31  ;;  %v1533_v29 = vld [vmem:[%s21082_s18 + $0x25a8] sm:$0xff] }
 0x58b   : > { %14218 = vmatprep.subr.bf16.mxu0 %v18825_v32  ;;  %14546 = vmatprep.subr.bf16.mxu1 %v18827_v0  ;;  %v1541_v31 = vld [vmem:[%s21082_s18 + $0x25e8] sm:$0xff]  ;;  %v18904_v32 = vcombine.low %v1516_v2, %v1524_v18  ;;  %v18906_v0 = vcombine.low %v1517_v54, %v1525_v17  ;;  %v18985_v2 = vcombine.high %v1596_v11, %v1604_v12  ;;  %v1612_v54 = vld [vmem:[%s21082_s18 + $0x2820] sm:$0xff] }
 0x58c   : > { %v18923_v35 = vcombine.high %v1533_v29, %v1541_v31  ;;  %v1620_v17 = vld [vmem:[%s21082_s18 + $0x2860] sm:$0xff] }
 0x58e   : > { %14219 = vmatpush1.bf16.msra.mxu0 %v18824_v40  ;;  %14547 = vmatpush1.bf16.msra.mxu1 %v18826_v41  ;;  %v1549_v40 = vld [vmem:[%s21082_s18 + $0x2628] sm:$0xff] }
 0x58f   : > { %14220 = vmatprep.subr.bf16.mxu0 %v18841_v42  ;;  %14548 = vmatprep.subr.bf16.mxu1 %v18843_v43  ;;  %v1557_v41 = vld [vmem:[%s21082_s18 + $0x2668] sm:$0xff]  ;;  %v18920_v42 = vcombine.low %v1532_v26, %v1540_v27  ;;  %v18922_v43 = vcombine.low %v1533_v29, %v1541_v31  ;;  %v19001_v26 = vcombine.high %v1612_v54, %v1620_v17  ;;  %v1628_v29 = vld [vmem:[%s21082_s18 + $0x28a0] sm:$0xff] }
 0x590   : > { %v18939_v46 = vcombine.high %v1549_v40, %v1557_v41  ;;  %v1636_v31 = vld [vmem:[%s21082_s18 + $0x28e0] sm:$0xff] }
 0x592   : > { %14221 = vmatpush1.bf16.msra.mxu0 %v18840_v51  ;;  %14549 = vmatpush1.bf16.msra.mxu1 %v18842_v53  ;;  %v1565_v51 = vld [vmem:[%s21082_s18 + $0x26a8] sm:$0xff] }
 0x593   : > { %14222 = vmatprep.subr.bf16.mxu0 %v18857_v55  ;;  %14550 = vmatprep.subr.bf16.mxu1 %v18859_v56  ;;  %v1573_v53 = vld [vmem:[%s21082_s18 + $0x26e8] sm:$0xff]  ;;  %v18936_v55 = vcombine.low %v1548_v36, %v1556_v37  ;;  %v18938_v56 = vcombine.low %v1549_v40, %v1557_v41  ;;  %v19017_v36 = vcombine.high %v1628_v29, %v1636_v31  ;;  %v1644_v40 = vld [vmem:[%s21082_s18 + $0x2920] sm:$0xff] }
 0x594   : > { %v18955_v58 = vcombine.high %v1565_v51, %v1573_v53  ;;  %v1652_v41 = vld [vmem:[%s21082_s18 + $0x2960] sm:$0xff] }
 0x596   : > { %14223 = vmatpush1.bf16.msra.mxu0 %v18856_v63  ;;  %14551 = vmatpush1.bf16.msra.mxu1 %v18858_v9  ;;  %v1581_v63 = vld [vmem:[%s21082_s18 + $0x2728] sm:$0xff] }
 0x597   : > { %14224 = vmatprep.subr.bf16.mxu0 %v18873_v4  ;;  %14552 = vmatprep.subr.bf16.mxu1 %v18875_v5  ;;  %v1589_v9 = vld [vmem:[%s21082_s18 + $0x2768] sm:$0xff]  ;;  %v18952_v4 = vcombine.low %v1564_v47, %v1572_v48  ;;  %v18954_v5 = vcombine.low %v1565_v51, %v1573_v53  ;;  %v19033_v47 = vcombine.high %v1644_v40, %v1652_v41  ;;  %v1660_v51 = vld [vmem:[%s21082_s18 + $0x29a0] sm:$0xff] }
 0x598   : > { %v18971_v7 = vcombine.high %v1581_v63, %v1589_v9  ;;  %v1668_v53 = vld [vmem:[%s21082_s18 + $0x29e0] sm:$0xff] }
 0x59a   : > { %14225 = vmatpush1.bf16.msra.mxu0 %v18872_v13  ;;  %14553 = vmatpush1.bf16.msra.mxu1 %v18874_v14  ;;  %v1597_v13 = vld [vmem:[%s21082_s18 + $0x27a8] sm:$0xff] }
 0x59b   : > { %14226 = vmatprep.subr.bf16.mxu0 %v18889_v15  ;;  %14554 = vmatprep.subr.bf16.mxu1 %v18891_v16  ;;  %v1605_v14 = vld [vmem:[%s21082_s18 + $0x27e8] sm:$0xff]  ;;  %v18968_v15 = vcombine.low %v1580_v61, %v1588_v62  ;;  %v18970_v16 = vcombine.low %v1581_v63, %v1589_v9  ;;  %v19049_v61 = vcombine.high %v1660_v51, %v1668_v53  ;;  %v1676_v63 = vld [vmem:[%s21082_s18 + $0x2a20] sm:$0xff] }
 0x59c   : > { %v18987_v18 = vcombine.high %v1597_v13, %v1605_v14  ;;  %v1684_v9 = vld [vmem:[%s21082_s18 + $0x2a60] sm:$0xff] }
 0x59e   : > { %14227 = vmatpush1.bf16.msra.mxu0 %v18888_v21  ;;  %14555 = vmatpush1.bf16.msra.mxu1 %v18890_v22  ;;  %v1613_v21 = vld [vmem:[%s21082_s18 + $0x2828] sm:$0xff] }
 0x59f   : > { %14228 = vmatprep.subr.bf16.mxu0 %v18905_v23  ;;  %14556 = vmatprep.subr.bf16.mxu1 %v18907_v25  ;;  %v1621_v22 = vld [vmem:[%s21082_s18 + $0x2868] sm:$0xff]  ;;  %v18984_v23 = vcombine.low %v1596_v11, %v1604_v12  ;;  %v18986_v25 = vcombine.low %v1597_v13, %v1605_v14  ;;  %v19065_v11 = vcombine.high %v1676_v63, %v1684_v9  ;;  %v1692_v13 = vld [vmem:[%s21082_s18 + $0x2aa0] sm:$0xff] }
 0x5a0   : > { %v19003_v27 = vcombine.high %v1613_v21, %v1621_v22  ;;  %v1700_v14 = vld [vmem:[%s21082_s18 + $0x2ae0] sm:$0xff] }
 0x5a2   : > { %14229 = vmatpush1.bf16.msra.mxu0 %v18904_v32  ;;  %14557 = vmatpush1.bf16.msra.mxu1 %v18906_v0  ;;  %v1629_v32 = vld [vmem:[%s21082_s18 + $0x28a8] sm:$0xff] }
 0x5a3   : > { %14230 = vmatprep.subr.bf16.mxu0 %v18921_v34  ;;  %14558 = vmatprep.subr.bf16.mxu1 %v18923_v35  ;;  %v1637_v0 = vld [vmem:[%s21082_s18 + $0x28e8] sm:$0xff]  ;;  %v19000_v34 = vcombine.low %v1612_v54, %v1620_v17  ;;  %v19002_v35 = vcombine.low %v1613_v21, %v1621_v22  ;;  %v19081_v54 = vcombine.high %v1692_v13, %v1700_v14  ;;  %v1708_v21 = vld [vmem:[%s21082_s18 + $0x2b20] sm:$0xff] }
 0x5a4   : > { %v19019_v37 = vcombine.high %v1629_v32, %v1637_v0  ;;  %v1716_v22 = vld [vmem:[%s21082_s18 + $0x2b60] sm:$0xff] }
 0x5a6   : > { %14231 = vmatpush1.bf16.msra.mxu0 %v18920_v42  ;;  %14559 = vmatpush1.bf16.msra.mxu1 %v18922_v43  ;;  %v1645_v42 = vld [vmem:[%s21082_s18 + $0x2928] sm:$0xff] }
 0x5a7   : > { %14232 = vmatprep.subr.bf16.mxu0 %v18937_v44  ;;  %14560 = vmatprep.subr.bf16.mxu1 %v18939_v46  ;;  %v1653_v43 = vld [vmem:[%s21082_s18 + $0x2968] sm:$0xff]  ;;  %v19016_v44 = vcombine.low %v1628_v29, %v1636_v31  ;;  %v19018_v46 = vcombine.low %v1629_v32, %v1637_v0  ;;  %v19097_v29 = vcombine.high %v1708_v21, %v1716_v22  ;;  %v1724_v32 = vld [vmem:[%s21082_s18 + $0x2ba0] sm:$0xff] }
 0x5a8   : > { %v19035_v48 = vcombine.high %v1645_v42, %v1653_v43  ;;  %v1732_v0 = vld [vmem:[%s21082_s18 + $0x2be0] sm:$0xff] }
 0x5aa   : > { %14233 = vmatpush1.bf16.msra.mxu0 %v18936_v55  ;;  %14561 = vmatpush1.bf16.msra.mxu1 %v18938_v56  ;;  %v1661_v55 = vld [vmem:[%s21082_s18 + $0x29a8] sm:$0xff] }
 0x5ab   : > { %14234 = vmatprep.subr.bf16.mxu0 %v18953_v57  ;;  %14562 = vmatprep.subr.bf16.mxu1 %v18955_v58  ;;  %v1669_v56 = vld [vmem:[%s21082_s18 + $0x29e8] sm:$0xff]  ;;  %v19032_v57 = vcombine.low %v1644_v40, %v1652_v41  ;;  %v19034_v58 = vcombine.low %v1645_v42, %v1653_v43  ;;  %v19113_v40 = vcombine.high %v1724_v32, %v1732_v0  ;;  %v1740_v42 = vld [vmem:[%s21082_s18 + $0x2c20] sm:$0xff] }
 0x5ac   : > { %v19051_v62 = vcombine.high %v1661_v55, %v1669_v56  ;;  %v1748_v43 = vld [vmem:[%s21082_s18 + $0x2c60] sm:$0xff] }
 0x5ae   : > { %14235 = vmatpush1.bf16.msra.mxu0 %v18952_v4  ;;  %14563 = vmatpush1.bf16.msra.mxu1 %v18954_v5  ;;  %v1677_v4 = vld [vmem:[%s21082_s18 + $0x2a28] sm:$0xff] }
 0x5af   : > { %14236 = vmatprep.subr.bf16.mxu0 %v18969_v30  ;;  %14564 = vmatprep.subr.bf16.mxu1 %v18971_v7  ;;  %v1685_v5 = vld [vmem:[%s21082_s18 + $0x2a68] sm:$0xff]  ;;  %v19048_v30 = vcombine.low %v1660_v51, %v1668_v53  ;;  %v19050_v7 = vcombine.low %v1661_v55, %v1669_v56  ;;  %v19129_v51 = vcombine.high %v1740_v42, %v1748_v43  ;;  %v1756_v55 = vld [vmem:[%s21082_s18 + $0x2ca0] sm:$0xff] }
 0x5b0   : > { %v19067_v12 = vcombine.high %v1677_v4, %v1685_v5  ;;  %v1764_v56 = vld [vmem:[%s21082_s18 + $0x2ce0] sm:$0xff] }
 0x5b2   : > { %14237 = vmatpush1.bf16.msra.mxu0 %v18968_v15  ;;  %14565 = vmatpush1.bf16.msra.mxu1 %v18970_v16  ;;  %v1693_v15 = vld [vmem:[%s21082_s18 + $0x2aa8] sm:$0xff] }
 0x5b3   : > { %14238 = vmatprep.subr.bf16.mxu0 %v18985_v2  ;;  %14566 = vmatprep.subr.bf16.mxu1 %v18987_v18  ;;  %v1701_v16 = vld [vmem:[%s21082_s18 + $0x2ae8] sm:$0xff]  ;;  %v19064_v2 = vcombine.low %v1676_v63, %v1684_v9  ;;  %v19066_v18 = vcombine.low %v1677_v4, %v1685_v5  ;;  %v19145_v63 = vcombine.high %v1756_v55, %v1764_v56  ;;  %v1772_v4 = vld [vmem:[%s21082_s18 + $0x2d20] sm:$0xff] }
 0x5b4   : > { %v19083_v17 = vcombine.high %v1693_v15, %v1701_v16  ;;  %v1780_v5 = vld [vmem:[%s21082_s18 + $0x2d60] sm:$0xff] }
 0x5b6   : > { %14239 = vmatpush1.bf16.msra.mxu0 %v18984_v23  ;;  %14567 = vmatpush1.bf16.msra.mxu1 %v18986_v25  ;;  %v1709_v23 = vld [vmem:[%s21082_s18 + $0x2b28] sm:$0xff] }
 0x5b7   : > { %14249 = vmatprep.subr.bf16.mxu0 %v19001_v26  ;;  %14577 = vmatprep.subr.bf16.mxu1 %v19003_v27  ;;  %v1717_v25 = vld [vmem:[%s21082_s18 + $0x2b68] sm:$0xff]  ;;  %v19080_v26 = vcombine.low %v1692_v13, %v1700_v14  ;;  %v19082_v27 = vcombine.low %v1693_v15, %v1701_v16  ;;  %v19161_v13 = vcombine.high %v1772_v4, %v1780_v5  ;;  %v1788_v15 = vld [vmem:[%s21082_s18 + $0x2da0] sm:$0xff] }
 0x5b8   : > { %v19099_v31 = vcombine.high %v1709_v23, %v1717_v25  ;;  %v1796_v16 = vld [vmem:[%s21082_s18 + $0x2de0] sm:$0xff] }
 0x5b9   : > { %14241 = vmatmul.mubr.bf16.vlgmr.msra.gmra.mrb[8].mxu0 %v21508_v52  ;;  %14569 = vmatmul.mubr.bf16.vlgmr.msra.gmra.mrb[8].mxu1 %v21508_v52 }
 0x5ba   : > { %14250 = vmatpush1.bf16.msra.mxu0 %v19000_v34  ;;  %14578 = vmatpush1.bf16.msra.mxu1 %v19002_v35  ;;  %v1725_v34 = vld [vmem:[%s21082_s18 + $0x2ba8] sm:$0xff] }
 0x5bb   : > { %14251 = vmatprep.subr.bf16.mxu0 %v19017_v36  ;;  %14579 = vmatprep.subr.bf16.mxu1 %v19019_v37  ;;  %v1733_v35 = vld [vmem:[%s21082_s18 + $0x2be8] sm:$0xff]  ;;  %v19096_v36 = vcombine.low %v1708_v21, %v1716_v22  ;;  %v19098_v37 = vcombine.low %v1709_v23, %v1717_v25  ;;  %v19177_v21 = vcombine.high %v1788_v15, %v1796_v16  ;;  %v1804_v23 = vld [vmem:[%s21082_s18 + $0x2e20] sm:$0xff] }
 0x5bc   : > { %14281 = vmatprep.mubr.bf16.mxu0 %v21516_v1  ;;  %14609 = vmatprep.mubr.bf16.mxu1 %v21516_v1  ;;  %v19115_v41 = vcombine.high %v1725_v34, %v1733_v35  ;;  %v1812_v25 = vld [vmem:[%s21082_s18 + $0x2e60] sm:$0xff] }
 0x5be   : > { %14252 = vmatpush1.bf16.msra.mxu0 %v19016_v44  ;;  %14580 = vmatpush1.bf16.msra.mxu1 %v19018_v46  ;;  %v1741_v44 = vld [vmem:[%s21082_s18 + $0x2c28] sm:$0xff] }
 0x5bf   : > { %14253 = vmatprep.subr.bf16.mxu0 %v19033_v47  ;;  %14581 = vmatprep.subr.bf16.mxu1 %v19035_v48  ;;  %v1749_v46 = vld [vmem:[%s21082_s18 + $0x2c68] sm:$0xff]  ;;  %v19112_v47 = vcombine.low %v1724_v32, %v1732_v0  ;;  %v19114_v48 = vcombine.low %v1725_v34, %v1733_v35  ;;  %v19193_v32 = vcombine.high %v1804_v23, %v1812_v25  ;;  %v1820_v34 = vld [vmem:[%s21082_s18 + $0x2ea0] sm:$0xff] }
 0x5c0   : > { %v19131_v53 = vcombine.high %v1741_v44, %v1749_v46  ;;  %v1828_v35 = vld [vmem:[%s21082_s18 + $0x2ee0] sm:$0xff] }
 0x5c2   : > { %14254 = vmatpush1.bf16.msra.mxu0 %v19032_v57  ;;  %14582 = vmatpush1.bf16.msra.mxu1 %v19034_v58  ;;  %v1757_v57 = vld [vmem:[%s21082_s18 + $0x2ca8] sm:$0xff] }
 0x5c3   : > { %14255 = vmatprep.subr.bf16.mxu0 %v19049_v61  ;;  %14583 = vmatprep.subr.bf16.mxu1 %v19051_v62  ;;  %v1765_v58 = vld [vmem:[%s21082_s18 + $0x2ce8] sm:$0xff]  ;;  %v19128_v61 = vcombine.low %v1740_v42, %v1748_v43  ;;  %v19130_v62 = vcombine.low %v1741_v44, %v1749_v46  ;;  %v19209_v42 = vcombine.high %v1820_v34, %v1828_v35  ;;  %v1836_v44 = vld [vmem:[%s21082_s18 + $0x2f20] sm:$0xff] }
 0x5c4   : > { %v19147_v9 = vcombine.high %v1757_v57, %v1765_v58  ;;  %v1844_v46 = vld [vmem:[%s21082_s18 + $0x2f60] sm:$0xff] }
 0x5c6   : > { %14256 = vmatpush1.bf16.msra.mxu0 %v19048_v30  ;;  %14584 = vmatpush1.bf16.msra.mxu1 %v19050_v7  ;;  %v1773_v30 = vld [vmem:[%s21082_s18 + $0x2d28] sm:$0xff] }
 0x5c7   : > { %14257 = vmatprep.subr.bf16.mxu0 %v19065_v11  ;;  %14585 = vmatprep.subr.bf16.mxu1 %v19067_v12  ;;  %v1781_v7 = vld [vmem:[%s21082_s18 + $0x2d68] sm:$0xff]  ;;  %v19144_v11 = vcombine.low %v1756_v55, %v1764_v56  ;;  %v19146_v12 = vcombine.low %v1757_v57, %v1765_v58  ;;  %v19225_v55 = vcombine.high %v1836_v44, %v1844_v46  ;;  %v1852_v57 = vld [vmem:[%s21082_s18 + $0x2fa0] sm:$0xff] }
 0x5c8   : > { %v19163_v14 = vcombine.high %v1773_v30, %v1781_v7  ;;  %v1860_v58 = vld [vmem:[%s21082_s18 + $0x2fe0] sm:$0xff] }
 0x5ca   : > { %14258 = vmatpush1.bf16.msra.mxu0 %v19064_v2  ;;  %14586 = vmatpush1.bf16.msra.mxu1 %v19066_v18  ;;  %v1789_v2 = vld [vmem:[%s21082_s18 + $0x2da8] sm:$0xff] }
 0x5cb   : > { %14259 = vmatprep.subr.bf16.mxu0 %v19081_v54  ;;  %14587 = vmatprep.subr.bf16.mxu1 %v19083_v17  ;;  %v1797_v18 = vld [vmem:[%s21082_s18 + $0x2de8] sm:$0xff]  ;;  %v19160_v54 = vcombine.low %v1772_v4, %v1780_v5  ;;  %v19162_v17 = vcombine.low %v1773_v30, %v1781_v7  ;;  %v19241_v4 = vcombine.high %v1852_v57, %v1860_v58  ;;  %v1868_v30 = vld [vmem:[%s21082_s18 + $0x3020] sm:$0xff] }
 0x5cc   : > { %v19179_v22 = vcombine.high %v1789_v2, %v1797_v18  ;;  %v1876_v7 = vld [vmem:[%s21082_s18 + $0x3060] sm:$0xff] }
 0x5ce   : > { %14260 = vmatpush1.bf16.msra.mxu0 %v19080_v26  ;;  %14588 = vmatpush1.bf16.msra.mxu1 %v19082_v27  ;;  %v1805_v26 = vld [vmem:[%s21082_s18 + $0x2e28] sm:$0xff] }
 0x5cf   : > { %14261 = vmatprep.subr.bf16.mxu0 %v19097_v29  ;;  %14589 = vmatprep.subr.bf16.mxu1 %v19099_v31  ;;  %v1813_v27 = vld [vmem:[%s21082_s18 + $0x2e68] sm:$0xff]  ;;  %v19176_v29 = vcombine.low %v1788_v15, %v1796_v16  ;;  %v19178_v31 = vcombine.low %v1789_v2, %v1797_v18  ;;  %v19257_v15 = vcombine.high %v1868_v30, %v1876_v7  ;;  %v1884_v2 = vld [vmem:[%s21082_s18 + $0x30a0] sm:$0xff] }
 0x5d0   : > { %v19195_v0 = vcombine.high %v1805_v26, %v1813_v27  ;;  %v1892_v18 = vld [vmem:[%s21082_s18 + $0x30e0] sm:$0xff] }
 0x5d2   : > { %14262 = vmatpush1.bf16.msra.mxu0 %v19096_v36  ;;  %14590 = vmatpush1.bf16.msra.mxu1 %v19098_v37  ;;  %v1821_v36 = vld [vmem:[%s21082_s18 + $0x2ea8] sm:$0xff] }
 0x5d3   : > { %14263 = vmatprep.subr.bf16.mxu0 %v19113_v40  ;;  %14591 = vmatprep.subr.bf16.mxu1 %v19115_v41  ;;  %v1829_v37 = vld [vmem:[%s21082_s18 + $0x2ee8] sm:$0xff]  ;;  %v19192_v40 = vcombine.low %v1804_v23, %v1812_v25  ;;  %v19194_v41 = vcombine.low %v1805_v26, %v1813_v27  ;;  %v19273_v23 = vcombine.high %v1884_v2, %v1892_v18  ;;  %v1900_v26 = vld [vmem:[%s21082_s18 + $0x3120] sm:$0xff] }
 0x5d4   : > { %v19211_v43 = vcombine.high %v1821_v36, %v1829_v37  ;;  %v1908_v27 = vld [vmem:[%s21082_s18 + $0x3160] sm:$0xff] }
 0x5d6   : > { %14264 = vmatpush1.bf16.msra.mxu0 %v19112_v47  ;;  %14592 = vmatpush1.bf16.msra.mxu1 %v19114_v48  ;;  %v1837_v47 = vld [vmem:[%s21082_s18 + $0x2f28] sm:$0xff] }
 0x5d7   : > { %14265 = vmatprep.subr.bf16.mxu0 %v19129_v51  ;;  %14593 = vmatprep.subr.bf16.mxu1 %v19131_v53  ;;  %v1845_v48 = vld [vmem:[%s21082_s18 + $0x2f68] sm:$0xff]  ;;  %v19208_v51 = vcombine.low %v1820_v34, %v1828_v35  ;;  %v19210_v53 = vcombine.low %v1821_v36, %v1829_v37  ;;  %v19289_v34 = vcombine.high %v1900_v26, %v1908_v27  ;;  %v1916_v36 = vld [vmem:[%s21082_s18 + $0x31a0] sm:$0xff] }
 0x5d8   : > { %v19227_v56 = vcombine.high %v1837_v47, %v1845_v48  ;;  %v1924_v37 = vld [vmem:[%s21082_s18 + $0x31e0] sm:$0xff] }
 0x5da   : > { %14266 = vmatpush1.bf16.msra.mxu0 %v19128_v61  ;;  %14594 = vmatpush1.bf16.msra.mxu1 %v19130_v62  ;;  %v1853_v61 = vld [vmem:[%s21082_s18 + $0x2fa8] sm:$0xff] }
 0x5db   : > { %14267 = vmatprep.subr.bf16.mxu0 %v19145_v63  ;;  %14595 = vmatprep.subr.bf16.mxu1 %v19147_v9  ;;  %v1861_v62 = vld [vmem:[%s21082_s18 + $0x2fe8] sm:$0xff]  ;;  %v19224_v63 = vcombine.low %v1836_v44, %v1844_v46  ;;  %v19226_v9 = vcombine.low %v1837_v47, %v1845_v48  ;;  %v19305_v44 = vcombine.high %v1916_v36, %v1924_v37  ;;  %v1932_v47 = vld [vmem:[%s21082_s18 + $0x3220] sm:$0xff] }
 0x5dc   : > { %v19243_v5 = vcombine.high %v1853_v61, %v1861_v62  ;;  %v1940_v48 = vld [vmem:[%s21082_s18 + $0x3260] sm:$0xff] }
 0x5de   : > { %14268 = vmatpush1.bf16.msra.mxu0 %v19144_v11  ;;  %14596 = vmatpush1.bf16.msra.mxu1 %v19146_v12  ;;  %v1869_v11 = vld [vmem:[%s21082_s18 + $0x3028] sm:$0xff] }
 0x5df   : > { %14269 = vmatprep.subr.bf16.mxu0 %v19161_v13  ;;  %14597 = vmatprep.subr.bf16.mxu1 %v19163_v14  ;;  %v1877_v12 = vld [vmem:[%s21082_s18 + $0x3068] sm:$0xff]  ;;  %v19240_v13 = vcombine.low %v1852_v57, %v1860_v58  ;;  %v19242_v14 = vcombine.low %v1853_v61, %v1861_v62  ;;  %v19321_v57 = vcombine.high %v1932_v47, %v1940_v48  ;;  %v1948_v61 = vld [vmem:[%s21082_s18 + $0x32a0] sm:$0xff] }
 0x5e0   : > { %v19259_v16 = vcombine.high %v1869_v11, %v1877_v12  ;;  %v1956_v62 = vld [vmem:[%s21082_s18 + $0x32e0] sm:$0xff] }
 0x5e2   : > { %14270 = vmatpush1.bf16.msra.mxu0 %v19160_v54  ;;  %14598 = vmatpush1.bf16.msra.mxu1 %v19162_v17  ;;  %v1885_v54 = vld [vmem:[%s21082_s18 + $0x30a8] sm:$0xff] }
 0x5e3   : > { %14271 = vmatprep.subr.bf16.mxu0 %v19177_v21  ;;  %14599 = vmatprep.subr.bf16.mxu1 %v19179_v22  ;;  %v1893_v17 = vld [vmem:[%s21082_s18 + $0x30e8] sm:$0xff]  ;;  %v19256_v21 = vcombine.low %v1868_v30, %v1876_v7  ;;  %v19258_v22 = vcombine.low %v1869_v11, %v1877_v12  ;;  %v19337_v30 = vcombine.high %v1948_v61, %v1956_v62  ;;  %v1964_v11 = vld [vmem:[%s21082_s18 + $0x3320] sm:$0xff] }
 0x5e4   : > { %v19275_v25 = vcombine.high %v1885_v54, %v1893_v17  ;;  %v1972_v12 = vld [vmem:[%s21082_s18 + $0x3360] sm:$0xff] }
 0x5e6   : > { %14272 = vmatpush1.bf16.msra.mxu0 %v19176_v29  ;;  %14600 = vmatpush1.bf16.msra.mxu1 %v19178_v31  ;;  %v1901_v29 = vld [vmem:[%s21082_s18 + $0x3128] sm:$0xff] }
 0x5e7   : > { %14273 = vmatprep.subr.bf16.mxu0 %v19193_v32  ;;  %14601 = vmatprep.subr.bf16.mxu1 %v19195_v0  ;;  %v1909_v31 = vld [vmem:[%s21082_s18 + $0x3168] sm:$0xff]  ;;  %v19272_v32 = vcombine.low %v1884_v2, %v1892_v18  ;;  %v19274_v0 = vcombine.low %v1885_v54, %v1893_v17  ;;  %v19353_v2 = vcombine.high %v1964_v11, %v1972_v12  ;;  %v1980_v54 = vld [vmem:[%s21082_s18 + $0x33a0] sm:$0xff] }
 0x5e8   : > { %v19291_v35 = vcombine.high %v1901_v29, %v1909_v31  ;;  %v1988_v17 = vld [vmem:[%s21082_s18 + $0x33e0] sm:$0xff] }
 0x5ea   : > { %14274 = vmatpush1.bf16.msra.mxu0 %v19192_v40  ;;  %14602 = vmatpush1.bf16.msra.mxu1 %v19194_v41  ;;  %v1917_v40 = vld [vmem:[%s21082_s18 + $0x31a8] sm:$0xff] }
 0x5eb   : > { %14275 = vmatprep.subr.bf16.mxu0 %v19209_v42  ;;  %14603 = vmatprep.subr.bf16.mxu1 %v19211_v43  ;;  %v1925_v41 = vld [vmem:[%s21082_s18 + $0x31e8] sm:$0xff]  ;;  %v19288_v42 = vcombine.low %v1900_v26, %v1908_v27  ;;  %v19290_v43 = vcombine.low %v1901_v29, %v1909_v31  ;;  %v19369_v26 = vcombine.high %v1980_v54, %v1988_v17  ;;  %v1996_v29 = vld [vmem:[%s21082_s18 + $0x3420] sm:$0xff] }
 0x5ec   : > { %v19307_v46 = vcombine.high %v1917_v40, %v1925_v41  ;;  %v2004_v31 = vld [vmem:[%s21082_s18 + $0x3460] sm:$0xff] }
 0x5ee   : > { %14276 = vmatpush1.bf16.msra.mxu0 %v19208_v51  ;;  %14604 = vmatpush1.bf16.msra.mxu1 %v19210_v53  ;;  %v1933_v51 = vld [vmem:[%s21082_s18 + $0x3228] sm:$0xff] }
 0x5ef   : > { %14277 = vmatprep.subr.bf16.mxu0 %v19225_v55  ;;  %14605 = vmatprep.subr.bf16.mxu1 %v19227_v56  ;;  %v1941_v53 = vld [vmem:[%s21082_s18 + $0x3268] sm:$0xff]  ;;  %v19304_v55 = vcombine.low %v1916_v36, %v1924_v37  ;;  %v19306_v56 = vcombine.low %v1917_v40, %v1925_v41  ;;  %v19385_v36 = vcombine.high %v1996_v29, %v2004_v31  ;;  %v2012_v40 = vld [vmem:[%s21082_s18 + $0x34a0] sm:$0xff] }
 0x5f0   : > { %v19323_v58 = vcombine.high %v1933_v51, %v1941_v53  ;;  %v2020_v41 = vld [vmem:[%s21082_s18 + $0x34e0] sm:$0xff] }
 0x5f2   : > { %14278 = vmatpush1.bf16.msra.mxu0 %v19224_v63  ;;  %14606 = vmatpush1.bf16.msra.mxu1 %v19226_v9  ;;  %v1949_v63 = vld [vmem:[%s21082_s18 + $0x32a8] sm:$0xff] }
 0x5f3   : > { %14279 = vmatprep.subr.bf16.mxu0 %v19241_v4  ;;  %14607 = vmatprep.subr.bf16.mxu1 %v19243_v5  ;;  %v1957_v9 = vld [vmem:[%s21082_s18 + $0x32e8] sm:$0xff]  ;;  %v19320_v4 = vcombine.low %v1932_v47, %v1940_v48  ;;  %v19322_v5 = vcombine.low %v1933_v51, %v1941_v53  ;;  %v19401_v47 = vcombine.high %v2012_v40, %v2020_v41  ;;  %v2028_v51 = vld [vmem:[%s21082_s18 + $0x3520] sm:$0xff] }
 0x5f4   : > { %v19339_v7 = vcombine.high %v1949_v63, %v1957_v9  ;;  %v2036_v53 = vld [vmem:[%s21082_s18 + $0x3560] sm:$0xff] }
 0x5f6   : > { %14280 = vmatpush1.bf16.msra.mxu0 %v19240_v13  ;;  %14608 = vmatpush1.bf16.msra.mxu1 %v19242_v14  ;;  %v1965_v13 = vld [vmem:[%s21082_s18 + $0x3328] sm:$0xff] }
 0x5f7   : > { %14290 = vmatprep.subr.bf16.mxu0 %v19257_v15  ;;  %14618 = vmatprep.subr.bf16.mxu1 %v19259_v16  ;;  %v1973_v14 = vld [vmem:[%s21082_s18 + $0x3368] sm:$0xff]  ;;  %v19336_v15 = vcombine.low %v1948_v61, %v1956_v62  ;;  %v19338_v16 = vcombine.low %v1949_v63, %v1957_v9  ;;  %v19417_v61 = vcombine.high %v2028_v51, %v2036_v53  ;;  %v2044_v63 = vld [vmem:[%s21082_s18 + $0x35a0] sm:$0xff] }
 0x5f8   : > { %v19355_v18 = vcombine.high %v1965_v13, %v1973_v14  ;;  %v2052_v9 = vld [vmem:[%s21082_s18 + $0x35e0] sm:$0xff] }
 0x5f9   : > { %14282 = vmatmul.mubr.bf16.vlgmr.msra.gmra.mrb[8].mxu0 %v21591_v28  ;;  %14610 = vmatmul.mubr.bf16.vlgmr.msra.gmra.mrb[8].mxu1 %v21591_v28 }
 0x5fa   : > { %14291 = vmatpush1.bf16.msra.mxu0 %v19256_v21  ;;  %14619 = vmatpush1.bf16.msra.mxu1 %v19258_v22  ;;  %v1981_v21 = vld [vmem:[%s21082_s18 + $0x33a8] sm:$0xff] }
 0x5fb   : > { %14292 = vmatprep.subr.bf16.mxu0 %v19273_v23  ;;  %14620 = vmatprep.subr.bf16.mxu1 %v19275_v25  ;;  %v1989_v22 = vld [vmem:[%s21082_s18 + $0x33e8] sm:$0xff]  ;;  %v19352_v23 = vcombine.low %v1964_v11, %v1972_v12  ;;  %v19354_v25 = vcombine.low %v1965_v13, %v1973_v14  ;;  %v19433_v11 = vcombine.high %v2044_v63, %v2052_v9  ;;  %v2060_v13 = vld [vmem:[%s21082_s18 + $0x3620] sm:$0xff] }
 0x5fc   : > { %14322 = vmatprep.mubr.bf16.mxu0 %v21598_v38  ;;  %14650 = vmatprep.mubr.bf16.mxu1 %v21598_v38  ;;  %v19371_v27 = vcombine.high %v1981_v21, %v1989_v22  ;;  %v2068_v14 = vld [vmem:[%s21082_s18 + $0x3660] sm:$0xff] }
 0x5fe   : > { %14293 = vmatpush1.bf16.msra.mxu0 %v19272_v32  ;;  %14621 = vmatpush1.bf16.msra.mxu1 %v19274_v0  ;;  %v1997_v32 = vld [vmem:[%s21082_s18 + $0x3428] sm:$0xff] }
 0x5ff   : > { %14294 = vmatprep.subr.bf16.mxu0 %v19289_v34  ;;  %14622 = vmatprep.subr.bf16.mxu1 %v19291_v35  ;;  %v2005_v0 = vld [vmem:[%s21082_s18 + $0x3468] sm:$0xff]  ;;  %v19368_v34 = vcombine.low %v1980_v54, %v1988_v17  ;;  %v19370_v35 = vcombine.low %v1981_v21, %v1989_v22  ;;  %v19449_v54 = vcombine.high %v2060_v13, %v2068_v14  ;;  %v2076_v21 = vld [vmem:[%s21082_s18 + $0x36a0] sm:$0xff] }
 0x600   : > { %v19387_v37 = vcombine.high %v1997_v32, %v2005_v0  ;;  %v2084_v22 = vld [vmem:[%s21082_s18 + $0x36e0] sm:$0xff] }
 0x602   : > { %14295 = vmatpush1.bf16.msra.mxu0 %v19288_v42  ;;  %14623 = vmatpush1.bf16.msra.mxu1 %v19290_v43  ;;  %v2013_v42 = vld [vmem:[%s21082_s18 + $0x34a8] sm:$0xff] }
 0x603   : > { %14296 = vmatprep.subr.bf16.mxu0 %v19305_v44  ;;  %14624 = vmatprep.subr.bf16.mxu1 %v19307_v46  ;;  %v2021_v43 = vld [vmem:[%s21082_s18 + $0x34e8] sm:$0xff]  ;;  %v19384_v44 = vcombine.low %v1996_v29, %v2004_v31  ;;  %v19386_v46 = vcombine.low %v1997_v32, %v2005_v0  ;;  %v19465_v29 = vcombine.high %v2076_v21, %v2084_v22  ;;  %v2092_v32 = vld [vmem:[%s21082_s18 + $0x3720] sm:$0xff] }
 0x604   : > { %v19403_v48 = vcombine.high %v2013_v42, %v2021_v43  ;;  %v2100_v0 = vld [vmem:[%s21082_s18 + $0x3760] sm:$0xff] }
 0x606   : > { %14297 = vmatpush1.bf16.msra.mxu0 %v19304_v55  ;;  %14625 = vmatpush1.bf16.msra.mxu1 %v19306_v56  ;;  %v2029_v55 = vld [vmem:[%s21082_s18 + $0x3528] sm:$0xff] }
 0x607   : > { %14298 = vmatprep.subr.bf16.mxu0 %v19321_v57  ;;  %14626 = vmatprep.subr.bf16.mxu1 %v19323_v58  ;;  %v2037_v56 = vld [vmem:[%s21082_s18 + $0x3568] sm:$0xff]  ;;  %v19400_v57 = vcombine.low %v2012_v40, %v2020_v41  ;;  %v19402_v58 = vcombine.low %v2013_v42, %v2021_v43  ;;  %v19481_v40 = vcombine.high %v2092_v32, %v2100_v0  ;;  %v2108_v42 = vld [vmem:[%s21082_s18 + $0x37a0] sm:$0xff] }
 0x608   : > { %v19419_v62 = vcombine.high %v2029_v55, %v2037_v56  ;;  %v2116_v43 = vld [vmem:[%s21082_s18 + $0x37e0] sm:$0xff] }
 0x60a   : > { %14299 = vmatpush1.bf16.msra.mxu0 %v19320_v4  ;;  %14627 = vmatpush1.bf16.msra.mxu1 %v19322_v5  ;;  %v2045_v4 = vld [vmem:[%s21082_s18 + $0x35a8] sm:$0xff] }
 0x60b   : > { %14300 = vmatprep.subr.bf16.mxu0 %v19337_v30  ;;  %14628 = vmatprep.subr.bf16.mxu1 %v19339_v7  ;;  %v2053_v5 = vld [vmem:[%s21082_s18 + $0x35e8] sm:$0xff]  ;;  %v19416_v30 = vcombine.low %v2028_v51, %v2036_v53  ;;  %v19418_v7 = vcombine.low %v2029_v55, %v2037_v56  ;;  %v19497_v51 = vcombine.high %v2108_v42, %v2116_v43  ;;  %v2124_v55 = vld [vmem:[%s21082_s18 + $0x3820] sm:$0xff] }
 0x60c   : > { %v19435_v12 = vcombine.high %v2045_v4, %v2053_v5  ;;  %v2132_v56 = vld [vmem:[%s21082_s18 + $0x3860] sm:$0xff] }
 0x60e   : > { %14301 = vmatpush1.bf16.msra.mxu0 %v19336_v15  ;;  %14629 = vmatpush1.bf16.msra.mxu1 %v19338_v16  ;;  %v2061_v15 = vld [vmem:[%s21082_s18 + $0x3628] sm:$0xff] }
 0x60f   : > { %14302 = vmatprep.subr.bf16.mxu0 %v19353_v2  ;;  %14630 = vmatprep.subr.bf16.mxu1 %v19355_v18  ;;  %v2069_v16 = vld [vmem:[%s21082_s18 + $0x3668] sm:$0xff]  ;;  %v19432_v2 = vcombine.low %v2044_v63, %v2052_v9  ;;  %v19434_v18 = vcombine.low %v2045_v4, %v2053_v5  ;;  %v19513_v63 = vcombine.high %v2124_v55, %v2132_v56  ;;  %v2140_v4 = vld [vmem:[%s21082_s18 + $0x38a0] sm:$0xff] }
 0x610   : > { %v19451_v17 = vcombine.high %v2061_v15, %v2069_v16  ;;  %v2148_v5 = vld [vmem:[%s21082_s18 + $0x38e0] sm:$0xff] }
 0x612   : > { %14303 = vmatpush1.bf16.msra.mxu0 %v19352_v23  ;;  %14631 = vmatpush1.bf16.msra.mxu1 %v19354_v25  ;;  %v2077_v23 = vld [vmem:[%s21082_s18 + $0x36a8] sm:$0xff] }
 0x613   : > { %14304 = vmatprep.subr.bf16.mxu0 %v19369_v26  ;;  %14632 = vmatprep.subr.bf16.mxu1 %v19371_v27  ;;  %v2085_v25 = vld [vmem:[%s21082_s18 + $0x36e8] sm:$0xff]  ;;  %v19448_v26 = vcombine.low %v2060_v13, %v2068_v14  ;;  %v19450_v27 = vcombine.low %v2061_v15, %v2069_v16  ;;  %v19529_v13 = vcombine.high %v2140_v4, %v2148_v5  ;;  %v2156_v15 = vld [vmem:[%s21082_s18 + $0x3920] sm:$0xff] }
 0x614   : > { %v19467_v31 = vcombine.high %v2077_v23, %v2085_v25  ;;  %v2164_v16 = vld [vmem:[%s21082_s18 + $0x3960] sm:$0xff] }
 0x616   : > { %14305 = vmatpush1.bf16.msra.mxu0 %v19368_v34  ;;  %14633 = vmatpush1.bf16.msra.mxu1 %v19370_v35  ;;  %v2093_v34 = vld [vmem:[%s21082_s18 + $0x3728] sm:$0xff] }
 0x617   : > { %14306 = vmatprep.subr.bf16.mxu0 %v19385_v36  ;;  %14634 = vmatprep.subr.bf16.mxu1 %v19387_v37  ;;  %v2101_v35 = vld [vmem:[%s21082_s18 + $0x3768] sm:$0xff]  ;;  %v19464_v36 = vcombine.low %v2076_v21, %v2084_v22  ;;  %v19466_v37 = vcombine.low %v2077_v23, %v2085_v25  ;;  %v19545_v21 = vcombine.high %v2156_v15, %v2164_v16  ;;  %v2172_v23 = vld [vmem:[%s21082_s18 + $0x39a0] sm:$0xff] }
 0x618   : > { %v19483_v41 = vcombine.high %v2093_v34, %v2101_v35  ;;  %v2180_v25 = vld [vmem:[%s21082_s18 + $0x39e0] sm:$0xff] }
 0x61a   : > { %14307 = vmatpush1.bf16.msra.mxu0 %v19384_v44  ;;  %14635 = vmatpush1.bf16.msra.mxu1 %v19386_v46  ;;  %v2109_v44 = vld [vmem:[%s21082_s18 + $0x37a8] sm:$0xff] }
 0x61b   : > { %14308 = vmatprep.subr.bf16.mxu0 %v19401_v47  ;;  %14636 = vmatprep.subr.bf16.mxu1 %v19403_v48  ;;  %v2117_v46 = vld [vmem:[%s21082_s18 + $0x37e8] sm:$0xff]  ;;  %v19480_v47 = vcombine.low %v2092_v32, %v2100_v0  ;;  %v19482_v48 = vcombine.low %v2093_v34, %v2101_v35  ;;  %v19561_v32 = vcombine.high %v2172_v23, %v2180_v25  ;;  %v2188_v34 = vld [vmem:[%s21082_s18 + $0x3a20] sm:$0xff] }
 0x61c   : > { %v19499_v53 = vcombine.high %v2109_v44, %v2117_v46  ;;  %v2196_v35 = vld [vmem:[%s21082_s18 + $0x3a60] sm:$0xff] }
 0x61e   : > { %14309 = vmatpush1.bf16.msra.mxu0 %v19400_v57  ;;  %14637 = vmatpush1.bf16.msra.mxu1 %v19402_v58  ;;  %v2125_v57 = vld [vmem:[%s21082_s18 + $0x3828] sm:$0xff] }
 0x61f   : > { %14310 = vmatprep.subr.bf16.mxu0 %v19417_v61  ;;  %14638 = vmatprep.subr.bf16.mxu1 %v19419_v62  ;;  %v2133_v58 = vld [vmem:[%s21082_s18 + $0x3868] sm:$0xff]  ;;  %v19496_v61 = vcombine.low %v2108_v42, %v2116_v43  ;;  %v19498_v62 = vcombine.low %v2109_v44, %v2117_v46  ;;  %v19577_v42 = vcombine.high %v2188_v34, %v2196_v35  ;;  %v2204_v44 = vld [vmem:[%s21082_s18 + $0x3aa0] sm:$0xff] }
 0x620   : > { %v19515_v9 = vcombine.high %v2125_v57, %v2133_v58  ;;  %v2212_v46 = vld [vmem:[%s21082_s18 + $0x3ae0] sm:$0xff] }
 0x622   : > { %14311 = vmatpush1.bf16.msra.mxu0 %v19416_v30  ;;  %14639 = vmatpush1.bf16.msra.mxu1 %v19418_v7  ;;  %v2141_v30 = vld [vmem:[%s21082_s18 + $0x38a8] sm:$0xff] }
 0x623   : > { %14312 = vmatprep.subr.bf16.mxu0 %v19433_v11  ;;  %14640 = vmatprep.subr.bf16.mxu1 %v19435_v12  ;;  %v2149_v7 = vld [vmem:[%s21082_s18 + $0x38e8] sm:$0xff]  ;;  %v19512_v11 = vcombine.low %v2124_v55, %v2132_v56  ;;  %v19514_v12 = vcombine.low %v2125_v57, %v2133_v58  ;;  %v19593_v55 = vcombine.high %v2204_v44, %v2212_v46  ;;  %v2220_v57 = vld [vmem:[%s21082_s18 + $0x3b20] sm:$0xff] }
 0x624   : > { %v19531_v14 = vcombine.high %v2141_v30, %v2149_v7  ;;  %v2228_v58 = vld [vmem:[%s21082_s18 + $0x3b60] sm:$0xff] }
 0x626   : > { %14313 = vmatpush1.bf16.msra.mxu0 %v19432_v2  ;;  %14641 = vmatpush1.bf16.msra.mxu1 %v19434_v18  ;;  %v2157_v2 = vld [vmem:[%s21082_s18 + $0x3928] sm:$0xff] }
 0x627   : > { %14314 = vmatprep.subr.bf16.mxu0 %v19449_v54  ;;  %14642 = vmatprep.subr.bf16.mxu1 %v19451_v17  ;;  %v2165_v18 = vld [vmem:[%s21082_s18 + $0x3968] sm:$0xff]  ;;  %v19528_v54 = vcombine.low %v2140_v4, %v2148_v5  ;;  %v19530_v17 = vcombine.low %v2141_v30, %v2149_v7  ;;  %v19609_v4 = vcombine.high %v2220_v57, %v2228_v58  ;;  %v2236_v30 = vld [vmem:[%s21082_s18 + $0x3ba0] sm:$0xff] }
 0x628   : > { %v19547_v22 = vcombine.high %v2157_v2, %v2165_v18  ;;  %v2244_v7 = vld [vmem:[%s21082_s18 + $0x3be0] sm:$0xff] }
 0x62a   : > { %14315 = vmatpush1.bf16.msra.mxu0 %v19448_v26  ;;  %14643 = vmatpush1.bf16.msra.mxu1 %v19450_v27  ;;  %v2173_v26 = vld [vmem:[%s21082_s18 + $0x39a8] sm:$0xff] }
 0x62b   : > { %14316 = vmatprep.subr.bf16.mxu0 %v19465_v29  ;;  %14644 = vmatprep.subr.bf16.mxu1 %v19467_v31  ;;  %v2181_v27 = vld [vmem:[%s21082_s18 + $0x39e8] sm:$0xff]  ;;  %v19544_v29 = vcombine.low %v2156_v15, %v2164_v16  ;;  %v19546_v31 = vcombine.low %v2157_v2, %v2165_v18  ;;  %v19625_v15 = vcombine.high %v2236_v30, %v2244_v7  ;;  %v2252_v2 = vld [vmem:[%s21082_s18 + $0x3c20] sm:$0xff] }
 0x62c   : > { %v19563_v0 = vcombine.high %v2173_v26, %v2181_v27  ;;  %v2260_v18 = vld [vmem:[%s21082_s18 + $0x3c60] sm:$0xff] }
 0x62e   : > { %14317 = vmatpush1.bf16.msra.mxu0 %v19464_v36  ;;  %14645 = vmatpush1.bf16.msra.mxu1 %v19466_v37  ;;  %v2189_v36 = vld [vmem:[%s21082_s18 + $0x3a28] sm:$0xff] }
 0x62f   : > { %14318 = vmatprep.subr.bf16.mxu0 %v19481_v40  ;;  %14646 = vmatprep.subr.bf16.mxu1 %v19483_v41  ;;  %v2197_v37 = vld [vmem:[%s21082_s18 + $0x3a68] sm:$0xff]  ;;  %v19560_v40 = vcombine.low %v2172_v23, %v2180_v25  ;;  %v19562_v41 = vcombine.low %v2173_v26, %v2181_v27  ;;  %v19641_v23 = vcombine.high %v2252_v2, %v2260_v18  ;;  %v2268_v26 = vld [vmem:[%s21082_s18 + $0x3ca0] sm:$0xff] }
 0x630   : > { %v19579_v43 = vcombine.high %v2189_v36, %v2197_v37  ;;  %v2276_v27 = vld [vmem:[%s21082_s18 + $0x3ce0] sm:$0xff] }
 0x632   : > { %14319 = vmatpush1.bf16.msra.mxu0 %v19480_v47  ;;  %14647 = vmatpush1.bf16.msra.mxu1 %v19482_v48  ;;  %v2205_v47 = vld [vmem:[%s21082_s18 + $0x3aa8] sm:$0xff] }
 0x633   : > { %14320 = vmatprep.subr.bf16.mxu0 %v19497_v51  ;;  %14648 = vmatprep.subr.bf16.mxu1 %v19499_v53  ;;  %v2213_v48 = vld [vmem:[%s21082_s18 + $0x3ae8] sm:$0xff]  ;;  %v19576_v51 = vcombine.low %v2188_v34, %v2196_v35  ;;  %v19578_v53 = vcombine.low %v2189_v36, %v2197_v37  ;;  %v19657_v34 = vcombine.high %v2268_v26, %v2276_v27  ;;  %v2284_v36 = vld [vmem:[%s21082_s18 + $0x3d20] sm:$0xff] }
 0x634   : > { %v19595_v56 = vcombine.high %v2205_v47, %v2213_v48  ;;  %v2292_v37 = vld [vmem:[%s21082_s18 + $0x3d60] sm:$0xff] }
 0x636   : > { %14321 = vmatpush1.bf16.msra.mxu0 %v19496_v61  ;;  %14649 = vmatpush1.bf16.msra.mxu1 %v19498_v62  ;;  %v2221_v61 = vld [vmem:[%s21082_s18 + $0x3b28] sm:$0xff] }
 0x637   : > { %14331 = vmatprep.subr.bf16.mxu0 %v19513_v63  ;;  %14659 = vmatprep.subr.bf16.mxu1 %v19515_v9  ;;  %v2229_v62 = vld [vmem:[%s21082_s18 + $0x3b68] sm:$0xff]  ;;  %v19592_v63 = vcombine.low %v2204_v44, %v2212_v46  ;;  %v19594_v9 = vcombine.low %v2205_v47, %v2213_v48  ;;  %v19673_v44 = vcombine.high %v2284_v36, %v2292_v37  ;;  %v2300_v47 = vld [vmem:[%s21082_s18 + $0x3da0] sm:$0xff] }
 0x638   : > { %v19611_v5 = vcombine.high %v2221_v61, %v2229_v62  ;;  %v2308_v48 = vld [vmem:[%s21082_s18 + $0x3de0] sm:$0xff] }
 0x639   : > { %14323 = vmatmul.mubr.bf16.vlgmr.msra.gmra.mrb[8].mxu0 %v21666_v8  ;;  %14651 = vmatmul.mubr.bf16.vlgmr.msra.gmra.mrb[8].mxu1 %v21666_v8 }
 0x63a   : > { %14332 = vmatpush1.bf16.msra.mxu0 %v19512_v11  ;;  %14660 = vmatpush1.bf16.msra.mxu1 %v19514_v12  ;;  %v2237_v11 = vld [vmem:[%s21082_s18 + $0x3ba8] sm:$0xff] }
 0x63b   : > { %14333 = vmatprep.subr.bf16.mxu0 %v19529_v13  ;;  %14661 = vmatprep.subr.bf16.mxu1 %v19531_v14  ;;  %v2245_v12 = vld [vmem:[%s21082_s18 + $0x3be8] sm:$0xff]  ;;  %v19608_v13 = vcombine.low %v2220_v57, %v2228_v58  ;;  %v19610_v14 = vcombine.low %v2221_v61, %v2229_v62  ;;  %v19689_v57 = vcombine.high %v2300_v47, %v2308_v48  ;;  %v2316_v61 = vld [vmem:[%s21082_s18 + $0x3e20] sm:$0xff] }
 0x63c   : > { %14363 = vmatprep.mubr.bf16.mxu0 %v21674_v19  ;;  %14691 = vmatprep.mubr.bf16.mxu1 %v21674_v19  ;;  %v19627_v16 = vcombine.high %v2237_v11, %v2245_v12  ;;  %v2324_v62 = vld [vmem:[%s21082_s18 + $0x3e60] sm:$0xff] }
 0x63e   : > { %14334 = vmatpush1.bf16.msra.mxu0 %v19528_v54  ;;  %14662 = vmatpush1.bf16.msra.mxu1 %v19530_v17  ;;  %v2253_v54 = vld [vmem:[%s21082_s18 + $0x3c28] sm:$0xff] }
 0x63f   : > { %14335 = vmatprep.subr.bf16.mxu0 %v19545_v21  ;;  %14663 = vmatprep.subr.bf16.mxu1 %v19547_v22  ;;  %v2261_v17 = vld [vmem:[%s21082_s18 + $0x3c68] sm:$0xff]  ;;  %v19624_v21 = vcombine.low %v2236_v30, %v2244_v7  ;;  %v19626_v22 = vcombine.low %v2237_v11, %v2245_v12  ;;  %v19705_v30 = vcombine.high %v2316_v61, %v2324_v62  ;;  %v2332_v11 = vld [vmem:[%s21082_s18 + $0x3ea0] sm:$0xff] }
 0x640   : > { %v19643_v25 = vcombine.high %v2253_v54, %v2261_v17  ;;  %v2340_v12 = vld [vmem:[%s21082_s18 + $0x3ee0] sm:$0xff] }
 0x642   : > { %14336 = vmatpush1.bf16.msra.mxu0 %v19544_v29  ;;  %14664 = vmatpush1.bf16.msra.mxu1 %v19546_v31  ;;  %v2269_v29 = vld [vmem:[%s21082_s18 + $0x3ca8] sm:$0xff] }
 0x643   : > { %14337 = vmatprep.subr.bf16.mxu0 %v19561_v32  ;;  %14665 = vmatprep.subr.bf16.mxu1 %v19563_v0  ;;  %v2277_v31 = vld [vmem:[%s21082_s18 + $0x3ce8] sm:$0xff]  ;;  %v19640_v32 = vcombine.low %v2252_v2, %v2260_v18  ;;  %v19642_v0 = vcombine.low %v2253_v54, %v2261_v17  ;;  %v19721_v2 = vcombine.high %v2332_v11, %v2340_v12  ;;  %v2348_v54 = vld [vmem:[%s21082_s18 + $0x3f20] sm:$0xff] }
 0x644   : > { %v19659_v35 = vcombine.high %v2269_v29, %v2277_v31  ;;  %v2356_v17 = vld [vmem:[%s21082_s18 + $0x3f60] sm:$0xff] }
 0x646   : > { %14338 = vmatpush1.bf16.msra.mxu0 %v19560_v40  ;;  %14666 = vmatpush1.bf16.msra.mxu1 %v19562_v41  ;;  %v2285_v40 = vld [vmem:[%s21082_s18 + $0x3d28] sm:$0xff] }
 0x647   : > { %14339 = vmatprep.subr.bf16.mxu0 %v19577_v42  ;;  %14667 = vmatprep.subr.bf16.mxu1 %v19579_v43  ;;  %v2293_v41 = vld [vmem:[%s21082_s18 + $0x3d68] sm:$0xff]  ;;  %v19656_v42 = vcombine.low %v2268_v26, %v2276_v27  ;;  %v19658_v43 = vcombine.low %v2269_v29, %v2277_v31  ;;  %v19737_v26 = vcombine.high %v2348_v54, %v2356_v17  ;;  %v2364_v29 = vld [vmem:[%s21082_s18 + $0x3fa0] sm:$0xff] }
 0x648   : > { %v19675_v46 = vcombine.high %v2285_v40, %v2293_v41  ;;  %v2372_v31 = vld [vmem:[%s21082_s18 + $0x3fe0] sm:$0xff] }
 0x64a   : > { %14340 = vmatpush1.bf16.msra.mxu0 %v19576_v51  ;;  %14668 = vmatpush1.bf16.msra.mxu1 %v19578_v53  ;;  %v2301_v51 = vld [vmem:[%s21082_s18 + $0x3da8] sm:$0xff] }
 0x64b   : > { %14341 = vmatprep.subr.bf16.mxu0 %v19593_v55  ;;  %14669 = vmatprep.subr.bf16.mxu1 %v19595_v56  ;;  %v2309_v53 = vld [vmem:[%s21082_s18 + $0x3de8] sm:$0xff]  ;;  %v19672_v55 = vcombine.low %v2284_v36, %v2292_v37  ;;  %v19674_v56 = vcombine.low %v2285_v40, %v2293_v41  ;;  %v19753_v36 = vcombine.high %v2364_v29, %v2372_v31  ;;  %v334_v40 = vld [vmem:[%s21082_s18 + $0x30] sm:$0xff] }
 0x64c   : > { %v19691_v58 = vcombine.high %v2301_v51, %v2309_v53  ;;  %v342_v41 = vld [vmem:[%s21082_s18 + $0x70] sm:$0xff] }
 0x64e   : > { %14342 = vmatpush1.bf16.msra.mxu0 %v19592_v63  ;;  %14670 = vmatpush1.bf16.msra.mxu1 %v19594_v9  ;;  %v2317_v63 = vld [vmem:[%s21082_s18 + $0x3e28] sm:$0xff] }
 0x64f   : > { %14343 = vmatprep.subr.bf16.mxu0 %v19609_v4  ;;  %14671 = vmatprep.subr.bf16.mxu1 %v19611_v5  ;;  %v2325_v9 = vld [vmem:[%s21082_s18 + $0x3e68] sm:$0xff]  ;;  %v19688_v4 = vcombine.low %v2300_v47, %v2308_v48  ;;  %v19690_v5 = vcombine.low %v2301_v51, %v2309_v53  ;;  %v17725_v47 = vcombine.high %v334_v40, %v342_v41  ;;  %v350_v51 = vld [vmem:[%s21082_s18 + $0xb0] sm:$0xff] }
 0x650   : > { %v19707_v7 = vcombine.high %v2317_v63, %v2325_v9  ;;  %v358_v53 = vld [vmem:[%s21082_s18 + $0xf0] sm:$0xff] }
 0x652   : > { %14344 = vmatpush1.bf16.msra.mxu0 %v19608_v13  ;;  %14672 = vmatpush1.bf16.msra.mxu1 %v19610_v14  ;;  %v2333_v13 = vld [vmem:[%s21082_s18 + $0x3ea8] sm:$0xff] }
 0x653   : > { %14345 = vmatprep.subr.bf16.mxu0 %v19625_v15  ;;  %14673 = vmatprep.subr.bf16.mxu1 %v19627_v16  ;;  %v2341_v14 = vld [vmem:[%s21082_s18 + $0x3ee8] sm:$0xff]  ;;  %v19704_v15 = vcombine.low %v2316_v61, %v2324_v62  ;;  %v19706_v16 = vcombine.low %v2317_v63, %v2325_v9  ;;  %v17741_v61 = vcombine.high %v350_v51, %v358_v53  ;;  %v366_v63 = vld [vmem:[%s21082_s18 + $0x130] sm:$0xff] }
 0x654   : > { %v19723_v18 = vcombine.high %v2333_v13, %v2341_v14  ;;  %v374_v9 = vld [vmem:[%s21082_s18 + $0x170] sm:$0xff] }
 0x656   : > { %14346 = vmatpush1.bf16.msra.mxu0 %v19624_v21  ;;  %14674 = vmatpush1.bf16.msra.mxu1 %v19626_v22  ;;  %v2349_v21 = vld [vmem:[%s21082_s18 + $0x3f28] sm:$0xff] }
 0x657   : > { %14347 = vmatprep.subr.bf16.mxu0 %v19641_v23  ;;  %14675 = vmatprep.subr.bf16.mxu1 %v19643_v25  ;;  %v2357_v22 = vld [vmem:[%s21082_s18 + $0x3f68] sm:$0xff]  ;;  %v19720_v23 = vcombine.low %v2332_v11, %v2340_v12  ;;  %v19722_v25 = vcombine.low %v2333_v13, %v2341_v14  ;;  %v17757_v11 = vcombine.high %v366_v63, %v374_v9  ;;  %v382_v13 = vld [vmem:[%s21082_s18 + $0x1b0] sm:$0xff] }
 0x658   : > { %v19739_v27 = vcombine.high %v2349_v21, %v2357_v22  ;;  %v390_v14 = vld [vmem:[%s21082_s18 + $0x1f0] sm:$0xff] }
 0x65a   : > { %14348 = vmatpush1.bf16.msra.mxu0 %v19640_v32  ;;  %14676 = vmatpush1.bf16.msra.mxu1 %v19642_v0  ;;  %v2365_v32 = vld [vmem:[%s21082_s18 + $0x3fa8] sm:$0xff] }
 0x65b   : > { %14349 = vmatprep.subr.bf16.mxu0 %v19657_v34  ;;  %14677 = vmatprep.subr.bf16.mxu1 %v19659_v35  ;;  %v2373_v0 = vld [vmem:[%s21082_s18 + $0x3fe8] sm:$0xff]  ;;  %v19736_v34 = vcombine.low %v2348_v54, %v2356_v17  ;;  %v19738_v35 = vcombine.low %v2349_v21, %v2357_v22  ;;  %v17773_v54 = vcombine.high %v382_v13, %v390_v14  ;;  %v398_v21 = vld [vmem:[%s21082_s18 + $0x230] sm:$0xff] }
 0x65c   : > { %v19755_v37 = vcombine.high %v2365_v32, %v2373_v0  ;;  %v406_v22 = vld [vmem:[%s21082_s18 + $0x270] sm:$0xff] }
 0x65e   : > { %14350 = vmatpush1.bf16.msra.mxu0 %v19656_v42  ;;  %14678 = vmatpush1.bf16.msra.mxu1 %v19658_v43  ;;  %v335_v42 = vld [vmem:[%s21082_s18 + $0x38] sm:$0xff] }
 0x65f   : > { %14351 = vmatprep.subr.bf16.mxu0 %v19673_v44  ;;  %14679 = vmatprep.subr.bf16.mxu1 %v19675_v46  ;;  %v343_v43 = vld [vmem:[%s21082_s18 + $0x78] sm:$0xff]  ;;  %v19752_v44 = vcombine.low %v2364_v29, %v2372_v31  ;;  %v19754_v46 = vcombine.low %v2365_v32, %v2373_v0  ;;  %v414_v31 = vld [vmem:[%s21082_s18 + $0x2b0] sm:$0xff] }
 0x660   : > { %v17727_v48 = vcombine.high %v335_v42, %v343_v43  ;;  %v422_v32 = vld [vmem:[%s21082_s18 + $0x2f0] sm:$0xff]  ;;  %v415_v0 = vld [vmem:[%s21082_s18 + $0x2b8] sm:$0xff] }
 0x662   : > { %14352 = vmatpush1.bf16.msra.mxu0 %v19672_v55  ;;  %14680 = vmatpush1.bf16.msra.mxu1 %v19674_v56  ;;  %v351_v55 = vld [vmem:[%s21082_s18 + $0xb8] sm:$0xff] }
 0x663   : > { %14353 = vmatprep.subr.bf16.mxu0 %v19689_v57  ;;  %14681 = vmatprep.subr.bf16.mxu1 %v19691_v58  ;;  %v359_v56 = vld [vmem:[%s21082_s18 + $0xf8] sm:$0xff]  ;;  %v17724_v57 = vcombine.low %v334_v40, %v342_v41  ;;  %v17726_v58 = vcombine.low %v335_v42, %v343_v43  ;;  %v430_v41 = vld [vmem:[%s21082_s18 + $0x330] sm:$0xff] }
 0x664   : > { %v17743_v62 = vcombine.high %v351_v55, %v359_v56  ;;  %v438_v42 = vld [vmem:[%s21082_s18 + $0x370] sm:$0xff]  ;;  %v431_v43 = vld [vmem:[%s21082_s18 + $0x338] sm:$0xff] }
 0x666   : > { %14354 = vmatpush1.bf16.msra.mxu0 %v19688_v4  ;;  %14682 = vmatpush1.bf16.msra.mxu1 %v19690_v5  ;;  %v367_v4 = vld [vmem:[%s21082_s18 + $0x138] sm:$0xff] }
 0x667   : > { %14355 = vmatprep.subr.bf16.mxu0 %v19705_v30  ;;  %14683 = vmatprep.subr.bf16.mxu1 %v19707_v7  ;;  %v375_v5 = vld [vmem:[%s21082_s18 + $0x178] sm:$0xff]  ;;  %v17740_v30 = vcombine.low %v350_v51, %v358_v53  ;;  %v17742_v7 = vcombine.low %v351_v55, %v359_v56  ;;  %v446_v53 = vld [vmem:[%s21082_s18 + $0x3b0] sm:$0xff] }
 0x668   : > { %v17759_v12 = vcombine.high %v367_v4, %v375_v5  ;;  %v454_v55 = vld [vmem:[%s21082_s18 + $0x3f0] sm:$0xff]  ;;  %v447_v56 = vld [vmem:[%s21082_s18 + $0x3b8] sm:$0xff] }
 0x66a   : > { %14356 = vmatpush1.bf16.msra.mxu0 %v19704_v15  ;;  %14684 = vmatpush1.bf16.msra.mxu1 %v19706_v16  ;;  %v383_v15 = vld [vmem:[%s21082_s18 + $0x1b8] sm:$0xff] }
 0x66b   : > { %14357 = vmatprep.subr.bf16.mxu0 %v19721_v2  ;;  %14685 = vmatprep.subr.bf16.mxu1 %v19723_v18  ;;  %v391_v16 = vld [vmem:[%s21082_s18 + $0x1f8] sm:$0xff]  ;;  %v17756_v2 = vcombine.low %v366_v63, %v374_v9  ;;  %v17758_v18 = vcombine.low %v367_v4, %v375_v5  ;;  %v462_v9 = vld [vmem:[%s21082_s18 + $0x430] sm:$0xff] }
 0x66c   : > { %v17775_v17 = vcombine.high %v383_v15, %v391_v16  ;;  %v470_v4 = vld [vmem:[%s21082_s18 + $0x470] sm:$0xff]  ;;  %v463_v5 = vld [vmem:[%s21082_s18 + $0x438] sm:$0xff] }
 0x66e   : > { %14358 = vmatpush1.bf16.msra.mxu0 %v19720_v23  ;;  %14686 = vmatpush1.bf16.msra.mxu1 %v19722_v25  ;;  %v399_v23 = vld [vmem:[%s21082_s18 + $0x238] sm:$0xff] }
 0x66f   : > { %14359 = vmatprep.subr.bf16.mxu0 %v19737_v26  ;;  %14687 = vmatprep.subr.bf16.mxu1 %v19739_v27  ;;  %v407_v25 = vld [vmem:[%s21082_s18 + $0x278] sm:$0xff]  ;;  %v17772_v26 = vcombine.low %v382_v13, %v390_v14  ;;  %v17789_v27 = vcombine.high %v398_v21, %v406_v22  ;;  %v478_v14 = vld [vmem:[%s21082_s18 + $0x4b0] sm:$0xff] }
 0x670   : > { %v17791_v29 = vcombine.high %v399_v23, %v407_v25 }
 0x672   : > { %14360 = vmatpush1.bf16.msra.mxu0 %v19736_v34  ;;  %14688 = vmatpush1.bf16.msra.mxu1 %v19738_v35  ;;  %v423_v34 = vld [vmem:[%s21082_s18 + $0x2f8] sm:$0xff]  ;;  %v17788_v35 = vcombine.low %v398_v21, %v406_v22  ;;  %v494_v22 = vld [vmem:[%s21082_s18 + $0x530] sm:$0xff] }
 0x673   : > { %14361 = vmatprep.subr.bf16.mxu0 %v19753_v36  ;;  %14689 = vmatprep.subr.bf16.mxu1 %v19755_v37  ;;  %v17790_v36 = vcombine.low %v399_v23, %v407_v25  ;;  %v17805_v37 = vcombine.high %v414_v31, %v422_v32  ;;  %v17807_v40 = vcombine.high %v415_v0, %v423_v34  ;;  %v502_v23 = vld [vmem:[%s21082_s18 + $0x570] sm:$0xff]  ;;  %v495_v25 = vld [vmem:[%s21082_s18 + $0x538] sm:$0xff] }
 0x676   : > { %14362 = vmatpush1.bf16.msra.mxu0 %v19752_v44  ;;  %14690 = vmatpush1.bf16.msra.mxu1 %v19754_v46  ;;  %v439_v44 = vld [vmem:[%s21082_s18 + $0x378] sm:$0xff]  ;;  %v17804_v46 = vcombine.low %v414_v31, %v422_v32  ;;  %v510_v32 = vld [vmem:[%s21082_s18 + $0x5b0] sm:$0xff] }
 0x677   : > { %14700 = vmatprep.subr.bf16.mxu0 %v17725_v47  ;;  %15028 = vmatprep.subr.bf16.mxu1 %v17727_v48  ;;  %v17806_v47 = vcombine.low %v415_v0, %v423_v34  ;;  %v17821_v48 = vcombine.high %v430_v41, %v438_v42  ;;  %v17823_v51 = vcombine.high %v431_v43, %v439_v44  ;;  %v518_v0 = vld [vmem:[%s21082_s18 + $0x5f0] sm:$0xff]  ;;  %v511_v34 = vld [vmem:[%s21082_s18 + $0x5b8] sm:$0xff] }
 0x679   : > { %14364 = vmatmul.mubr.bf16.vlgmr.msra.gmra.mrb[8].mxu0 %v21742_v50  ;;  %14692 = vmatmul.mubr.bf16.vlgmr.msra.gmra.mrb[8].mxu1 %v21742_v50 }
 0x67a   : > { %14701 = vmatpush1.bf16.msra.mxu0 %v17724_v57  ;;  %15029 = vmatpush1.bf16.msra.mxu1 %v17726_v58  ;;  %v455_v57 = vld [vmem:[%s21082_s18 + $0x3f8] sm:$0xff]  ;;  %v17820_v58 = vcombine.low %v430_v41, %v438_v42  ;;  %v526_v42 = vld [vmem:[%s21082_s18 + $0x630] sm:$0xff] }
 0x67b   : > { %14702 = vmatprep.subr.bf16.mxu0 %v17741_v61  ;;  %15030 = vmatprep.subr.bf16.mxu1 %v17743_v62  ;;  %v17822_v61 = vcombine.low %v431_v43, %v439_v44  ;;  %v17837_v62 = vcombine.high %v446_v53, %v454_v55  ;;  %v17839_v63 = vcombine.high %v447_v56, %v455_v57  ;;  %v534_v43 = vld [vmem:[%s21082_s18 + $0x670] sm:$0xff]  ;;  %v527_v44 = vld [vmem:[%s21082_s18 + $0x638] sm:$0xff] }
 0x67c   : > { %14732 = vmatprep.mubr.bf16.mxu0 %v21148_v10  ;;  %15060 = vmatprep.mubr.bf16.mxu1 %v21148_v10  ;;  %v17774_v10 = vcombine.low %v383_v15, %v391_v16  ;;  %v486_v15 = vld [vmem:[%s21082_s18 + $0x4f0] sm:$0xff]  ;;  %v479_v16 = vld [vmem:[%s21082_s18 + $0x4b8] sm:$0xff] }
 0x67e   : > { %14703 = vmatpush1.bf16.msra.mxu0 %v17740_v30  ;;  %15031 = vmatpush1.bf16.msra.mxu1 %v17742_v7  ;;  %v471_v30 = vld [vmem:[%s21082_s18 + $0x478] sm:$0xff]  ;;  %v17836_v7 = vcombine.low %v446_v53, %v454_v55  ;;  %v542_v55 = vld [vmem:[%s21082_s18 + $0x6b0] sm:$0xff] }
 0x67f   : > { %14704 = vmatprep.subr.bf16.mxu0 %v17757_v11  ;;  %15032 = vmatprep.subr.bf16.mxu1 %v17759_v12  ;;  %v17838_v11 = vcombine.low %v447_v56, %v455_v57  ;;  %v17853_v12 = vcombine.high %v462_v9, %v470_v4  ;;  %v17855_v13 = vcombine.high %v463_v5, %v471_v30  ;;  %v550_v56 = vld [vmem:[%s21082_s18 + $0x6f0] sm:$0xff]  ;;  %v543_v57 = vld [vmem:[%s21082_s18 + $0x6b8] sm:$0xff] }
 0x682   : > { %14705 = vmatpush1.bf16.msra.mxu0 %v17756_v2  ;;  %15033 = vmatpush1.bf16.msra.mxu1 %v17758_v18  ;;  %v487_v2 = vld [vmem:[%s21082_s18 + $0x4f8] sm:$0xff]  ;;  %v17852_v18 = vcombine.low %v462_v9, %v470_v4  ;;  %v558_v4 = vld [vmem:[%s21082_s18 + $0x730] sm:$0xff] }
 0x683   : > { %14706 = vmatprep.subr.bf16.mxu0 %v17773_v54  ;;  %15034 = vmatprep.subr.bf16.mxu1 %v17775_v17  ;;  %v17854_v54 = vcombine.low %v463_v5, %v471_v30  ;;  %v17869_v17 = vcombine.high %v478_v14, %v486_v15  ;;  %v17871_v21 = vcombine.high %v479_v16, %v487_v2  ;;  %v566_v5 = vld [vmem:[%s21082_s18 + $0x770] sm:$0xff]  ;;  %v559_v30 = vld [vmem:[%s21082_s18 + $0x738] sm:$0xff] }
 0x686   : > { %14707 = vmatpush1.bf16.msra.mxu0 %v17772_v26  ;;  %15035 = vmatpush1.bf16.msra.mxu1 %v17774_v10  ;;  %v503_v26 = vld [vmem:[%s21082_s18 + $0x578] sm:$0xff]  ;;  %v17868_v10 = vcombine.low %v478_v14, %v486_v15  ;;  %v574_v15 = vld [vmem:[%s21082_s18 + $0x7b0] sm:$0xff] }
 0x687   : > { %14708 = vmatprep.subr.bf16.mxu0 %v17789_v27  ;;  %15036 = vmatprep.subr.bf16.mxu1 %v17791_v29  ;;  %v17870_v27 = vcombine.low %v479_v16, %v487_v2  ;;  %v17885_v29 = vcombine.high %v494_v22, %v502_v23  ;;  %v17887_v31 = vcombine.high %v495_v25, %v503_v26  ;;  %v582_v16 = vld [vmem:[%s21082_s18 + $0x7f0] sm:$0xff]  ;;  %v575_v2 = vld [vmem:[%s21082_s18 + $0x7b8] sm:$0xff] }
 0x68a   : > { %14709 = vmatpush1.bf16.msra.mxu0 %v17788_v35  ;;  %15037 = vmatpush1.bf16.msra.mxu1 %v17790_v36  ;;  %v519_v35 = vld [vmem:[%s21082_s18 + $0x5f8] sm:$0xff]  ;;  %v17884_v36 = vcombine.low %v494_v22, %v502_v23  ;;  %v590_v23 = vld [vmem:[%s21082_s18 + $0x830] sm:$0xff] }
 0x68b   : > { %14710 = vmatprep.subr.bf16.mxu0 %v17805_v37  ;;  %15038 = vmatprep.subr.bf16.mxu1 %v17807_v40  ;;  %v17886_v37 = vcombine.low %v495_v25, %v503_v26  ;;  %v17901_v40 = vcombine.high %v510_v32, %v518_v0  ;;  %v17903_v41 = vcombine.high %v511_v34, %v519_v35  ;;  %v598_v25 = vld [vmem:[%s21082_s18 + $0x870] sm:$0xff]  ;;  %v591_v26 = vld [vmem:[%s21082_s18 + $0x838] sm:$0xff] }
 0x68e   : > { %14711 = vmatpush1.bf16.msra.mxu0 %v17804_v46  ;;  %15039 = vmatpush1.bf16.msra.mxu1 %v17806_v47  ;;  %v535_v46 = vld [vmem:[%s21082_s18 + $0x678] sm:$0xff]  ;;  %v17900_v47 = vcombine.low %v510_v32, %v518_v0  ;;  %v606_v0 = vld [vmem:[%s21082_s18 + $0x8b0] sm:$0xff] }
 0x68f   : > { %14712 = vmatprep.subr.bf16.mxu0 %v17821_v48  ;;  %15040 = vmatprep.subr.bf16.mxu1 %v17823_v51  ;;  %v17902_v48 = vcombine.low %v511_v34, %v519_v35  ;;  %v17917_v51 = vcombine.high %v526_v42, %v534_v43  ;;  %v17919_v53 = vcombine.high %v527_v44, %v535_v46  ;;  %v614_v34 = vld [vmem:[%s21082_s18 + $0x8f0] sm:$0xff]  ;;  %v607_v35 = vld [vmem:[%s21082_s18 + $0x8b8] sm:$0xff] }
 0x692   : > { %14713 = vmatpush1.bf16.msra.mxu0 %v17820_v58  ;;  %15041 = vmatpush1.bf16.msra.mxu1 %v17822_v61  ;;  %v551_v58 = vld [vmem:[%s21082_s18 + $0x6f8] sm:$0xff]  ;;  %v17916_v61 = vcombine.low %v526_v42, %v534_v43  ;;  %v622_v43 = vld [vmem:[%s21082_s18 + $0x930] sm:$0xff] }
 0x693   : > { %14714 = vmatprep.subr.bf16.mxu0 %v17837_v62  ;;  %15042 = vmatprep.subr.bf16.mxu1 %v17839_v63  ;;  %v17918_v62 = vcombine.low %v527_v44, %v535_v46  ;;  %v17933_v63 = vcombine.high %v542_v55, %v550_v56  ;;  %v17935_v9 = vcombine.high %v543_v57, %v551_v58  ;;  %v630_v44 = vld [vmem:[%s21082_s18 + $0x970] sm:$0xff]  ;;  %v623_v46 = vld [vmem:[%s21082_s18 + $0x938] sm:$0xff] }
 0x696   : > { %14715 = vmatpush1.bf16.msra.mxu0 %v17836_v7  ;;  %15043 = vmatpush1.bf16.msra.mxu1 %v17838_v11  ;;  %v567_v7 = vld [vmem:[%s21082_s18 + $0x778] sm:$0xff]  ;;  %v17932_v11 = vcombine.low %v542_v55, %v550_v56  ;;  %v638_v56 = vld [vmem:[%s21082_s18 + $0x9b0] sm:$0xff] }
 0x697   : > { %14716 = vmatprep.subr.bf16.mxu0 %v17853_v12  ;;  %15044 = vmatprep.subr.bf16.mxu1 %v17855_v13  ;;  %v17934_v12 = vcombine.low %v543_v57, %v551_v58  ;;  %v17949_v13 = vcombine.high %v558_v4, %v566_v5  ;;  %v17951_v14 = vcombine.high %v559_v30, %v567_v7  ;;  %v646_v57 = vld [vmem:[%s21082_s18 + $0x9f0] sm:$0xff]  ;;  %v639_v58 = vld [vmem:[%s21082_s18 + $0x9b8] sm:$0xff] }
 0x69a   : > { %14717 = vmatpush1.bf16.msra.mxu0 %v17852_v18  ;;  %15045 = vmatpush1.bf16.msra.mxu1 %v17854_v54  ;;  %v583_v18 = vld [vmem:[%s21082_s18 + $0x7f8] sm:$0xff]  ;;  %v17948_v54 = vcombine.low %v558_v4, %v566_v5  ;;  %v654_v4 = vld [vmem:[%s21082_s18 + $0xa30] sm:$0xff] }
 0x69b   : > { %14718 = vmatprep.subr.bf16.mxu0 %v17869_v17  ;;  %15046 = vmatprep.subr.bf16.mxu1 %v17871_v21  ;;  %v17950_v17 = vcombine.low %v559_v30, %v567_v7  ;;  %v17965_v21 = vcombine.high %v574_v15, %v582_v16  ;;  %v17967_v22 = vcombine.high %v575_v2, %v583_v18  ;;  %v662_v5 = vld [vmem:[%s21082_s18 + $0xa70] sm:$0xff]  ;;  %v655_v30 = vld [vmem:[%s21082_s18 + $0xa38] sm:$0xff] }
 0x69c   : > { %v663_v7 = vld [vmem:[%s21082_s18 + $0xa78] sm:$0xff] }
 0x69e   : > { %14719 = vmatpush1.bf16.msra.mxu0 %v17868_v10  ;;  %15047 = vmatpush1.bf16.msra.mxu1 %v17870_v27  ;;  %v599_v10 = vld [vmem:[%s21082_s18 + $0x878] sm:$0xff]  ;;  %v17964_v27 = vcombine.low %v574_v15, %v582_v16  ;;  %v678_v15 = vld [vmem:[%s21082_s18 + $0xaf0] sm:$0xff] }
 0x69f   : > { %14720 = vmatprep.subr.bf16.mxu0 %v17885_v29  ;;  %15048 = vmatprep.subr.bf16.mxu1 %v17887_v31  ;;  %v17966_v29 = vcombine.low %v575_v2, %v583_v18  ;;  %v17981_v31 = vcombine.high %v590_v23, %v598_v25  ;;  %v17983_v32 = vcombine.high %v591_v26, %v599_v10  ;;  %v671_v16 = vld [vmem:[%s21082_s18 + $0xab8] sm:$0xff] }
 0x6a0   : > { %v679_v2 = vld [vmem:[%s21082_s18 + $0xaf8] sm:$0xff]  ;;  %v18044_v18 = vcombine.low %v654_v4, %v662_v5 }
 0x6a2   : > { %14721 = vmatpush1.bf16.msra.mxu0 %v17884_v36  ;;  %15049 = vmatpush1.bf16.msra.mxu1 %v17886_v37  ;;  %v615_v36 = vld [vmem:[%s21082_s18 + $0x8f8] sm:$0xff]  ;;  %v17980_v37 = vcombine.low %v590_v23, %v598_v25  ;;  %v694_v23 = vld [vmem:[%s21082_s18 + $0xb70] sm:$0xff] }
 0x6a3   : > { %14722 = vmatprep.subr.bf16.mxu0 %v17901_v40  ;;  %15050 = vmatprep.subr.bf16.mxu1 %v17903_v41  ;;  %v17982_v40 = vcombine.low %v591_v26, %v599_v10  ;;  %v17997_v41 = vcombine.high %v606_v0, %v614_v34  ;;  %v17999_v42 = vcombine.high %v607_v35, %v615_v36  ;;  %v687_v25 = vld [vmem:[%s21082_s18 + $0xb38] sm:$0xff] }
 0x6a4   : > { %v695_v26 = vld [vmem:[%s21082_s18 + $0xb78] sm:$0xff] }
 0x6a6   : > { %14723 = vmatpush1.bf16.msra.mxu0 %v17900_v47  ;;  %15051 = vmatpush1.bf16.msra.mxu1 %v17902_v48  ;;  %v631_v47 = vld [vmem:[%s21082_s18 + $0x978] sm:$0xff]  ;;  %v17996_v48 = vcombine.low %v606_v0, %v614_v34  ;;  %v710_v0 = vld [vmem:[%s21082_s18 + $0xbf0] sm:$0xff] }
 0x6a7   : > { %14724 = vmatprep.subr.bf16.mxu0 %v17917_v51  ;;  %15052 = vmatprep.subr.bf16.mxu1 %v17919_v53  ;;  %v17998_v51 = vcombine.low %v607_v35, %v615_v36  ;;  %v18013_v53 = vcombine.high %v622_v43, %v630_v44  ;;  %v18015_v55 = vcombine.high %v623_v46, %v631_v47  ;;  %v703_v34 = vld [vmem:[%s21082_s18 + $0xbb8] sm:$0xff] }
 0x6a8   : > { %v711_v35 = vld [vmem:[%s21082_s18 + $0xbf8] sm:$0xff] }
 0x6aa   : > { %14725 = vmatpush1.bf16.msra.mxu0 %v17916_v61  ;;  %15053 = vmatpush1.bf16.msra.mxu1 %v17918_v62  ;;  %v647_v61 = vld [vmem:[%s21082_s18 + $0x9f8] sm:$0xff]  ;;  %v18014_v62 = vcombine.low %v623_v46, %v631_v47 }
 0x6ab   : > { %14726 = vmatprep.subr.bf16.mxu0 %v17933_v63  ;;  %15054 = vmatprep.subr.bf16.mxu1 %v17935_v9  ;;  %v18029_v63 = vcombine.high %v638_v56, %v646_v57  ;;  %v18031_v9 = vcombine.high %v639_v58, %v647_v61  ;;  %v727_v46 = vld [vmem:[%s21082_s18 + $0xc78] sm:$0xff] }
 0x6ae   : > { %14727 = vmatpush1.bf16.msra.mxu0 %v17932_v11  ;;  %15055 = vmatpush1.bf16.msra.mxu1 %v17934_v12  ;;  %v18028_v11 = vcombine.low %v638_v56, %v646_v57  ;;  %v18045_v12 = vcombine.high %v654_v4, %v662_v5  ;;  %v742_v56 = vld [vmem:[%s21082_s18 + $0xcf0] sm:$0xff]  ;;  %v735_v57 = vld [vmem:[%s21082_s18 + $0xcb8] sm:$0xff] }
 0x6af   : > { %14728 = vmatprep.subr.bf16.mxu0 %v17949_v13  ;;  %15056 = vmatprep.subr.bf16.mxu1 %v17951_v14  ;;  %v18047_v13 = vcombine.high %v655_v30, %v663_v7  ;;  %v670_v14 = vld [vmem:[%s21082_s18 + $0xab0] sm:$0xff]  ;;  %v751_v5 = vld [vmem:[%s21082_s18 + $0xd38] sm:$0xff] }
 0x6b0   : > { %v18060_v10 = vcombine.low %v670_v14, %v678_v15  ;;  %v758_v4 = vld [vmem:[%s21082_s18 + $0xd70] sm:$0xff] }
 0x6b2   : > { %14729 = vmatpush1.bf16.msra.mxu0 %v17948_v54  ;;  %15057 = vmatpush1.bf16.msra.mxu1 %v17950_v17  ;;  %v18046_v54 = vcombine.low %v655_v30, %v663_v7  ;;  %v18061_v17 = vcombine.high %v670_v14, %v678_v15  ;;  %v759_v30 = vld [vmem:[%s21082_s18 + $0xd78] sm:$0xff]  ;;  %v774_v14 = vld [vmem:[%s21082_s18 + $0xdf0] sm:$0xff] }
 0x6b3   : > { %14730 = vmatprep.subr.bf16.mxu0 %v17965_v21  ;;  %15058 = vmatprep.subr.bf16.mxu1 %v17967_v22  ;;  %v18063_v21 = vcombine.high %v671_v16, %v679_v2  ;;  %v686_v22 = vld [vmem:[%s21082_s18 + $0xb30] sm:$0xff]  ;;  %v767_v15 = vld [vmem:[%s21082_s18 + $0xdb8] sm:$0xff] }
 0x6b4   : > { %v18076_v36 = vcombine.low %v686_v22, %v694_v23 }
 0x6b6   : > { %14731 = vmatpush1.bf16.msra.mxu0 %v17964_v27  ;;  %15059 = vmatpush1.bf16.msra.mxu1 %v17966_v29  ;;  %v18062_v27 = vcombine.low %v671_v16, %v679_v2  ;;  %v18077_v29 = vcombine.high %v686_v22, %v694_v23  ;;  %v775_v16 = vld [vmem:[%s21082_s18 + $0xdf8] sm:$0xff]  ;;  %v790_v22 = vld [vmem:[%s21082_s18 + $0xe70] sm:$0xff] }
 0x6b7   : > { %14741 = vmatprep.subr.bf16.mxu0 %v17981_v31  ;;  %15069 = vmatprep.subr.bf16.mxu1 %v17983_v32  ;;  %v18079_v31 = vcombine.high %v687_v25, %v695_v26  ;;  %v702_v32 = vld [vmem:[%s21082_s18 + $0xbb0] sm:$0xff]  ;;  %v783_v23 = vld [vmem:[%s21082_s18 + $0xe38] sm:$0xff] }
 0x6b8   : > { %v18092_v47 = vcombine.low %v702_v32, %v710_v0 }
 0x6b9   : > { %14733 = vmatmul.mubr.bf16.vlgmr.msra.gmra.mrb[12].mxu0 %v21190_v24  ;;  %15061 = vmatmul.mubr.bf16.vlgmr.msra.gmra.mrb[12].mxu1 %v21190_v24  ;;  %v18012_v24 = vcombine.low %v622_v43, %v630_v44  ;;  %v726_v43 = vld [vmem:[%s21082_s18 + $0xc70] sm:$0xff]  ;;  %v719_v44 = vld [vmem:[%s21082_s18 + $0xc38] sm:$0xff] }
 0x6ba   : > { %14742 = vmatpush1.bf16.msra.mxu0 %v17980_v37  ;;  %15070 = vmatpush1.bf16.msra.mxu1 %v17982_v40  ;;  %v18078_v37 = vcombine.low %v687_v25, %v695_v26  ;;  %v18093_v40 = vcombine.high %v702_v32, %v710_v0  ;;  %v791_v25 = vld [vmem:[%s21082_s18 + $0xe78] sm:$0xff]  ;;  %v806_v32 = vld [vmem:[%s21082_s18 + $0xef0] sm:$0xff] }
 0x6bb   : > { %14743 = vmatprep.subr.bf16.mxu0 %v17997_v41  ;;  %15071 = vmatprep.subr.bf16.mxu1 %v17999_v42  ;;  %v18095_v41 = vcombine.high %v703_v34, %v711_v35  ;;  %v718_v42 = vld [vmem:[%s21082_s18 + $0xc30] sm:$0xff]  ;;  %v799_v0 = vld [vmem:[%s21082_s18 + $0xeb8] sm:$0xff] }
 0x6bc   : > { %14773 = vmatprep.mubr.bf16.mxu0 %v21198_v33  ;;  %15101 = vmatprep.mubr.bf16.mxu1 %v21198_v33  ;;  %v18030_v33 = vcombine.low %v639_v58, %v647_v61  ;;  %v743_v58 = vld [vmem:[%s21082_s18 + $0xcf8] sm:$0xff]  ;;  %v18108_v61 = vcombine.low %v718_v42, %v726_v43 }
 0x6be   : > { %14744 = vmatpush1.bf16.msra.mxu0 %v17996_v48  ;;  %15072 = vmatpush1.bf16.msra.mxu1 %v17998_v51  ;;  %v18094_v48 = vcombine.low %v703_v34, %v711_v35  ;;  %v18109_v51 = vcombine.high %v718_v42, %v726_v43  ;;  %v807_v34 = vld [vmem:[%s21082_s18 + $0xef8] sm:$0xff]  ;;  %v822_v42 = vld [vmem:[%s21082_s18 + $0xf70] sm:$0xff] }
 0x6bf   : > { %14745 = vmatprep.subr.bf16.mxu0 %v18013_v53  ;;  %15073 = vmatprep.subr.bf16.mxu1 %v18015_v55  ;;  %v18111_v53 = vcombine.high %v719_v44, %v727_v46  ;;  %v734_v55 = vld [vmem:[%s21082_s18 + $0xcb0] sm:$0xff]  ;;  %v815_v43 = vld [vmem:[%s21082_s18 + $0xf38] sm:$0xff] }
 0x6c0   : > { %v18124_v7 = vcombine.low %v734_v55, %v742_v56 }
 0x6c2   : > { %14746 = vmatpush1.bf16.msra.mxu0 %v18012_v24  ;;  %15074 = vmatpush1.bf16.msra.mxu1 %v18014_v62  ;;  %v18110_v24 = vcombine.low %v719_v44, %v727_v46  ;;  %v18125_v62 = vcombine.high %v734_v55, %v742_v56  ;;  %v823_v44 = vld [vmem:[%s21082_s18 + $0xf78] sm:$0xff]  ;;  %v838_v55 = vld [vmem:[%s21082_s18 + $0xff0] sm:$0xff] }
 0x6c3   : > { %14747 = vmatprep.subr.bf16.mxu0 %v18029_v63  ;;  %15075 = vmatprep.subr.bf16.mxu1 %v18031_v9  ;;  %v18127_v63 = vcombine.high %v735_v57, %v743_v58  ;;  %v750_v9 = vld [vmem:[%s21082_s18 + $0xd30] sm:$0xff]  ;;  %v831_v56 = vld [vmem:[%s21082_s18 + $0xfb8] sm:$0xff] }
 0x6c4   : > { %v18140_v2 = vcombine.low %v750_v9, %v758_v4 }
 0x6c6   : > { %14748 = vmatpush1.bf16.msra.mxu0 %v18028_v11  ;;  %15076 = vmatpush1.bf16.msra.mxu1 %v18030_v33  ;;  %v18126_v11 = vcombine.low %v735_v57, %v743_v58  ;;  %v18141_v33 = vcombine.high %v750_v9, %v758_v4  ;;  %v839_v57 = vld [vmem:[%s21082_s18 + $0xff8] sm:$0xff]  ;;  %v854_v9 = vld [vmem:[%s21082_s18 + $0x1070] sm:$0xff] }
 0x6c7   : > { %14749 = vmatprep.subr.bf16.mxu0 %v18045_v12  ;;  %15077 = vmatprep.subr.bf16.mxu1 %v18047_v13  ;;  %v18143_v12 = vcombine.high %v751_v5, %v759_v30  ;;  %v766_v13 = vld [vmem:[%s21082_s18 + $0xdb0] sm:$0xff]  ;;  %v847_v4 = vld [vmem:[%s21082_s18 + $0x1038] sm:$0xff] }
 0x6c8   : > { %v18156_v26 = vcombine.low %v766_v13, %v774_v14 }
 0x6ca   : > { %14750 = vmatpush1.bf16.msra.mxu0 %v18044_v18  ;;  %15078 = vmatpush1.bf16.msra.mxu1 %v18046_v54  ;;  %v18142_v18 = vcombine.low %v751_v5, %v759_v30  ;;  %v18157_v54 = vcombine.high %v766_v13, %v774_v14  ;;  %v855_v5 = vld [vmem:[%s21082_s18 + $0x1078] sm:$0xff]  ;;  %v870_v13 = vld [vmem:[%s21082_s18 + $0x10f0] sm:$0xff] }
 0x6cb   : > { %14751 = vmatprep.subr.bf16.mxu0 %v18061_v17  ;;  %15079 = vmatprep.subr.bf16.mxu1 %v18063_v21  ;;  %v18159_v17 = vcombine.high %v767_v15, %v775_v16  ;;  %v782_v21 = vld [vmem:[%s21082_s18 + $0xe30] sm:$0xff]  ;;  %v863_v14 = vld [vmem:[%s21082_s18 + $0x10b8] sm:$0xff] }
 0x6cc   : > { %v18172_v35 = vcombine.low %v782_v21, %v790_v22 }
 0x6ce   : > { %14752 = vmatpush1.bf16.msra.mxu0 %v18060_v10  ;;  %15080 = vmatpush1.bf16.msra.mxu1 %v18062_v27  ;;  %v18158_v10 = vcombine.low %v767_v15, %v775_v16  ;;  %v18173_v27 = vcombine.high %v782_v21, %v790_v22  ;;  %v871_v15 = vld [vmem:[%s21082_s18 + $0x10f8] sm:$0xff]  ;;  %v886_v21 = vld [vmem:[%s21082_s18 + $0x1170] sm:$0xff] }
 0x6cf   : > { %14753 = vmatprep.subr.bf16.mxu0 %v18077_v29  ;;  %15081 = vmatprep.subr.bf16.mxu1 %v18079_v31  ;;  %v18175_v29 = vcombine.high %v783_v23, %v791_v25  ;;  %v798_v31 = vld [vmem:[%s21082_s18 + $0xeb0] sm:$0xff]  ;;  %v879_v22 = vld [vmem:[%s21082_s18 + $0x1138] sm:$0xff] }
 0x6d0   : > { %v18188_v46 = vcombine.low %v798_v31, %v806_v32 }
 0x6d2   : > { %14754 = vmatpush1.bf16.msra.mxu0 %v18076_v36  ;;  %15082 = vmatpush1.bf16.msra.mxu1 %v18078_v37  ;;  %v18174_v36 = vcombine.low %v783_v23, %v791_v25  ;;  %v18189_v37 = vcombine.high %v798_v31, %v806_v32  ;;  %v887_v23 = vld [vmem:[%s21082_s18 + $0x1178] sm:$0xff]  ;;  %v902_v31 = vld [vmem:[%s21082_s18 + $0x11f0] sm:$0xff] }
 0x6d3   : > { %14755 = vmatprep.subr.bf16.mxu0 %v18093_v40  ;;  %15083 = vmatprep.subr.bf16.mxu1 %v18095_v41  ;;  %v18191_v40 = vcombine.high %v799_v0, %v807_v34  ;;  %v814_v41 = vld [vmem:[%s21082_s18 + $0xf30] sm:$0xff]  ;;  %v895_v32 = vld [vmem:[%s21082_s18 + $0x11b8] sm:$0xff] }
 0x6d4   : > { %v18204_v58 = vcombine.low %v814_v41, %v822_v42 }
 0x6d6   : > { %14756 = vmatpush1.bf16.msra.mxu0 %v18092_v47  ;;  %15084 = vmatpush1.bf16.msra.mxu1 %v18094_v48  ;;  %v18190_v47 = vcombine.low %v799_v0, %v807_v34  ;;  %v18205_v48 = vcombine.high %v814_v41, %v822_v42  ;;  %v903_v0 = vld [vmem:[%s21082_s18 + $0x11f8] sm:$0xff]  ;;  %v18270_v34 = vcombine.low %v879_v22, %v887_v23 }
 0x6d7   : > { %14757 = vmatprep.subr.bf16.mxu0 %v18109_v51  ;;  %15085 = vmatprep.subr.bf16.mxu1 %v18111_v53  ;;  %v18207_v51 = vcombine.high %v815_v43, %v823_v44  ;;  %v830_v53 = vld [vmem:[%s21082_s18 + $0xfb0] sm:$0xff]  ;;  %v911_v41 = vld [vmem:[%s21082_s18 + $0x1238] sm:$0xff] }
 0x6d8   : > { %v18220_v30 = vcombine.low %v830_v53, %v838_v55  ;;  %v919_v42 = vld [vmem:[%s21082_s18 + $0x1278] sm:$0xff] }
 0x6da   : > { %14758 = vmatpush1.bf16.msra.mxu0 %v18108_v61  ;;  %15086 = vmatpush1.bf16.msra.mxu1 %v18110_v24  ;;  %v18206_v61 = vcombine.low %v815_v43, %v823_v44  ;;  %v18221_v24 = vcombine.high %v830_v53, %v838_v55  ;;  %v935_v53 = vld [vmem:[%s21082_s18 + $0x12f8] sm:$0xff] }
 0x6db   : > { %14759 = vmatprep.subr.bf16.mxu0 %v18125_v62  ;;  %15087 = vmatprep.subr.bf16.mxu1 %v18127_v63  ;;  %v18223_v62 = vcombine.high %v831_v56, %v839_v57  ;;  %v846_v63 = vld [vmem:[%s21082_s18 + $0x1030] sm:$0xff] }
 0x6dc   : > { %v18236_v16 = vcombine.low %v846_v63, %v854_v9 }
 0x6de   : > { %14760 = vmatpush1.bf16.msra.mxu0 %v18124_v7  ;;  %15088 = vmatpush1.bf16.msra.mxu1 %v18126_v11  ;;  %v18222_v7 = vcombine.low %v831_v56, %v839_v57  ;;  %v18237_v11 = vcombine.high %v846_v63, %v854_v9  ;;  %v18302_v56 = vcombine.low %v911_v41, %v919_v42  ;;  %v951_v63 = vld [vmem:[%s21082_s18 + $0x1378] sm:$0xff] }
 0x6df   : > { %14761 = vmatprep.subr.bf16.mxu0 %v18141_v33  ;;  %15089 = vmatprep.subr.bf16.mxu1 %v18143_v12  ;;  %v18239_v33 = vcombine.high %v847_v4, %v855_v5  ;;  %v862_v12 = vld [vmem:[%s21082_s18 + $0x10b0] sm:$0xff] }
 0x6e0   : > { %v18252_v25 = vcombine.low %v862_v12, %v870_v13 }
 0x6e2   : > { %14762 = vmatpush1.bf16.msra.mxu0 %v18140_v2  ;;  %15090 = vmatpush1.bf16.msra.mxu1 %v18142_v18  ;;  %v18238_v2 = vcombine.low %v847_v4, %v855_v5  ;;  %v18253_v18 = vcombine.high %v862_v12, %v870_v13  ;;  %v967_v12 = vld [vmem:[%s21082_s18 + $0x13f8] sm:$0xff] }
 0x6e3   : > { %14763 = vmatprep.subr.bf16.mxu0 %v18157_v54  ;;  %15091 = vmatprep.subr.bf16.mxu1 %v18159_v17  ;;  %v18255_v54 = vcombine.high %v863_v14, %v871_v15  ;;  %v878_v17 = vld [vmem:[%s21082_s18 + $0x1130] sm:$0xff] }
 0x6e6   : > { %14764 = vmatpush1.bf16.msra.mxu0 %v18156_v26  ;;  %15092 = vmatpush1.bf16.msra.mxu1 %v18158_v10  ;;  %v18254_v26 = vcombine.low %v863_v14, %v871_v15  ;;  %v18269_v10 = vcombine.high %v878_v17, %v886_v21 }
 0x6e7   : > { %14765 = vmatprep.subr.bf16.mxu0 %v18173_v27  ;;  %15093 = vmatprep.subr.bf16.mxu1 %v18175_v29  ;;  %v18271_v27 = vcombine.high %v879_v22, %v887_v23  ;;  %v894_v29 = vld [vmem:[%s21082_s18 + $0x11b0] sm:$0xff] }
 0x6e8   : > { %v18284_v43 = vcombine.low %v894_v29, %v902_v31 }
 0x6ea   : > { %14766 = vmatpush1.bf16.msra.mxu0 %v18172_v35  ;;  %15094 = vmatpush1.bf16.msra.mxu1 %v18174_v36  ;;  %v18285_v35 = vcombine.high %v894_v29, %v902_v31  ;;  %v18287_v36 = vcombine.high %v895_v32, %v903_v0  ;;  %v999_v29 = vld [vmem:[%s21082_s18 + $0x14f8] sm:$0xff] }
 0x6eb   : > { %14767 = vmatprep.subr.bf16.mxu0 %v18189_v37  ;;  %15095 = vmatprep.subr.bf16.mxu1 %v18191_v40  ;;  %v910_v37 = vld [vmem:[%s21082_s18 + $0x1230] sm:$0xff] }
 0x6ec   : > { %v918_v40 = vld [vmem:[%s21082_s18 + $0x1270] sm:$0xff] }
 0x6ed   : > { %v18301_v44 = vcombine.high %v910_v37, %v918_v40  ;;  %v18300_v55 = vcombine.low %v910_v37, %v918_v40  ;;  %v1015_v37 = vld [vmem:[%s21082_s18 + $0x1578] sm:$0xff] }
 0x6ee   : > { %14768 = vmatpush1.bf16.msra.mxu0 %v18188_v46  ;;  %15096 = vmatpush1.bf16.msra.mxu1 %v18190_v47  ;;  %v18303_v46 = vcombine.high %v911_v41, %v919_v42  ;;  %v926_v47 = vld [vmem:[%s21082_s18 + $0x12b0] sm:$0xff] }
 0x6ef   : > { %14769 = vmatprep.subr.bf16.mxu0 %v18205_v48  ;;  %15097 = vmatprep.subr.bf16.mxu1 %v18207_v51  ;;  %v934_v48 = vld [vmem:[%s21082_s18 + $0x12f0] sm:$0xff]  ;;  %v927_v51 = vld [vmem:[%s21082_s18 + $0x12b8] sm:$0xff] }
 0x6f0   : > { %v18317_v57 = vcombine.high %v926_v47, %v934_v48  ;;  %v18316_v9 = vcombine.low %v926_v47, %v934_v48  ;;  %v18318_v4 = vcombine.low %v927_v51, %v935_v53  ;;  %v1031_v47 = vld [vmem:[%s21082_s18 + $0x15f8] sm:$0xff] }
 0x6f2   : > { %14770 = vmatpush1.bf16.msra.mxu0 %v18204_v58  ;;  %15098 = vmatpush1.bf16.msra.mxu1 %v18206_v61  ;;  %v18319_v58 = vcombine.high %v927_v51, %v935_v53  ;;  %v942_v61 = vld [vmem:[%s21082_s18 + $0x1330] sm:$0xff] }
 0x6f3   : > { %14771 = vmatprep.subr.bf16.mxu0 %v18221_v24  ;;  %15099 = vmatprep.subr.bf16.mxu1 %v18223_v62  ;;  %v950_v24 = vld [vmem:[%s21082_s18 + $0x1370] sm:$0xff]  ;;  %v943_v62 = vld [vmem:[%s21082_s18 + $0x1338] sm:$0xff] }
 0x6f4   : > { %v18333_v5 = vcombine.high %v942_v61, %v950_v24  ;;  %v18332_v13 = vcombine.low %v942_v61, %v950_v24  ;;  %v18334_v14 = vcombine.low %v943_v62, %v951_v63  ;;  %v1047_v61 = vld [vmem:[%s21082_s18 + $0x1678] sm:$0xff] }
 0x6f6   : > { %14772 = vmatpush1.bf16.msra.mxu0 %v18220_v30  ;;  %15100 = vmatpush1.bf16.msra.mxu1 %v18222_v7  ;;  %v18335_v30 = vcombine.high %v943_v62, %v951_v63  ;;  %v958_v7 = vld [vmem:[%s21082_s18 + $0x13b0] sm:$0xff] }
 0x6f7   : > { %14782 = vmatprep.subr.bf16.mxu0 %v18237_v11  ;;  %15110 = vmatprep.subr.bf16.mxu1 %v18239_v33  ;;  %v966_v11 = vld [vmem:[%s21082_s18 + $0x13f0] sm:$0xff]  ;;  %v959_v33 = vld [vmem:[%s21082_s18 + $0x13b8] sm:$0xff] }
 0x6f8   : > { %v18349_v15 = vcombine.high %v958_v7, %v966_v11  ;;  %v18350_v22 = vcombine.low %v959_v33, %v967_v12 }
 0x6f9   : > { %14774 = vmatmul.mubr.bf16.vlgmr.msra.gmra.mrb[12].mxu0 %v21273_v39  ;;  %15102 = vmatmul.mubr.bf16.vlgmr.msra.gmra.mrb[12].mxu1 %v21273_v39  ;;  %v18268_v39 = vcombine.low %v878_v17, %v886_v21  ;;  %v983_v17 = vld [vmem:[%s21082_s18 + $0x1478] sm:$0xff]  ;;  %v18348_v21 = vcombine.low %v958_v7, %v966_v11 }
 0x6fa   : > { %14783 = vmatpush1.bf16.msra.mxu0 %v18236_v16  ;;  %15111 = vmatpush1.bf16.msra.mxu1 %v18238_v2  ;;  %v18351_v16 = vcombine.high %v959_v33, %v967_v12  ;;  %v974_v2 = vld [vmem:[%s21082_s18 + $0x1430] sm:$0xff]  ;;  %v1063_v7 = vld [vmem:[%s21082_s18 + $0x16f8] sm:$0xff] }
 0x6fb   : > { %14784 = vmatprep.subr.bf16.mxu0 %v18253_v18  ;;  %15112 = vmatprep.subr.bf16.mxu1 %v18255_v54  ;;  %v982_v18 = vld [vmem:[%s21082_s18 + $0x1470] sm:$0xff]  ;;  %v975_v54 = vld [vmem:[%s21082_s18 + $0x1438] sm:$0xff] }
 0x6fc   : > { %14814 = vmatprep.mubr.bf16.mxu0 %v21280_v49  ;;  %15142 = vmatprep.mubr.bf16.mxu1 %v21280_v49  ;;  %v18286_v49 = vcombine.low %v895_v32, %v903_v0  ;;  %v18365_v23 = vcombine.high %v974_v2, %v982_v18  ;;  %v18364_v31 = vcombine.low %v974_v2, %v982_v18  ;;  %v1079_v2 = vld [vmem:[%s21082_s18 + $0x1778] sm:$0xff] }
 0x6fd   : > { %v18366_v32 = vcombine.low %v975_v54, %v983_v17 }
 0x6fe   : > { %14785 = vmatpush1.bf16.msra.mxu0 %v18252_v25  ;;  %15113 = vmatpush1.bf16.msra.mxu1 %v18254_v26  ;;  %v18367_v25 = vcombine.high %v975_v54, %v983_v17  ;;  %v990_v26 = vld [vmem:[%s21082_s18 + $0x14b0] sm:$0xff] }
 0x6ff   : > { %14786 = vmatprep.subr.bf16.mxu0 %v18269_v10  ;;  %15114 = vmatprep.subr.bf16.mxu1 %v18271_v27  ;;  %v998_v10 = vld [vmem:[%s21082_s18 + $0x14f0] sm:$0xff]  ;;  %v991_v27 = vld [vmem:[%s21082_s18 + $0x14b8] sm:$0xff] }
 0x700   : > { %v18381_v0 = vcombine.high %v990_v26, %v998_v10  ;;  %v18380_v40 = vcombine.low %v990_v26, %v998_v10  ;;  %v18382_v41 = vcombine.low %v991_v27, %v999_v29  ;;  %v1095_v26 = vld [vmem:[%s21082_s18 + $0x17f8] sm:$0xff] }
 0x702   : > { %14787 = vmatpush1.bf16.msra.mxu0 %v18268_v39  ;;  %15115 = vmatpush1.bf16.msra.mxu1 %v18270_v34  ;;  %v18383_v39 = vcombine.high %v991_v27, %v999_v29  ;;  %v1006_v34 = vld [vmem:[%s21082_s18 + $0x1530] sm:$0xff] }
 0x703   : > { %14788 = vmatprep.subr.bf16.mxu0 %v18285_v35  ;;  %15116 = vmatprep.subr.bf16.mxu1 %v18287_v36  ;;  %v1014_v35 = vld [vmem:[%s21082_s18 + $0x1570] sm:$0xff]  ;;  %v1007_v36 = vld [vmem:[%s21082_s18 + $0x1538] sm:$0xff] }
 0x704   : > { %v18397_v42 = vcombine.high %v1006_v34, %v1014_v35  ;;  %v18396_v48 = vcombine.low %v1006_v34, %v1014_v35  ;;  %v18398_v51 = vcombine.low %v1007_v36, %v1015_v37  ;;  %v1111_v34 = vld [vmem:[%s21082_s18 + $0x1878] sm:$0xff] }
 0x706   : > { %14789 = vmatpush1.bf16.msra.mxu0 %v18284_v43  ;;  %15117 = vmatpush1.bf16.msra.mxu1 %v18286_v49  ;;  %v18399_v43 = vcombine.high %v1007_v36, %v1015_v37  ;;  %v1022_v49 = vld [vmem:[%s21082_s18 + $0x15b0] sm:$0xff] }
 0x707   : > { %14790 = vmatprep.subr.bf16.mxu0 %v18301_v44  ;;  %15118 = vmatprep.subr.bf16.mxu1 %v18303_v46  ;;  %v1030_v44 = vld [vmem:[%s21082_s18 + $0x15f0] sm:$0xff]  ;;  %v1023_v46 = vld [vmem:[%s21082_s18 + $0x15b8] sm:$0xff] }
 0x708   : > { %v18413_v53 = vcombine.high %v1022_v49, %v1030_v44  ;;  %v18412_v24 = vcombine.low %v1022_v49, %v1030_v44  ;;  %v18414_v62 = vcombine.low %v1023_v46, %v1031_v47  ;;  %v1127_v49 = vld [vmem:[%s21082_s18 + $0x18f8] sm:$0xff] }
 0x70a   : > { %14791 = vmatpush1.bf16.msra.mxu0 %v18300_v55  ;;  %15119 = vmatpush1.bf16.msra.mxu1 %v18302_v56  ;;  %v18415_v55 = vcombine.high %v1023_v46, %v1031_v47  ;;  %v1038_v56 = vld [vmem:[%s21082_s18 + $0x1630] sm:$0xff] }
 0x70b   : > { %14792 = vmatprep.subr.bf16.mxu0 %v18317_v57  ;;  %15120 = vmatprep.subr.bf16.mxu1 %v18319_v58  ;;  %v1046_v57 = vld [vmem:[%s21082_s18 + $0x1670] sm:$0xff]  ;;  %v1039_v58 = vld [vmem:[%s21082_s18 + $0x1638] sm:$0xff] }
 0x70c   : > { %v18429_v63 = vcombine.high %v1038_v56, %v1046_v57  ;;  %v18428_v11 = vcombine.low %v1038_v56, %v1046_v57  ;;  %v18430_v33 = vcombine.low %v1039_v58, %v1047_v61  ;;  %v1143_v56 = vld [vmem:[%s21082_s18 + $0x1978] sm:$0xff] }
 0x70e   : > { %14793 = vmatpush1.bf16.msra.mxu0 %v18316_v9  ;;  %15121 = vmatpush1.bf16.msra.mxu1 %v18318_v4  ;;  %v18431_v9 = vcombine.high %v1039_v58, %v1047_v61  ;;  %v1054_v4 = vld [vmem:[%s21082_s18 + $0x16b0] sm:$0xff] }
 0x70f   : > { %14794 = vmatprep.subr.bf16.mxu0 %v18333_v5  ;;  %15122 = vmatprep.subr.bf16.mxu1 %v18335_v30  ;;  %v1062_v5 = vld [vmem:[%s21082_s18 + $0x16f0] sm:$0xff]  ;;  %v1055_v30 = vld [vmem:[%s21082_s18 + $0x16b8] sm:$0xff] }
 0x710   : > { %v18445_v12 = vcombine.high %v1054_v4, %v1062_v5  ;;  %v18444_v18 = vcombine.low %v1054_v4, %v1062_v5  ;;  %v18446_v54 = vcombine.low %v1055_v30, %v1063_v7  ;;  %v1159_v4 = vld [vmem:[%s21082_s18 + $0x19f8] sm:$0xff] }
 0x712   : > { %14795 = vmatpush1.bf16.msra.mxu0 %v18332_v13  ;;  %15123 = vmatpush1.bf16.msra.mxu1 %v18334_v14  ;;  %v18447_v13 = vcombine.high %v1055_v30, %v1063_v7  ;;  %v1070_v14 = vld [vmem:[%s21082_s18 + $0x1730] sm:$0xff] }
 0x713   : > { %14796 = vmatprep.subr.bf16.mxu0 %v18349_v15  ;;  %15124 = vmatprep.subr.bf16.mxu1 %v18351_v16  ;;  %v1078_v15 = vld [vmem:[%s21082_s18 + $0x1770] sm:$0xff]  ;;  %v1071_v16 = vld [vmem:[%s21082_s18 + $0x1738] sm:$0xff] }
 0x714   : > { %v18461_v17 = vcombine.high %v1070_v14, %v1078_v15  ;;  %v18460_v10 = vcombine.low %v1070_v14, %v1078_v15  ;;  %v18462_v27 = vcombine.low %v1071_v16, %v1079_v2 }
 0x716   : > { %14797 = vmatpush1.bf16.msra.mxu0 %v18348_v21  ;;  %15125 = vmatpush1.bf16.msra.mxu1 %v18350_v22  ;;  %v18463_v21 = vcombine.high %v1071_v16, %v1079_v2  ;;  %v1086_v22 = vld [vmem:[%s21082_s18 + $0x17b0] sm:$0xff] }
 0x717   : > { %14798 = vmatprep.subr.bf16.mxu0 %v18365_v23  ;;  %15126 = vmatprep.subr.bf16.mxu1 %v18367_v25  ;;  %v1094_v23 = vld [vmem:[%s21082_s18 + $0x17f0] sm:$0xff]  ;;  %v1087_v25 = vld [vmem:[%s21082_s18 + $0x17b8] sm:$0xff] }
 0x718   : > { %v18477_v29 = vcombine.high %v1086_v22, %v1094_v23  ;;  %v18476_v35 = vcombine.low %v1086_v22, %v1094_v23  ;;  %v18478_v36 = vcombine.low %v1087_v25, %v1095_v26  ;;  %v1182_v2 = vld [vmem:[%s21082_s18 + $0x1ab0] sm:$0xff] }
 0x71a   : > { %14799 = vmatpush1.bf16.msra.mxu0 %v18364_v31  ;;  %15127 = vmatpush1.bf16.msra.mxu1 %v18366_v32  ;;  %v18479_v31 = vcombine.high %v1087_v25, %v1095_v26  ;;  %v1102_v32 = vld [vmem:[%s21082_s18 + $0x1830] sm:$0xff] }
 0x71b   : > { %14800 = vmatprep.subr.bf16.mxu0 %v18381_v0  ;;  %15128 = vmatprep.subr.bf16.mxu1 %v18383_v39  ;;  %v1110_v0 = vld [vmem:[%s21082_s18 + $0x1870] sm:$0xff]  ;;  %v1103_v39 = vld [vmem:[%s21082_s18 + $0x1838] sm:$0xff] }
 0x71c   : > { %v18493_v37 = vcombine.high %v1102_v32, %v1110_v0  ;;  %v18492_v44 = vcombine.low %v1102_v32, %v1110_v0  ;;  %v18494_v46 = vcombine.low %v1103_v39, %v1111_v34  ;;  %v1198_v26 = vld [vmem:[%s21082_s18 + $0x1b30] sm:$0xff] }
 0x71e   : > { %14801 = vmatpush1.bf16.msra.mxu0 %v18380_v40  ;;  %15129 = vmatpush1.bf16.msra.mxu1 %v18382_v41  ;;  %v18495_v40 = vcombine.high %v1103_v39, %v1111_v34  ;;  %v1118_v41 = vld [vmem:[%s21082_s18 + $0x18b0] sm:$0xff] }
 0x71f   : > { %14802 = vmatprep.subr.bf16.mxu0 %v18397_v42  ;;  %15130 = vmatprep.subr.bf16.mxu1 %v18399_v43  ;;  %v1126_v42 = vld [vmem:[%s21082_s18 + $0x18f0] sm:$0xff]  ;;  %v1119_v43 = vld [vmem:[%s21082_s18 + $0x18b8] sm:$0xff] }
 0x720   : > { %v18509_v47 = vcombine.high %v1118_v41, %v1126_v42  ;;  %v18508_v57 = vcombine.low %v1118_v41, %v1126_v42  ;;  %v18510_v58 = vcombine.low %v1119_v43, %v1127_v49  ;;  %v1215_v41 = vld [vmem:[%s21082_s18 + $0x1bb8] sm:$0xff] }
 0x721   : > { %v1223_v42 = vld [vmem:[%s21082_s18 + $0x1bf8] sm:$0xff] }
 0x722   : > { %14803 = vmatpush1.bf16.msra.mxu0 %v18396_v48  ;;  %15131 = vmatpush1.bf16.msra.mxu1 %v18398_v51  ;;  %v18511_v48 = vcombine.high %v1119_v43, %v1127_v49  ;;  %v1134_v51 = vld [vmem:[%s21082_s18 + $0x1930] sm:$0xff] }
 0x723   : > { %14804 = vmatprep.subr.bf16.mxu0 %v18413_v53  ;;  %15132 = vmatprep.subr.bf16.mxu1 %v18415_v55  ;;  %v1142_v53 = vld [vmem:[%s21082_s18 + $0x1970] sm:$0xff]  ;;  %v1135_v55 = vld [vmem:[%s21082_s18 + $0x1938] sm:$0xff] }
 0x724   : > { %v18525_v61 = vcombine.high %v1134_v51, %v1142_v53  ;;  %v18526_v5 = vcombine.low %v1135_v55, %v1143_v56 }
 0x726   : > { %14805 = vmatpush1.bf16.msra.mxu0 %v18412_v24  ;;  %15133 = vmatpush1.bf16.msra.mxu1 %v18414_v62  ;;  %v18527_v24 = vcombine.high %v1135_v55, %v1143_v56  ;;  %v1150_v62 = vld [vmem:[%s21082_s18 + $0x19b0] sm:$0xff] }
 0x727   : > { %14806 = vmatprep.subr.bf16.mxu0 %v18429_v63  ;;  %15134 = vmatprep.subr.bf16.mxu1 %v18431_v9  ;;  %v1158_v63 = vld [vmem:[%s21082_s18 + $0x19f0] sm:$0xff]  ;;  %v1151_v9 = vld [vmem:[%s21082_s18 + $0x19b8] sm:$0xff] }
 0x728   : > { %v18541_v30 = vcombine.high %v1150_v62, %v1158_v63  ;;  %v18543_v7 = vcombine.high %v1151_v9, %v1159_v4  ;;  %v18540_v14 = vcombine.low %v1150_v62, %v1158_v63  ;;  %v1231_v63 = vld [vmem:[%s21082_s18 + $0x1c38] sm:$0xff] }
 0x72a   : > { %14807 = vmatpush1.bf16.msra.mxu0 %v18428_v11  ;;  %15135 = vmatpush1.bf16.msra.mxu1 %v18430_v33  ;;  %v1166_v11 = vld [vmem:[%s21082_s18 + $0x1a30] sm:$0xff] }
 0x72b   : > { %14808 = vmatprep.subr.bf16.mxu0 %v18445_v12  ;;  %15136 = vmatprep.subr.bf16.mxu1 %v18447_v13  ;;  %v1174_v33 = vld [vmem:[%s21082_s18 + $0x1a70] sm:$0xff]  ;;  %v1167_v12 = vld [vmem:[%s21082_s18 + $0x1a38] sm:$0xff] }
 0x72c   : > { %v1175_v13 = vld [vmem:[%s21082_s18 + $0x1a78] sm:$0xff]  ;;  %v18557_v15 = vcombine.high %v1166_v11, %v1174_v33 }
 0x72d   : > { %v18559_v16 = vcombine.high %v1167_v12, %v1175_v13  ;;  %v18558_v22 = vcombine.low %v1167_v12, %v1175_v13  ;;  %v1254_v12 = vld [vmem:[%s21082_s18 + $0x1cf0] sm:$0xff] }
 0x72e   : > { %14809 = vmatpush1.bf16.msra.mxu0 %v18444_v18  ;;  %15137 = vmatpush1.bf16.msra.mxu1 %v18446_v54  ;;  %v1190_v18 = vld [vmem:[%s21082_s18 + $0x1af0] sm:$0xff]  ;;  %v1183_v54 = vld [vmem:[%s21082_s18 + $0x1ab8] sm:$0xff] }
 0x72f   : > { %14810 = vmatprep.subr.bf16.mxu0 %v18461_v17  ;;  %15138 = vmatprep.subr.bf16.mxu1 %v18463_v21  ;;  %v1191_v17 = vld [vmem:[%s21082_s18 + $0x1af8] sm:$0xff]  ;;  %v18556_v21 = vcombine.low %v1166_v11, %v1174_v33  ;;  %v18573_v23 = vcombine.high %v1182_v2, %v1190_v18  ;;  %v1246_v33 = vld [vmem:[%s21082_s18 + $0x1cb0] sm:$0xff] }
 0x730   : > { %v18575_v25 = vcombine.high %v1183_v54, %v1191_v17  ;;  %v18574_v32 = vcombine.low %v1183_v54, %v1191_v17  ;;  %v1262_v54 = vld [vmem:[%s21082_s18 + $0x1d30] sm:$0xff] }
 0x731   : > { %v1270_v17 = vld [vmem:[%s21082_s18 + $0x1d70] sm:$0xff] }
 0x732   : > { %14811 = vmatpush1.bf16.msra.mxu0 %v18460_v10  ;;  %15139 = vmatpush1.bf16.msra.mxu1 %v18462_v27  ;;  %v1206_v10 = vld [vmem:[%s21082_s18 + $0x1b70] sm:$0xff]  ;;  %v1199_v27 = vld [vmem:[%s21082_s18 + $0x1b38] sm:$0xff] }
 0x733   : > { %14812 = vmatprep.subr.bf16.mxu0 %v18477_v29  ;;  %15140 = vmatprep.subr.bf16.mxu1 %v18479_v31  ;;  %v1207_v29 = vld [vmem:[%s21082_s18 + $0x1b78] sm:$0xff]  ;;  %v18572_v31 = vcombine.low %v1182_v2, %v1190_v18  ;;  %v18589_v0 = vcombine.high %v1198_v26, %v1206_v10  ;;  %v18637_v2 = vcombine.high %v1246_v33, %v1254_v12 }
 0x734   : > { %v18591_v34 = vcombine.high %v1199_v27, %v1207_v29 }
 0x736   : > { %14813 = vmatpush1.bf16.msra.mxu0 %v18476_v35  ;;  %15141 = vmatpush1.bf16.msra.mxu1 %v18478_v36  ;;  %v1214_v35 = vld [vmem:[%s21082_s18 + $0x1bb0] sm:$0xff] }
 0x737   : > { %14823 = vmatprep.subr.bf16.mxu0 %v18493_v37  ;;  %15151 = vmatprep.subr.bf16.mxu1 %v18495_v40  ;;  %v1222_v36 = vld [vmem:[%s21082_s18 + $0x1bf0] sm:$0xff] }
 0x738   : > { %v18605_v55 = vcombine.high %v1214_v35, %v1222_v36 }
 0x739   : > { %14815 = vmatmul.mubr.bf16.vlgmr.msra.gmra.mrb[12].mxu0 %v21348_v59  ;;  %15143 = vmatmul.mubr.bf16.vlgmr.msra.gmra.mrb[12].mxu1 %v21348_v59  ;;  %v18524_v59 = vcombine.low %v1134_v51, %v1142_v53  ;;  %v18590_v53 = vcombine.low %v1199_v27, %v1207_v29  ;;  %v1278_v27 = vld [vmem:[%s21082_s18 + $0x1db0] sm:$0xff] }
 0x73a   : > { %14824 = vmatpush1.bf16.msra.mxu0 %v18492_v44  ;;  %15152 = vmatpush1.bf16.msra.mxu1 %v18494_v46  ;;  %v18588_v46 = vcombine.low %v1198_v26, %v1206_v10  ;;  %v18653_v26 = vcombine.high %v1262_v54, %v1270_v17  ;;  %v1286_v29 = vld [vmem:[%s21082_s18 + $0x1df0] sm:$0xff] }
 0x73b   : > { %14825 = vmatprep.subr.bf16.mxu0 %v18509_v47  ;;  %15153 = vmatprep.subr.bf16.mxu1 %v18511_v48 }
 0x73c   : > { %14855 = vmatprep.mubr.bf16.mxu0 %v21356_v6  ;;  %15183 = vmatprep.mubr.bf16.mxu1 %v21356_v6  ;;  %v18542_v6 = vcombine.low %v1151_v9, %v1159_v4  ;;  %v1239_v9 = vld [vmem:[%s21082_s18 + $0x1c78] sm:$0xff]  ;;  %v326_v4 = vld [vmem:[#allocation2 + $0x10] sm:$0xff] }
 0x73d   : > { %v18623_v11 = vcombine.high %v1231_v63, %v1239_v9 }
 0x73e   : > { %14826 = vmatpush1.bf16.msra.mxu0 %v18508_v57  ;;  %15154 = vmatpush1.bf16.msra.mxu1 %v18510_v58  ;;  %v18607_v58 = vcombine.high %v1215_v41, %v1223_v42 }
 0x73f   : > { %14827 = vmatprep.subr.bf16.mxu0 %v18525_v61  ;;  %15155 = vmatprep.subr.bf16.mxu1 %v18527_v24  ;;  %v1230_v61 = vld [vmem:[%s21082_s18 + $0x1c30] sm:$0xff] }
 0x740   : > { %v1238_v24 = vld [vmem:[%s21082_s18 + $0x1c70] sm:$0xff] }
 0x742   : > { %14828 = vmatpush1.bf16.msra.mxu0 %v18524_v59  ;;  %15156 = vmatpush1.bf16.msra.mxu1 %v18526_v5  ;;  %v18604_v59 = vcombine.low %v1214_v35, %v1222_v36  ;;  %v1294_v36 = vld [vmem:[%s21082_s18 + $0x1e30] sm:$0xff] }
 0x743   : > { %14829 = vmatprep.subr.bf16.mxu0 %v18541_v30  ;;  %15157 = vmatprep.subr.bf16.mxu1 %v18543_v7  ;;  %v18606_v30 = vcombine.low %v1215_v41, %v1223_v42  ;;  %v18621_v7 = vcombine.high %v1230_v61, %v1238_v24  ;;  %v1303_v41 = vld [vmem:[%s21082_s18 + $0x1e78] sm:$0xff]  ;;  %v18668_v42 = vcombine.low %v1278_v27, %v1286_v29 }
 0x746   : > { %14830 = vmatpush1.bf16.msra.mxu0 %v18540_v14  ;;  %15158 = vmatpush1.bf16.msra.mxu1 %v18542_v6  ;;  %v1247_v14 = vld [vmem:[%s21082_s18 + $0x1cb8] sm:$0xff] }
 0x747   : > { %14831 = vmatprep.subr.bf16.mxu0 %v18557_v15  ;;  %15159 = vmatprep.subr.bf16.mxu1 %v18559_v16  ;;  %v1255_v6 = vld [vmem:[%s21082_s18 + $0x1cf8] sm:$0xff]  ;;  %v18620_v15 = vcombine.low %v1230_v61, %v1238_v24  ;;  %v18622_v16 = vcombine.low %v1231_v63, %v1239_v9  ;;  %v1334_v61 = vld [vmem:[%s21082_s18 + $0x1f70] sm:$0xff] }
 0x748   : > { %v18639_v18 = vcombine.high %v1247_v14, %v1255_v6  ;;  %v1327_v24 = vld [vmem:[%s21082_s18 + $0x1f38] sm:$0xff] }
 0x74a   : > { %14832 = vmatpush1.bf16.msra.mxu0 %v18556_v21  ;;  %15160 = vmatpush1.bf16.msra.mxu1 %v18558_v22  ;;  %v1263_v21 = vld [vmem:[%s21082_s18 + $0x1d38] sm:$0xff] }
 0x74b   : > { %14833 = vmatprep.subr.bf16.mxu0 %v18573_v23  ;;  %15161 = vmatprep.subr.bf16.mxu1 %v18575_v25  ;;  %v1271_v22 = vld [vmem:[%s21082_s18 + $0x1d78] sm:$0xff]  ;;  %v18636_v23 = vcombine.low %v1246_v33, %v1254_v12  ;;  %v18638_v25 = vcombine.low %v1247_v14, %v1255_v6  ;;  %v1358_v6 = vld [vmem:[%s21082_s18 + $0x2030] sm:$0xff] }
 0x74c   : > { %v14365_v39 = vpop.f32.mrb[8].mxu0  ;;  %v14693_v37 = vpop.f32.mrb[8].mxu1  ;;  %v18655_v10 = vcombine.high %v1263_v21, %v1271_v22 }
 0x74d   : > { %v14367_v40 = vpop.f32.mrb[9].mxu0  ;;  %v14695_v49 = vpop.f32.mrb[9].mxu1 }
 0x74e   : > { %v15406_v43 = vcombine.low %v14365_v39, %v14367_v40  ;;  %v14369_v44 = vpop.f32.mrb[10].mxu0  ;;  %14834 = vmatpush1.bf16.msra.mxu0 %v18572_v31  ;;  %v15407_v47 = vcombine.low %v14693_v37, %v14695_v49  ;;  %v14697_v48 = vpop.f32.mrb[10].mxu1  ;;  %15162 = vmatpush1.bf16.msra.mxu1 %v18574_v32  ;;  %v1279_v31 = vld [vmem:[%s21082_s18 + $0x1db8] sm:$0xff]  ;;  %v18654_v39 = vcombine.low %v1263_v21, %v1271_v22  ;;  %v1302_v37 = vld [vmem:[%s21082_s18 + $0x1e70] sm:$0xff] }
 0x74f   : > { %v14370_v51 = vpop.f32.mrb[11].mxu0  ;;  %14835 = vmatprep.subr.bf16.mxu0 %v18589_v0  ;;  %v14698_v57 = vpop.f32.mrb[11].mxu1  ;;  %15163 = vmatprep.subr.bf16.mxu1 %v18591_v34  ;;  %v1287_v32 = vld [vmem:[%s21082_s18 + $0x1df8] sm:$0xff]  ;;  %v18652_v0 = vcombine.low %v1262_v54, %v1270_v17  ;;  %v18669_v34 = vcombine.high %v1278_v27, %v1286_v29  ;;  %v18685_v49 = vcombine.high %v1294_v36, %v1302_v37  ;;  %v1374_v22 = vld [vmem:[%s21082_s18 + $0x20b0] sm:$0xff] }
 0x750   : > { %v15414_v56 = vrot.slane %v15406_v43, %v21975_v3  ;;  %v15421_v62 = vrot.slane %v15407_v47, %v21975_v3  ;;  %v18671_v35 = vcombine.high %v1279_v31, %v1287_v32  ;;  %v1295_v40 = vld [vmem:[%s21082_s18 + $0x1e38] sm:$0xff]  ;;  %v18670_v43 = vcombine.low %v1279_v31, %v1287_v32  ;;  %v1318_v47 = vld [vmem:[%s21082_s18 + $0x1ef0] sm:$0xff] }
 0x751   : > { %v18687_v44 = vcombine.high %v1295_v40, %v1303_v41  ;;  %v1311_v48 = vld [vmem:[%s21082_s18 + $0x1eb8] sm:$0xff]  ;;  %v1390_v32 = vld [vmem:[%s21082_s18 + $0x2130] sm:$0xff] }
 0x752   : > { %14836 = vmatpush1.bf16.msra.mxu0 %v18588_v46  ;;  %v15422_v5 = vcombine.low %v15414_v56, %v15421_v62  ;;  %15164 = vmatpush1.bf16.msra.mxu1 %v18590_v53  ;;  %v1310_v46 = vld [vmem:[%s21082_s18 + $0x1eb0] sm:$0xff]  ;;  %v1319_v51 = vld [vmem:[%s21082_s18 + $0x1ef8] sm:$0xff]  ;;  %v18684_v53 = vcombine.low %v1294_v36, %v1302_v37 }
 0x753   : > { %14837 = vmatprep.subr.bf16.mxu0 %v18605_v55  ;;  %15165 = vmatprep.subr.bf16.mxu1 %v18607_v58  ;;  %v18686_v55 = vcombine.low %v1295_v40, %v1303_v41  ;;  %v18701_v56 = vcombine.high %v1310_v46, %v1318_v47  ;;  %v18703_v57 = vcombine.high %v1311_v48, %v1319_v51  ;;  %v1326_v58 = vld [vmem:[%s21082_s18 + $0x1f30] sm:$0xff]  ;;  %v1335_v62 = vld [vmem:[%s21082_s18 + $0x1f78] sm:$0xff] }
 0x754   : > { %v15446_v13 = vadd.f32 %v15422_v5, %v326_v4  ;;  %v18700_v63 = vcombine.low %v1310_v46, %v1318_v47  ;;  %v18702_v9 = vcombine.low %v1311_v48, %v1319_v51  ;;  %v18717_v4 = vcombine.high %v1326_v58, %v1334_v61  ;;  %v1342_v5 = vld [vmem:[%s21082_s18 + $0x1fb0] sm:$0xff] }
 0x755   : > { %v18716_v33 = vcombine.low %v1326_v58, %v1334_v61  ;;  %v18718_v12 = vcombine.low %v1327_v24, %v1335_v62  ;;  %v1406_v41 = vld [vmem:[%s21082_s18 + $0x21b0] sm:$0xff] }
 0x756   : > { %14838 = vmatpush1.bf16.msra.mxu0 %v18604_v59  ;;  %15450 = vst [vmem:[#allocation2 + $0x10] sm:$0xff] %v15446_v13  ;;  %15166 = vmatpush1.bf16.msra.mxu1 %v18606_v30  ;;  %v18719_v59 = vcombine.high %v1327_v24, %v1335_v62  ;;  %v1350_v30 = vld [vmem:[%s21082_s18 + $0x1ff0] sm:$0xff]  ;;  %v1439_v62 = vld [vmem:[%s21082_s18 + $0x22b8] sm:$0xff] }
 0x757   : > { %14839 = vmatprep.subr.bf16.mxu0 %v18621_v7  ;;  %15167 = vmatprep.subr.bf16.mxu1 %v18623_v11  ;;  %v1343_v7 = vld [vmem:[%s21082_s18 + $0x1fb8] sm:$0xff]  ;;  %v18733_v13 = vcombine.high %v1342_v5, %v1350_v30  ;;  %v1422_v48 = vld [vmem:[%s21082_s18 + $0x2230] sm:$0xff] }
 0x758   : > { %v1351_v11 = vld [vmem:[%s21082_s18 + $0x1ff8] sm:$0xff]  ;;  %v1430_v51 = vld [vmem:[%s21082_s18 + $0x2270] sm:$0xff] }
 0x759   : > { %v18735_v14 = vcombine.high %v1343_v7, %v1351_v11  ;;  %v18734_v54 = vcombine.low %v1343_v7, %v1351_v11  ;;  %v1438_v61 = vld [vmem:[%s21082_s18 + $0x22b0] sm:$0xff]  ;;  %v1455_v11 = vld [vmem:[%s21082_s18 + $0x2338] sm:$0xff] }
 0x75a   : > { %14840 = vmatpush1.bf16.msra.mxu0 %v18620_v15  ;;  %15168 = vmatpush1.bf16.msra.mxu1 %v18622_v16  ;;  %v1366_v15 = vld [vmem:[%s21082_s18 + $0x2070] sm:$0xff]  ;;  %v1359_v16 = vld [vmem:[%s21082_s18 + $0x2038] sm:$0xff] }
 0x75b   : > { %14841 = vmatprep.subr.bf16.mxu0 %v18637_v2  ;;  %15169 = vmatprep.subr.bf16.mxu1 %v18639_v18  ;;  %v1367_v2 = vld [vmem:[%s21082_s18 + $0x2078] sm:$0xff]  ;;  %v18732_v18 = vcombine.low %v1342_v5, %v1350_v30  ;;  %v18749_v17 = vcombine.high %v1358_v6, %v1366_v15  ;;  %v1446_v24 = vld [vmem:[%s21082_s18 + $0x22f0] sm:$0xff] }
 0x75c   : > { %v18751_v21 = vcombine.high %v1359_v16, %v1367_v2  ;;  %v18750_v27 = vcombine.low %v1359_v16, %v1367_v2  ;;  %v1454_v30 = vld [vmem:[%s21082_s18 + $0x2330] sm:$0xff]  ;;  %v1471_v2 = vld [vmem:[%s21082_s18 + $0x23b8] sm:$0xff] }
 0x75d   : > { %v1462_v7 = vld [vmem:[%s21082_s18 + $0x2370] sm:$0xff] }
 0x75e   : > { %14842 = vmatpush1.bf16.msra.mxu0 %v18636_v23  ;;  %15170 = vmatpush1.bf16.msra.mxu1 %v18638_v25  ;;  %v1382_v23 = vld [vmem:[%s21082_s18 + $0x20f0] sm:$0xff]  ;;  %v1375_v25 = vld [vmem:[%s21082_s18 + $0x20b8] sm:$0xff] }
 0x75f   : > { %14843 = vmatprep.subr.bf16.mxu0 %v18653_v26  ;;  %15171 = vmatprep.subr.bf16.mxu1 %v18655_v10  ;;  %v1383_v26 = vld [vmem:[%s21082_s18 + $0x20f8] sm:$0xff]  ;;  %v18748_v10 = vcombine.low %v1358_v6, %v1366_v15  ;;  %v18765_v29 = vcombine.high %v1374_v22, %v1382_v23  ;;  %v1470_v15 = vld [vmem:[%s21082_s18 + $0x23b0] sm:$0xff] }
 0x760   : > { %v18767_v31 = vcombine.high %v1375_v25, %v1383_v26  ;;  %v18766_v36 = vcombine.low %v1375_v25, %v1383_v26  ;;  %v1478_v16 = vld [vmem:[%s21082_s18 + $0x23f0] sm:$0xff]  ;;  %v1487_v26 = vld [vmem:[%s21082_s18 + $0x2438] sm:$0xff] }
 0x761   : > { %v1494_v25 = vld [vmem:[%s21082_s18 + $0x2470] sm:$0xff] }
 0x762   : > { %14844 = vmatpush1.bf16.msra.mxu0 %v18652_v0  ;;  %15172 = vmatpush1.bf16.msra.mxu1 %v18654_v39  ;;  %v1398_v0 = vld [vmem:[%s21082_s18 + $0x2170] sm:$0xff]  ;;  %v1391_v39 = vld [vmem:[%s21082_s18 + $0x2138] sm:$0xff] }
 0x763   : > { %14845 = vmatprep.subr.bf16.mxu0 %v18669_v34  ;;  %15173 = vmatprep.subr.bf16.mxu1 %v18671_v35  ;;  %v1399_v34 = vld [vmem:[%s21082_s18 + $0x2178] sm:$0xff]  ;;  %v18764_v35 = vcombine.low %v1374_v22, %v1382_v23  ;;  %v18781_v37 = vcombine.high %v1390_v32, %v1398_v0  ;;  %v1486_v23 = vld [vmem:[%s21082_s18 + $0x2430] sm:$0xff] }
 0x764   : > { %v18783_v40 = vcombine.high %v1391_v39, %v1399_v34 }
 0x766   : > { %14846 = vmatpush1.bf16.msra.mxu0 %v18668_v42  ;;  %15174 = vmatpush1.bf16.msra.mxu1 %v18670_v43  ;;  %v1414_v42 = vld [vmem:[%s21082_s18 + $0x21f0] sm:$0xff]  ;;  %v1407_v43 = vld [vmem:[%s21082_s18 + $0x21b8] sm:$0xff] }
 0x767   : > { %14847 = vmatprep.subr.bf16.mxu0 %v18685_v49  ;;  %15175 = vmatprep.subr.bf16.mxu1 %v18687_v44  ;;  %v1415_v49 = vld [vmem:[%s21082_s18 + $0x21f8] sm:$0xff]  ;;  %v18782_v44 = vcombine.low %v1391_v39, %v1399_v34  ;;  %v18797_v46 = vcombine.high %v1406_v41, %v1414_v42  ;;  %v1510_v39 = vld [vmem:[%s21082_s18 + $0x24f0] sm:$0xff] }
 0x768   : > { %v18799_v47 = vcombine.high %v1407_v43, %v1415_v49  ;;  %v1503_v34 = vld [vmem:[%s21082_s18 + $0x24b8] sm:$0xff] }
 0x76a   : > { %14848 = vmatpush1.bf16.msra.mxu0 %v18684_v53  ;;  %15176 = vmatpush1.bf16.msra.mxu1 %v18686_v55  ;;  %v1423_v53 = vld [vmem:[%s21082_s18 + $0x2238] sm:$0xff] }
 0x76b   : > { %14849 = vmatprep.subr.bf16.mxu0 %v18701_v56  ;;  %15177 = vmatprep.subr.bf16.mxu1 %v18703_v57  ;;  %v1431_v55 = vld [vmem:[%s21082_s18 + $0x2278] sm:$0xff]  ;;  %v18796_v56 = vcombine.low %v1406_v41, %v1414_v42  ;;  %v18813_v57 = vcombine.high %v1422_v48, %v1430_v51  ;;  %v1518_v42 = vld [vmem:[%s21082_s18 + $0x2530] sm:$0xff] }
 0x76c   : > { %v18815_v58 = vcombine.high %v1423_v53, %v1431_v55 }
 0x76e   : > { %14850 = vmatpush1.bf16.msra.mxu0 %v18700_v63  ;;  %15178 = vmatpush1.bf16.msra.mxu1 %v18702_v9  ;;  %v1447_v63 = vld [vmem:[%s21082_s18 + $0x22f8] sm:$0xff]  ;;  %v18812_v9 = vcombine.low %v1422_v48, %v1430_v51  ;;  %v1534_v51 = vld [vmem:[%s21082_s18 + $0x25b0] sm:$0xff] }
 0x76f   : > { %14851 = vmatprep.subr.bf16.mxu0 %v18717_v4  ;;  %15179 = vmatprep.subr.bf16.mxu1 %v18719_v59  ;;  %v18814_v4 = vcombine.low %v1423_v53, %v1431_v55  ;;  %v18829_v59 = vcombine.high %v1438_v61, %v1446_v24  ;;  %v18831_v5 = vcombine.high %v1439_v62, %v1447_v63  ;;  %v1542_v53 = vld [vmem:[%s21082_s18 + $0x25f0] sm:$0xff]  ;;  %v1535_v55 = vld [vmem:[%s21082_s18 + $0x25b8] sm:$0xff] }
 0x772   : > { %14852 = vmatpush1.bf16.msra.mxu0 %v18716_v33  ;;  %15180 = vmatpush1.bf16.msra.mxu1 %v18718_v12  ;;  %v1463_v33 = vld [vmem:[%s21082_s18 + $0x2378] sm:$0xff]  ;;  %v18828_v12 = vcombine.low %v1438_v61, %v1446_v24  ;;  %v1550_v24 = vld [vmem:[%s21082_s18 + $0x2630] sm:$0xff] }
 0x773   : > { %14853 = vmatprep.subr.bf16.mxu0 %v18733_v13  ;;  %15181 = vmatprep.subr.bf16.mxu1 %v18735_v14  ;;  %v18830_v13 = vcombine.low %v1439_v62, %v1447_v63  ;;  %v18845_v14 = vcombine.high %v1454_v30, %v1462_v7  ;;  %v18847_v6 = vcombine.high %v1455_v11, %v1463_v33  ;;  %v1558_v62 = vld [vmem:[%s21082_s18 + $0x2670] sm:$0xff]  ;;  %v1551_v63 = vld [vmem:[%s21082_s18 + $0x2638] sm:$0xff] }
 0x776   : > { %14854 = vmatpush1.bf16.msra.mxu0 %v18732_v18  ;;  %15182 = vmatpush1.bf16.msra.mxu1 %v18734_v54  ;;  %v1479_v18 = vld [vmem:[%s21082_s18 + $0x23f8] sm:$0xff]  ;;  %v18844_v54 = vcombine.low %v1454_v30, %v1462_v7  ;;  %v1566_v7 = vld [vmem:[%s21082_s18 + $0x26b0] sm:$0xff] }
 0x777   : > { %14864 = vmatprep.subr.bf16.mxu0 %v18749_v17  ;;  %15192 = vmatprep.subr.bf16.mxu1 %v18751_v21  ;;  %v18846_v17 = vcombine.low %v1455_v11, %v1463_v33  ;;  %v18861_v21 = vcombine.high %v1470_v15, %v1478_v16  ;;  %v18863_v22 = vcombine.high %v1471_v2, %v1479_v18  ;;  %v1574_v11 = vld [vmem:[%s21082_s18 + $0x26f0] sm:$0xff]  ;;  %v1567_v33 = vld [vmem:[%s21082_s18 + $0x26b8] sm:$0xff] }
 0x779   : > { %14856 = vmatmul.mubr.bf16.vlgmr.msra.gmra.mrb[12].mxu0 %v21433_v20  ;;  %15184 = vmatmul.mubr.bf16.vlgmr.msra.gmra.mrb[12].mxu1 %v21433_v20  ;;  %v18780_v20 = vcombine.low %v1390_v32, %v1398_v0  ;;  %v1502_v0 = vld [vmem:[%s21082_s18 + $0x24b0] sm:$0xff] }
 0x77a   : > { %14865 = vmatpush1.bf16.msra.mxu0 %v18748_v10  ;;  %15193 = vmatpush1.bf16.msra.mxu1 %v18750_v27  ;;  %v1495_v10 = vld [vmem:[%s21082_s18 + $0x2478] sm:$0xff]  ;;  %v18860_v27 = vcombine.low %v1470_v15, %v1478_v16  ;;  %v1582_v16 = vld [vmem:[%s21082_s18 + $0x2730] sm:$0xff] }
 0x77b   : > { %14866 = vmatprep.subr.bf16.mxu0 %v18765_v29  ;;  %15194 = vmatprep.subr.bf16.mxu1 %v18767_v31  ;;  %v18862_v29 = vcombine.low %v1471_v2, %v1479_v18  ;;  %v18877_v31 = vcombine.high %v1486_v23, %v1494_v25  ;;  %v18879_v32 = vcombine.high %v1487_v26, %v1495_v10  ;;  %v1590_v2 = vld [vmem:[%s21082_s18 + $0x2770] sm:$0xff]  ;;  %v1583_v18 = vld [vmem:[%s21082_s18 + $0x2738] sm:$0xff] }
 0x77c   : > { %14896 = vmatprep.mubr.bf16.mxu0 %v21440_v60  ;;  %15224 = vmatprep.mubr.bf16.mxu1 %v21440_v60  ;;  %v18798_v60 = vcombine.low %v1407_v43, %v1415_v49  ;;  %v1526_v43 = vld [vmem:[%s21082_s18 + $0x2570] sm:$0xff]  ;;  %v1519_v49 = vld [vmem:[%s21082_s18 + $0x2538] sm:$0xff] }
 0x77e   : > { %14867 = vmatpush1.bf16.msra.mxu0 %v18764_v35  ;;  %15195 = vmatpush1.bf16.msra.mxu1 %v18766_v36  ;;  %v1511_v35 = vld [vmem:[%s21082_s18 + $0x24f8] sm:$0xff]  ;;  %v18876_v36 = vcombine.low %v1486_v23, %v1494_v25  ;;  %v1598_v25 = vld [vmem:[%s21082_s18 + $0x27b0] sm:$0xff] }
 0x77f   : > { %14868 = vmatprep.subr.bf16.mxu0 %v18781_v37  ;;  %15196 = vmatprep.subr.bf16.mxu1 %v18783_v40  ;;  %v18878_v37 = vcombine.low %v1487_v26, %v1495_v10  ;;  %v18893_v40 = vcombine.high %v1502_v0, %v1510_v39  ;;  %v18895_v41 = vcombine.high %v1503_v34, %v1511_v35  ;;  %v1606_v26 = vld [vmem:[%s21082_s18 + $0x27f0] sm:$0xff]  ;;  %v1599_v10 = vld [vmem:[%s21082_s18 + $0x27b8] sm:$0xff] }
 0x782   : > { %14869 = vmatpush1.bf16.msra.mxu0 %v18780_v20  ;;  %15197 = vmatpush1.bf16.msra.mxu1 %v18782_v44  ;;  %v1527_v20 = vld [vmem:[%s21082_s18 + $0x2578] sm:$0xff]  ;;  %v18892_v44 = vcombine.low %v1502_v0, %v1510_v39  ;;  %v1614_v39 = vld [vmem:[%s21082_s18 + $0x2830] sm:$0xff] }
 0x783   : > { %14870 = vmatprep.subr.bf16.mxu0 %v18797_v46  ;;  %15198 = vmatprep.subr.bf16.mxu1 %v18799_v47  ;;  %v18894_v46 = vcombine.low %v1503_v34, %v1511_v35  ;;  %v18909_v47 = vcombine.high %v1518_v42, %v1526_v43  ;;  %v18911_v48 = vcombine.high %v1519_v49, %v1527_v20  ;;  %v1622_v34 = vld [vmem:[%s21082_s18 + $0x2870] sm:$0xff]  ;;  %v1615_v35 = vld [vmem:[%s21082_s18 + $0x2838] sm:$0xff] }
 0x786   : > { %14871 = vmatpush1.bf16.msra.mxu0 %v18796_v56  ;;  %15199 = vmatpush1.bf16.msra.mxu1 %v18798_v60  ;;  %v1543_v56 = vld [vmem:[%s21082_s18 + $0x25f8] sm:$0xff]  ;;  %v18908_v60 = vcombine.low %v1518_v42, %v1526_v43  ;;  %v1630_v43 = vld [vmem:[%s21082_s18 + $0x28b0] sm:$0xff] }
 0x787   : > { %14872 = vmatprep.subr.bf16.mxu0 %v18813_v57  ;;  %15200 = vmatprep.subr.bf16.mxu1 %v18815_v58  ;;  %v18910_v57 = vcombine.low %v1519_v49, %v1527_v20  ;;  %v18925_v58 = vcombine.high %v1534_v51, %v1542_v53  ;;  %v18927_v61 = vcombine.high %v1535_v55, %v1543_v56  ;;  %v1638_v49 = vld [vmem:[%s21082_s18 + $0x28f0] sm:$0xff]  ;;  %v1631_v20 = vld [vmem:[%s21082_s18 + $0x28b8] sm:$0xff] }
 0x78a   : > { %14873 = vmatpush1.bf16.msra.mxu0 %v18812_v9  ;;  %15201 = vmatpush1.bf16.msra.mxu1 %v18814_v4  ;;  %v1559_v9 = vld [vmem:[%s21082_s18 + $0x2678] sm:$0xff]  ;;  %v18924_v4 = vcombine.low %v1534_v51, %v1542_v53  ;;  %v1646_v53 = vld [vmem:[%s21082_s18 + $0x2930] sm:$0xff] }
 0x78b   : > { %14874 = vmatprep.subr.bf16.mxu0 %v18829_v59  ;;  %15202 = vmatprep.subr.bf16.mxu1 %v18831_v5  ;;  %v18926_v59 = vcombine.low %v1535_v55, %v1543_v56  ;;  %v18941_v5 = vcombine.high %v1550_v24, %v1558_v62  ;;  %v18943_v30 = vcombine.high %v1551_v63, %v1559_v9  ;;  %v1654_v55 = vld [vmem:[%s21082_s18 + $0x2970] sm:$0xff]  ;;  %v1647_v56 = vld [vmem:[%s21082_s18 + $0x2938] sm:$0xff] }
 0x78e   : > { %14875 = vmatpush1.bf16.msra.mxu0 %v18828_v12  ;;  %15203 = vmatpush1.bf16.msra.mxu1 %v18830_v13  ;;  %v1575_v12 = vld [vmem:[%s21082_s18 + $0x26f8] sm:$0xff]  ;;  %v18940_v13 = vcombine.low %v1550_v24, %v1558_v62  ;;  %v1662_v62 = vld [vmem:[%s21082_s18 + $0x29b0] sm:$0xff] }
 0x78f   : > { %14876 = vmatprep.subr.bf16.mxu0 %v18845_v14  ;;  %15204 = vmatprep.subr.bf16.mxu1 %v18847_v6  ;;  %v18942_v14 = vcombine.low %v1551_v63, %v1559_v9  ;;  %v18957_v6 = vcombine.high %v1566_v7, %v1574_v11  ;;  %v18959_v15 = vcombine.high %v1567_v33, %v1575_v12  ;;  %v1670_v63 = vld [vmem:[%s21082_s18 + $0x29f0] sm:$0xff]  ;;  %v1663_v9 = vld [vmem:[%s21082_s18 + $0x29b8] sm:$0xff] }
 0x792   : > { %14877 = vmatpush1.bf16.msra.mxu0 %v18844_v54  ;;  %15205 = vmatpush1.bf16.msra.mxu1 %v18846_v17  ;;  %v1591_v54 = vld [vmem:[%s21082_s18 + $0x2778] sm:$0xff]  ;;  %v18956_v17 = vcombine.low %v1566_v7, %v1574_v11  ;;  %v1678_v7 = vld [vmem:[%s21082_s18 + $0x2a30] sm:$0xff] }
 0x793   : > { %14878 = vmatprep.subr.bf16.mxu0 %v18861_v21  ;;  %15206 = vmatprep.subr.bf16.mxu1 %v18863_v22  ;;  %v18958_v21 = vcombine.low %v1567_v33, %v1575_v12  ;;  %v18973_v22 = vcombine.high %v1582_v16, %v1590_v2  ;;  %v18975_v23 = vcombine.high %v1583_v18, %v1591_v54  ;;  %v1686_v11 = vld [vmem:[%s21082_s18 + $0x2a70] sm:$0xff]  ;;  %v1679_v33 = vld [vmem:[%s21082_s18 + $0x2a38] sm:$0xff] }
 0x794   : > { %v1687_v12 = vld [vmem:[%s21082_s18 + $0x2a78] sm:$0xff] }
 0x796   : > { %14879 = vmatpush1.bf16.msra.mxu0 %v18860_v27  ;;  %15207 = vmatpush1.bf16.msra.mxu1 %v18862_v29  ;;  %v1607_v27 = vld [vmem:[%s21082_s18 + $0x27f8] sm:$0xff]  ;;  %v18972_v29 = vcombine.low %v1582_v16, %v1590_v2  ;;  %v1702_v16 = vld [vmem:[%s21082_s18 + $0x2af0] sm:$0xff] }
 0x797   : > { %14880 = vmatprep.subr.bf16.mxu0 %v18877_v31  ;;  %15208 = vmatprep.subr.bf16.mxu1 %v18879_v32  ;;  %v18974_v31 = vcombine.low %v1583_v18, %v1591_v54  ;;  %v18989_v32 = vcombine.high %v1598_v25, %v1606_v26  ;;  %v18991_v0 = vcombine.high %v1599_v10, %v1607_v27  ;;  %v1695_v2 = vld [vmem:[%s21082_s18 + $0x2ab8] sm:$0xff] }
 0x798   : > { %v1703_v18 = vld [vmem:[%s21082_s18 + $0x2af8] sm:$0xff]  ;;  %v19068_v54 = vcombine.low %v1678_v7, %v1686_v11 }
 0x79a   : > { %14881 = vmatpush1.bf16.msra.mxu0 %v18876_v36  ;;  %15209 = vmatpush1.bf16.msra.mxu1 %v18878_v37  ;;  %v1623_v36 = vld [vmem:[%s21082_s18 + $0x2878] sm:$0xff]  ;;  %v18988_v37 = vcombine.low %v1598_v25, %v1606_v26  ;;  %v1718_v25 = vld [vmem:[%s21082_s18 + $0x2b70] sm:$0xff] }
 0x79b   : > { %14882 = vmatprep.subr.bf16.mxu0 %v18893_v40  ;;  %15210 = vmatprep.subr.bf16.mxu1 %v18895_v41  ;;  %v18990_v40 = vcombine.low %v1599_v10, %v1607_v27  ;;  %v19005_v41 = vcombine.high %v1614_v39, %v1622_v34  ;;  %v19007_v42 = vcombine.high %v1615_v35, %v1623_v36  ;;  %v1711_v26 = vld [vmem:[%s21082_s18 + $0x2b38] sm:$0xff] }
 0x79c   : > { %v1719_v10 = vld [vmem:[%s21082_s18 + $0x2b78] sm:$0xff] }
 0x79e   : > { %14883 = vmatpush1.bf16.msra.mxu0 %v18892_v44  ;;  %15211 = vmatpush1.bf16.msra.mxu1 %v18894_v46  ;;  %v1639_v44 = vld [vmem:[%s21082_s18 + $0x28f8] sm:$0xff]  ;;  %v19004_v46 = vcombine.low %v1614_v39, %v1622_v34  ;;  %v1734_v39 = vld [vmem:[%s21082_s18 + $0x2bf0] sm:$0xff] }
 0x79f   : > { %14884 = vmatprep.subr.bf16.mxu0 %v18909_v47  ;;  %15212 = vmatprep.subr.bf16.mxu1 %v18911_v48  ;;  %v19006_v47 = vcombine.low %v1615_v35, %v1623_v36  ;;  %v19021_v48 = vcombine.high %v1630_v43, %v1638_v49  ;;  %v19023_v51 = vcombine.high %v1631_v20, %v1639_v44  ;;  %v1727_v34 = vld [vmem:[%s21082_s18 + $0x2bb8] sm:$0xff] }
 0x7a0   : > { %v1735_v35 = vld [vmem:[%s21082_s18 + $0x2bf8] sm:$0xff] }
 0x7a2   : > { %14885 = vmatpush1.bf16.msra.mxu0 %v18908_v60  ;;  %15213 = vmatpush1.bf16.msra.mxu1 %v18910_v57  ;;  %v1655_v60 = vld [vmem:[%s21082_s18 + $0x2978] sm:$0xff]  ;;  %v19020_v57 = vcombine.low %v1630_v43, %v1638_v49  ;;  %v1750_v43 = vld [vmem:[%s21082_s18 + $0x2c70] sm:$0xff] }
 0x7a3   : > { %14886 = vmatprep.subr.bf16.mxu0 %v18925_v58  ;;  %15214 = vmatprep.subr.bf16.mxu1 %v18927_v61  ;;  %v19022_v58 = vcombine.low %v1631_v20, %v1639_v44  ;;  %v19037_v61 = vcombine.high %v1646_v53, %v1654_v55  ;;  %v19039_v24 = vcombine.high %v1647_v56, %v1655_v60  ;;  %v1743_v49 = vld [vmem:[%s21082_s18 + $0x2c38] sm:$0xff] }
 0x7a4   : > { %v1751_v20 = vld [vmem:[%s21082_s18 + $0x2c78] sm:$0xff] }
 0x7a6   : > { %14887 = vmatpush1.bf16.msra.mxu0 %v18924_v4  ;;  %15215 = vmatpush1.bf16.msra.mxu1 %v18926_v59  ;;  %v1671_v4 = vld [vmem:[%s21082_s18 + $0x29f8] sm:$0xff]  ;;  %v19038_v59 = vcombine.low %v1647_v56, %v1655_v60 }
 0x7a7   : > { %14888 = vmatprep.subr.bf16.mxu0 %v18941_v5  ;;  %15216 = vmatprep.subr.bf16.mxu1 %v18943_v30  ;;  %v19053_v5 = vcombine.high %v1662_v62, %v1670_v63  ;;  %v19055_v30 = vcombine.high %v1663_v9, %v1671_v4  ;;  %v1767_v56 = vld [vmem:[%s21082_s18 + $0x2cf8] sm:$0xff] }
 0x7aa   : > { %14889 = vmatpush1.bf16.msra.mxu0 %v18940_v13  ;;  %15217 = vmatpush1.bf16.msra.mxu1 %v18942_v14  ;;  %v19052_v13 = vcombine.low %v1662_v62, %v1670_v63  ;;  %v19069_v14 = vcombine.high %v1678_v7, %v1686_v11  ;;  %v1782_v62 = vld [vmem:[%s21082_s18 + $0x2d70] sm:$0xff]  ;;  %v1775_v63 = vld [vmem:[%s21082_s18 + $0x2d38] sm:$0xff] }
 0x7ab   : > { %14890 = vmatprep.subr.bf16.mxu0 %v18957_v6  ;;  %15218 = vmatprep.subr.bf16.mxu1 %v18959_v15  ;;  %v19071_v6 = vcombine.high %v1679_v33, %v1687_v12  ;;  %v1694_v15 = vld [vmem:[%s21082_s18 + $0x2ab0] sm:$0xff]  ;;  %v1791_v11 = vld [vmem:[%s21082_s18 + $0x2db8] sm:$0xff] }
 0x7ac   : > { %v19084_v27 = vcombine.low %v1694_v15, %v1702_v16  ;;  %v1798_v7 = vld [vmem:[%s21082_s18 + $0x2df0] sm:$0xff] }
 0x7ae   : > { %14891 = vmatpush1.bf16.msra.mxu0 %v18956_v17  ;;  %15219 = vmatpush1.bf16.msra.mxu1 %v18958_v21  ;;  %v19070_v17 = vcombine.low %v1679_v33, %v1687_v12  ;;  %v19085_v21 = vcombine.high %v1694_v15, %v1702_v16  ;;  %v1799_v33 = vld [vmem:[%s21082_s18 + $0x2df8] sm:$0xff]  ;;  %v1814_v15 = vld [vmem:[%s21082_s18 + $0x2e70] sm:$0xff] }
 0x7af   : > { %14892 = vmatprep.subr.bf16.mxu0 %v18973_v22  ;;  %15220 = vmatprep.subr.bf16.mxu1 %v18975_v23  ;;  %v19087_v22 = vcombine.high %v1695_v2, %v1703_v18  ;;  %v1710_v23 = vld [vmem:[%s21082_s18 + $0x2b30] sm:$0xff]  ;;  %v1807_v16 = vld [vmem:[%s21082_s18 + $0x2e38] sm:$0xff] }
 0x7b0   : > { %v19100_v36 = vcombine.low %v1710_v23, %v1718_v25 }
 0x7b2   : > { %14893 = vmatpush1.bf16.msra.mxu0 %v18972_v29  ;;  %15221 = vmatpush1.bf16.msra.mxu1 %v18974_v31  ;;  %v19086_v29 = vcombine.low %v1695_v2, %v1703_v18  ;;  %v19101_v31 = vcombine.high %v1710_v23, %v1718_v25  ;;  %v1815_v2 = vld [vmem:[%s21082_s18 + $0x2e78] sm:$0xff]  ;;  %v1830_v23 = vld [vmem:[%s21082_s18 + $0x2ef0] sm:$0xff] }
 0x7b3   : > { %14894 = vmatprep.subr.bf16.mxu0 %v18989_v32  ;;  %15222 = vmatprep.subr.bf16.mxu1 %v18991_v0  ;;  %v19103_v32 = vcombine.high %v1711_v26, %v1719_v10  ;;  %v1726_v0 = vld [vmem:[%s21082_s18 + $0x2bb0] sm:$0xff]  ;;  %v1823_v25 = vld [vmem:[%s21082_s18 + $0x2eb8] sm:$0xff] }
 0x7b4   : > { %v19116_v44 = vcombine.low %v1726_v0, %v1734_v39 }
 0x7b6   : > { %14895 = vmatpush1.bf16.msra.mxu0 %v18988_v37  ;;  %15223 = vmatpush1.bf16.msra.mxu1 %v18990_v40  ;;  %v19102_v37 = vcombine.low %v1711_v26, %v1719_v10  ;;  %v19117_v40 = vcombine.high %v1726_v0, %v1734_v39  ;;  %v1831_v26 = vld [vmem:[%s21082_s18 + $0x2ef8] sm:$0xff]  ;;  %v1846_v0 = vld [vmem:[%s21082_s18 + $0x2f70] sm:$0xff] }
 0x7b7   : > { %14905 = vmatprep.subr.bf16.mxu0 %v19005_v41  ;;  %15233 = vmatprep.subr.bf16.mxu1 %v19007_v42  ;;  %v19119_v41 = vcombine.high %v1727_v34, %v1735_v35  ;;  %v1742_v42 = vld [vmem:[%s21082_s18 + $0x2c30] sm:$0xff]  ;;  %v1839_v39 = vld [vmem:[%s21082_s18 + $0x2f38] sm:$0xff] }
 0x7b8   : > { %v19132_v60 = vcombine.low %v1742_v42, %v1750_v43 }
 0x7b9   : > { %14897 = vmatmul.mubr.bf16.vlgmr.msra.gmra.mrb[12].mxu0 %v21508_v52  ;;  %15225 = vmatmul.mubr.bf16.vlgmr.msra.gmra.mrb[12].mxu1 %v21508_v52  ;;  %v19036_v52 = vcombine.low %v1646_v53, %v1654_v55  ;;  %v1766_v53 = vld [vmem:[%s21082_s18 + $0x2cf0] sm:$0xff]  ;;  %v1759_v55 = vld [vmem:[%s21082_s18 + $0x2cb8] sm:$0xff] }
 0x7ba   : > { %14906 = vmatpush1.bf16.msra.mxu0 %v19004_v46  ;;  %15234 = vmatpush1.bf16.msra.mxu1 %v19006_v47  ;;  %v19118_v46 = vcombine.low %v1727_v34, %v1735_v35  ;;  %v19133_v47 = vcombine.high %v1742_v42, %v1750_v43  ;;  %v1847_v34 = vld [vmem:[%s21082_s18 + $0x2f78] sm:$0xff]  ;;  %v1862_v42 = vld [vmem:[%s21082_s18 + $0x2ff0] sm:$0xff] }
 0x7bb   : > { %14907 = vmatprep.subr.bf16.mxu0 %v19021_v48  ;;  %15235 = vmatprep.subr.bf16.mxu1 %v19023_v51  ;;  %v19135_v48 = vcombine.high %v1743_v49, %v1751_v20  ;;  %v1758_v51 = vld [vmem:[%s21082_s18 + $0x2cb0] sm:$0xff]  ;;  %v1855_v43 = vld [vmem:[%s21082_s18 + $0x2fb8] sm:$0xff] }
 0x7bc   : > { %14937 = vmatprep.mubr.bf16.mxu0 %v21516_v1  ;;  %15265 = vmatprep.mubr.bf16.mxu1 %v21516_v1  ;;  %v19054_v1 = vcombine.low %v1663_v9, %v1671_v4  ;;  %v1783_v9 = vld [vmem:[%s21082_s18 + $0x2d78] sm:$0xff]  ;;  %v19148_v4 = vcombine.low %v1758_v51, %v1766_v53 }
 0x7be   : > { %14908 = vmatpush1.bf16.msra.mxu0 %v19020_v57  ;;  %15236 = vmatpush1.bf16.msra.mxu1 %v19022_v58  ;;  %v19134_v57 = vcombine.low %v1743_v49, %v1751_v20  ;;  %v19149_v58 = vcombine.high %v1758_v51, %v1766_v53  ;;  %v1863_v49 = vld [vmem:[%s21082_s18 + $0x2ff8] sm:$0xff]  ;;  %v1878_v51 = vld [vmem:[%s21082_s18 + $0x3070] sm:$0xff] }
 0x7bf   : > { %14909 = vmatprep.subr.bf16.mxu0 %v19037_v61  ;;  %15237 = vmatprep.subr.bf16.mxu1 %v19039_v24  ;;  %v19151_v61 = vcombine.high %v1759_v55, %v1767_v56  ;;  %v1774_v24 = vld [vmem:[%s21082_s18 + $0x2d30] sm:$0xff]  ;;  %v1871_v53 = vld [vmem:[%s21082_s18 + $0x3038] sm:$0xff] }
 0x7c0   : > { %v19164_v12 = vcombine.low %v1774_v24, %v1782_v62 }
 0x7c2   : > { %14910 = vmatpush1.bf16.msra.mxu0 %v19036_v52  ;;  %15238 = vmatpush1.bf16.msra.mxu1 %v19038_v59  ;;  %v19150_v52 = vcombine.low %v1759_v55, %v1767_v56  ;;  %v19165_v59 = vcombine.high %v1774_v24, %v1782_v62  ;;  %v1879_v55 = vld [vmem:[%s21082_s18 + $0x3078] sm:$0xff]  ;;  %v1894_v24 = vld [vmem:[%s21082_s18 + $0x30f0] sm:$0xff] }
 0x7c3   : > { %14911 = vmatprep.subr.bf16.mxu0 %v19053_v5  ;;  %15239 = vmatprep.subr.bf16.mxu1 %v19055_v30  ;;  %v19167_v5 = vcombine.high %v1775_v63, %v1783_v9  ;;  %v1790_v30 = vld [vmem:[%s21082_s18 + $0x2db0] sm:$0xff]  ;;  %v1887_v62 = vld [vmem:[%s21082_s18 + $0x30b8] sm:$0xff] }
 0x7c4   : > { %v19180_v18 = vcombine.low %v1790_v30, %v1798_v7 }
 0x7c6   : > { %14912 = vmatpush1.bf16.msra.mxu0 %v19052_v13  ;;  %15240 = vmatpush1.bf16.msra.mxu1 %v19054_v1  ;;  %v19166_v13 = vcombine.low %v1775_v63, %v1783_v9  ;;  %v19181_v1 = vcombine.high %v1790_v30, %v1798_v7  ;;  %v1895_v63 = vld [vmem:[%s21082_s18 + $0x30f8] sm:$0xff]  ;;  %v1910_v30 = vld [vmem:[%s21082_s18 + $0x3170] sm:$0xff] }
 0x7c7   : > { %14913 = vmatprep.subr.bf16.mxu0 %v19069_v14  ;;  %15241 = vmatprep.subr.bf16.mxu1 %v19071_v6  ;;  %v19183_v14 = vcombine.high %v1791_v11, %v1799_v33  ;;  %v1806_v6 = vld [vmem:[%s21082_s18 + $0x2e30] sm:$0xff]  ;;  %v1903_v7 = vld [vmem:[%s21082_s18 + $0x3138] sm:$0xff] }
 0x7c8   : > { %v19196_v10 = vcombine.low %v1806_v6, %v1814_v15 }
 0x7ca   : > { %14914 = vmatpush1.bf16.msra.mxu0 %v19068_v54  ;;  %15242 = vmatpush1.bf16.msra.mxu1 %v19070_v17  ;;  %v19182_v54 = vcombine.low %v1791_v11, %v1799_v33  ;;  %v19197_v17 = vcombine.high %v1806_v6, %v1814_v15  ;;  %v1911_v11 = vld [vmem:[%s21082_s18 + $0x3178] sm:$0xff]  ;;  %v1926_v6 = vld [vmem:[%s21082_s18 + $0x31f0] sm:$0xff] }
 0x7cb   : > { %14915 = vmatprep.subr.bf16.mxu0 %v19085_v21  ;;  %15243 = vmatprep.subr.bf16.mxu1 %v19087_v22  ;;  %v19199_v21 = vcombine.high %v1807_v16, %v1815_v2  ;;  %v1822_v22 = vld [vmem:[%s21082_s18 + $0x2eb0] sm:$0xff]  ;;  %v1919_v15 = vld [vmem:[%s21082_s18 + $0x31b8] sm:$0xff] }
 0x7cc   : > { %v19212_v35 = vcombine.low %v1822_v22, %v1830_v23 }
 0x7ce   : > { %14916 = vmatpush1.bf16.msra.mxu0 %v19084_v27  ;;  %15244 = vmatpush1.bf16.msra.mxu1 %v19086_v29  ;;  %v19198_v27 = vcombine.low %v1807_v16, %v1815_v2  ;;  %v19213_v29 = vcombine.high %v1822_v22, %v1830_v23  ;;  %v1927_v16 = vld [vmem:[%s21082_s18 + $0x31f8] sm:$0xff]  ;;  %v19294_v2 = vcombine.low %v1903_v7, %v1911_v11 }
 0x7cf   : > { %14917 = vmatprep.subr.bf16.mxu0 %v19101_v31  ;;  %15245 = vmatprep.subr.bf16.mxu1 %v19103_v32  ;;  %v19215_v31 = vcombine.high %v1823_v25, %v1831_v26  ;;  %v1838_v32 = vld [vmem:[%s21082_s18 + $0x2f30] sm:$0xff]  ;;  %v1935_v22 = vld [vmem:[%s21082_s18 + $0x3238] sm:$0xff] }
 0x7d0   : > { %v19228_v20 = vcombine.low %v1838_v32, %v1846_v0  ;;  %v1943_v23 = vld [vmem:[%s21082_s18 + $0x3278] sm:$0xff] }
 0x7d2   : > { %14918 = vmatpush1.bf16.msra.mxu0 %v19100_v36  ;;  %15246 = vmatpush1.bf16.msra.mxu1 %v19102_v37  ;;  %v19214_v36 = vcombine.low %v1823_v25, %v1831_v26  ;;  %v19229_v37 = vcombine.high %v1838_v32, %v1846_v0  ;;  %v1959_v32 = vld [vmem:[%s21082_s18 + $0x32f8] sm:$0xff] }
 0x7d3   : > { %14919 = vmatprep.subr.bf16.mxu0 %v19117_v40  ;;  %15247 = vmatprep.subr.bf16.mxu1 %v19119_v41  ;;  %v19231_v40 = vcombine.high %v1839_v39, %v1847_v34  ;;  %v1854_v41 = vld [vmem:[%s21082_s18 + $0x2fb0] sm:$0xff] }
 0x7d4   : > { %v19244_v56 = vcombine.low %v1854_v41, %v1862_v42 }
 0x7d6   : > { %14920 = vmatpush1.bf16.msra.mxu0 %v19116_v44  ;;  %15248 = vmatpush1.bf16.msra.mxu1 %v19118_v46  ;;  %v19230_v44 = vcombine.low %v1839_v39, %v1847_v34  ;;  %v19245_v46 = vcombine.high %v1854_v41, %v1862_v42  ;;  %v19326_v39 = vcombine.low %v1935_v22, %v1943_v23  ;;  %v1975_v41 = vld [vmem:[%s21082_s18 + $0x3378] sm:$0xff] }
 0x7d7   : > { %14921 = vmatprep.subr.bf16.mxu0 %v19133_v47  ;;  %15249 = vmatprep.subr.bf16.mxu1 %v19135_v48  ;;  %v19247_v47 = vcombine.high %v1855_v43, %v1863_v49  ;;  %v1870_v48 = vld [vmem:[%s21082_s18 + $0x3030] sm:$0xff] }
 0x7d8   : > { %v19260_v9 = vcombine.low %v1870_v48, %v1878_v51 }
 0x7da   : > { %14922 = vmatpush1.bf16.msra.mxu0 %v19132_v60  ;;  %15250 = vmatpush1.bf16.msra.mxu1 %v19134_v57  ;;  %v19246_v60 = vcombine.low %v1855_v43, %v1863_v49  ;;  %v19261_v57 = vcombine.high %v1870_v48, %v1878_v51  ;;  %v1991_v48 = vld [vmem:[%s21082_s18 + $0x33f8] sm:$0xff] }
 0x7db   : > { %14923 = vmatprep.subr.bf16.mxu0 %v19149_v58  ;;  %15251 = vmatprep.subr.bf16.mxu1 %v19151_v61  ;;  %v19263_v58 = vcombine.high %v1871_v53, %v1879_v55  ;;  %v1886_v61 = vld [vmem:[%s21082_s18 + $0x30b0] sm:$0xff] }
 0x7dc   : > { %v19276_v33 = vcombine.low %v1886_v61, %v1894_v24 }
 0x7de   : > { %14924 = vmatpush1.bf16.msra.mxu0 %v19148_v4  ;;  %15252 = vmatpush1.bf16.msra.mxu1 %v19150_v52  ;;  %v19262_v4 = vcombine.low %v1871_v53, %v1879_v55  ;;  %v19277_v52 = vcombine.high %v1886_v61, %v1894_v24  ;;  %v2007_v61 = vld [vmem:[%s21082_s18 + $0x3478] sm:$0xff] }
 0x7df   : > { %14925 = vmatprep.subr.bf16.mxu0 %v19165_v59  ;;  %15253 = vmatprep.subr.bf16.mxu1 %v19167_v5  ;;  %v19279_v59 = vcombine.high %v1887_v62, %v1895_v63  ;;  %v1902_v5 = vld [vmem:[%s21082_s18 + $0x3130] sm:$0xff] }
 0x7e2   : > { %14926 = vmatpush1.bf16.msra.mxu0 %v19164_v12  ;;  %15254 = vmatpush1.bf16.msra.mxu1 %v19166_v13  ;;  %v19278_v12 = vcombine.low %v1887_v62, %v1895_v63  ;;  %v19293_v13 = vcombine.high %v1902_v5, %v1910_v30 }
 0x7e3   : > { %14927 = vmatprep.subr.bf16.mxu0 %v19181_v1  ;;  %15255 = vmatprep.subr.bf16.mxu1 %v19183_v14  ;;  %v19295_v1 = vcombine.high %v1903_v7, %v1911_v11  ;;  %v1918_v14 = vld [vmem:[%s21082_s18 + $0x31b0] sm:$0xff] }
 0x7e4   : > { %v19308_v25 = vcombine.low %v1918_v14, %v1926_v6 }
 0x7e6   : > { %14928 = vmatpush1.bf16.msra.mxu0 %v19180_v18  ;;  %15256 = vmatpush1.bf16.msra.mxu1 %v19182_v54  ;;  %v19309_v18 = vcombine.high %v1918_v14, %v1926_v6  ;;  %v19311_v54 = vcombine.high %v1919_v15, %v1927_v16  ;;  %v2039_v14 = vld [vmem:[%s21082_s18 + $0x3578] sm:$0xff] }
 0x7e7   : > { %14929 = vmatprep.subr.bf16.mxu0 %v19197_v17  ;;  %15257 = vmatprep.subr.bf16.mxu1 %v19199_v21  ;;  %v1934_v17 = vld [vmem:[%s21082_s18 + $0x3230] sm:$0xff] }
 0x7e8   : > { %v1942_v21 = vld [vmem:[%s21082_s18 + $0x3270] sm:$0xff] }
 0x7e9   : > { %v19325_v26 = vcombine.high %v1934_v17, %v1942_v21  ;;  %v19324_v0 = vcombine.low %v1934_v17, %v1942_v21  ;;  %v2055_v17 = vld [vmem:[%s21082_s18 + $0x35f8] sm:$0xff] }
 0x7ea   : > { %14930 = vmatpush1.bf16.msra.mxu0 %v19196_v10  ;;  %15258 = vmatpush1.bf16.msra.mxu1 %v19198_v27  ;;  %v19327_v10 = vcombine.high %v1935_v22, %v1943_v23  ;;  %v1950_v27 = vld [vmem:[%s21082_s18 + $0x32b0] sm:$0xff] }
 0x7eb   : > { %14931 = vmatprep.subr.bf16.mxu0 %v19213_v29  ;;  %15259 = vmatprep.subr.bf16.mxu1 %v19215_v31  ;;  %v1958_v29 = vld [vmem:[%s21082_s18 + $0x32f0] sm:$0xff]  ;;  %v1951_v31 = vld [vmem:[%s21082_s18 + $0x32b8] sm:$0xff] }
 0x7ec   : > { %v19341_v34 = vcombine.high %v1950_v27, %v1958_v29  ;;  %v19340_v42 = vcombine.low %v1950_v27, %v1958_v29  ;;  %v19342_v43 = vcombine.low %v1951_v31, %v1959_v32  ;;  %v2071_v27 = vld [vmem:[%s21082_s18 + $0x3678] sm:$0xff] }
 0x7ee   : > { %14932 = vmatpush1.bf16.msra.mxu0 %v19212_v35  ;;  %15260 = vmatpush1.bf16.msra.mxu1 %v19214_v36  ;;  %v19343_v35 = vcombine.high %v1951_v31, %v1959_v32  ;;  %v1966_v36 = vld [vmem:[%s21082_s18 + $0x3330] sm:$0xff] }
 0x7ef   : > { %14933 = vmatprep.subr.bf16.mxu0 %v19229_v37  ;;  %15261 = vmatprep.subr.bf16.mxu1 %v19231_v40  ;;  %v1974_v37 = vld [vmem:[%s21082_s18 + $0x3370] sm:$0xff]  ;;  %v1967_v40 = vld [vmem:[%s21082_s18 + $0x3338] sm:$0xff] }
 0x7f0   : > { %v19357_v49 = vcombine.high %v1966_v36, %v1974_v37  ;;  %v19356_v51 = vcombine.low %v1966_v36, %v1974_v37  ;;  %v19358_v53 = vcombine.low %v1967_v40, %v1975_v41  ;;  %v2087_v36 = vld [vmem:[%s21082_s18 + $0x36f8] sm:$0xff] }
 0x7f2   : > { %14934 = vmatpush1.bf16.msra.mxu0 %v19228_v20  ;;  %15262 = vmatpush1.bf16.msra.mxu1 %v19230_v44  ;;  %v19359_v20 = vcombine.high %v1967_v40, %v1975_v41  ;;  %v1982_v44 = vld [vmem:[%s21082_s18 + $0x33b0] sm:$0xff] }
 0x7f3   : > { %14935 = vmatprep.subr.bf16.mxu0 %v19245_v46  ;;  %15263 = vmatprep.subr.bf16.mxu1 %v19247_v47  ;;  %v1990_v46 = vld [vmem:[%s21082_s18 + $0x33f0] sm:$0xff]  ;;  %v1983_v47 = vld [vmem:[%s21082_s18 + $0x33b8] sm:$0xff] }
 0x7f4   : > { %v19373_v55 = vcombine.high %v1982_v44, %v1990_v46  ;;  %v19372_v24 = vcombine.low %v1982_v44, %v1990_v46  ;;  %v19374_v62 = vcombine.low %v1983_v47, %v1991_v48  ;;  %v2103_v44 = vld [vmem:[%s21082_s18 + $0x3778] sm:$0xff] }
 0x7f6   : > { %14936 = vmatpush1.bf16.msra.mxu0 %v19244_v56  ;;  %15264 = vmatpush1.bf16.msra.mxu1 %v19246_v60  ;;  %v19375_v56 = vcombine.high %v1983_v47, %v1991_v48  ;;  %v1998_v60 = vld [vmem:[%s21082_s18 + $0x3430] sm:$0xff] }
 0x7f7   : > { %14946 = vmatprep.subr.bf16.mxu0 %v19261_v57  ;;  %15274 = vmatprep.subr.bf16.mxu1 %v19263_v58  ;;  %v2006_v57 = vld [vmem:[%s21082_s18 + $0x3470] sm:$0xff]  ;;  %v1999_v58 = vld [vmem:[%s21082_s18 + $0x3438] sm:$0xff] }
 0x7f8   : > { %v19389_v63 = vcombine.high %v1998_v60, %v2006_v57  ;;  %v19390_v7 = vcombine.low %v1999_v58, %v2007_v61 }
 0x7f9   : > { %14938 = vmatmul.mubr.bf16.vlgmr.msra.gmra.mrb[12].mxu0 %v21591_v28  ;;  %15266 = vmatmul.mubr.bf16.vlgmr.msra.gmra.mrb[12].mxu1 %v21591_v28  ;;  %v19292_v28 = vcombine.low %v1902_v5, %v1910_v30  ;;  %v2023_v5 = vld [vmem:[%s21082_s18 + $0x34f8] sm:$0xff]  ;;  %v19388_v30 = vcombine.low %v1998_v60, %v2006_v57 }
 0x7fa   : > { %14947 = vmatpush1.bf16.msra.mxu0 %v19260_v9  ;;  %15275 = vmatpush1.bf16.msra.mxu1 %v19262_v4  ;;  %v19391_v9 = vcombine.high %v1999_v58, %v2007_v61  ;;  %v2014_v4 = vld [vmem:[%s21082_s18 + $0x34b0] sm:$0xff]  ;;  %v2119_v60 = vld [vmem:[%s21082_s18 + $0x37f8] sm:$0xff] }
 0x7fb   : > { %14948 = vmatprep.subr.bf16.mxu0 %v19277_v52  ;;  %15276 = vmatprep.subr.bf16.mxu1 %v19279_v59  ;;  %v2022_v52 = vld [vmem:[%s21082_s18 + $0x34f0] sm:$0xff]  ;;  %v2015_v59 = vld [vmem:[%s21082_s18 + $0x34b8] sm:$0xff] }
 0x7fc   : > { %14978 = vmatprep.mubr.bf16.mxu0 %v21598_v38  ;;  %15306 = vmatprep.mubr.bf16.mxu1 %v21598_v38  ;;  %v19310_v38 = vcombine.low %v1919_v15, %v1927_v16  ;;  %v19405_v11 = vcombine.high %v2014_v4, %v2022_v52  ;;  %v19404_v6 = vcombine.low %v2014_v4, %v2022_v52  ;;  %v2135_v4 = vld [vmem:[%s21082_s18 + $0x3878] sm:$0xff] }
 0x7fd   : > { %v19406_v15 = vcombine.low %v2015_v59, %v2023_v5 }
 0x7fe   : > { %14949 = vmatpush1.bf16.msra.mxu0 %v19276_v33  ;;  %15277 = vmatpush1.bf16.msra.mxu1 %v19278_v12  ;;  %v19407_v33 = vcombine.high %v2015_v59, %v2023_v5  ;;  %v2030_v12 = vld [vmem:[%s21082_s18 + $0x3530] sm:$0xff] }
 0x7ff   : > { %14950 = vmatprep.subr.bf16.mxu0 %v19293_v13  ;;  %15278 = vmatprep.subr.bf16.mxu1 %v19295_v1  ;;  %v2038_v13 = vld [vmem:[%s21082_s18 + $0x3570] sm:$0xff]  ;;  %v2031_v1 = vld [vmem:[%s21082_s18 + $0x3538] sm:$0xff] }
 0x800   : > { %v19421_v16 = vcombine.high %v2030_v12, %v2038_v13  ;;  %v19420_v21 = vcombine.low %v2030_v12, %v2038_v13  ;;  %v19422_v22 = vcombine.low %v2031_v1, %v2039_v14  ;;  %v2151_v12 = vld [vmem:[%s21082_s18 + $0x38f8] sm:$0xff] }
 0x802   : > { %14951 = vmatpush1.bf16.msra.mxu0 %v19292_v28  ;;  %15279 = vmatpush1.bf16.msra.mxu1 %v19294_v2  ;;  %v19423_v28 = vcombine.high %v2031_v1, %v2039_v14  ;;  %v2046_v2 = vld [vmem:[%s21082_s18 + $0x35b0] sm:$0xff] }
 0x803   : > { %14952 = vmatprep.subr.bf16.mxu0 %v19309_v18  ;;  %15280 = vmatprep.subr.bf16.mxu1 %v19311_v54  ;;  %v2054_v18 = vld [vmem:[%s21082_s18 + $0x35f0] sm:$0xff]  ;;  %v2047_v54 = vld [vmem:[%s21082_s18 + $0x35b8] sm:$0xff] }
 0x804   : > { %v19437_v23 = vcombine.high %v2046_v2, %v2054_v18  ;;  %v19436_v29 = vcombine.low %v2046_v2, %v2054_v18  ;;  %v19438_v31 = vcombine.low %v2047_v54, %v2055_v17  ;;  %v2167_v2 = vld [vmem:[%s21082_s18 + $0x3978] sm:$0xff] }
 0x806   : > { %14953 = vmatpush1.bf16.msra.mxu0 %v19308_v25  ;;  %15281 = vmatpush1.bf16.msra.mxu1 %v19310_v38  ;;  %v19439_v25 = vcombine.high %v2047_v54, %v2055_v17  ;;  %v2062_v38 = vld [vmem:[%s21082_s18 + $0x3630] sm:$0xff] }
 0x807   : > { %14954 = vmatprep.subr.bf16.mxu0 %v19325_v26  ;;  %15282 = vmatprep.subr.bf16.mxu1 %v19327_v10  ;;  %v2070_v26 = vld [vmem:[%s21082_s18 + $0x3670] sm:$0xff]  ;;  %v2063_v10 = vld [vmem:[%s21082_s18 + $0x3638] sm:$0xff] }
 0x808   : > { %v19453_v32 = vcombine.high %v2062_v38, %v2070_v26  ;;  %v19452_v37 = vcombine.low %v2062_v38, %v2070_v26  ;;  %v19454_v40 = vcombine.low %v2063_v10, %v2071_v27  ;;  %v2183_v38 = vld [vmem:[%s21082_s18 + $0x39f8] sm:$0xff] }
 0x80a   : > { %14955 = vmatpush1.bf16.msra.mxu0 %v19324_v0  ;;  %15283 = vmatpush1.bf16.msra.mxu1 %v19326_v39  ;;  %v19455_v0 = vcombine.high %v2063_v10, %v2071_v27  ;;  %v2078_v39 = vld [vmem:[%s21082_s18 + $0x36b0] sm:$0xff] }
 0x80b   : > { %14956 = vmatprep.subr.bf16.mxu0 %v19341_v34  ;;  %15284 = vmatprep.subr.bf16.mxu1 %v19343_v35  ;;  %v2086_v34 = vld [vmem:[%s21082_s18 + $0x36f0] sm:$0xff]  ;;  %v2079_v35 = vld [vmem:[%s21082_s18 + $0x36b8] sm:$0xff] }
 0x80c   : > { %v19469_v41 = vcombine.high %v2078_v39, %v2086_v34  ;;  %v19468_v46 = vcombine.low %v2078_v39, %v2086_v34  ;;  %v19470_v47 = vcombine.low %v2079_v35, %v2087_v36 }
 0x80e   : > { %14957 = vmatpush1.bf16.msra.mxu0 %v19340_v42  ;;  %15285 = vmatpush1.bf16.msra.mxu1 %v19342_v43  ;;  %v19471_v42 = vcombine.high %v2079_v35, %v2087_v36  ;;  %v2094_v43 = vld [vmem:[%s21082_s18 + $0x3730] sm:$0xff] }
 0x80f   : > { %14958 = vmatprep.subr.bf16.mxu0 %v19357_v49  ;;  %15286 = vmatprep.subr.bf16.mxu1 %v19359_v20  ;;  %v2102_v49 = vld [vmem:[%s21082_s18 + $0x3770] sm:$0xff]  ;;  %v2095_v20 = vld [vmem:[%s21082_s18 + $0x3738] sm:$0xff] }
 0x810   : > { %v19485_v48 = vcombine.high %v2094_v43, %v2102_v49  ;;  %v19484_v57 = vcombine.low %v2094_v43, %v2102_v49  ;;  %v19486_v58 = vcombine.low %v2095_v20, %v2103_v44  ;;  %v2206_v36 = vld [vmem:[%s21082_s18 + $0x3ab0] sm:$0xff] }
 0x812   : > { %14959 = vmatpush1.bf16.msra.mxu0 %v19356_v51  ;;  %15287 = vmatpush1.bf16.msra.mxu1 %v19358_v53  ;;  %v19487_v51 = vcombine.high %v2095_v20, %v2103_v44  ;;  %v2110_v53 = vld [vmem:[%s21082_s18 + $0x37b0] sm:$0xff] }
 0x813   : > { %14960 = vmatprep.subr.bf16.mxu0 %v19373_v55  ;;  %15288 = vmatprep.subr.bf16.mxu1 %v19375_v56  ;;  %v2118_v55 = vld [vmem:[%s21082_s18 + $0x37f0] sm:$0xff]  ;;  %v2111_v56 = vld [vmem:[%s21082_s18 + $0x37b8] sm:$0xff] }
 0x814   : > { %v19501_v61 = vcombine.high %v2110_v53, %v2118_v55  ;;  %v19500_v52 = vcombine.low %v2110_v53, %v2118_v55  ;;  %v19502_v59 = vcombine.low %v2111_v56, %v2119_v60  ;;  %v2222_v44 = vld [vmem:[%s21082_s18 + $0x3b30] sm:$0xff] }
 0x816   : > { %14961 = vmatpush1.bf16.msra.mxu0 %v19372_v24  ;;  %15289 = vmatpush1.bf16.msra.mxu1 %v19374_v62  ;;  %v19503_v24 = vcombine.high %v2111_v56, %v2119_v60  ;;  %v2126_v62 = vld [vmem:[%s21082_s18 + $0x3830] sm:$0xff] }
 0x817   : > { %14962 = vmatprep.subr.bf16.mxu0 %v19389_v63  ;;  %15290 = vmatprep.subr.bf16.mxu1 %v19391_v9  ;;  %v2134_v63 = vld [vmem:[%s21082_s18 + $0x3870] sm:$0xff]  ;;  %v2127_v9 = vld [vmem:[%s21082_s18 + $0x3838] sm:$0xff] }
 0x818   : > { %v19517_v5 = vcombine.high %v2126_v62, %v2134_v63  ;;  %v19516_v13 = vcombine.low %v2126_v62, %v2134_v63  ;;  %v19518_v1 = vcombine.low %v2127_v9, %v2135_v4  ;;  %v2238_v60 = vld [vmem:[%s21082_s18 + $0x3bb0] sm:$0xff] }
 0x81a   : > { %14963 = vmatpush1.bf16.msra.mxu0 %v19388_v30  ;;  %15291 = vmatpush1.bf16.msra.mxu1 %v19390_v7  ;;  %v19519_v30 = vcombine.high %v2127_v9, %v2135_v4  ;;  %v2142_v7 = vld [vmem:[%s21082_s18 + $0x38b0] sm:$0xff] }
 0x81b   : > { %14964 = vmatprep.subr.bf16.mxu0 %v19405_v11  ;;  %15292 = vmatprep.subr.bf16.mxu1 %v19407_v33  ;;  %v2150_v11 = vld [vmem:[%s21082_s18 + $0x38f0] sm:$0xff]  ;;  %v2143_v33 = vld [vmem:[%s21082_s18 + $0x38b8] sm:$0xff] }
 0x81c   : > { %v19533_v14 = vcombine.high %v2142_v7, %v2150_v11  ;;  %v19532_v18 = vcombine.low %v2142_v7, %v2150_v11  ;;  %v19534_v54 = vcombine.low %v2143_v33, %v2151_v12  ;;  %v2254_v4 = vld [vmem:[%s21082_s18 + $0x3c30] sm:$0xff] }
 0x81e   : > { %14965 = vmatpush1.bf16.msra.mxu0 %v19404_v6  ;;  %15293 = vmatpush1.bf16.msra.mxu1 %v19406_v15  ;;  %v19535_v6 = vcombine.high %v2143_v33, %v2151_v12  ;;  %v2158_v15 = vld [vmem:[%s21082_s18 + $0x3930] sm:$0xff] }
 0x81f   : > { %14966 = vmatprep.subr.bf16.mxu0 %v19421_v16  ;;  %15294 = vmatprep.subr.bf16.mxu1 %v19423_v28  ;;  %v2166_v16 = vld [vmem:[%s21082_s18 + $0x3970] sm:$0xff]  ;;  %v2159_v28 = vld [vmem:[%s21082_s18 + $0x3938] sm:$0xff] }
 0x820   : > { %v19549_v17 = vcombine.high %v2158_v15, %v2166_v16  ;;  %v19550_v26 = vcombine.low %v2159_v28, %v2167_v2  ;;  %v2270_v12 = vld [vmem:[%s21082_s18 + $0x3cb0] sm:$0xff] }
 0x822   : > { %14967 = vmatpush1.bf16.msra.mxu0 %v19420_v21  ;;  %15295 = vmatpush1.bf16.msra.mxu1 %v19422_v22  ;;  %v19551_v21 = vcombine.high %v2159_v28, %v2167_v2  ;;  %v2174_v22 = vld [vmem:[%s21082_s18 + $0x39b0] sm:$0xff] }
 0x823   : > { %14968 = vmatprep.subr.bf16.mxu0 %v19437_v23  ;;  %15296 = vmatprep.subr.bf16.mxu1 %v19439_v25  ;;  %v2182_v23 = vld [vmem:[%s21082_s18 + $0x39f0] sm:$0xff]  ;;  %v2175_v25 = vld [vmem:[%s21082_s18 + $0x39b8] sm:$0xff] }
 0x824   : > { %v19565_v10 = vcombine.high %v2174_v22, %v2182_v23  ;;  %v19567_v27 = vcombine.high %v2175_v25, %v2183_v38  ;;  %v19564_v39 = vcombine.low %v2174_v22, %v2182_v23  ;;  %v2286_v2 = vld [vmem:[%s21082_s18 + $0x3d30] sm:$0xff] }
 0x826   : > { %14969 = vmatpush1.bf16.msra.mxu0 %v19436_v29  ;;  %15297 = vmatpush1.bf16.msra.mxu1 %v19438_v31  ;;  %v2190_v29 = vld [vmem:[%s21082_s18 + $0x3a30] sm:$0xff] }
 0x827   : > { %14970 = vmatprep.subr.bf16.mxu0 %v19453_v32  ;;  %15298 = vmatprep.subr.bf16.mxu1 %v19455_v0  ;;  %v2198_v31 = vld [vmem:[%s21082_s18 + $0x3a70] sm:$0xff]  ;;  %v2191_v32 = vld [vmem:[%s21082_s18 + $0x3a38] sm:$0xff] }
 0x828   : > { %v2199_v0 = vld [vmem:[%s21082_s18 + $0x3a78] sm:$0xff]  ;;  %v19581_v34 = vcombine.high %v2190_v29, %v2198_v31 }
 0x829   : > { %v19583_v35 = vcombine.high %v2191_v32, %v2199_v0  ;;  %v19582_v43 = vcombine.low %v2191_v32, %v2199_v0  ;;  %v2318_v0 = vld [vmem:[%s21082_s18 + $0x3e30] sm:$0xff] }
 0x82a   : > { %14971 = vmatpush1.bf16.msra.mxu0 %v19452_v37  ;;  %15299 = vmatpush1.bf16.msra.mxu1 %v19454_v40  ;;  %v2214_v37 = vld [vmem:[%s21082_s18 + $0x3af0] sm:$0xff]  ;;  %v2207_v40 = vld [vmem:[%s21082_s18 + $0x3ab8] sm:$0xff] }
 0x82b   : > { %14972 = vmatprep.subr.bf16.mxu0 %v19469_v41  ;;  %15300 = vmatprep.subr.bf16.mxu1 %v19471_v42  ;;  %v2215_v41 = vld [vmem:[%s21082_s18 + $0x3af8] sm:$0xff]  ;;  %v19580_v42 = vcombine.low %v2190_v29, %v2198_v31  ;;  %v19597_v49 = vcombine.high %v2206_v36, %v2214_v37 }
 0x82c   : > { %v19599_v20 = vcombine.high %v2207_v40, %v2215_v41  ;;  %v19598_v53 = vcombine.low %v2207_v40, %v2215_v41  ;;  %v2334_v41 = vld [vmem:[%s21082_s18 + $0x3eb0] sm:$0xff] }
 0x82e   : > { %14973 = vmatpush1.bf16.msra.mxu0 %v19468_v46  ;;  %15301 = vmatpush1.bf16.msra.mxu1 %v19470_v47  ;;  %v2230_v46 = vld [vmem:[%s21082_s18 + $0x3b70] sm:$0xff]  ;;  %v2223_v47 = vld [vmem:[%s21082_s18 + $0x3b38] sm:$0xff] }
 0x82f   : > { %14974 = vmatprep.subr.bf16.mxu0 %v19485_v48  ;;  %15302 = vmatprep.subr.bf16.mxu1 %v19487_v51  ;;  %v2231_v48 = vld [vmem:[%s21082_s18 + $0x3b78] sm:$0xff]  ;;  %v19596_v51 = vcombine.low %v2206_v36, %v2214_v37  ;;  %v19613_v55 = vcombine.high %v2222_v44, %v2230_v46 }
 0x830   : > { %v19615_v56 = vcombine.high %v2223_v47, %v2231_v48  ;;  %v19614_v62 = vcombine.low %v2223_v47, %v2231_v48  ;;  %v2350_v48 = vld [vmem:[%s21082_s18 + $0x3f30] sm:$0xff] }
 0x832   : > { %14975 = vmatpush1.bf16.msra.mxu0 %v19484_v57  ;;  %15303 = vmatpush1.bf16.msra.mxu1 %v19486_v58  ;;  %v2246_v57 = vld [vmem:[%s21082_s18 + $0x3bf0] sm:$0xff]  ;;  %v2239_v58 = vld [vmem:[%s21082_s18 + $0x3bb8] sm:$0xff] }
 0x833   : > { %14976 = vmatprep.subr.bf16.mxu0 %v19501_v61  ;;  %15304 = vmatprep.subr.bf16.mxu1 %v19503_v24  ;;  %v2247_v61 = vld [vmem:[%s21082_s18 + $0x3bf8] sm:$0xff]  ;;  %v19612_v24 = vcombine.low %v2222_v44, %v2230_v46  ;;  %v19629_v63 = vcombine.high %v2238_v60, %v2246_v57 }
 0x834   : > { %v19631_v9 = vcombine.high %v2239_v58, %v2247_v61  ;;  %v19630_v7 = vcombine.low %v2239_v58, %v2247_v61  ;;  %v2366_v61 = vld [vmem:[%s21082_s18 + $0x3fb0] sm:$0xff] }
 0x836   : > { %14977 = vmatpush1.bf16.msra.mxu0 %v19500_v52  ;;  %15305 = vmatpush1.bf16.msra.mxu1 %v19502_v59  ;;  %v2262_v52 = vld [vmem:[%s21082_s18 + $0x3c70] sm:$0xff]  ;;  %v2255_v59 = vld [vmem:[%s21082_s18 + $0x3c38] sm:$0xff] }
 0x837   : > { %14987 = vmatprep.subr.bf16.mxu0 %v19517_v5  ;;  %15315 = vmatprep.subr.bf16.mxu1 %v19519_v30  ;;  %v2263_v5 = vld [vmem:[%s21082_s18 + $0x3c78] sm:$0xff]  ;;  %v19628_v30 = vcombine.low %v2238_v60, %v2246_v57  ;;  %v19645_v11 = vcombine.high %v2254_v4, %v2262_v52 }
 0x838   : > { %v19647_v33 = vcombine.high %v2255_v59, %v2263_v5 }
 0x839   : > { %14979 = vmatmul.mubr.bf16.vlgmr.msra.gmra.mrb[12].mxu0 %v21666_v8  ;;  %15307 = vmatmul.mubr.bf16.vlgmr.msra.gmra.mrb[12].mxu1 %v21666_v8  ;;  %v19548_v8 = vcombine.low %v2158_v15, %v2166_v16  ;;  %v19646_v15 = vcombine.low %v2255_v59, %v2263_v5 }
 0x83a   : > { %14988 = vmatpush1.bf16.msra.mxu0 %v19516_v13  ;;  %15316 = vmatpush1.bf16.msra.mxu1 %v19518_v1  ;;  %v2278_v13 = vld [vmem:[%s21082_s18 + $0x3cf0] sm:$0xff]  ;;  %v2271_v1 = vld [vmem:[%s21082_s18 + $0x3cb8] sm:$0xff] }
 0x83b   : > { %14989 = vmatprep.subr.bf16.mxu0 %v19533_v14  ;;  %15317 = vmatprep.subr.bf16.mxu1 %v19535_v6  ;;  %v2279_v14 = vld [vmem:[%s21082_s18 + $0x3cf8] sm:$0xff]  ;;  %v19644_v6 = vcombine.low %v2254_v4, %v2262_v52  ;;  %v19661_v16 = vcombine.high %v2270_v12, %v2278_v13 }
 0x83c   : > { %15019 = vmatprep.mubr.bf16.mxu0 %v21674_v19  ;;  %15347 = vmatprep.mubr.bf16.mxu1 %v21674_v19  ;;  %v19566_v19 = vcombine.low %v2175_v25, %v2183_v38  ;;  %v19663_v28 = vcombine.high %v2271_v1, %v2279_v14  ;;  %v19662_v22 = vcombine.low %v2271_v1, %v2279_v14  ;;  %v2302_v38 = vld [vmem:[%s21082_s18 + $0x3db0] sm:$0xff] }
 0x83e   : > { %14990 = vmatpush1.bf16.msra.mxu0 %v19532_v18  ;;  %15318 = vmatpush1.bf16.msra.mxu1 %v19534_v54  ;;  %v2294_v18 = vld [vmem:[%s21082_s18 + $0x3d70] sm:$0xff]  ;;  %v2287_v54 = vld [vmem:[%s21082_s18 + $0x3d38] sm:$0xff] }
 0x83f   : > { %14991 = vmatprep.subr.bf16.mxu0 %v19549_v17  ;;  %15319 = vmatprep.subr.bf16.mxu1 %v19551_v21  ;;  %v2295_v17 = vld [vmem:[%s21082_s18 + $0x3d78] sm:$0xff]  ;;  %v19660_v21 = vcombine.low %v2270_v12, %v2278_v13  ;;  %v19677_v23 = vcombine.high %v2286_v2, %v2294_v18 }
 0x840   : > { %v19679_v25 = vcombine.high %v2287_v54, %v2295_v17  ;;  %v19678_v29 = vcombine.low %v2287_v54, %v2295_v17 }
 0x842   : > { %14992 = vmatpush1.bf16.msra.mxu0 %v19548_v8  ;;  %15320 = vmatpush1.bf16.msra.mxu1 %v19550_v26  ;;  %v2310_v8 = vld [vmem:[%s21082_s18 + $0x3df0] sm:$0xff]  ;;  %v2303_v26 = vld [vmem:[%s21082_s18 + $0x3db8] sm:$0xff] }
 0x843   : > { %14993 = vmatprep.subr.bf16.mxu0 %v19565_v10  ;;  %15321 = vmatprep.subr.bf16.mxu1 %v19567_v27  ;;  %v2311_v10 = vld [vmem:[%s21082_s18 + $0x3df8] sm:$0xff]  ;;  %v19676_v27 = vcombine.low %v2286_v2, %v2294_v18  ;;  %v19693_v31 = vcombine.high %v2302_v38, %v2310_v8 }
 0x844   : > { %v19695_v32 = vcombine.high %v2303_v26, %v2311_v10  ;;  %v19694_v36 = vcombine.low %v2303_v26, %v2311_v10  ;;  %v327_v18 = vld [vmem:[#allocation2 + $0x18] sm:$0xff]  ;;  %v20369_v26 = vld [vmem:[#allocation8 + $0x410] ss:$8 sps:$4 sm:$0xff] (!%p19760_p5)  }
 0x845   : > { %v20370_v10 = vld [vmem:[#allocation8 + $0x24] ss:$8 sps:$4 sm:$0xff] (!%p19760_p5)  }
 0x846   : > { %14994 = vmatpush1.bf16.msra.mxu0 %v19564_v39  ;;  %15322 = vmatpush1.bf16.msra.mxu1 %v19566_v19  ;;  %v2326_v39 = vld [vmem:[%s21082_s18 + $0x3e70] sm:$0xff]  ;;  %v2319_v19 = vld [vmem:[%s21082_s18 + $0x3e38] sm:$0xff] }
 0x847   : > { %14995 = vmatprep.subr.bf16.mxu0 %v19581_v34  ;;  %15323 = vmatprep.subr.bf16.mxu1 %v19583_v35  ;;  %v2327_v34 = vld [vmem:[%s21082_s18 + $0x3e78] sm:$0xff]  ;;  %v19692_v35 = vcombine.low %v2302_v38, %v2310_v8  ;;  %v19709_v37 = vcombine.high %v2318_v0, %v2326_v39  ;;  %v20366_v38 = vld [vmem:[#allocation8 + $0x414] ss:$8 sps:$4 sm:$0xff] (!%p19760_p5)   ;;  %v20368_v8 = vld [vmem:[#allocation8 + $0x10] ss:$8 sps:$4 sm:$0xff] (!%p19760_p5)  }
 0x848   : > { %v19711_v40 = vcombine.high %v2319_v19, %v2327_v34  ;;  %v19710_v44 = vcombine.low %v2319_v19, %v2327_v34  ;;  %v20381_v19 = vld [vmem:[#allocation8 + $0x430] ss:$8 sps:$4 sm:$0xff] (!%p19760_p5)   ;;  %v20382_v34 = vld [vmem:[#allocation8 + $0x44] ss:$8 sps:$4 sm:$0xff] (!%p19760_p5)  }
 0x84a   : > { %14996 = vmatpush1.bf16.msra.mxu0 %v19580_v42  ;;  %15324 = vmatpush1.bf16.msra.mxu1 %v19582_v43  ;;  %v2342_v42 = vld [vmem:[%s21082_s18 + $0x3ef0] sm:$0xff]  ;;  %v2335_v43 = vld [vmem:[%s21082_s18 + $0x3eb8] sm:$0xff] }
 0x84b   : > { %14997 = vmatprep.subr.bf16.mxu0 %v19597_v49  ;;  %15325 = vmatprep.subr.bf16.mxu1 %v19599_v20  ;;  %v2343_v49 = vld [vmem:[%s21082_s18 + $0x3ef8] sm:$0xff]  ;;  %v19708_v20 = vcombine.low %v2318_v0, %v2326_v39  ;;  %v19725_v46 = vcombine.high %v2334_v41, %v2342_v42  ;;  %v20378_v0 = vld [vmem:[#allocation8 + $0x434] ss:$8 sps:$4 sm:$0xff] (!%p19760_p5)   ;;  %v20380_v39 = vld [vmem:[#allocation8 + $0x30] ss:$8 sps:$4 sm:$0xff] (!%p19760_p5)  }
 0x84c   : > { %v19727_v47 = vcombine.high %v2335_v43, %v2343_v49  ;;  %v19726_v60 = vcombine.low %v2335_v43, %v2343_v49  ;;  %v20393_v43 = vld [vmem:[#allocation8 + $0x450] ss:$8 sps:$4 sm:$0xff] (!%p19760_p5)   ;;  %v20394_v49 = vld [vmem:[#allocation8 + $0x64] ss:$8 sps:$4 sm:$0xff] (!%p19760_p5)  }
 0x84e   : > { %14998 = vmatpush1.bf16.msra.mxu0 %v19596_v51  ;;  %15326 = vmatpush1.bf16.msra.mxu1 %v19598_v53  ;;  %v2358_v51 = vld [vmem:[%s21082_s18 + $0x3f70] sm:$0xff]  ;;  %v2351_v53 = vld [vmem:[%s21082_s18 + $0x3f38] sm:$0xff] }
 0x84f   : > { %14999 = vmatprep.subr.bf16.mxu0 %v19613_v55  ;;  %15327 = vmatprep.subr.bf16.mxu1 %v19615_v56  ;;  %v2359_v55 = vld [vmem:[%s21082_s18 + $0x3f78] sm:$0xff]  ;;  %v19724_v56 = vcombine.low %v2334_v41, %v2342_v42  ;;  %v19741_v57 = vcombine.high %v2350_v48, %v2358_v51  ;;  %v20390_v41 = vld [vmem:[#allocation8 + $0x454] ss:$8 sps:$4 sm:$0xff] (!%p19760_p5)   ;;  %v20392_v42 = vld [vmem:[#allocation8 + $0x50] ss:$8 sps:$4 sm:$0xff] (!%p19760_p5)  }
 0x850   : > { %v19743_v58 = vcombine.high %v2351_v53, %v2359_v55  ;;  %v19742_v4 = vcombine.low %v2351_v53, %v2359_v55  ;;  %v20405_v53 = vld [vmem:[#allocation8 + $0x470] ss:$8 sps:$4 sm:$0xff] (!%p19760_p5)   ;;  %v20406_v55 = vld [vmem:[#allocation8 + $0x84] ss:$8 sps:$4 sm:$0xff] (!%p19760_p5)  }
 0x852   : > { %15000 = vmatpush1.bf16.msra.mxu0 %v19612_v24  ;;  %15328 = vmatpush1.bf16.msra.mxu1 %v19614_v62  ;;  %v2374_v24 = vld [vmem:[%s21082_s18 + $0x3ff0] sm:$0xff]  ;;  %v2367_v62 = vld [vmem:[%s21082_s18 + $0x3fb8] sm:$0xff] }
 0x853   : > { %15001 = vmatprep.subr.bf16.mxu0 %v19629_v63  ;;  %15329 = vmatprep.subr.bf16.mxu1 %v19631_v9  ;;  %v2375_v63 = vld [vmem:[%s21082_s18 + $0x3ff8] sm:$0xff]  ;;  %v19740_v9 = vcombine.low %v2350_v48, %v2358_v51  ;;  %v19757_v52 = vcombine.high %v2366_v61, %v2374_v24  ;;  %v19756_v5 = vcombine.low %v2366_v61, %v2374_v24  ;;  %v20402_v48 = vld [vmem:[#allocation8 + $0x474] ss:$8 sps:$4 sm:$0xff] (!%p19760_p5)   ;;  %v20404_v51 = vld [vmem:[#allocation8 + $0x70] ss:$8 sps:$4 sm:$0xff] (!%p19760_p5)  }
 0x854   : > { %v19759_v59 = vcombine.high %v2367_v62, %v2375_v63  ;;  %v20414_v61 = vld [vmem:[#allocation8 + $0x494] ss:$8 sps:$4 sm:$0xff] (!%p19760_p5)   ;;  %v20416_v24 = vld [vmem:[#allocation8 + $0x90] ss:$8 sps:$4 sm:$0xff] (!%p19760_p5)  }
 0x856   : > { %15002 = vmatpush1.bf16.msra.mxu0 %v19628_v30  ;;  %15330 = vmatpush1.bf16.msra.mxu1 %v19630_v7  ;;  %v19758_v30 = vcombine.low %v2367_v62, %v2375_v63  ;;  %v20417_v62 = vld [vmem:[#allocation8 + $0x490] ss:$8 sps:$4 sm:$0xff] (!%p19760_p5)   ;;  %v20418_v63 = vld [vmem:[#allocation8 + $0xa4] ss:$8 sps:$4 sm:$0xff] (!%p19760_p5)  }
 0x857   : > { %15003 = vmatprep.subr.bf16.mxu0 %v19645_v11  ;;  %15331 = vmatprep.subr.bf16.mxu1 %v19647_v33 }
 0x85a   : > { %15004 = vmatpush1.bf16.msra.mxu0 %v19644_v6  ;;  %15332 = vmatpush1.bf16.msra.mxu1 %v19646_v15 }
 0x85b   : > { %15005 = vmatprep.subr.bf16.mxu0 %v19661_v16  ;;  %15333 = vmatprep.subr.bf16.mxu1 %v19663_v28 }
 0x85e   : > { %15006 = vmatpush1.bf16.msra.mxu0 %v19660_v21  ;;  %15334 = vmatpush1.bf16.msra.mxu1 %v19662_v22  ;;  %v20360_v21 = vld [vmem:[#allocation8 + $0x404] ss:$8 sps:$4 sm:$0xff] (!%p19760_p5)   ;;  %v20362_v22 = vld [vmem:[#allocation8] ss:$8 sps:$4 sm:$0xff] (!%p19760_p5)  }
 0x85f   : > { %15007 = vmatprep.subr.bf16.mxu0 %v19677_v23  ;;  %15335 = vmatprep.subr.bf16.mxu1 %v19679_v25  ;;  %v20363_v23 = vld [vmem:[#allocation8 + $0x400] ss:$8 sps:$4 sm:$0xff] (!%p19760_p5)   ;;  %v20364_v25 = vld [vmem:[#allocation8 + $0x14] ss:$8 sps:$4 sm:$0xff] (!%p19760_p5)  }
 0x862   : > { %15008 = vmatpush1.bf16.msra.mxu0 %v19676_v27  ;;  %15336 = vmatpush1.bf16.msra.mxu1 %v19678_v29  ;;  %v20372_v27 = vld [vmem:[#allocation8 + $0x424] ss:$8 sps:$4 sm:$0xff] (!%p19760_p5)   ;;  %v20374_v29 = vld [vmem:[#allocation8 + $0x20] ss:$8 sps:$4 sm:$0xff] (!%p19760_p5)  }
 0x863   : > { %15009 = vmatprep.subr.bf16.mxu0 %v19693_v31  ;;  %15337 = vmatprep.subr.bf16.mxu1 %v19695_v32  ;;  %v20375_v31 = vld [vmem:[#allocation8 + $0x420] ss:$8 sps:$4 sm:$0xff] (!%p19760_p5)   ;;  %v20376_v32 = vld [vmem:[#allocation8 + $0x34] ss:$8 sps:$4 sm:$0xff] (!%p19760_p5)  }
 0x866   : > { %15010 = vmatpush1.bf16.msra.mxu0 %v19692_v35  ;;  %15338 = vmatpush1.bf16.msra.mxu1 %v19694_v36  ;;  %v20384_v35 = vld [vmem:[#allocation8 + $0x444] ss:$8 sps:$4 sm:$0xff] (!%p19760_p5)   ;;  %v20386_v36 = vld [vmem:[#allocation8 + $0x40] ss:$8 sps:$4 sm:$0xff] (!%p19760_p5)  }
 0x867   : > { %15011 = vmatprep.subr.bf16.mxu0 %v19709_v37  ;;  %15339 = vmatprep.subr.bf16.mxu1 %v19711_v40  ;;  %v20387_v37 = vld [vmem:[#allocation8 + $0x440] ss:$8 sps:$4 sm:$0xff] (!%p19760_p5)   ;;  %v20388_v40 = vld [vmem:[#allocation8 + $0x54] ss:$8 sps:$4 sm:$0xff] (!%p19760_p5)  }
 0x86a   : > { %15012 = vmatpush1.bf16.msra.mxu0 %v19708_v20  ;;  %15340 = vmatpush1.bf16.msra.mxu1 %v19710_v44  ;;  %v20396_v20 = vld [vmem:[#allocation8 + $0x464] ss:$8 sps:$4 sm:$0xff] (!%p19760_p5)   ;;  %v20398_v44 = vld [vmem:[#allocation8 + $0x60] ss:$8 sps:$4 sm:$0xff] (!%p19760_p5)  }
 0x86b   : > { %15013 = vmatprep.subr.bf16.mxu0 %v19725_v46  ;;  %15341 = vmatprep.subr.bf16.mxu1 %v19727_v47  ;;  %v20399_v46 = vld [vmem:[#allocation8 + $0x460] ss:$8 sps:$4 sm:$0xff] (!%p19760_p5)   ;;  %v20400_v47 = vld [vmem:[#allocation8 + $0x74] ss:$8 sps:$4 sm:$0xff] (!%p19760_p5)  }
 0x86e   : > { %15014 = vmatpush1.bf16.msra.mxu0 %v19724_v56  ;;  %15342 = vmatpush1.bf16.msra.mxu1 %v19726_v60  ;;  %v20408_v56 = vld [vmem:[#allocation8 + $0x484] ss:$8 sps:$4 sm:$0xff] (!%p19760_p5)   ;;  %v20410_v60 = vld [vmem:[#allocation8 + $0x80] ss:$8 sps:$4 sm:$0xff] (!%p19760_p5)  }
 0x86f   : > { %15015 = vmatprep.subr.bf16.mxu0 %v19741_v57  ;;  %15343 = vmatprep.subr.bf16.mxu1 %v19743_v58  ;;  %v20411_v57 = vld [vmem:[#allocation8 + $0x480] ss:$8 sps:$4 sm:$0xff] (!%p19760_p5)   ;;  %v20412_v58 = vld [vmem:[#allocation8 + $0x94] ss:$8 sps:$4 sm:$0xff] (!%p19760_p5)  }
 0x872   : > { %15016 = vmatpush1.bf16.msra.mxu0 %v19740_v9  ;;  %15344 = vmatpush1.bf16.msra.mxu1 %v19742_v4  ;;  %v20420_v9 = vld [vmem:[#allocation8 + $0x4a4] ss:$8 sps:$4 sm:$0xff] (!%p19760_p5)   ;;  %v20422_v4 = vld [vmem:[#allocation8 + $0xa0] ss:$8 sps:$4 sm:$0xff] (!%p19760_p5)  }
 0x873   : > { %15017 = vmatprep.subr.bf16.mxu0 %v19757_v52  ;;  %15345 = vmatprep.subr.bf16.mxu1 %v19759_v59  ;;  %v20423_v52 = vld [vmem:[#allocation8 + $0x4a0] ss:$8 sps:$4 sm:$0xff] (!%p19760_p5)   ;;  %v15466_v59 = vsub.s32 (!%p19760_p5), 0, %v21116_v45 }
 0x876   : > { %15018 = vmatpush1.bf16.msra.mxu0 %v19756_v5  ;;  %15346 = vmatpush1.bf16.msra.mxu1 %v19758_v30  ;;  %v20424_v5 = vld [vmem:[#allocation8 + $0xb4] ss:$8 sps:$4 sm:$0xff] (!%p19760_p5)   ;;  %v15470_v30 = vsub.s32 (!%p19760_p5), 1, %v21116_v45 }
 0x877   : > { %17422 = vmatprep.subr.bf16.mxu0 (!%p19760_p5), %v20360_v21 }
 0x879   : > { %15020 = vmatmul.mubr.bf16.vlgmr.msra.gmra.mrb[12].mxu0 %v21742_v50  ;;  %15348 = vmatmul.mubr.bf16.vlgmr.msra.gmra.mrb[12].mxu1 %v21742_v50  ;;  %v20358_v50 = vld [vmem:[#allocation8 + $0x4] ss:$8 sps:$4 sm:$0xff] (!%p19760_p5)  }
 0x87a   : > { %17258 = vmatprep.subr.bf16.mxu1 (!%p19760_p5), %v20358_v50  ;;  %17423 = vmatpush1.bf16.msra.mxu0 (!%p19760_p5), %v20363_v23  ;;  %v20435_v23 = vld [vmem:[#allocation8 + $0x4c0] ss:$8 sps:$4 sm:$0xff] (!%p19760_p5)  }
 0x87b   : > { %17259 = vmatpush1.bf16.msra.mxu1 (!%p19760_p5), %v20362_v22  ;;  %17424 = vmatprep.subr.bf16.mxu0 (!%p19760_p5), %v20366_v38  ;;  %v20434_v22 = vld [vmem:[#allocation8 + $0xc0] ss:$8 sps:$4 sm:$0xff] (!%p19760_p5)  }
 0x87c   : > { %17260 = vmatprep.subr.bf16.mxu1 (!%p19760_p5), %v20364_v25 }
 0x87e   : > { %17425 = vmatpush1.bf16.msra.mxu0 (!%p19760_p5), %v20369_v26 }
 0x87f   : > { %17261 = vmatpush1.bf16.msra.mxu1 (!%p19760_p5), %v20368_v8  ;;  %17426 = vmatprep.subr.bf16.mxu0 (!%p19760_p5), %v20372_v27  ;;  %v20436_v8 = vld [vmem:[#allocation8 + $0xd4] ss:$8 sps:$4 sm:$0xff] (!%p19760_p5)  }
 0x880   : > { %17262 = vmatprep.subr.bf16.mxu1 (!%p19760_p5), %v20370_v10  ;;  %v20438_v27 = vld [vmem:[#allocation8 + $0x4d4] ss:$8 sps:$4 sm:$0xff] (!%p19760_p5)  }
 0x882   : > { %17427 = vmatpush1.bf16.msra.mxu0 (!%p19760_p5), %v20375_v31 }
 0x883   : > { %17263 = vmatpush1.bf16.msra.mxu1 (!%p19760_p5), %v20374_v29  ;;  %17428 = vmatprep.subr.bf16.mxu0 (!%p19760_p5), %v20378_v0  ;;  %v15456_v0 = vld [vmem:[#allocation2] sm:$0xff] (!%p19760_p5) }
 0x884   : > { %17264 = vmatprep.subr.bf16.mxu1 (!%p19760_p5), %v20376_v32  ;;  %v20440_v32 = vld [vmem:[#allocation8 + $0xd0] ss:$8 sps:$4 sm:$0xff] (!%p19760_p5)  }
 0x886   : > { %17429 = vmatpush1.bf16.msra.mxu0 (!%p19760_p5), %v20381_v19  ;;  %v20441_v19 = vld [vmem:[#allocation8 + $0x4d0] ss:$8 sps:$4 sm:$0xff] (!%p19760_p5)  }
 0x887   : > { %17265 = vmatpush1.bf16.msra.mxu1 (!%p19760_p5), %v20380_v39  ;;  %17430 = vmatprep.subr.bf16.mxu0 (!%p19760_p5), %v20384_v35 }
 0x888   : > { %17266 = vmatprep.subr.bf16.mxu1 (!%p19760_p5), %v20382_v34  ;;  %v20442_v34 = vld [vmem:[#allocation8 + $0xe4] ss:$8 sps:$4 sm:$0xff] (!%p19760_p5)  }
 0x88a   : > { %17431 = vmatpush1.bf16.msra.mxu0 (!%p19760_p5), %v20387_v37  ;;  %v23407_v37 = vstv (!%p19760_p5), %s23390_s23 }
 0x88b   : > { %17267 = vmatpush1.bf16.msra.mxu1 (!%p19760_p5), %v20386_v36  ;;  %17432 = vmatprep.subr.bf16.mxu0 (!%p19760_p5), %v20390_v41  ;;  %v20444_v41 = vld [vmem:[#allocation8 + $0x4e4] ss:$8 sps:$4 sm:$0xff] (!%p19760_p5)  }
 0x88c   : > { %17268 = vmatprep.subr.bf16.mxu1 (!%p19760_p5), %v20388_v40  ;;  %v15458_v40 = vld [vmem:[#allocation2 + $0x10] sm:$0xff] (!%p19760_p5) }
 0x88e   : > { %17433 = vmatpush1.bf16.msra.mxu0 (!%p19760_p5), %v20393_v43 }
 0x88f   : > { %17269 = vmatpush1.bf16.msra.mxu1 (!%p19760_p5), %v20392_v42  ;;  %17434 = vmatprep.subr.bf16.mxu0 (!%p19760_p5), %v20396_v20  ;;  %v20447_v20 = vld [vmem:[#allocation8 + $0x4e0] ss:$8 sps:$4 sm:$0xff] (!%p19760_p5)  }
 0x890   : > { %17270 = vmatprep.subr.bf16.mxu1 (!%p19760_p5), %v20394_v49  ;;  %v20446_v49 = vld [vmem:[#allocation8 + $0xe0] ss:$8 sps:$4 sm:$0xff] (!%p19760_p5)  }
 0x892   : > { %17435 = vmatpush1.bf16.msra.mxu0 (!%p19760_p5), %v20399_v46 }
 0x893   : > { %17271 = vmatpush1.bf16.msra.mxu1 (!%p19760_p5), %v20398_v44  ;;  %17436 = vmatprep.subr.bf16.mxu0 (!%p19760_p5), %v20402_v48  ;;  %v20450_v48 = vld [vmem:[#allocation8 + $0x4f4] ss:$8 sps:$4 sm:$0xff] (!%p19760_p5)  }
 0x894   : > { %17272 = vmatprep.subr.bf16.mxu1 (!%p19760_p5), %v20400_v47  ;;  %v20448_v47 = vld [vmem:[#allocation8 + $0xf4] ss:$8 sps:$4 sm:$0xff] (!%p19760_p5)  }
 0x896   : > { %17437 = vmatpush1.bf16.msra.mxu0 (!%p19760_p5), %v20405_v53 }
 0x897   : > { %17273 = vmatpush1.bf16.msra.mxu1 (!%p19760_p5), %v20404_v51  ;;  %17438 = vmatprep.subr.bf16.mxu0 (!%p19760_p5), %v20408_v56 }
 0x898   : > { %17274 = vmatprep.subr.bf16.mxu1 (!%p19760_p5), %v20406_v55 }
 0x89a   : > { %17439 = vmatpush1.bf16.msra.mxu0 (!%p19760_p5), %v20411_v57 }
 0x89b   : > { %17275 = vmatpush1.bf16.msra.mxu1 (!%p19760_p5), %v20410_v60  ;;  %17440 = vmatprep.subr.bf16.mxu0 (!%p19760_p5), %v20414_v61  ;;  %v20452_v60 = vld [vmem:[#allocation8 + $0xf0] ss:$8 sps:$4 sm:$0xff] (!%p19760_p5)  }
 0x89c   : > { %17276 = vmatprep.subr.bf16.mxu1 (!%p19760_p5), %v20412_v58  ;;  %v20453_v58 = vld [vmem:[#allocation8 + $0x4f0] ss:$8 sps:$4 sm:$0xff] (!%p19760_p5)  }
 0x89e   : > { %17441 = vmatpush1.bf16.msra.mxu0 (!%p19760_p5), %v20417_v62 }
 0x89f   : > { %17277 = vmatpush1.bf16.msra.mxu1 (!%p19760_p5), %v20416_v24  ;;  %17442 = vmatprep.subr.bf16.mxu0 (!%p19760_p5), %v20420_v9 }
 0x8a0   : > { %17278 = vmatprep.subr.bf16.mxu1 (!%p19760_p5), %v20418_v63  ;;  %v20456_v63 = vld [vmem:[#allocation8 + $0x104] ss:$8 sps:$4 sm:$0xff] (!%p19760_p5)  }
 0x8a2   : > { %17443 = vmatpush1.bf16.msra.mxu0 (!%p19760_p5), %v20423_v52 }
 0x8a3   : > { %17279 = vmatpush1.bf16.msra.mxu1 (!%p19760_p5), %v20422_v4 }
 0x8a4   : > { %17280 = vmatprep.subr.bf16.mxu1 (!%p19760_p5), %v20424_v5 }
 0x94c   : > { %v15021_v7 = vpop.f32.mrb[12].mxu0  ;;  %v15349_v11 = vpop.f32.mrb[12].mxu1 }
 0x94d   : > { %v15023_v33 = vpop.f32.mrb[13].mxu0  ;;  %v15351_v13 = vpop.f32.mrb[13].mxu1 }
 0x94e   : > { %v15423_v12 = vcombine.low %v15021_v7, %v15023_v33  ;;  %v15025_v1 = vpop.f32.mrb[14].mxu0  ;;  %v15424_v14 = vcombine.low %v15349_v11, %v15351_v13  ;;  %v15353_v6 = vpop.f32.mrb[14].mxu1  ;;  %v15474_v7 = vsub.s32 (!%p19760_p5), 2, %v21116_v45  ;;  %v20426_v11 = vld [vmem:[#allocation8 + $0x4b4] ss:$8 sps:$4 sm:$0xff] (!%p19760_p5)   ;;  %v15478_v33 = vsub.s32 (!%p19760_p5), 3, %v21116_v45 }
 0x94f   : > { %v15026_v15 = vpop.f32.mrb[15].mxu0  ;;  %v15354_v28 = vpop.f32.mrb[15].mxu1  ;;  %v23388_v13 = vld [vmem:[#allocation6] sm:$0xff] (!%p19760_p5)  ;;  %v20432_v6 = vld [vmem:[#allocation8 + $0x4c4] ss:$8 sps:$4 sm:$0xff] (!%p19760_p5)   ;;  %17444 = vmatprep.subr.bf16.mxu0 (!%p19760_p5), %v20426_v11 }
 0x950   : > { %v15431_v16 = vrot.slane %v15423_v12, %v21975_v3  ;;  %v15438_v2 = vrot.slane %v15424_v14, %v21975_v3  ;;  %15455 = sbr.rel (%p19760_p5) target bundleno = 2820 (0xb04), region = 60  ;;  %v20428_v12 = vld [vmem:[#allocation8 + $0xb0] ss:$8 sps:$4 sm:$0xff] (!%p19760_p5)   ;;  %v20430_v14 = vld [vmem:[#allocation8 + $0xc4] ss:$8 sps:$4 sm:$0xff] (!%p19760_p5)   ;;  %v15467_v15 = vrot.slane (!%p19760_p5), %v23388_v13, %v15466_v59  ;;  %v15475_v28 = vrot.slane (!%p19760_p5), %v23388_v13, %v15474_v7 }
 0x951   : > { %v20429_v1 = vld [vmem:[#allocation8 + $0x4b0] ss:$8 sps:$4 sm:$0xff] (!%p19760_p5)   ;;  %17281 = vmatpush1.bf16.msra.mxu1 (!%p19760_p5), %v20428_v12 }
 0x952   : > { %v15439_v54 = vcombine.low %v15431_v16, %v15438_v2  ;;  %v15471_v16 = vrot.slane (!%p19760_p5), %v23388_v13, %v15470_v30  ;;  %v15479_v2 = vrot.slane (!%p19760_p5), %v23388_v13, %v15478_v33  ;;  %17445 = vmatpush1.bf16.msra.mxu0 (!%p19760_p5), %v20429_v1  ;;  %17282 = vmatprep.subr.bf16.mxu1 (!%p19760_p5), %v20430_v14 }
 0x953   : > { %17446 = vmatprep.subr.bf16.mxu0 (!%p19760_p5), %v20432_v6  ;;  %v20462_v6 = vld [vmem:[#allocation8 + $0x114] ss:$8 sps:$4 sm:$0xff] (!%p19760_p5)  }
 0x954   : > { %v15447_v17 = vadd.f32 %v15439_v54, %v327_v18  ;;  %v23396_v18 = vld [vmem:[#allocation6 + $0x8] sm:$0xff] (!%p19760_p5)  ;;  %v15528_v54 = vcombine.low (!%p19760_p5), %v15467_v15, %v15471_v16  ;;  %v15529_v25 = vcombine.low (!%p19760_p5), %v15475_v28, %v15479_v2 }
 0x955   : > { %v15503_v50 = vrot.slane (!%p19760_p5), %v23396_v18, %v15470_v30  ;;  %v15507_v21 = vrot.slane (!%p19760_p5), %v23396_v18, %v15474_v7  ;;  %v15511_v38 = vrot.slane (!%p19760_p5), %v23396_v18, %v15478_v33  ;;  %17283 = vmatpush1.bf16.msra.mxu1 (!%p19760_p5), %v20434_v22  ;;  %v20454_v30 = vld [vmem:[#allocation8 + $0x100] ss:$8 sps:$4 sm:$0xff] (!%p19760_p5)   ;;  %v20465_v15 = vld [vmem:[#allocation8 + $0x514] ss:$8 sps:$4 sm:$0xff] (!%p19760_p5)   ;;  %v20460_v28 = vld [vmem:[#allocation8 + $0x110] ss:$8 sps:$4 sm:$0xff] (!%p19760_p5)  }
 0x956   : > { %15451 = vst [vmem:[#allocation2 + $0x18] sm:$0xff] %v15447_v17  ;;  %v15499_v17 = vrot.slane (!%p19760_p5), %v23396_v18, %v15466_v59  ;;  %v15536_v26 = vrot.slane (!%p19760_p5), %v15528_v54, %v21975_v3  ;;  %v15543_v29 = vrot.slane (!%p19760_p5), %v15529_v25, %v21975_v3  ;;  %17447 = vmatpush1.bf16.msra.mxu0 (!%p19760_p5), %v20435_v23  ;;  %v20459_v59 = vld [vmem:[#allocation8 + $0x504] ss:$8 sps:$4 sm:$0xff] (!%p19760_p5)   ;;  %v20457_v33 = vld [vmem:[#allocation8 + $0x500] ss:$8 sps:$4 sm:$0xff] (!%p19760_p5)  }
 0x957   : > { %v15563_v31 = vcombine.low %v15507_v21, %v15511_v38  ;;  %17284 = vmatprep.subr.bf16.mxu1 %v20436_v8  ;;  %17448 = vmatprep.subr.bf16.mxu0 %v20438_v27  ;;  %v20463_v54 = vld [vmem:[#allocation8 + $0x510] ss:$8 sps:$4 sm:$0xff]   ;;  %v20466_v21 = vld [vmem:[#allocation8 + $0x120] ss:$8 sps:$4 sm:$0xff]   ;;  %v20474_v23 = vld [vmem:[#allocation8 + $0x134] ss:$8 sps:$4 sm:$0xff]  }
 0x958   : > { %v15562_v10 = vcombine.low %v15499_v17, %v15503_v50  ;;  %v15544_v35 = vcombine.low %v15536_v26, %v15543_v29  ;;  %v20468_v17 = vld [vmem:[#allocation8 + $0x124] ss:$8 sps:$4 sm:$0xff]   ;;  %v20469_v22 = vld [vmem:[#allocation8 + $0x520] ss:$8 sps:$4 sm:$0xff]   ;;  %v20477_v25 = vld [vmem:[#allocation8 + $0x534] ss:$8 sps:$4 sm:$0xff]  }
 0x959   : > { %v15577_v36 = vrot.slane %v15563_v31, %v21975_v3  ;;  %17285 = vmatpush1.bf16.msra.mxu1 %v20440_v32  ;;  %v20471_v50 = vld [vmem:[#allocation8 + $0x524] ss:$8 sps:$4 sm:$0xff]   ;;  %v20472_v38 = vld [vmem:[#allocation8 + $0x130] ss:$8 sps:$4 sm:$0xff]   ;;  %v20478_v27 = vld [vmem:[#allocation8 + $0x140] ss:$8 sps:$4 sm:$0xff]  }
 0x95a   : > { %v15570_v39 = vrot.slane %v15562_v10, %v21975_v3  ;;  %v15600_v42 = vadd.f32 %v15544_v35, %v15456_v0  ;;  %17449 = vmatpush1.bf16.msra.mxu0 %v20441_v19  ;;  %17286 = vmatprep.subr.bf16.mxu1 %v20442_v34  ;;  %v20475_v8 = vld [vmem:[#allocation8 + $0x530] ss:$8 sps:$4 sm:$0xff]   ;;  %v20480_v26 = vld [vmem:[#allocation8 + $0x144] ss:$8 sps:$4 sm:$0xff]   ;;  %v20481_v29 = vld [vmem:[#allocation8 + $0x540] ss:$8 sps:$4 sm:$0xff]  }
 0x95b   : > { %17450 = vmatprep.subr.bf16.mxu0 %v20444_v41  ;;  %v20483_v10 = vld [vmem:[#allocation8 + $0x544] ss:$8 sps:$4 sm:$0xff]   ;;  %v20486_v31 = vld [vmem:[#allocation8 + $0x154] ss:$8 sps:$4 sm:$0xff]   ;;  %v20484_v0 = vld [vmem:[#allocation8 + $0x150] ss:$8 sps:$4 sm:$0xff]  }
 0x95c   : > { %v15578_v43 = vcombine.low %v15570_v39, %v15577_v36  ;;  %vm15605_vm0 = vcmp.gt.f32.partialorder %v15600_v42, 0.0  ;;  %v15610_v44 = vmul.f32 %v23407_v37, %v15600_v42  ;;  %v20489_v32 = vld [vmem:[#allocation8 + $0x554] ss:$8 sps:$4 sm:$0xff]   ;;  %v20487_v39 = vld [vmem:[#allocation8 + $0x550] ss:$8 sps:$4 sm:$0xff]  }
 0x95d   : > { %17287 = vmatpush1.bf16.msra.mxu1 %v20446_v49  ;;  %v20492_v19 = vld [vmem:[#allocation8 + $0x164] ss:$8 sps:$4 sm:$0xff]   ;;  %v20490_v35 = vld [vmem:[#allocation8 + $0x160] ss:$8 sps:$4 sm:$0xff]   ;;  %v20501_v41 = vld [vmem:[#allocation8 + $0x574] ss:$8 sps:$4 sm:$0xff]  }
 0x95e   : > { %v15602_v46 = vadd.f32 %v15578_v43, %v15458_v40  ;;  %v15614_v51 = vsel %vm15605_vm0, %v15600_v42, %v15610_v44  ;;  %17451 = vmatpush1.bf16.msra.mxu0 %v20447_v20  ;;  %17288 = vmatprep.subr.bf16.mxu1 %v20448_v47  ;;  %v20495_v34 = vld [vmem:[#allocation8 + $0x564] ss:$8 sps:$4 sm:$0xff]   ;;  %v20493_v36 = vld [vmem:[#allocation8 + $0x560] ss:$8 sps:$4 sm:$0xff]   ;;  %v20498_v40 = vld [vmem:[#allocation8 + $0x174] ss:$8 sps:$4 sm:$0xff]  }
 0x95f   : > { %v15622_v55 = vcombine.high %v15614_v51, %v15614_v51  ;;  %v15629_v56 = vrot.slane %v15614_v51, %v21975_v3  ;;  %17452 = vmatprep.subr.bf16.mxu0 %v20450_v48  ;;  %v20496_v42 = vld [vmem:[#allocation8 + $0x170] ss:$8 sps:$4 sm:$0xff]   ;;  %v20504_v49 = vld [vmem:[#allocation8 + $0x184] ss:$8 sps:$4 sm:$0xff]   ;;  %v20502_v44 = vld [vmem:[#allocation8 + $0x180] ss:$8 sps:$4 sm:$0xff]  }
 0x960   : > { %vm15607_vm1 = vcmp.gt.f32.partialorder %v15602_v46, 0.0  ;;  %v15612_v53 = vmul.f32 %v23407_v37, %v15602_v46  ;;  %v20499_v43 = vld [vmem:[#allocation8 + $0x570] ss:$8 sps:$4 sm:$0xff]   ;;  %v20507_v20 = vld [vmem:[#allocation8 + $0x584] ss:$8 sps:$4 sm:$0xff]  }
 0x961   : > { %v23413_v61 = vrot.slane %v15622_v55, %v21975_v3  ;;  %v15637_v24 = vcombine.high %v15629_v56, %v15629_v56  ;;  %v15706_v11 = vpack.c.bf16 %v15629_v56, %v15629_v56  ;;  %17289 = vmatpush1.bf16.msra.mxu1 %v20452_v60  ;;  %v20510_v47 = vld [vmem:[#allocation8 + $0x194] ss:$8 sps:$4 sm:$0xff]   ;;  %v20508_v51 = vld [vmem:[#allocation8 + $0x190] ss:$8 sps:$4 sm:$0xff]   ;;  %v20516_v55 = vld [vmem:[#allocation8 + $0x1a4] ss:$8 sps:$4 sm:$0xff]  }
 0x962   : > { %v15616_v57 = vsel %vm15607_vm1, %v15602_v46, %v15612_v53  ;;  %17453 = vmatpush1.bf16.msra.mxu0 %v20453_v58  ;;  %17299 = vmatprep.subr.bf16.mxu1 %v20456_v63  ;;  %v20505_v46 = vld [vmem:[#allocation8 + $0x580] ss:$8 sps:$4 sm:$0xff]   ;;  %v20513_v48 = vld [vmem:[#allocation8 + $0x594] ss:$8 sps:$4 sm:$0xff]   ;;  %v20511_v53 = vld [vmem:[#allocation8 + $0x590] ss:$8 sps:$4 sm:$0xff]  }
 0x963   : > { %v15656_v62 = vcombine.high %v15616_v57, %v15616_v57  ;;  %v15663_v9 = vrot.slane %v15616_v57, %v21975_v3  ;;  %v15707_v4 = vpack.c.bf16 %v15637_v24, %v15637_v24  ;;  %v15638_v5 = vcombine.high %v23413_v61, %v23413_v61  ;;  %17463 = vmatprep.subr.bf16.mxu0 %v20459_v59  ;;  %v20519_v56 = vld [vmem:[#allocation8 + $0x5a4] ss:$8 sps:$4 sm:$0xff]   ;;  %v20514_v60 = vld [vmem:[#allocation8 + $0x1a0] ss:$8 sps:$4 sm:$0xff]   ;;  %v20522_v58 = vld [vmem:[#allocation8 + $0x1b4] ss:$8 sps:$4 sm:$0xff]  }
 0x964   : > { %v20517_v57 = vld [vmem:[#allocation8 + $0x5a0] ss:$8 sps:$4 sm:$0xff]   ;;  %v20525_v24 = vld [vmem:[#allocation8 + $0x5b4] ss:$8 sps:$4 sm:$0xff]   ;;  %v20523_v63 = vld [vmem:[#allocation8 + $0x5b0] ss:$8 sps:$4 sm:$0xff]  }
 0x965   : > { %v23417_v52 = vrot.slane %v15656_v62, %v21975_v3  ;;  %v15671_v7 = vcombine.high %v15663_v9, %v15663_v9  ;;  %v15714_v12 = vpack.c.bf16 %v15663_v9, %v15663_v9  ;;  %17290 = vmatprep.mubr.bf16.mxu1 %v15707_v4  ;;  %v15709_v16 = vpack.c.bf16 %v15638_v5, %v15638_v5  ;;  %v20520_v62 = vld [vmem:[#allocation8 + $0x1b0] ss:$8 sps:$4 sm:$0xff]   ;;  %v20528_v9 = vld [vmem:[#allocation8 + $0x1c4] ss:$8 sps:$4 sm:$0xff]  }
 0x966   : > { %17291 = vmatmul.mubr.bf16.vlgmr.msra.gmra.mrb[0].mxu1 %v15706_v11  ;;  %v15482_v4 = vsub.s32 4, %v21116_v45  ;;  %v20531_v59 = vld [vmem:[#allocation8 + $0x5c4] ss:$8 sps:$4 sm:$0xff]   ;;  %v15486_v5 = vsub.s32 5, %v21116_v45  ;;  %v20526_v11 = vld [vmem:[#allocation8 + $0x1c0] ss:$8 sps:$4 sm:$0xff]  }
 0x967   : > { %v15672_v1 = vcombine.high %v23417_v52, %v23417_v52  ;;  %v15715_v14 = vpack.c.bf16 %v15671_v7, %v15671_v7  ;;  %17300 = vmatpush1.bf16.msra.mxu1 %v20454_v30  ;;  %17331 = vmatprep.mubr.bf16.mxu1 %v15709_v16  ;;  %v15490_v30 = vsub.s32 6, %v21116_v45  ;;  %v15494_v7 = vsub.s32 7, %v21116_v45 }
 0x968   : > { %17301 = vmatprep.subr.bf16.mxu1 %v20462_v6  ;;  %v15487_v6 = vrot.slane %v23388_v13, %v15486_v5  ;;  %v15515_v45 = vrot.slane %v23396_v18, %v15482_v4 }
 0x969   : > { %17454 = vmatprep.mubr.bf16.mxu0 %v15715_v14  ;;  %v15717_v2 = vpack.c.bf16 %v15672_v1, %v15672_v1  ;;  %v20537_v1 = vld [vmem:[#allocation8 + $0x5d4] ss:$8 sps:$4 sm:$0xff]   ;;  %v15483_v14 = vrot.slane %v23388_v13, %v15482_v4  ;;  %v15495_v16 = vrot.slane %v23388_v13, %v15494_v7 }
 0x96a   : > { %17455 = vmatmul.mubr.bf16.vlgmr.msra.gmra.mrb[0].mxu0 %v15714_v12  ;;  %v20534_v12 = vld [vmem:[#allocation8 + $0x1d4] ss:$8 sps:$4 sm:$0xff]  }
 0x96b   : > { %17464 = vmatpush1.bf16.msra.mxu0 %v20457_v33  ;;  %17495 = vmatprep.mubr.bf16.mxu0 %v15717_v2  ;;  %v20529_v33 = vld [vmem:[#allocation8 + $0x5c0] ss:$8 sps:$4 sm:$0xff]   ;;  %v20535_v2 = vld [vmem:[#allocation8 + $0x5d0] ss:$8 sps:$4 sm:$0xff]  }
 0x96c   : > { %17465 = vmatprep.subr.bf16.mxu0 %v20465_v15  ;;  %17302 = vmatpush1.bf16.msra.mxu1 %v20460_v28  ;;  %v15491_v15 = vrot.slane %v23388_v13, %v15490_v30  ;;  %v20532_v28 = vld [vmem:[#allocation8 + $0x1d0] ss:$8 sps:$4 sm:$0xff]   ;;  %v20541_v13 = vld [vmem:[#allocation8 + $0x5e0] ss:$8 sps:$4 sm:$0xff]  }
 0x96d   : > { %17303 = vmatprep.subr.bf16.mxu1 %v20468_v17  ;;  %v15523_v17 = vrot.slane %v23396_v18, %v15490_v30  ;;  %v20568_v30 = vld [vmem:[#allocation8 + $0x230] ss:$8 sps:$4 sm:$0xff]  }
 0x96f   : > { %17466 = vmatpush1.bf16.msra.mxu0 %v20463_v54  ;;  %v15519_v54 = vrot.slane %v23396_v18, %v15486_v5 }
 0x970   : > { %17467 = vmatprep.subr.bf16.mxu0 %v20471_v50  ;;  %17304 = vmatpush1.bf16.msra.mxu1 %v20466_v21  ;;  %v15527_v50 = vrot.slane %v23396_v18, %v15494_v7  ;;  %v20540_v21 = vld [vmem:[#allocation8 + $0x1e4] ss:$8 sps:$4 sm:$0xff]   ;;  %v20571_v7 = vld [vmem:[#allocation8 + $0x630] ss:$8 sps:$4 sm:$0xff]  }
 0x971   : > { %17305 = vmatprep.subr.bf16.mxu1 %v20474_v23  ;;  %v15545_v23 = vcombine.low %v15483_v14, %v15487_v6  ;;  %v20577_v14 = vld [vmem:[#allocation8 + $0x640] ss:$8 sps:$4 sm:$0xff]   ;;  %v20582_v6 = vld [vmem:[#allocation8 + $0x254] ss:$8 sps:$4 sm:$0xff]  }
 0x973   : > { %17468 = vmatpush1.bf16.msra.mxu0 %v20469_v22  ;;  %v20543_v22 = vld [vmem:[#allocation8 + $0x5e4] ss:$8 sps:$4 sm:$0xff]  }
 0x974   : > { %17469 = vmatprep.subr.bf16.mxu0 %v20477_v25  ;;  %17306 = vmatpush1.bf16.msra.mxu1 %v20472_v38  ;;  %v15546_v25 = vcombine.low %v15491_v15, %v15495_v16  ;;  %v20538_v38 = vld [vmem:[#allocation8 + $0x1e0] ss:$8 sps:$4 sm:$0xff]   ;;  %v20585_v15 = vld [vmem:[#allocation8 + $0x654] ss:$8 sps:$4 sm:$0xff]   ;;  %v20580_v16 = vld [vmem:[#allocation8 + $0x250] ss:$8 sps:$4 sm:$0xff]  }
 0x975   : > { %17307 = vmatprep.subr.bf16.mxu1 %v20480_v26  ;;  %v15580_v26 = vcombine.low %v15523_v17, %v15527_v50  ;;  %v20589_v17 = vld [vmem:[#allocation8 + $0x660] ss:$8 sps:$4 sm:$0xff]   ;;  %v20594_v50 = vld [vmem:[#allocation8 + $0x274] ss:$8 sps:$4 sm:$0xff]  }
 0x976   : > { %v15560_v18 = vrot.slane %v15546_v25, %v21975_v3  ;;  %v20600_v25 = vld [vmem:[#allocation8 + $0x284] ss:$8 sps:$4 sm:$0xff]  }
 0x977   : > { %17470 = vmatpush1.bf16.msra.mxu0 %v20475_v8  ;;  %v15579_v8 = vcombine.low %v15515_v45, %v15519_v54  ;;  %v20591_v45 = vld [vmem:[#allocation8 + $0x664] ss:$8 sps:$4 sm:$0xff]   ;;  %v20586_v54 = vld [vmem:[#allocation8 + $0x260] ss:$8 sps:$4 sm:$0xff]  }
 0x978   : > { %17471 = vmatprep.subr.bf16.mxu0 %v20483_v10  ;;  %17308 = vmatpush1.bf16.msra.mxu1 %v20478_v27  ;;  %v20546_v10 = vld [vmem:[#allocation8 + $0x1f4] ss:$8 sps:$4 sm:$0xff]  }
 0x979   : > { %17309 = vmatprep.subr.bf16.mxu1 %v20486_v31  ;;  %v20549_v27 = vld [vmem:[#allocation8 + $0x5f4] ss:$8 sps:$4 sm:$0xff]   ;;  %v20544_v31 = vld [vmem:[#allocation8 + $0x1f0] ss:$8 sps:$4 sm:$0xff]  }
 0x97b   : > { %17472 = vmatpush1.bf16.msra.mxu0 %v20481_v29  ;;  %v15553_v29 = vrot.slane %v15545_v23, %v21975_v3  ;;  %v20595_v23 = vld [vmem:[#allocation8 + $0x670] ss:$8 sps:$4 sm:$0xff]  }
 0x97c   : > { %17473 = vmatprep.subr.bf16.mxu0 %v20489_v32  ;;  %17310 = vmatpush1.bf16.msra.mxu1 %v20484_v0  ;;  %v20547_v32 = vld [vmem:[#allocation8 + $0x5f0] ss:$8 sps:$4 sm:$0xff]   ;;  %v15587_v0 = vrot.slane %v15579_v8, %v21975_v3  ;;  %v20601_v8 = vld [vmem:[#allocation8 + $0x680] ss:$8 sps:$4 sm:$0xff]  }
 0x97d   : > { %17311 = vmatprep.subr.bf16.mxu1 %v20492_v19  ;;  %v20552_v19 = vld [vmem:[#allocation8 + $0x204] ss:$8 sps:$4 sm:$0xff]  }
 0x97f   : > { %17474 = vmatpush1.bf16.msra.mxu0 %v20487_v39  ;;  %v15594_v39 = vrot.slane %v15580_v26, %v21975_v3  ;;  %v20606_v26 = vld [vmem:[#allocation8 + $0x294] ss:$8 sps:$4 sm:$0xff]  }
 0x980   : > { %17475 = vmatprep.subr.bf16.mxu0 %v20495_v34  ;;  %17312 = vmatpush1.bf16.msra.mxu1 %v20490_v35  ;;  %v20555_v34 = vld [vmem:[#allocation8 + $0x604] ss:$8 sps:$4 sm:$0xff]   ;;  %v15561_v35 = vcombine.low %v15553_v29, %v15560_v18  ;;  %v20607_v29 = vld [vmem:[#allocation8 + $0x690] ss:$8 sps:$4 sm:$0xff]  }
 0x981   : > { %17313 = vmatprep.subr.bf16.mxu1 %v20498_v40  ;;  %v20550_v40 = vld [vmem:[#allocation8 + $0x200] ss:$8 sps:$4 sm:$0xff]   ;;  %v20612_v18 = vld [vmem:[#allocation8 + $0x2a4] ss:$8 sps:$4 sm:$0xff]  }
 0x983   : > { %17476 = vmatpush1.bf16.msra.mxu0 %v20493_v36  ;;  %v15708_v36 = vpack.c.bf16 %v23413_v61, %v23413_v61 }
 0x984   : > { %17477 = vmatprep.subr.bf16.mxu0 %v20501_v41  ;;  %17314 = vmatpush1.bf16.msra.mxu1 %v20496_v42  ;;  %v15716_v41 = vpack.c.bf16 %v23417_v52, %v23417_v52  ;;  %v20553_v42 = vld [vmem:[#allocation8 + $0x600] ss:$8 sps:$4 sm:$0xff]   ;;  %v20559_v52 = vld [vmem:[#allocation8 + $0x610] ss:$8 sps:$4 sm:$0xff]  }
 0x985   : > { %17315 = vmatprep.subr.bf16.mxu1 %v20504_v49  ;;  %v20558_v49 = vld [vmem:[#allocation8 + $0x214] ss:$8 sps:$4 sm:$0xff]  }
 0x987   : > { %17478 = vmatpush1.bf16.msra.mxu0 %v20499_v43  ;;  %v15595_v43 = vcombine.low %v15587_v0, %v15594_v39  ;;  %v20613_v0 = vld [vmem:[#allocation8 + $0x6a0] ss:$8 sps:$4 sm:$0xff]   ;;  %v20618_v39 = vld [vmem:[#allocation8 + $0x2b4] ss:$8 sps:$4 sm:$0xff]  }
 0x988   : > { %17479 = vmatprep.subr.bf16.mxu0 %v20507_v20  ;;  %17316 = vmatpush1.bf16.msra.mxu1 %v20502_v44  ;;  %v15457_v20 = vld [vmem:[#allocation2 + $0x8] sm:$0xff] }
 0x989   : > { %17317 = vmatprep.subr.bf16.mxu1 %v20510_v47  ;;  %v20561_v44 = vld [vmem:[#allocation8 + $0x614] ss:$8 sps:$4 sm:$0xff]   ;;  %v15459_v47 = vld [vmem:[#allocation2 + $0x18] sm:$0xff] }
 0x98b   : > { %17480 = vmatpush1.bf16.msra.mxu0 %v20505_v46  ;;  %v15601_v46 = vadd.f32 %v15561_v35, %v15457_v20  ;;  %v20619_v35 = vld [vmem:[#allocation8 + $0x6b0] ss:$8 sps:$4 sm:$0xff]  }
 0x98c   : > { %17481 = vmatprep.subr.bf16.mxu0 %v20513_v48  ;;  %17318 = vmatpush1.bf16.msra.mxu1 %v20508_v51  ;;  %v20556_v48 = vld [vmem:[#allocation8 + $0x210] ss:$8 sps:$4 sm:$0xff]   ;;  %v15603_v51 = vadd.f32 %v15595_v43, %v15459_v47  ;;  %v20630_v43 = vld [vmem:[#allocation8 + $0x2d4] ss:$8 sps:$4 sm:$0xff]   ;;  %v20639_v47 = vld [vmem:[#allocation8 + $0x6e4] ss:$8 sps:$4 sm:$0xff]  }
 0x98d   : > { %17319 = vmatprep.subr.bf16.mxu1 %v20516_v55  ;;  %vm15606_vm2 = vcmp.gt.f32.partialorder %v15601_v46, 0.0  ;;  %v15611_v61 = vmul.f32 %v23407_v37, %v15601_v46  ;;  %v20567_v55 = vld [vmem:[#allocation8 + $0x624] ss:$8 sps:$4 sm:$0xff]   ;;  %v20628_v20 = vld [vmem:[#allocation8 + $0x2d0] ss:$8 sps:$4 sm:$0xff]  }
 0x98e   : > { %vm15608_vm3 = vcmp.gt.f32.partialorder %v15603_v51, 0.0 }
 0x98f   : > { %17482 = vmatpush1.bf16.msra.mxu0 %v20511_v53  ;;  %v20564_v53 = vld [vmem:[#allocation8 + $0x224] ss:$8 sps:$4 sm:$0xff]  }
 0x990   : > { %17483 = vmatprep.subr.bf16.mxu0 %v20519_v56  ;;  %17320 = vmatpush1.bf16.msra.mxu1 %v20514_v60  ;;  %v23444_v56 = vsel %vm15606_vm2, %v15601_v46, %v15611_v61  ;;  %v15613_v60 = vmul.f32 %v23407_v37, %v15603_v51  ;;  %v20573_v37 = vld [vmem:[#allocation8 + $0x634] ss:$8 sps:$4 sm:$0xff]   ;;  %v20636_v46 = vld [vmem:[#allocation8 + $0x2e4] ss:$8 sps:$4 sm:$0xff]  }
 0x991   : > { %17321 = vmatprep.subr.bf16.mxu1 %v20522_v58  ;;  %v20562_v58 = vld [vmem:[#allocation8 + $0x220] ss:$8 sps:$4 sm:$0xff]  }
 0x993   : > { %17484 = vmatpush1.bf16.msra.mxu0 %v20517_v57  ;;  %v23449_v57 = vrot.slane %v23444_v56, %v21975_v3 }
 0x994   : > { %17485 = vmatprep.subr.bf16.mxu0 %v20525_v24  ;;  %17322 = vmatpush1.bf16.msra.mxu1 %v20520_v62  ;;  %v23451_v24 = vsel %vm15608_vm3, %v15603_v51, %v15613_v60  ;;  %v20565_v62 = vld [vmem:[#allocation8 + $0x620] ss:$8 sps:$4 sm:$0xff]  }
 0x995   : > { %17323 = vmatprep.subr.bf16.mxu1 %v20528_v9  ;;  %v15654_v9 = vcombine.high %v23449_v57, %v23449_v57  ;;  %v23457_v4 = vrot.slane %v23451_v24, %v21975_v3  ;;  %v15673_v61 = vcombine.high %v23451_v24, %v23451_v24  ;;  %v20634_v51 = vld [vmem:[#allocation8 + $0x2e0] ss:$8 sps:$4 sm:$0xff]   ;;  %v20648_v24 = vld [vmem:[#allocation8 + $0x304] ss:$8 sps:$4 sm:$0xff]  }
 0x997   : > { %17486 = vmatpush1.bf16.msra.mxu0 %v20523_v63  ;;  %v20570_v63 = vld [vmem:[#allocation8 + $0x234] ss:$8 sps:$4 sm:$0xff]   ;;  %v15688_v5 = vcombine.high %v23457_v4, %v23457_v4 }
 0x998   : > { %17487 = vmatprep.subr.bf16.mxu0 %v20531_v59  ;;  %17324 = vmatpush1.bf16.msra.mxu1 %v20526_v11  ;;  %v15711_v59 = vpack.c.bf16 %v15654_v9, %v15654_v9  ;;  %v20576_v11 = vld [vmem:[#allocation8 + $0x244] ss:$8 sps:$4 sm:$0xff]  }
 0x999   : > { %17325 = vmatprep.subr.bf16.mxu1 %v20534_v12  ;;  %v20579_v12 = vld [vmem:[#allocation8 + $0x644] ss:$8 sps:$4 sm:$0xff]  }
 0x99b   : > { %17488 = vmatpush1.bf16.msra.mxu0 %v20529_v33  ;;  %v15719_v33 = vpack.c.bf16 %v15688_v5, %v15688_v5  ;;  %v15718_v5 = vpack.c.bf16 %v23457_v4, %v23457_v4  ;;  %v20658_v4 = vld [vmem:[#allocation8 + $0x320] ss:$8 sps:$4 sm:$0xff]  }
 0x99c   : > { %17489 = vmatprep.subr.bf16.mxu0 %v20537_v1  ;;  %17326 = vmatpush1.bf16.msra.mxu1 %v20532_v28  ;;  %v20574_v1 = vld [vmem:[#allocation8 + $0x240] ss:$8 sps:$4 sm:$0xff]   ;;  %v20583_v28 = vld [vmem:[#allocation8 + $0x650] ss:$8 sps:$4 sm:$0xff]  }
 0x99d   : > { %17327 = vmatprep.subr.bf16.mxu1 %v20540_v21  ;;  %v20597_v21 = vld [vmem:[#allocation8 + $0x674] ss:$8 sps:$4 sm:$0xff]  }
 0x99f   : > { %17490 = vmatpush1.bf16.msra.mxu0 %v20535_v2  ;;  %v20588_v2 = vld [vmem:[#allocation8 + $0x264] ss:$8 sps:$4 sm:$0xff]  }
 0x9a0   : > { %17491 = vmatprep.subr.bf16.mxu0 %v20543_v22  ;;  %17328 = vmatpush1.bf16.msra.mxu1 %v20538_v38  ;;  %v20592_v22 = vld [vmem:[#allocation8 + $0x270] ss:$8 sps:$4 sm:$0xff]   ;;  %v20603_v38 = vld [vmem:[#allocation8 + $0x684] ss:$8 sps:$4 sm:$0xff]  }
 0x9a1   : > { %17329 = vmatprep.subr.bf16.mxu1 %v20546_v10  ;;  %v20609_v10 = vld [vmem:[#allocation8 + $0x694] ss:$8 sps:$4 sm:$0xff]  }
 0x9a3   : > { %17492 = vmatpush1.bf16.msra.mxu0 %v20541_v13  ;;  %v20598_v13 = vld [vmem:[#allocation8 + $0x280] ss:$8 sps:$4 sm:$0xff]  }
 0x9a4   : > { %17493 = vmatprep.subr.bf16.mxu0 %v20549_v27  ;;  %17330 = vmatpush1.bf16.msra.mxu1 %v20544_v31  ;;  %v20604_v27 = vld [vmem:[#allocation8 + $0x290] ss:$8 sps:$4 sm:$0xff]   ;;  %v20615_v31 = vld [vmem:[#allocation8 + $0x6a4] ss:$8 sps:$4 sm:$0xff]  }
 0x9a5   : > { %17340 = vmatprep.subr.bf16.mxu1 %v20552_v19  ;;  %v20621_v19 = vld [vmem:[#allocation8 + $0x6b4] ss:$8 sps:$4 sm:$0xff]  }
 0x9a7   : > { %17494 = vmatpush1.bf16.msra.mxu0 %v20547_v32  ;;  %17332 = vmatmul.mubr.bf16.vlgmr.msra.gmra.mrb[0].mxu1 %v15708_v36  ;;  %v20610_v32 = vld [vmem:[#allocation8 + $0x2a0] ss:$8 sps:$4 sm:$0xff]   ;;  %v20624_v36 = vld [vmem:[#allocation8 + $0x2c4] ss:$8 sps:$4 sm:$0xff]  }
 0x9a8   : > { %17504 = vmatprep.subr.bf16.mxu0 %v20555_v34  ;;  %17341 = vmatpush1.bf16.msra.mxu1 %v20550_v40  ;;  %v20616_v34 = vld [vmem:[#allocation8 + $0x2b0] ss:$8 sps:$4 sm:$0xff]   ;;  %v20627_v40 = vld [vmem:[#allocation8 + $0x6c4] ss:$8 sps:$4 sm:$0xff]  }
 0x9a9   : > { %17342 = vmatprep.subr.bf16.mxu1 %v20558_v49  ;;  %17372 = vmatprep.mubr.bf16.mxu1 %v15711_v59  ;;  %v20633_v49 = vld [vmem:[#allocation8 + $0x6d4] ss:$8 sps:$4 sm:$0xff]  }
 0x9aa   : > { %17496 = vmatmul.mubr.bf16.vlgmr.msra.gmra.mrb[0].mxu0 %v15716_v41  ;;  %v20622_v41 = vld [vmem:[#allocation8 + $0x2c0] ss:$8 sps:$4 sm:$0xff]  }
 0x9ab   : > { %17505 = vmatpush1.bf16.msra.mxu0 %v20553_v42  ;;  %17536 = vmatprep.mubr.bf16.mxu0 %v15719_v33  ;;  %v20625_v42 = vld [vmem:[#allocation8 + $0x6c0] ss:$8 sps:$4 sm:$0xff]  }
 0x9ac   : > { %17506 = vmatprep.subr.bf16.mxu0 %v20561_v44  ;;  %17343 = vmatpush1.bf16.msra.mxu1 %v20556_v48  ;;  %v20631_v44 = vld [vmem:[#allocation8 + $0x6d0] ss:$8 sps:$4 sm:$0xff]   ;;  %v15639_v48 = vcombine.high %v23444_v56, %v23444_v56 }
 0x9ad   : > { %17344 = vmatprep.subr.bf16.mxu1 %v20564_v53  ;;  %v20642_v53 = vld [vmem:[#allocation8 + $0x2f4] ss:$8 sps:$4 sm:$0xff]   ;;  %v20643_v56 = vld [vmem:[#allocation8 + $0x6f0] ss:$8 sps:$4 sm:$0xff]  }
 0x9ae   : > { %v23466_v60 = vrot.slane %v15639_v48, %v21975_v3  ;;  %v20720_v48 = vld [vmem:[#allocation8 + $0x3c4] ss:$8 sps:$4 sm:$0xff]  }
 0x9af   : > { %17507 = vmatpush1.bf16.msra.mxu0 %v20559_v52  ;;  %v20637_v52 = vld [vmem:[#allocation8 + $0x6e0] ss:$8 sps:$4 sm:$0xff]  }
 0x9b0   : > { %17508 = vmatprep.subr.bf16.mxu0 %v20567_v55  ;;  %17345 = vmatpush1.bf16.msra.mxu1 %v20562_v58  ;;  %v20645_v55 = vld [vmem:[#allocation8 + $0x6f4] ss:$8 sps:$4 sm:$0xff]   ;;  %v23469_v58 = vrot.slane %v15673_v61, %v21975_v3  ;;  %v15655_v9 = vcombine.high %v23466_v60, %v23466_v60  ;;  %v20646_v3 = vld [vmem:[#allocation8 + $0x300] ss:$8 sps:$4 sm:$0xff]   ;;  %v20723_v61 = vld [vmem:[#allocation8 + $0x7c4] ss:$8 sps:$4 sm:$0xff]  }
 0x9b1   : > { %17346 = vmatprep.subr.bf16.mxu1 %v20570_v63  ;;  %v20651_v63 = vld [vmem:[#allocation8 + $0x704] ss:$8 sps:$4 sm:$0xff]  }
 0x9b2   : > { %v15689_v59 = vcombine.high %v23469_v58, %v23469_v58  ;;  %v15713_v33 = vpack.c.bf16 %v15655_v9, %v15655_v9  ;;  %v20730_v9 = vld [vmem:[#allocation8 + $0x3e0] ss:$8 sps:$4 sm:$0xff]  }
 0x9b3   : > { %17509 = vmatpush1.bf16.msra.mxu0 %v20565_v62  ;;  %v20640_v62 = vld [vmem:[#allocation8 + $0x2f0] ss:$8 sps:$4 sm:$0xff]  }
 0x9b4   : > { %17510 = vmatprep.subr.bf16.mxu0 %v20573_v37  ;;  %17347 = vmatpush1.bf16.msra.mxu1 %v20568_v30  ;;  %v15710_v37 = vpack.c.bf16 %v23449_v57, %v23449_v57  ;;  %v20649_v30 = vld [vmem:[#allocation8 + $0x700] ss:$8 sps:$4 sm:$0xff]   ;;  %v20652_v57 = vld [vmem:[#allocation8 + $0x310] ss:$8 sps:$4 sm:$0xff]  }
 0x9b5   : > { %17348 = vmatprep.subr.bf16.mxu1 %v20576_v11  ;;  %v20657_v11 = vld [vmem:[#allocation8 + $0x714] ss:$8 sps:$4 sm:$0xff]  }
 0x9b7   : > { %17511 = vmatpush1.bf16.msra.mxu0 %v20571_v7  ;;  %v20654_v7 = vld [vmem:[#allocation8 + $0x314] ss:$8 sps:$4 sm:$0xff]  }
 0x9b8   : > { %17512 = vmatprep.subr.bf16.mxu0 %v20579_v12  ;;  %17349 = vmatpush1.bf16.msra.mxu1 %v20574_v1  ;;  %v15721_v12 = vpack.c.bf16 %v15689_v59, %v15689_v59  ;;  %v20655_v1 = vld [vmem:[#allocation8 + $0x710] ss:$8 sps:$4 sm:$0xff]   ;;  %v20738_v59 = vld [vmem:[#allocation8 + $0x3f4] ss:$8 sps:$4 sm:$0xff]  }
 0x9b9   : > { %17350 = vmatprep.subr.bf16.mxu1 %v20582_v6  ;;  %v20663_v6 = vld [vmem:[#allocation8 + $0x724] ss:$8 sps:$4 sm:$0xff]  }
 0x9bb   : > { %17513 = vmatpush1.bf16.msra.mxu0 %v20577_v14  ;;  %v20660_v14 = vld [vmem:[#allocation8 + $0x324] ss:$8 sps:$4 sm:$0xff]  }
 0x9bc   : > { %17514 = vmatprep.subr.bf16.mxu0 %v20585_v15  ;;  %17351 = vmatpush1.bf16.msra.mxu1 %v20580_v16  ;;  %v20661_v15 = vld [vmem:[#allocation8 + $0x720] ss:$8 sps:$4 sm:$0xff]   ;;  %v20666_v16 = vld [vmem:[#allocation8 + $0x334] ss:$8 sps:$4 sm:$0xff]  }
 0x9bd   : > { %17352 = vmatprep.subr.bf16.mxu1 %v20588_v2  ;;  %v20664_v2 = vld [vmem:[#allocation8 + $0x330] ss:$8 sps:$4 sm:$0xff]  }
 0x9bf   : > { %17515 = vmatpush1.bf16.msra.mxu0 %v20583_v28  ;;  %v20669_v28 = vld [vmem:[#allocation8 + $0x734] ss:$8 sps:$4 sm:$0xff]  }
 0x9c0   : > { %17516 = vmatprep.subr.bf16.mxu0 %v20591_v45  ;;  %17353 = vmatpush1.bf16.msra.mxu1 %v20586_v54  ;;  %v20667_v45 = vld [vmem:[#allocation8 + $0x730] ss:$8 sps:$4 sm:$0xff]   ;;  %v20672_v54 = vld [vmem:[#allocation8 + $0x344] ss:$8 sps:$4 sm:$0xff]  }
 0x9c1   : > { %17354 = vmatprep.subr.bf16.mxu1 %v20594_v50  ;;  %v20670_v50 = vld [vmem:[#allocation8 + $0x340] ss:$8 sps:$4 sm:$0xff]  }
 0x9c3   : > { %17517 = vmatpush1.bf16.msra.mxu0 %v20589_v17  ;;  %v20675_v17 = vld [vmem:[#allocation8 + $0x744] ss:$8 sps:$4 sm:$0xff]  }
 0x9c4   : > { %17518 = vmatprep.subr.bf16.mxu0 %v20597_v21  ;;  %17355 = vmatpush1.bf16.msra.mxu1 %v20592_v22  ;;  %v20673_v21 = vld [vmem:[#allocation8 + $0x740] ss:$8 sps:$4 sm:$0xff]   ;;  %v20678_v22 = vld [vmem:[#allocation8 + $0x354] ss:$8 sps:$4 sm:$0xff]  }
 0x9c5   : > { %17356 = vmatprep.subr.bf16.mxu1 %v20600_v25  ;;  %v20676_v25 = vld [vmem:[#allocation8 + $0x350] ss:$8 sps:$4 sm:$0xff]  }
 0x9c7   : > { %17519 = vmatpush1.bf16.msra.mxu0 %v20595_v23  ;;  %v20681_v23 = vld [vmem:[#allocation8 + $0x754] ss:$8 sps:$4 sm:$0xff]  }
 0x9c8   : > { %17520 = vmatprep.subr.bf16.mxu0 %v20603_v38  ;;  %17357 = vmatpush1.bf16.msra.mxu1 %v20598_v13  ;;  %v20679_v38 = vld [vmem:[#allocation8 + $0x750] ss:$8 sps:$4 sm:$0xff]   ;;  %v20684_v13 = vld [vmem:[#allocation8 + $0x364] ss:$8 sps:$4 sm:$0xff]  }
 0x9c9   : > { %17358 = vmatprep.subr.bf16.mxu1 %v20606_v26  ;;  %v20682_v26 = vld [vmem:[#allocation8 + $0x360] ss:$8 sps:$4 sm:$0xff]  }
 0x9cb   : > { %17521 = vmatpush1.bf16.msra.mxu0 %v20601_v8  ;;  %v20687_v8 = vld [vmem:[#allocation8 + $0x764] ss:$8 sps:$4 sm:$0xff]  }
 0x9cc   : > { %17522 = vmatprep.subr.bf16.mxu0 %v20609_v10  ;;  %17359 = vmatpush1.bf16.msra.mxu1 %v20604_v27  ;;  %v20685_v10 = vld [vmem:[#allocation8 + $0x760] ss:$8 sps:$4 sm:$0xff]   ;;  %v20690_v27 = vld [vmem:[#allocation8 + $0x374] ss:$8 sps:$4 sm:$0xff]  }
 0x9cd   : > { %17360 = vmatprep.subr.bf16.mxu1 %v20612_v18  ;;  %v20688_v18 = vld [vmem:[#allocation8 + $0x370] ss:$8 sps:$4 sm:$0xff]  }
 0x9cf   : > { %17523 = vmatpush1.bf16.msra.mxu0 %v20607_v29  ;;  %v20693_v29 = vld [vmem:[#allocation8 + $0x774] ss:$8 sps:$4 sm:$0xff]  }
 0x9d0   : > { %17524 = vmatprep.subr.bf16.mxu0 %v20615_v31  ;;  %17361 = vmatpush1.bf16.msra.mxu1 %v20610_v32  ;;  %v20691_v31 = vld [vmem:[#allocation8 + $0x770] ss:$8 sps:$4 sm:$0xff]   ;;  %v20696_v32 = vld [vmem:[#allocation8 + $0x384] ss:$8 sps:$4 sm:$0xff]  }
 0x9d1   : > { %17362 = vmatprep.subr.bf16.mxu1 %v20618_v39  ;;  %v20694_v39 = vld [vmem:[#allocation8 + $0x380] ss:$8 sps:$4 sm:$0xff]  }
 0x9d3   : > { %17525 = vmatpush1.bf16.msra.mxu0 %v20613_v0  ;;  %v20699_v0 = vld [vmem:[#allocation8 + $0x784] ss:$8 sps:$4 sm:$0xff]  }
 0x9d4   : > { %17526 = vmatprep.subr.bf16.mxu0 %v20621_v19  ;;  %17363 = vmatpush1.bf16.msra.mxu1 %v20616_v34  ;;  %v20697_v19 = vld [vmem:[#allocation8 + $0x780] ss:$8 sps:$4 sm:$0xff]   ;;  %v20702_v34 = vld [vmem:[#allocation8 + $0x394] ss:$8 sps:$4 sm:$0xff]  }
 0x9d5   : > { %17364 = vmatprep.subr.bf16.mxu1 %v20624_v36  ;;  %v20700_v36 = vld [vmem:[#allocation8 + $0x390] ss:$8 sps:$4 sm:$0xff]  }
 0x9d7   : > { %17527 = vmatpush1.bf16.msra.mxu0 %v20619_v35  ;;  %v20705_v35 = vld [vmem:[#allocation8 + $0x794] ss:$8 sps:$4 sm:$0xff]  }
 0x9d8   : > { %17528 = vmatprep.subr.bf16.mxu0 %v20627_v40  ;;  %17365 = vmatpush1.bf16.msra.mxu1 %v20622_v41  ;;  %v20703_v40 = vld [vmem:[#allocation8 + $0x790] ss:$8 sps:$4 sm:$0xff]   ;;  %v20708_v41 = vld [vmem:[#allocation8 + $0x3a4] ss:$8 sps:$4 sm:$0xff]  }
 0x9d9   : > { %17366 = vmatprep.subr.bf16.mxu1 %v20630_v43  ;;  %v20706_v43 = vld [vmem:[#allocation8 + $0x3a0] ss:$8 sps:$4 sm:$0xff]  }
 0x9db   : > { %17529 = vmatpush1.bf16.msra.mxu0 %v20625_v42  ;;  %v20711_v42 = vld [vmem:[#allocation8 + $0x7a4] ss:$8 sps:$4 sm:$0xff]  }
 0x9dc   : > { %17530 = vmatprep.subr.bf16.mxu0 %v20633_v49  ;;  %17367 = vmatpush1.bf16.msra.mxu1 %v20628_v20  ;;  %v20709_v49 = vld [vmem:[#allocation8 + $0x7a0] ss:$8 sps:$4 sm:$0xff]   ;;  %v20714_v20 = vld [vmem:[#allocation8 + $0x3b4] ss:$8 sps:$4 sm:$0xff]  }
 0x9dd   : > { %17368 = vmatprep.subr.bf16.mxu1 %v20636_v46  ;;  %v20712_v46 = vld [vmem:[#allocation8 + $0x3b0] ss:$8 sps:$4 sm:$0xff]  }
 0x9df   : > { %17531 = vmatpush1.bf16.msra.mxu0 %v20631_v44  ;;  %v20717_v44 = vld [vmem:[#allocation8 + $0x7b4] ss:$8 sps:$4 sm:$0xff]  }
 0x9e0   : > { %17532 = vmatprep.subr.bf16.mxu0 %v20639_v47  ;;  %17369 = vmatpush1.bf16.msra.mxu1 %v20634_v51  ;;  %v20715_v47 = vld [vmem:[#allocation8 + $0x7b0] ss:$8 sps:$4 sm:$0xff]   ;;  %v20718_v51 = vld [vmem:[#allocation8 + $0x3c0] ss:$8 sps:$4 sm:$0xff]  }
 0x9e1   : > { %17370 = vmatprep.subr.bf16.mxu1 %v20642_v53  ;;  %v20726_v53 = vld [vmem:[#allocation8 + $0x3d4] ss:$8 sps:$4 sm:$0xff]  }
 0x9e3   : > { %17533 = vmatpush1.bf16.msra.mxu0 %v20637_v52  ;;  %v20721_v52 = vld [vmem:[#allocation8 + $0x7c0] ss:$8 sps:$4 sm:$0xff]  }
 0x9e4   : > { %17534 = vmatprep.subr.bf16.mxu0 %v20645_v55  ;;  %17371 = vmatpush1.bf16.msra.mxu1 %v20640_v62  ;;  %v20729_v55 = vld [vmem:[#allocation8 + $0x7d4] ss:$8 sps:$4 sm:$0xff]   ;;  %v20724_v62 = vld [vmem:[#allocation8 + $0x3d0] ss:$8 sps:$4 sm:$0xff]  }
 0x9e5   : > { %17381 = vmatprep.subr.bf16.mxu1 %v20648_v24  ;;  %v20732_v24 = vld [vmem:[#allocation8 + $0x3e4] ss:$8 sps:$4 sm:$0xff]  }
 0x9e7   : > { %17535 = vmatpush1.bf16.msra.mxu0 %v20643_v56  ;;  %17373 = vmatmul.mubr.bf16.vlgmr.msra.gmra.mrb[0].mxu1 %v15710_v37  ;;  %v20727_v56 = vld [vmem:[#allocation8 + $0x7d0] ss:$8 sps:$4 sm:$0xff]   ;;  %v20733_v37 = vld [vmem:[#allocation8 + $0x7e0] ss:$8 sps:$4 sm:$0xff]  }
 0x9e8   : > { %17545 = vmatprep.subr.bf16.mxu0 %v20651_v63  ;;  %17382 = vmatpush1.bf16.msra.mxu1 %v20646_v3  ;;  %v20735_v63 = vld [vmem:[#allocation8 + $0x7e4] ss:$8 sps:$4 sm:$0xff]   ;;  %v20741_v3 = vld [vmem:[#allocation8 + $0x7f4] ss:$8 sps:$4 sm:$0xff]  }
 0x9e9   : > { %17383 = vmatprep.subr.bf16.mxu1 %v20654_v7  ;;  %17413 = vmatprep.mubr.bf16.mxu1 %v15713_v33  ;;  %v15712_v7 = vpack.c.bf16 %v23466_v60, %v23466_v60 }
 0x9ea   : > { %17537 = vmatmul.mubr.bf16.vlgmr.msra.gmra.mrb[0].mxu0 %v15718_v5  ;;  %v20736_v5 = vld [vmem:[#allocation8 + $0x3f0] ss:$8 sps:$4 sm:$0xff]  }
 0x9eb   : > { %17546 = vmatpush1.bf16.msra.mxu0 %v20649_v30  ;;  %17577 = vmatprep.mubr.bf16.mxu0 %v15721_v12  ;;  %v20739_v30 = vld [vmem:[#allocation8 + $0x7f0] ss:$8 sps:$4 sm:$0xff]  }
 0x9ec   : > { %17547 = vmatprep.subr.bf16.mxu0 %v20657_v11  ;;  %17384 = vmatpush1.bf16.msra.mxu1 %v20652_v57  ;;  %v15720_v11 = vpack.c.bf16 %v23469_v58, %v23469_v58 }
 0x9ed   : > { %17385 = vmatprep.subr.bf16.mxu1 %v20660_v14 }
 0x9ef   : > { %17548 = vmatpush1.bf16.msra.mxu0 %v20655_v1 }
 0x9f0   : > { %17549 = vmatprep.subr.bf16.mxu0 %v20663_v6  ;;  %17386 = vmatpush1.bf16.msra.mxu1 %v20658_v4 }
 0x9f1   : > { %17387 = vmatprep.subr.bf16.mxu1 %v20666_v16 }
 0x9f3   : > { %17550 = vmatpush1.bf16.msra.mxu0 %v20661_v15 }
 0x9f4   : > { %17551 = vmatprep.subr.bf16.mxu0 %v20669_v28  ;;  %17388 = vmatpush1.bf16.msra.mxu1 %v20664_v2 }
 0x9f5   : > { %17389 = vmatprep.subr.bf16.mxu1 %v20672_v54 }
 0x9f7   : > { %17552 = vmatpush1.bf16.msra.mxu0 %v20667_v45 }
 0x9f8   : > { %17553 = vmatprep.subr.bf16.mxu0 %v20675_v17  ;;  %17390 = vmatpush1.bf16.msra.mxu1 %v20670_v50 }
 0x9f9   : > { %17391 = vmatprep.subr.bf16.mxu1 %v20678_v22 }
 0x9fb   : > { %17554 = vmatpush1.bf16.msra.mxu0 %v20673_v21 }
 0x9fc   : > { %17555 = vmatprep.subr.bf16.mxu0 %v20681_v23  ;;  %17392 = vmatpush1.bf16.msra.mxu1 %v20676_v25 }
 0x9fd   : > { %17393 = vmatprep.subr.bf16.mxu1 %v20684_v13 }
 0x9ff   : > { %17556 = vmatpush1.bf16.msra.mxu0 %v20679_v38 }
 0xa00   : > { %17557 = vmatprep.subr.bf16.mxu0 %v20687_v8  ;;  %17394 = vmatpush1.bf16.msra.mxu1 %v20682_v26 }
 0xa01   : > { %17395 = vmatprep.subr.bf16.mxu1 %v20690_v27 }
 0xa03   : > { %17558 = vmatpush1.bf16.msra.mxu0 %v20685_v10 }
 0xa04   : > { %17559 = vmatprep.subr.bf16.mxu0 %v20693_v29  ;;  %17396 = vmatpush1.bf16.msra.mxu1 %v20688_v18 }
 0xa05   : > { %17397 = vmatprep.subr.bf16.mxu1 %v20696_v32 }
 0xa07   : > { %17560 = vmatpush1.bf16.msra.mxu0 %v20691_v31 }
 0xa08   : > { %17561 = vmatprep.subr.bf16.mxu0 %v20699_v0  ;;  %17398 = vmatpush1.bf16.msra.mxu1 %v20694_v39 }
 0xa09   : > { %17399 = vmatprep.subr.bf16.mxu1 %v20702_v34 }
 0xa0b   : > { %17562 = vmatpush1.bf16.msra.mxu0 %v20697_v19 }
 0xa0c   : > { %17563 = vmatprep.subr.bf16.mxu0 %v20705_v35  ;;  %17400 = vmatpush1.bf16.msra.mxu1 %v20700_v36 }
 0xa0d   : > { %17401 = vmatprep.subr.bf16.mxu1 %v20708_v41 }
 0xa0f   : > { %17564 = vmatpush1.bf16.msra.mxu0 %v20703_v40 }
 0xa10   : > { %17565 = vmatprep.subr.bf16.mxu0 %v20711_v42  ;;  %17402 = vmatpush1.bf16.msra.mxu1 %v20706_v43 }
 0xa11   : > { %17403 = vmatprep.subr.bf16.mxu1 %v20714_v20 }
 0xa13   : > { %17566 = vmatpush1.bf16.msra.mxu0 %v20709_v49 }
 0xa14   : > { %17567 = vmatprep.subr.bf16.mxu0 %v20717_v44  ;;  %17404 = vmatpush1.bf16.msra.mxu1 %v20712_v46 }
 0xa15   : > { %17405 = vmatprep.subr.bf16.mxu1 %v20720_v48 }
 0xa17   : > { %17568 = vmatpush1.bf16.msra.mxu0 %v20715_v47 }
 0xa18   : > { %17569 = vmatprep.subr.bf16.mxu0 %v20723_v61  ;;  %17406 = vmatpush1.bf16.msra.mxu1 %v20718_v51 }
 0xa19   : > { %17407 = vmatprep.subr.bf16.mxu1 %v20726_v53 }
 0xa1b   : > { %17570 = vmatpush1.bf16.msra.mxu0 %v20721_v52 }
 0xa1c   : > { %17571 = vmatprep.subr.bf16.mxu0 %v20729_v55  ;;  %17408 = vmatpush1.bf16.msra.mxu1 %v20724_v62 }
 0xa1d   : > { %17409 = vmatprep.subr.bf16.mxu1 %v20732_v24 }
 0xa1f   : > { %17572 = vmatpush1.bf16.msra.mxu0 %v20727_v56 }
 0xa20   : > { %17573 = vmatprep.subr.bf16.mxu0 %v20735_v63  ;;  %17410 = vmatpush1.bf16.msra.mxu1 %v20730_v9 }
 0xa21   : > { %17411 = vmatprep.subr.bf16.mxu1 %v20738_v59 }
 0xa23   : > { %17574 = vmatpush1.bf16.msra.mxu0 %v20733_v37 }
 0xa24   : > { %17575 = vmatprep.subr.bf16.mxu0 %v20741_v3  ;;  %17412 = vmatpush1.bf16.msra.mxu1 %v20736_v5 }
 0xa27   : > { %17576 = vmatpush1.bf16.msra.mxu0 %v20739_v30  ;;  %17414 = vmatmul.mubr.bf16.vlgmr.msra.gmra.mrb[0].mxu1 %v15712_v7 }
 0xa2a   : > { %17578 = vmatmul.mubr.bf16.vlgmr.msra.gmra.mrb[0].mxu0 %v15720_v11 }
 0xafa   : > { %v17415_v33 = vpop.f32.mrb[0].mxu1 }
 0xafb   : > { %v17417_v57 = vpop.f32.mrb[1].mxu1 }
 0xafc   : > { %v17419_v6 = vpop.f32.mrb[2].mxu1 }
 0xafd   : > { %v17579_v12 = vpop.f32.mrb[0].mxu0  ;;  %v17420_v16 = vpop.f32.mrb[3].mxu1 }
 0xafe   : > { %v20247_v1 = vadd.f32 %v17579_v12, %v17415_v33  ;;  %v17581_v14 = vpop.f32.mrb[1].mxu0 }
 0xaff   : > { %v20248_v4 = vadd.f32 %v17581_v14, %v17417_v57  ;;  %v17583_v15 = vpop.f32.mrb[2].mxu0 }
 0xb00   : > { %v17584_v28 = vpop.f32.mrb[3].mxu0 }
 0xb01   : > { %v17588_v2 = vcombine.low %v20247_v1, %v20248_v4 }
 0xb03   : > { %20017 = vst.sshfl [vmem:[%s23509_s5] sm:$0x33 pattern:$0x76325410] %v17588_v2 }
 0xb04 PF: > { %s20_s25 = sadd.s32 1, %s20882_s25   ;;  %s23524_s4 = smov %s23531_s20 }
 0xb05   : > { %p17_p7 = scmp.ge.s32.totalorder %s20_s25, 42   ;;  %s23525_s20 = smov %s20866_s21 }
 0xb06   : > { %s23526_s21 = smov %s20870_s22  ;;  %s23527_s22 = smov %s21049_s14 }
 0xb07   : > { %s23528_s23 = smov %s20878_s24  ;;  %s23529_s24 = smov %s23524_s4 }
 0xb08   :  { %19 = sbr.rel (!%p17_p7) target bundleno = 7 (0x7), region = 99 }
 0xb0f   :  { %17619 = vsyncpa [#allocation5], 1 }
 0xb10   :  { %17621 = vsyncpa [#allocation5 + $0x1], 1 }
 0xb11   :  { %17622 = vsyncpa [#allocation7], 1 }

</bundles_post_ra>
